<compile_context>
chip_gen: v5e
topology: v5e:2x2
jax: 0.10.0
libtpu: 0.0.40
codegen_flags: <defaults>
</compile_context>

<pallas_src>
import functools

import jax
import jax.numpy as jnp
from jax.experimental import pallas as pl
from jax.experimental.pallas import tpu as pltpu

J = 17          # number of joints (module hard-codes reshape(-1, 17, in_dim))
LN_EPS = 1e-5   # torch.nn.LayerNorm default


def _round_up(x, m):
    return (x + m - 1) // m * m


def _erf_poly(x):
    # erf via Abramowitz & Stegun 7.1.26 (|err| < 1.5e-7 ~ fp32 precision).
    # TODO(synk): replace with lax.erf once Mosaic exposes a direct erf lowering.
    p = 0.3275911
    a1, a2, a3, a4, a5 = 0.254829592, -0.284496736, 1.421413741, -1.453152027, 1.061405429
    ax = jnp.abs(x)
    t = 1.0 / (1.0 + p * ax)
    poly = ((((a5 * t + a4) * t + a3) * t + a2) * t + a1) * t
    y = 1.0 - poly * jnp.exp(-ax * ax)
    return jnp.where(x < 0.0, -y, y)


def _gelu_exact(x):
    return 0.5 * x * (1.0 + _erf_poly(x * 0.7071067811865476))


# ------------------------------- fused kernel --------------------------------

def _make_dense_gcn_kernel(cfgs):
    """cfgs: per-layer static config dicts {cin, cout, do_norm, do_gelu, out_off}."""
    n_l = len(cfgs)

    def kernel(x_ref, *rest):
        # rest = 4 refs per layer (Wcat, Mcat_rows, bias_rows, A_blockdiag),
        #        then o_ref, then the dense-concat VMEM scratch.
        param_refs = rest[:4 * n_l]
        o_ref = rest[4 * n_l]
        dense_ref = rest[4 * n_l + 1]

        for li, cfg in enumerate(cfgs):
            w_ref, m_ref, bias_ref, a_ref = param_refs[4 * li:4 * li + 4]
            cout = cfg['cout']

            if li == 0:
                xin = x_ref[...].astype(jnp.float32)          # (R, in_dim)
            else:
                xin = dense_ref[:, :cfg['cin']]                # (R, cin)

            if cfg['do_norm']:
                # LayerNorm without affine: gamma/beta are folded into W / bias.
                mu = jnp.mean(xin, axis=-1, keepdims=True)
                var = jnp.mean(jnp.square(xin - mu), axis=-1, keepdims=True)
                xin = (xin - mu) * jax.lax.rsqrt(var + LN_EPS)

            # One fused matmul for both graph-conv weight matrices: (R, 2*cout).
            h = jnp.dot(xin, w_ref[...], preferred_element_type=jnp.float32)
            mh = h * m_ref[...]                                # [diag*M | M] modulation
            # direct (diag) path + off-diagonal adjacency path (block-diag matmul)
            out = (mh[:, :cout]
                   + jnp.dot(a_ref[...], mh[:, cout:],
                             preferred_element_type=jnp.float32)
                   + bias_ref[...])

            if cfg['do_gelu']:
                out = _gelu_exact(out)

            if cfg['out_off'] is None:                         # final layer -> HBM
                o_ref[...] = out.astype(o_ref.dtype)
            else:                                              # dense concat slice
                dense_ref[:, cfg['out_off']:cfg['out_off'] + cout] = out

    return kernel


# -------------------------- host-side parameter fold --------------------------

def _fold_layer(g, b, W, M, adj, adj2, bias, batch_tile):
    """Fold LN affine, adjacency diagonal and modulation into kernel-ready params."""
    a = adj + adj2
    a = (a.T + a) * 0.5                                   # symmetric
    diag = jnp.diag(a)                                    # (J,)
    aoff = a * (1.0 - jnp.eye(J, dtype=a.dtype))          # off-diagonal part

    W0, W1 = W[0], W[1]
    cout = W0.shape[1]
    if g is None:                                         # no preceding LayerNorm
        gW0, gW1 = W0, W1
        c0 = jnp.zeros((cout,), jnp.float32)
        c1 = jnp.zeros((cout,), jnp.float32)
    else:
        gW0 = g[:, None] * W0                             # gamma folded into weights
        gW1 = g[:, None] * W1
        c0 = b @ W0                                       # beta contribution
        c1 = b @ W1

    Wcat = jnp.concatenate([gW0, gW1], axis=1)            # (Cin, 2*Cout)
    Md = diag[:, None] * M                                # diag folded into modulation
    Mcat = jnp.concatenate([Md, M], axis=1)               # (J, 2*Cout)
    bias_fold = (bias[None, :]
                 + diag[:, None] * (M * c0[None, :])
                 + aoff @ (M * c1[None, :]))              # (J, Cout)

    # Tile per-joint params to row layout r = b*J + j, and build block-diag adjacency.
    Mcat_rows = jnp.tile(Mcat, (batch_tile, 1))                   # (Bt*J, 2*Cout)
    bias_rows = jnp.tile(bias_fold, (batch_tile, 1))              # (Bt*J, Cout)
    A_bd = jnp.kron(jnp.eye(batch_tile, dtype=jnp.float32),
                    aoff.astype(jnp.float32))                     # (Bt*J, Bt*J)

    return (Wcat.astype(jnp.float32), Mcat_rows.astype(jnp.float32),
            bias_rows.astype(jnp.float32), A_bd)


# ----------------------------- DenseGCN forward ------------------------------

def dense_gcn_forward(params, x_gcn, in_dim, *, batch_tile=None):
    """Mirrors DenseGCN.forward (drop_path=0.0 -> Identity)."""
    x = x_gcn.reshape(-1, J, in_dim).astype(jnp.float32)
    B = x.shape[0]
    inter = params['gcn1']['M'].shape[-1]
    num_layer = len(params['layers'])
    out_dim = params['final']['M'].shape[-1]
    c_dense = inter * (num_layer + 1)

    # Batch tile: >= 8 samples (>=136 matmul rows), capped so the block-diagonal
    # adjacency stays small in VMEM (important for v7x's 64 MiB VMEM).
    Bt = 16 if batch_tile is None else batch_tile
    Bt = int(min(max(8, _round_up(Bt, 8)), 32))
    if B < Bt:
        Bt = _round_up(max(B, 1), 8)
    B_pad = _round_up(B, Bt)
    R = Bt * J

    if B_pad != B:
        x = jnp.concatenate(
            [x, jnp.zeros((B_pad - B, J, in_dim), x.dtype)], axis=0)
    x2 = x.reshape(B_pad * J, in_dim)                     # rows r = b*J + j

    # Per-layer static configs + folded params (gcn1, dense layers, final).
    cfgs, flat_params = [], []
    p = params['gcn1']
    flat_params.extend(_fold_layer(p['g'], p['b'], p['W'], p['M'],
                                   params['adj'], p['adj2'], p['bias'], Bt))
    cfgs.append(dict(cin=in_dim, cout=inter, do_norm=True, do_gelu=True, out_off=0))
    for i, p in enumerate(params['layers']):
        flat_params.extend(_fold_layer(p['g'], p['b'], p['W'], p['M'],
                                       params['adj'], p['adj2'], p['bias'], Bt))
        cfgs.append(dict(cin=inter * (1 + i), cout=inter, do_norm=True,
                         do_gelu=True, out_off=inter * (1 + i)))
    p = params['final']
    flat_params.extend(_fold_layer(None, None, p['W'], p['M'],
                                   params['adj'], p['adj2'], p['bias'], Bt))
    cfgs.append(dict(cin=c_dense, cout=out_dim, do_norm=False,
                     do_gelu=False, out_off=None))

    # BlockSpecs: x / output tiled over batch tiles, params resident (constant block).
    in_specs = [pl.BlockSpec((R, in_dim), lambda t: (t, 0))]
    for arr in flat_params:
        in_specs.append(pl.BlockSpec(arr.shape, lambda t: (0, 0)))
    out_spec = pl.BlockSpec((R, out_dim), lambda t: (t, 0))

    n_tiles = B_pad // Bt
    flops = 0
    for cfg in cfgs:
        flops += 2 * R * cfg['cin'] * (2 * cfg['cout'])   # weight matmul
        flops += 2 * R * R * cfg['cout']                  # block-diag adjacency
        flops += 8 * R * cfg['cout']                      # epilogue
    cost = pl.CostEstimate(
        flops=int(flops * n_tiles),
        transcendentals=int(n_tiles * R * inter * (num_layer + 1)),
        bytes_accessed=int(4 * (x2.size + B_pad * J * out_dim
                                + sum(int(a.size) for a in flat_params))))

    kernel = _make_dense_gcn_kernel(cfgs)
    out = pl.pallas_call(
        kernel,
        out_shape=jax.ShapeDtypeStruct((B_pad * J, out_dim), jnp.float32),
        grid=(n_tiles,),
        in_specs=in_specs,
        out_specs=out_spec,
        scratch_shapes=[pltpu.VMEM((R, c_dense), jnp.float32)],
        compiler_params=pltpu.CompilerParams(
            dimension_semantics=("parallel",),
            vmem_limit_bytes=32 * 1024 * 1024),
        cost_estimate=cost,
    )(x2, *flat_params)

    return out[:B * J].reshape(B, J * out_dim)


# --------------------------- pure-JAX reference -------------------------------

def _ref_mgcn(x, g, b, W, M, adj, adj2, bias, do_norm, do_gelu):
    if do_norm:
        mu = x.mean(-1, keepdims=True)
        var = jnp.square(x - mu).mean(-1, keepdims=True)
        x = (x - mu) / jnp.sqrt(var + LN_EPS) * g + b
    hp = jax.lax.Precision.HIGHEST
    h0 = jnp.einsum('bjc,co->bjo', x, W[0], precision=hp)
    h1 = jnp.einsum('bjc,co->bjo', x, W[1], precision=hp)
    a = adj + adj2
    a = (a.T + a) * 0.5
    E = jnp.eye(J, dtype=a.dtype)
    out = jnp.einsum('jk,bko->bjo', a * E, M * h0, precision=hp) \
        + jnp.einsum('jk,bko->bjo', a * (1.0 - E), M * h1, precision=hp) \
        + bias
    if do_gelu:
        out = jax.nn.gelu(out, approximate=False)
    return out


def ref_forward(params, x_gcn, in_dim):
    x = x_gcn.reshape(-1, J, in_dim)
    p = params['gcn1']
    x = _ref_mgcn(x, p['g'], p['b'], p['W'], p['M'], params['adj'], p['adj2'],
                  p['bias'], True, True)
    for p in params['layers']:
        y = _ref_mgcn(x, p['g'], p['b'], p['W'], p['M'], params['adj'], p['adj2'],
                      p['bias'], True, True)
        x = jnp.concatenate((x, y), axis=2)
    p = params['final']
    x = _ref_mgcn(x, jnp.ones((x.shape[-1],)), jnp.zeros((x.shape[-1],)),
                  p['W'], p['M'], params['adj'], p['adj2'], p['bias'], False, False)
    return x.reshape(-1, J * 3)


# ------------------------------ param init ------------------------------------

def init_params(key, in_dim, inter_dim, num_layer, out_dim):
    keys = iter(jax.random.split(key, 8 * (num_layer + 3)))

    def nrm(shape, scale=0.1):
        return scale * jax.random.normal(next(keys), shape, dtype=jnp.float32)

    def mgcn_params(cin, cout, with_norm=True):
        p = {
            'W': nrm((2, cin, cout)),
            'M': nrm((J, cout)),
            'adj2': jnp.full((J, J), 1e-6, dtype=jnp.float32),  # ModulatedGraphConv init
            'bias': nrm((cout,), scale=0.05),
        }
        if with_norm:
            p['g'] = 1.0 + nrm((cin,), scale=0.05)
            p['b'] = nrm((cin,), scale=0.05)
        return p

    params = {
        'adj': jax.random.uniform(next(keys), (J, J), dtype=jnp.float32),
        'gcn1': mgcn_params(in_dim, inter_dim),   # norm_gcn1 is LayerNorm(120) == LayerNorm(in_dim)
        'layers': [mgcn_params(inter_dim * (1 + i), inter_dim) for i in range(num_layer)],
        'final': mgcn_params(inter_dim * (num_layer + 1), out_dim, with_norm=False),
    }
    return params


if __name__ == "__main__":
    in_dim = 120        # fixed by norm_gcn1 = LayerNorm(120) in the module
    inter_dim = 32
    num_layer = 2
    out_dim = 3
    batch = 4

    key = jax.random.PRNGKey(0)
    kp, kx = jax.random.split(key)
    params = init_params(kp, in_dim, inter_dim, num_layer, out_dim)
    x_gcn = jax.random.normal(kx, (batch, J * in_dim), dtype=jnp.float32)

    out = dense_gcn_forward(params, x_gcn, in_dim)
    out = jax.block_until_ready(out)
    assert out.shape == (batch, J * 3), out.shape

    ref = jax.block_until_ready(ref_forward(params, x_gcn, in_dim))
    err = float(jnp.max(jnp.abs(out - ref)))
    assert err < 2e-3, f"max abs error {err}"

    print("KERNEL_OK")
</pallas_src>

<mosaic_0001>
module attributes {stable_mosaic.version = 11 : i64} {
  func.func @kernel(%arg0: i32, %arg1: memref<136x120xf32, #tpu.memory_space<vmem>>, %arg2: memref<120x64xf32, #tpu.memory_space<vmem>>, %arg3: memref<136x64xf32, #tpu.memory_space<vmem>>, %arg4: memref<136x32xf32, #tpu.memory_space<vmem>>, %arg5: memref<136x136xf32, #tpu.memory_space<vmem>>, %arg6: memref<32x64xf32, #tpu.memory_space<vmem>>, %arg7: memref<136x64xf32, #tpu.memory_space<vmem>>, %arg8: memref<136x32xf32, #tpu.memory_space<vmem>>, %arg9: memref<136x136xf32, #tpu.memory_space<vmem>>, %arg10: memref<64x64xf32, #tpu.memory_space<vmem>>, %arg11: memref<136x64xf32, #tpu.memory_space<vmem>>, %arg12: memref<136x32xf32, #tpu.memory_space<vmem>>, %arg13: memref<136x136xf32, #tpu.memory_space<vmem>>, %arg14: memref<96x6xf32, #tpu.memory_space<vmem>>, %arg15: memref<136x6xf32, #tpu.memory_space<vmem>>, %arg16: memref<136x3xf32, #tpu.memory_space<vmem>>, %arg17: memref<136x136xf32, #tpu.memory_space<vmem>>, %arg18: memref<136x3xf32, #tpu.memory_space<vmem>>, %arg19: memref<136x96xf32, #tpu.memory_space<vmem>>) attributes {dimension_semantics = [#tpu.dimension_semantics<parallel>], iteration_bounds = array<i64: 1>, scalar_prefetch = 0 : i64, scratch_operands = 1 : i64, tpu.core_type = #tpu.core_type<tc>, window_params = [{transform_indices = @transform_0, window_bounds = array<i64: 136, 120>}, {pipeline_mode = #tpu.pipeline_mode<synchronous>, transform_indices = @transform_1, window_bounds = array<i64: 120, 64>}, {pipeline_mode = #tpu.pipeline_mode<synchronous>, transform_indices = @transform_2, window_bounds = array<i64: 136, 64>}, {pipeline_mode = #tpu.pipeline_mode<synchronous>, transform_indices = @transform_3, window_bounds = array<i64: 136, 32>}, {pipeline_mode = #tpu.pipeline_mode<synchronous>, transform_indices = @transform_4, window_bounds = array<i64: 136, 136>}, {pipeline_mode = #tpu.pipeline_mode<synchronous>, transform_indices = @transform_5, window_bounds = array<i64: 32, 64>}, {pipeline_mode = #tpu.pipeline_mode<synchronous>, transform_indices = @transform_6, window_bounds = array<i64: 136, 64>}, {pipeline_mode = #tpu.pipeline_mode<synchronous>, transform_indices = @transform_7, window_bounds = array<i64: 136, 32>}, {pipeline_mode = #tpu.pipeline_mode<synchronous>, transform_indices = @transform_8, window_bounds = array<i64: 136, 136>}, {pipeline_mode = #tpu.pipeline_mode<synchronous>, transform_indices = @transform_9, window_bounds = array<i64: 64, 64>}, {pipeline_mode = #tpu.pipeline_mode<synchronous>, transform_indices = @transform_10, window_bounds = array<i64: 136, 64>}, {pipeline_mode = #tpu.pipeline_mode<synchronous>, transform_indices = @transform_11, window_bounds = array<i64: 136, 32>}, {pipeline_mode = #tpu.pipeline_mode<synchronous>, transform_indices = @transform_12, window_bounds = array<i64: 136, 136>}, {pipeline_mode = #tpu.pipeline_mode<synchronous>, transform_indices = @transform_13, window_bounds = array<i64: 96, 6>}, {pipeline_mode = #tpu.pipeline_mode<synchronous>, transform_indices = @transform_14, window_bounds = array<i64: 136, 6>}, {pipeline_mode = #tpu.pipeline_mode<synchronous>, transform_indices = @transform_15, window_bounds = array<i64: 136, 3>}, {pipeline_mode = #tpu.pipeline_mode<synchronous>, transform_indices = @transform_16, window_bounds = array<i64: 136, 136>}, {transform_indices = @transform_17, window_bounds = array<i64: 136, 3>}]} {
    %c0 = arith.constant 0 : index
    %c0_0 = arith.constant 0 : index
    %0 = vector.load %arg1[%c0, %c0_0] : memref<136x120xf32, #tpu.memory_space<vmem>>, vector<136x120xf32>
    %cst = arith.constant dense<0.000000e+00> : vector<136xf32>
    %1 = vector.multi_reduction <add>, %0, %cst [1] : vector<136x120xf32> to vector<136xf32>
    %2 = vector.shape_cast %1 : vector<136xf32> to vector<136x1xf32>
    %cst_1 = arith.constant 1.200000e+02 : f32
    %3 = vector.broadcast %cst_1 : f32 to vector<136x1xf32>
    %4 = arith.divf %2, %3 : vector<136x1xf32>
    %5 = vector.broadcast %4 : vector<136x1xf32> to vector<136x120xf32>
    %6 = arith.subf %0, %5 : vector<136x120xf32>
    %7 = arith.mulf %6, %6 : vector<136x120xf32>
    %cst_2 = arith.constant dense<0.000000e+00> : vector<136xf32>
    %8 = vector.multi_reduction <add>, %7, %cst_2 [1] : vector<136x120xf32> to vector<136xf32>
    %9 = vector.shape_cast %8 : vector<136xf32> to vector<136x1xf32>
    %cst_3 = arith.constant 1.200000e+02 : f32
    %10 = vector.broadcast %cst_3 : f32 to vector<136x1xf32>
    %11 = arith.divf %9, %10 : vector<136x1xf32>
    %12 = vector.broadcast %4 : vector<136x1xf32> to vector<136x120xf32>
    %13 = arith.subf %0, %12 : vector<136x120xf32>
    %cst_4 = arith.constant 9.99999974E-6 : f32
    %14 = vector.broadcast %cst_4 : f32 to vector<136x1xf32>
    %15 = arith.addf %11, %14 : vector<136x1xf32>
    %16 = math.rsqrt %15 : vector<136x1xf32>
    %17 = vector.broadcast %16 : vector<136x1xf32> to vector<136x120xf32>
    %18 = arith.mulf %13, %17 : vector<136x120xf32>
    %c0_5 = arith.constant 0 : index
    %c0_6 = arith.constant 0 : index
    %19 = vector.load %arg2[%c0_5, %c0_6] : memref<120x64xf32, #tpu.memory_space<vmem>>, vector<120x64xf32>
    %cst_7 = arith.constant dense<0.000000e+00> : vector<136x64xf32>
    %20 = tpu.matmul %18, %19, %cst_7 {dimension_numbers = #tpu.dot_dimension_numbers<[1], [0], [0], [1], [0, 0, 1, 1], [], []>} : vector<136x120xf32>, vector<120x64xf32>, vector<136x64xf32> -> vector<136x64xf32>
    %c0_8 = arith.constant 0 : index
    %c0_9 = arith.constant 0 : index
    %21 = vector.load %arg3[%c0_8, %c0_9] : memref<136x64xf32, #tpu.memory_space<vmem>>, vector<136x64xf32>
    %22 = arith.mulf %20, %21 : vector<136x64xf32>
    %23 = vector.extract_strided_slice %22 {offsets = [0, 0], sizes = [136, 32], strides = [1, 1]} : vector<136x64xf32> to vector<136x32xf32>
    %c0_10 = arith.constant 0 : index
    %c0_11 = arith.constant 0 : index
    %24 = vector.load %arg5[%c0_10, %c0_11] : memref<136x136xf32, #tpu.memory_space<vmem>>, vector<136x136xf32>
    %25 = vector.extract_strided_slice %22 {offsets = [0, 32], sizes = [136, 32], strides = [1, 1]} : vector<136x64xf32> to vector<136x32xf32>
    %cst_12 = arith.constant dense<0.000000e+00> : vector<136x32xf32>
    %26 = tpu.matmul %24, %25, %cst_12 {dimension_numbers = #tpu.dot_dimension_numbers<[1], [0], [0], [1], [0, 0, 1, 1], [], []>} : vector<136x136xf32>, vector<136x32xf32>, vector<136x32xf32> -> vector<136x32xf32>
    %27 = arith.addf %23, %26 : vector<136x32xf32>
    %c0_13 = arith.constant 0 : index
    %c0_14 = arith.constant 0 : index
    %28 = vector.load %arg4[%c0_13, %c0_14] : memref<136x32xf32, #tpu.memory_space<vmem>>, vector<136x32xf32>
    %29 = arith.addf %27, %28 : vector<136x32xf32>
    %cst_15 = arith.constant 5.000000e-01 : f32
    %30 = vector.broadcast %cst_15 : f32 to vector<136x32xf32>
    %31 = arith.mulf %30, %29 : vector<136x32xf32>
    %cst_16 = arith.constant 0.707106769 : f32
    %32 = vector.broadcast %cst_16 : f32 to vector<136x32xf32>
    %33 = arith.mulf %29, %32 : vector<136x32xf32>
    %34 = math.absf %33 : vector<136x32xf32>
    %cst_17 = arith.constant 0.327591091 : f32
    %35 = vector.broadcast %cst_17 : f32 to vector<136x32xf32>
    %36 = arith.mulf %35, %34 : vector<136x32xf32>
    %cst_18 = arith.constant 1.000000e+00 : f32
    %37 = vector.broadcast %cst_18 : f32 to vector<136x32xf32>
    %38 = arith.addf %37, %36 : vector<136x32xf32>
    %cst_19 = arith.constant 1.000000e+00 : f32
    %39 = vector.broadcast %cst_19 : f32 to vector<136x32xf32>
    %40 = arith.divf %39, %38 : vector<136x32xf32>
    %cst_20 = arith.constant 1.06140542 : f32
    %41 = vector.broadcast %cst_20 : f32 to vector<136x32xf32>
    %42 = arith.mulf %41, %40 : vector<136x32xf32>
    %cst_21 = arith.constant -1.45315206 : f32
    %43 = vector.broadcast %cst_21 : f32 to vector<136x32xf32>
    %44 = arith.addf %42, %43 : vector<136x32xf32>
    %45 = arith.mulf %44, %40 : vector<136x32xf32>
    %cst_22 = arith.constant 1.42141378 : f32
    %46 = vector.broadcast %cst_22 : f32 to vector<136x32xf32>
    %47 = arith.addf %45, %46 : vector<136x32xf32>
    %48 = arith.mulf %47, %40 : vector<136x32xf32>
    %cst_23 = arith.constant -0.284496725 : f32
    %49 = vector.broadcast %cst_23 : f32 to vector<136x32xf32>
    %50 = arith.addf %48, %49 : vector<136x32xf32>
    %51 = arith.mulf %50, %40 : vector<136x32xf32>
    %cst_24 = arith.constant 0.254829586 : f32
    %52 = vector.broadcast %cst_24 : f32 to vector<136x32xf32>
    %53 = arith.addf %51, %52 : vector<136x32xf32>
    %54 = arith.mulf %53, %40 : vector<136x32xf32>
    %cst_25 = arith.constant 0.000000e+00 : f32
    %55 = vector.broadcast %cst_25 : f32 to vector<136x32xf32>
    %56 = arith.subf %55, %34 : vector<136x32xf32>
    %57 = arith.mulf %56, %34 : vector<136x32xf32>
    %58 = math.exp %57 : vector<136x32xf32>
    %59 = arith.mulf %54, %58 : vector<136x32xf32>
    %cst_26 = arith.constant 1.000000e+00 : f32
    %60 = vector.broadcast %cst_26 : f32 to vector<136x32xf32>
    %61 = arith.subf %60, %59 : vector<136x32xf32>
    %cst_27 = arith.constant 0.000000e+00 : f32
    %62 = vector.broadcast %cst_27 : f32 to vector<136x32xf32>
    %63 = arith.cmpf olt, %33, %62 : vector<136x32xf32>
    %cst_28 = arith.constant 0.000000e+00 : f32
    %64 = vector.broadcast %cst_28 : f32 to vector<136x32xf32>
    %65 = arith.subf %64, %61 : vector<136x32xf32>
    %66 = arith.select %63, %65, %61 : vector<136x32xi1>, vector<136x32xf32>
    %cst_29 = arith.constant 1.000000e+00 : f32
    %67 = vector.broadcast %cst_29 : f32 to vector<136x32xf32>
    %68 = arith.addf %67, %66 : vector<136x32xf32>
    %69 = arith.mulf %31, %68 : vector<136x32xf32>
    %c0_30 = arith.constant 0 : index
    %c0_31 = arith.constant 0 : index
    %70 = vector.load %arg19[%c0_30, %c0_31] : memref<136x96xf32, #tpu.memory_space<vmem>>, vector<136x32xf32>
    tpu.vector_store %arg19[%c0_30, %c0_31], %69 {strides = array<i32>} : memref<136x96xf32, #tpu.memory_space<vmem>>, vector<136x32xf32>,
    %c0_32 = arith.constant 0 : index
    %c0_33 = arith.constant 0 : index
    %71 = vector.load %arg19[%c0_32, %c0_33] : memref<136x96xf32, #tpu.memory_space<vmem>>, vector<136x32xf32>
    %cst_34 = arith.constant dense<0.000000e+00> : vector<136xf32>
    %72 = vector.multi_reduction <add>, %71, %cst_34 [1] : vector<136x32xf32> to vector<136xf32>
    %73 = vector.shape_cast %72 : vector<136xf32> to vector<136x1xf32>
    %cst_35 = arith.constant 3.200000e+01 : f32
    %74 = vector.broadcast %cst_35 : f32 to vector<136x1xf32>
    %75 = arith.divf %73, %74 : vector<136x1xf32>
    %76 = vector.broadcast %75 : vector<136x1xf32> to vector<136x32xf32>
    %77 = arith.subf %71, %76 : vector<136x32xf32>
    %78 = arith.mulf %77, %77 : vector<136x32xf32>
    %cst_36 = arith.constant dense<0.000000e+00> : vector<136xf32>
    %79 = vector.multi_reduction <add>, %78, %cst_36 [1] : vector<136x32xf32> to vector<136xf32>
    %80 = vector.shape_cast %79 : vector<136xf32> to vector<136x1xf32>
    %cst_37 = arith.constant 3.200000e+01 : f32
    %81 = vector.broadcast %cst_37 : f32 to vector<136x1xf32>
    %82 = arith.divf %80, %81 : vector<136x1xf32>
    %83 = vector.broadcast %75 : vector<136x1xf32> to vector<136x32xf32>
    %84 = arith.subf %71, %83 : vector<136x32xf32>
    %cst_38 = arith.constant 9.99999974E-6 : f32
    %85 = vector.broadcast %cst_38 : f32 to vector<136x1xf32>
    %86 = arith.addf %82, %85 : vector<136x1xf32>
    %87 = math.rsqrt %86 : vector<136x1xf32>
    %88 = vector.broadcast %87 : vector<136x1xf32> to vector<136x32xf32>
    %89 = arith.mulf %84, %88 : vector<136x32xf32>
    %c0_39 = arith.constant 0 : index
    %c0_40 = arith.constant 0 : index
    %90 = vector.load %arg6[%c0_39, %c0_40] : memref<32x64xf32, #tpu.memory_space<vmem>>, vector<32x64xf32>
    %cst_41 = arith.constant dense<0.000000e+00> : vector<136x64xf32>
    %91 = tpu.matmul %89, %90, %cst_41 {dimension_numbers = #tpu.dot_dimension_numbers<[1], [0], [0], [1], [0, 0, 1, 1], [], []>} : vector<136x32xf32>, vector<32x64xf32>, vector<136x64xf32> -> vector<136x64xf32>
    %c0_42 = arith.constant 0 : index
    %c0_43 = arith.constant 0 : index
    %92 = vector.load %arg7[%c0_42, %c0_43] : memref<136x64xf32, #tpu.memory_space<vmem>>, vector<136x64xf32>
    %93 = arith.mulf %91, %92 : vector<136x64xf32>
    %94 = vector.extract_strided_slice %93 {offsets = [0, 0], sizes = [136, 32], strides = [1, 1]} : vector<136x64xf32> to vector<136x32xf32>
    %c0_44 = arith.constant 0 : index
    %c0_45 = arith.constant 0 : index
    %95 = vector.load %arg9[%c0_44, %c0_45] : memref<136x136xf32, #tpu.memory_space<vmem>>, vector<136x136xf32>
    %96 = vector.extract_strided_slice %93 {offsets = [0, 32], sizes = [136, 32], strides = [1, 1]} : vector<136x64xf32> to vector<136x32xf32>
    %cst_46 = arith.constant dense<0.000000e+00> : vector<136x32xf32>
    %97 = tpu.matmul %95, %96, %cst_46 {dimension_numbers = #tpu.dot_dimension_numbers<[1], [0], [0], [1], [0, 0, 1, 1], [], []>} : vector<136x136xf32>, vector<136x32xf32>, vector<136x32xf32> -> vector<136x32xf32>
    %98 = arith.addf %94, %97 : vector<136x32xf32>
    %c0_47 = arith.constant 0 : index
    %c0_48 = arith.constant 0 : index
    %99 = vector.load %arg8[%c0_47, %c0_48] : memref<136x32xf32, #tpu.memory_space<vmem>>, vector<136x32xf32>
    %100 = arith.addf %98, %99 : vector<136x32xf32>
    %cst_49 = arith.constant 5.000000e-01 : f32
    %101 = vector.broadcast %cst_49 : f32 to vector<136x32xf32>
    %102 = arith.mulf %101, %100 : vector<136x32xf32>
    %cst_50 = arith.constant 0.707106769 : f32
    %103 = vector.broadcast %cst_50 : f32 to vector<136x32xf32>
    %104 = arith.mulf %100, %103 : vector<136x32xf32>
    %105 = math.absf %104 : vector<136x32xf32>
    %cst_51 = arith.constant 0.327591091 : f32
    %106 = vector.broadcast %cst_51 : f32 to vector<136x32xf32>
    %107 = arith.mulf %106, %105 : vector<136x32xf32>
    %cst_52 = arith.constant 1.000000e+00 : f32
    %108 = vector.broadcast %cst_52 : f32 to vector<136x32xf32>
    %109 = arith.addf %108, %107 : vector<136x32xf32>
    %cst_53 = arith.constant 1.000000e+00 : f32
    %110 = vector.broadcast %cst_53 : f32 to vector<136x32xf32>
    %111 = arith.divf %110, %109 : vector<136x32xf32>
    %cst_54 = arith.constant 1.06140542 : f32
    %112 = vector.broadcast %cst_54 : f32 to vector<136x32xf32>
    %113 = arith.mulf %112, %111 : vector<136x32xf32>
    %cst_55 = arith.constant -1.45315206 : f32
    %114 = vector.broadcast %cst_55 : f32 to vector<136x32xf32>
    %115 = arith.addf %113, %114 : vector<136x32xf32>
    %116 = arith.mulf %115, %111 : vector<136x32xf32>
    %cst_56 = arith.constant 1.42141378 : f32
    %117 = vector.broadcast %cst_56 : f32 to vector<136x32xf32>
    %118 = arith.addf %116, %117 : vector<136x32xf32>
    %119 = arith.mulf %118, %111 : vector<136x32xf32>
    %cst_57 = arith.constant -0.284496725 : f32
    %120 = vector.broadcast %cst_57 : f32 to vector<136x32xf32>
    %121 = arith.addf %119, %120 : vector<136x32xf32>
    %122 = arith.mulf %121, %111 : vector<136x32xf32>
    %cst_58 = arith.constant 0.254829586 : f32
    %123 = vector.broadcast %cst_58 : f32 to vector<136x32xf32>
    %124 = arith.addf %122, %123 : vector<136x32xf32>
    %125 = arith.mulf %124, %111 : vector<136x32xf32>
    %cst_59 = arith.constant 0.000000e+00 : f32
    %126 = vector.broadcast %cst_59 : f32 to vector<136x32xf32>
    %127 = arith.subf %126, %105 : vector<136x32xf32>
    %128 = arith.mulf %127, %105 : vector<136x32xf32>
    %129 = math.exp %128 : vector<136x32xf32>
    %130 = arith.mulf %125, %129 : vector<136x32xf32>
    %cst_60 = arith.constant 1.000000e+00 : f32
    %131 = vector.broadcast %cst_60 : f32 to vector<136x32xf32>
    %132 = arith.subf %131, %130 : vector<136x32xf32>
    %cst_61 = arith.constant 0.000000e+00 : f32
    %133 = vector.broadcast %cst_61 : f32 to vector<136x32xf32>
    %134 = arith.cmpf olt, %104, %133 : vector<136x32xf32>
    %cst_62 = arith.constant 0.000000e+00 : f32
    %135 = vector.broadcast %cst_62 : f32 to vector<136x32xf32>
    %136 = arith.subf %135, %132 : vector<136x32xf32>
    %137 = arith.select %134, %136, %132 : vector<136x32xi1>, vector<136x32xf32>
    %cst_63 = arith.constant 1.000000e+00 : f32
    %138 = vector.broadcast %cst_63 : f32 to vector<136x32xf32>
    %139 = arith.addf %138, %137 : vector<136x32xf32>
    %140 = arith.mulf %102, %139 : vector<136x32xf32>
    %c0_64 = arith.constant 0 : index
    %c32 = arith.constant 32 : index
    %141 = vector.load %arg19[%c0_64, %c32] : memref<136x96xf32, #tpu.memory_space<vmem>>, vector<136x32xf32>
    tpu.vector_store %arg19[%c0_64, %c32], %140 {strides = array<i32>} : memref<136x96xf32, #tpu.memory_space<vmem>>, vector<136x32xf32>,
    %c0_65 = arith.constant 0 : index
    %c0_66 = arith.constant 0 : index
    %142 = vector.load %arg19[%c0_65, %c0_66] : memref<136x96xf32, #tpu.memory_space<vmem>>, vector<136x64xf32>
    %cst_67 = arith.constant dense<0.000000e+00> : vector<136xf32>
    %143 = vector.multi_reduction <add>, %142, %cst_67 [1] : vector<136x64xf32> to vector<136xf32>
    %144 = vector.shape_cast %143 : vector<136xf32> to vector<136x1xf32>
    %cst_68 = arith.constant 6.400000e+01 : f32
    %145 = vector.broadcast %cst_68 : f32 to vector<136x1xf32>
    %146 = arith.divf %144, %145 : vector<136x1xf32>
    %147 = vector.broadcast %146 : vector<136x1xf32> to vector<136x64xf32>
    %148 = arith.subf %142, %147 : vector<136x64xf32>
    %149 = arith.mulf %148, %148 : vector<136x64xf32>
    %cst_69 = arith.constant dense<0.000000e+00> : vector<136xf32>
    %150 = vector.multi_reduction <add>, %149, %cst_69 [1] : vector<136x64xf32> to vector<136xf32>
    %151 = vector.shape_cast %150 : vector<136xf32> to vector<136x1xf32>
    %cst_70 = arith.constant 6.400000e+01 : f32
    %152 = vector.broadcast %cst_70 : f32 to vector<136x1xf32>
    %153 = arith.divf %151, %152 : vector<136x1xf32>
    %154 = vector.broadcast %146 : vector<136x1xf32> to vector<136x64xf32>
    %155 = arith.subf %142, %154 : vector<136x64xf32>
    %cst_71 = arith.constant 9.99999974E-6 : f32
    %156 = vector.broadcast %cst_71 : f32 to vector<136x1xf32>
    %157 = arith.addf %153, %156 : vector<136x1xf32>
    %158 = math.rsqrt %157 : vector<136x1xf32>
    %159 = vector.broadcast %158 : vector<136x1xf32> to vector<136x64xf32>
    %160 = arith.mulf %155, %159 : vector<136x64xf32>
    %c0_72 = arith.constant 0 : index
    %c0_73 = arith.constant 0 : index
    %161 = vector.load %arg10[%c0_72, %c0_73] : memref<64x64xf32, #tpu.memory_space<vmem>>, vector<64x64xf32>
    %cst_74 = arith.constant dense<0.000000e+00> : vector<136x64xf32>
    %162 = tpu.matmul %160, %161, %cst_74 {dimension_numbers = #tpu.dot_dimension_numbers<[1], [0], [0], [1], [0, 0, 1, 1], [], []>} : vector<136x64xf32>, vector<64x64xf32>, vector<136x64xf32> -> vector<136x64xf32>
    %c0_75 = arith.constant 0 : index
    %c0_76 = arith.constant 0 : index
    %163 = vector.load %arg11[%c0_75, %c0_76] : memref<136x64xf32, #tpu.memory_space<vmem>>, vector<136x64xf32>
    %164 = arith.mulf %162, %163 : vector<136x64xf32>
    %165 = vector.extract_strided_slice %164 {offsets = [0, 0], sizes = [136, 32], strides = [1, 1]} : vector<136x64xf32> to vector<136x32xf32>
    %c0_77 = arith.constant 0 : index
    %c0_78 = arith.constant 0 : index
    %166 = vector.load %arg13[%c0_77, %c0_78] : memref<136x136xf32, #tpu.memory_space<vmem>>, vector<136x136xf32>
    %167 = vector.extract_strided_slice %164 {offsets = [0, 32], sizes = [136, 32], strides = [1, 1]} : vector<136x64xf32> to vector<136x32xf32>
    %cst_79 = arith.constant dense<0.000000e+00> : vector<136x32xf32>
    %168 = tpu.matmul %166, %167, %cst_79 {dimension_numbers = #tpu.dot_dimension_numbers<[1], [0], [0], [1], [0, 0, 1, 1], [], []>} : vector<136x136xf32>, vector<136x32xf32>, vector<136x32xf32> -> vector<136x32xf32>
    %169 = arith.addf %165, %168 : vector<136x32xf32>
    %c0_80 = arith.constant 0 : index
    %c0_81 = arith.constant 0 : index
    %170 = vector.load %arg12[%c0_80, %c0_81] : memref<136x32xf32, #tpu.memory_space<vmem>>, vector<136x32xf32>
    %171 = arith.addf %169, %170 : vector<136x32xf32>
    %cst_82 = arith.constant 5.000000e-01 : f32
    %172 = vector.broadcast %cst_82 : f32 to vector<136x32xf32>
    %173 = arith.mulf %172, %171 : vector<136x32xf32>
    %cst_83 = arith.constant 0.707106769 : f32
    %174 = vector.broadcast %cst_83 : f32 to vector<136x32xf32>
    %175 = arith.mulf %171, %174 : vector<136x32xf32>
    %176 = math.absf %175 : vector<136x32xf32>
    %cst_84 = arith.constant 0.327591091 : f32
    %177 = vector.broadcast %cst_84 : f32 to vector<136x32xf32>
    %178 = arith.mulf %177, %176 : vector<136x32xf32>
    %cst_85 = arith.constant 1.000000e+00 : f32
    %179 = vector.broadcast %cst_85 : f32 to vector<136x32xf32>
    %180 = arith.addf %179, %178 : vector<136x32xf32>
    %cst_86 = arith.constant 1.000000e+00 : f32
    %181 = vector.broadcast %cst_86 : f32 to vector<136x32xf32>
    %182 = arith.divf %181, %180 : vector<136x32xf32>
    %cst_87 = arith.constant 1.06140542 : f32
    %183 = vector.broadcast %cst_87 : f32 to vector<136x32xf32>
    %184 = arith.mulf %183, %182 : vector<136x32xf32>
    %cst_88 = arith.constant -1.45315206 : f32
    %185 = vector.broadcast %cst_88 : f32 to vector<136x32xf32>
    %186 = arith.addf %184, %185 : vector<136x32xf32>
    %187 = arith.mulf %186, %182 : vector<136x32xf32>
    %cst_89 = arith.constant 1.42141378 : f32
    %188 = vector.broadcast %cst_89 : f32 to vector<136x32xf32>
    %189 = arith.addf %187, %188 : vector<136x32xf32>
    %190 = arith.mulf %189, %182 : vector<136x32xf32>
    %cst_90 = arith.constant -0.284496725 : f32
    %191 = vector.broadcast %cst_90 : f32 to vector<136x32xf32>
    %192 = arith.addf %190, %191 : vector<136x32xf32>
    %193 = arith.mulf %192, %182 : vector<136x32xf32>
    %cst_91 = arith.constant 0.254829586 : f32
    %194 = vector.broadcast %cst_91 : f32 to vector<136x32xf32>
    %195 = arith.addf %193, %194 : vector<136x32xf32>
    %196 = arith.mulf %195, %182 : vector<136x32xf32>
    %cst_92 = arith.constant 0.000000e+00 : f32
    %197 = vector.broadcast %cst_92 : f32 to vector<136x32xf32>
    %198 = arith.subf %197, %176 : vector<136x32xf32>
    %199 = arith.mulf %198, %176 : vector<136x32xf32>
    %200 = math.exp %199 : vector<136x32xf32>
    %201 = arith.mulf %196, %200 : vector<136x32xf32>
    %cst_93 = arith.constant 1.000000e+00 : f32
    %202 = vector.broadcast %cst_93 : f32 to vector<136x32xf32>
    %203 = arith.subf %202, %201 : vector<136x32xf32>
    %cst_94 = arith.constant 0.000000e+00 : f32
    %204 = vector.broadcast %cst_94 : f32 to vector<136x32xf32>
    %205 = arith.cmpf olt, %175, %204 : vector<136x32xf32>
    %cst_95 = arith.constant 0.000000e+00 : f32
    %206 = vector.broadcast %cst_95 : f32 to vector<136x32xf32>
    %207 = arith.subf %206, %203 : vector<136x32xf32>
    %208 = arith.select %205, %207, %203 : vector<136x32xi1>, vector<136x32xf32>
    %cst_96 = arith.constant 1.000000e+00 : f32
    %209 = vector.broadcast %cst_96 : f32 to vector<136x32xf32>
    %210 = arith.addf %209, %208 : vector<136x32xf32>
    %211 = arith.mulf %173, %210 : vector<136x32xf32>
    %c0_97 = arith.constant 0 : index
    %c64 = arith.constant 64 : index
    %212 = vector.load %arg19[%c0_97, %c64] : memref<136x96xf32, #tpu.memory_space<vmem>>, vector<136x32xf32>
    tpu.vector_store %arg19[%c0_97, %c64], %211 {strides = array<i32>} : memref<136x96xf32, #tpu.memory_space<vmem>>, vector<136x32xf32>,
    %c0_98 = arith.constant 0 : index
    %c0_99 = arith.constant 0 : index
    %213 = vector.load %arg19[%c0_98, %c0_99] : memref<136x96xf32, #tpu.memory_space<vmem>>, vector<136x96xf32>
    %c0_100 = arith.constant 0 : index
    %c0_101 = arith.constant 0 : index
    %214 = vector.load %arg14[%c0_100, %c0_101] : memref<96x6xf32, #tpu.memory_space<vmem>>, vector<96x6xf32>
    %cst_102 = arith.constant dense<0.000000e+00> : vector<136x6xf32>
    %215 = tpu.matmul %213, %214, %cst_102 {dimension_numbers = #tpu.dot_dimension_numbers<[1], [0], [0], [1], [0, 0, 1, 1], [], []>} : vector<136x96xf32>, vector<96x6xf32>, vector<136x6xf32> -> vector<136x6xf32>
    %c0_103 = arith.constant 0 : index
    %c0_104 = arith.constant 0 : index
    %216 = vector.load %arg15[%c0_103, %c0_104] : memref<136x6xf32, #tpu.memory_space<vmem>>, vector<136x6xf32>
    %217 = arith.mulf %215, %216 : vector<136x6xf32>
    %218 = vector.extract_strided_slice %217 {offsets = [0, 0], sizes = [136, 3], strides = [1, 1]} : vector<136x6xf32> to vector<136x3xf32>
    %c0_105 = arith.constant 0 : index
    %c0_106 = arith.constant 0 : index
    %219 = vector.load %arg17[%c0_105, %c0_106] : memref<136x136xf32, #tpu.memory_space<vmem>>, vector<136x136xf32>
    %220 = vector.extract_strided_slice %217 {offsets = [0, 3], sizes = [136, 3], strides = [1, 1]} : vector<136x6xf32> to vector<136x3xf32>
    %cst_107 = arith.constant dense<0.000000e+00> : vector<136x3xf32>
    %221 = tpu.matmul %219, %220, %cst_107 {dimension_numbers = #tpu.dot_dimension_numbers<[1], [0], [0], [1], [0, 0, 1, 1], [], []>} : vector<136x136xf32>, vector<136x3xf32>, vector<136x3xf32> -> vector<136x3xf32>
    %222 = arith.addf %218, %221 : vector<136x3xf32>
    %c0_108 = arith.constant 0 : index
    %c0_109 = arith.constant 0 : index
    %223 = vector.load %arg16[%c0_108, %c0_109] : memref<136x3xf32, #tpu.memory_space<vmem>>, vector<136x3xf32>
    %224 = arith.addf %222, %223 : vector<136x3xf32>
    %c0_110 = arith.constant 0 : index
    %c0_111 = arith.constant 0 : index
    %225 = vector.load %arg18[%c0_110, %c0_111] : memref<136x3xf32, #tpu.memory_space<vmem>>, vector<136x3xf32>
    tpu.vector_store %arg18[%c0_110, %c0_111], %224 {strides = array<i32>} : memref<136x3xf32, #tpu.memory_space<vmem>>, vector<136x3xf32>,
    return
  }
  func.func @transform_0(%arg0: i32) -> (i32, i32) {
    %c0_i32 = arith.constant 0 : i32
    %c0_i32_0 = arith.constant 0 : i32
    return %arg0, %c0_i32 : i32, i32
  }
  func.func @transform_1(%arg0: i32) -> (i32, i32) {
    %c0_i32 = arith.constant 0 : i32
    %c0_i32_0 = arith.constant 0 : i32
    %c0_i32_1 = arith.constant 0 : i32
    return %c0_i32, %c0_i32_0 : i32, i32
  }
  func.func @transform_2(%arg0: i32) -> (i32, i32) {
    %c0_i32 = arith.constant 0 : i32
    %c0_i32_0 = arith.constant 0 : i32
    %c0_i32_1 = arith.constant 0 : i32
    return %c0_i32, %c0_i32_0 : i32, i32
  }
  func.func @transform_3(%arg0: i32) -> (i32, i32) {
    %c0_i32 = arith.constant 0 : i32
    %c0_i32_0 = arith.constant 0 : i32
    %c0_i32_1 = arith.constant 0 : i32
    return %c0_i32, %c0_i32_0 : i32, i32
  }
  func.func @transform_4(%arg0: i32) -> (i32, i32) {
    %c0_i32 = arith.constant 0 : i32
    %c0_i32_0 = arith.constant 0 : i32
    %c0_i32_1 = arith.constant 0 : i32
    return %c0_i32, %c0_i32_0 : i32, i32
  }
  func.func @transform_5(%arg0: i32) -> (i32, i32) {
    %c0_i32 = arith.constant 0 : i32
    %c0_i32_0 = arith.constant 0 : i32
    %c0_i32_1 = arith.constant 0 : i32
    return %c0_i32, %c0_i32_0 : i32, i32
  }
  func.func @transform_6(%arg0: i32) -> (i32, i32) {
    %c0_i32 = arith.constant 0 : i32
    %c0_i32_0 = arith.constant 0 : i32
    %c0_i32_1 = arith.constant 0 : i32
    return %c0_i32, %c0_i32_0 : i32, i32
  }
  func.func @transform_7(%arg0: i32) -> (i32, i32) {
    %c0_i32 = arith.constant 0 : i32
    %c0_i32_0 = arith.constant 0 : i32
    %c0_i32_1 = arith.constant 0 : i32
    return %c0_i32, %c0_i32_0 : i32, i32
  }
  func.func @transform_8(%arg0: i32) -> (i32, i32) {
    %c0_i32 = arith.constant 0 : i32
    %c0_i32_0 = arith.constant 0 : i32
    %c0_i32_1 = arith.constant 0 : i32
    return %c0_i32, %c0_i32_0 : i32, i32
  }
  func.func @transform_9(%arg0: i32) -> (i32, i32) {
    %c0_i32 = arith.constant 0 : i32
    %c0_i32_0 = arith.constant 0 : i32
    %c0_i32_1 = arith.constant 0 : i32
    return %c0_i32, %c0_i32_0 : i32, i32
  }
  func.func @transform_10(%arg0: i32) -> (i32, i32) {
    %c0_i32 = arith.constant 0 : i32
    %c0_i32_0 = arith.constant 0 : i32
    %c0_i32_1 = arith.constant 0 : i32
    return %c0_i32, %c0_i32_0 : i32, i32
  }
  func.func @transform_11(%arg0: i32) -> (i32, i32) {
    %c0_i32 = arith.constant 0 : i32
    %c0_i32_0 = arith.constant 0 : i32
    %c0_i32_1 = arith.constant 0 : i32
    return %c0_i32, %c0_i32_0 : i32, i32
  }
  func.func @transform_12(%arg0: i32) -> (i32, i32) {
    %c0_i32 = arith.constant 0 : i32
    %c0_i32_0 = arith.constant 0 : i32
    %c0_i32_1 = arith.constant 0 : i32
    return %c0_i32, %c0_i32_0 : i32, i32
  }
  func.func @transform_13(%arg0: i32) -> (i32, i32) {
    %c0_i32 = arith.constant 0 : i32
    %c0_i32_0 = arith.constant 0 : i32
    %c0_i32_1 = arith.constant 0 : i32
    return %c0_i32, %c0_i32_0 : i32, i32
  }
  func.func @transform_14(%arg0: i32) -> (i32, i32) {
    %c0_i32 = arith.constant 0 : i32
    %c0_i32_0 = arith.constant 0 : i32
    %c0_i32_1 = arith.constant 0 : i32
    return %c0_i32, %c0_i32_0 : i32, i32
  }
  func.func @transform_15(%arg0: i32) -> (i32, i32) {
    %c0_i32 = arith.constant 0 : i32
    %c0_i32_0 = arith.constant 0 : i32
    %c0_i32_1 = arith.constant 0 : i32
    return %c0_i32, %c0_i32_0 : i32, i32
  }
  func.func @transform_16(%arg0: i32) -> (i32, i32) {
    %c0_i32 = arith.constant 0 : i32
    %c0_i32_0 = arith.constant 0 : i32
    %c0_i32_1 = arith.constant 0 : i32
    return %c0_i32, %c0_i32_0 : i32, i32
  }
  func.func @transform_17(%arg0: i32) -> (i32, i32) {
    %c0_i32 = arith.constant 0 : i32
    %c0_i32_0 = arith.constant 0 : i32
    return %arg0, %c0_i32 : i32, i32
  }
}

</mosaic_0001>

<bundles_post_ra>
// kernel: tpu_custom_call.1
= control target key start
LH: loop header
LB: loop body
LE: loop exit
PB: predicated region body
PF: predicated region fallthrough
CT: control target
= control target key end

     0   :  { %vm73_vm0 = vcmask 982016   ;;  %v6183_v14 = vmov 120.0   ;;  %s6184_s27 = smov 96   ;;  %s6188_s25 = smov 64   ;;  %s10517_s0 = inlined_call_operand.vmem [shape: f32[136,120], index: 0, kind: input, shape index: {}]   ;;  %s10518_s1 = inlined_call_operand.vmem [shape: f32[120,64], index: 1, kind: input, shape index: {}]   ;;  %s10519_s2 = inlined_call_operand.vmem [shape: f32[136,64], index: 2, kind: input, shape index: {}]   ;;  %s10520_s4 = inlined_call_operand.vmem [shape: f32[136,136], index: 4, kind: input, shape index: {}]   ;;  %s10521_s3 = inlined_call_operand.vmem [shape: f32[136,32], index: 3, kind: input, shape index: {}]   ;;  %s10522_s5 = inlined_call_operand.vmem [shape: f32[32,64], index: 5, kind: input, shape index: {}]   ;;  %s10523_s6 = inlined_call_operand.vmem [shape: f32[136,64], index: 6, kind: input, shape index: {}]   ;;  %s10524_s8 = inlined_call_operand.vmem [shape: f32[136,136], index: 8, kind: input, shape index: {}]   ;;  %s10525_s7 = inlined_call_operand.vmem [shape: f32[136,32], index: 7, kind: input, shape index: {}]   ;;  %s10526_s9 = inlined_call_operand.vmem [shape: f32[64,64], index: 9, kind: input, shape index: {}]   ;;  %s10527_s10 = inlined_call_operand.vmem [shape: f32[136,64], index: 10, kind: input, shape index: {}]   ;;  %s10528_s12 = inlined_call_operand.vmem [shape: f32[136,136], index: 12, kind: input, shape index: {}]   ;;  %s10529_s11 = inlined_call_operand.vmem [shape: f32[136,32], index: 11, kind: input, shape index: {}]   ;;  %s10530_s13 = inlined_call_operand.vmem [shape: f32[96,6], index: 13, kind: input, shape index: {}]   ;;  %s10531_s14 = inlined_call_operand.vmem [shape: f32[136,6], index: 14, kind: input, shape index: {}]   ;;  %s10532_s16 = inlined_call_operand.vmem [shape: f32[136,136], index: 16, kind: input, shape index: {}]   ;;  %s10533_s15 = inlined_call_operand.vmem [shape: f32[136,3], index: 15, kind: input, shape index: {}]   ;;  %s10534_s17 = inlined_call_operand.vmem [shape: f32[136,3], index: 17, kind: output, shape index: {}]  }
   0x1   :  { %10540 = sst [smem:[#allocation6_spill]] %s10517_s0  ;;  %5869 = vrcp.f32 %v6183_v14  ;;  %s6186_s0 = smov 32  }
   0x2   :  { %10541 = sst [smem:[#allocation7_spill]] %s10518_s1 }
   0x3   :  { %s10542_s26 = sld [smem:[#allocation6_spill]] }
   0x4   :  { %s10543_s30 = sld [smem:[#allocation7_spill]] }
   0x7   :  { %v5870_v15 = vpop.eup %5869 }
   0x8   :  { %v126_v16 = vmul.f32 120.0, %v5870_v15  ;;  %vm130_vm1 = vweird.f32 %v5870_v15 }
   0x9   :  { %v58_v0 = vld [vmem:[%s10542_s26 + $0x10] sm:$0xff]  ;;  %v56_v1 = vld [vmem:[%s10542_s26] sm:$0xff]  ;;  %v57_v6 = vld [vmem:[%s10542_s26 + $0x8] sm:$0xff] }
   0xa   :  { %v6289_v2 = vld [vmem:[%s10542_s26 + $0x20] sm:$0xff]  ;;  %v80_v3 = vsel %vm73_vm0, %v58_v0, 0.0  ;;  %v74_v4 = vsel %vm73_vm0, %v56_v1, 0.0  ;;  %v59_v7 = vld [vmem:[%s10542_s26 + $0x18] sm:$0xff]  ;;  %v61_v8 = vld [vmem:[%s10542_s26 + $0x28] sm:$0xff]  ;;  %v77_v9 = vsel %vm73_vm0, %v57_v6, 0.0 }
   0xb   :  { %v86_v5 = vsel %vm73_vm0, %v6289_v2, 0.0  ;;  %81 = vadd.xlane.f32.xlu1 %v80_v3  ;;  %75 = vadd.xlane.f32.xlu0 %v74_v4  ;;  %v83_v10 = vsel %vm73_vm0, %v59_v7, 0.0  ;;  %v89_v11 = vsel %vm73_vm0, %v61_v8, 0.0  ;;  %v6310_v12 = vld [vmem:[%s10542_s26 + $0x30] sm:$0xff]  ;;  %v127_v17 = vsub.f32 1.0, %v126_v16  ;;  %v6332_v36 = vld [vmem:[%s10542_s26 + $0x48] sm:$0xff] }
   0xc   :  { %87 = vadd.xlane.f32.xlu2 %v86_v5  ;;  %v92_v13 = vsel %vm73_vm0, %v6310_v12, 0.0  ;;  %v6339_v39 = vld [vmem:[%s10542_s26 + $0x38] sm:$0xff]  ;;  %v101_v41 = vsel %vm73_vm0, %v6332_v36, 0.0  ;;  %v469_v47 = vld [vmem:[%s10543_s30 + $0x70] sm:$0xff]  ;;  %v468_v48 = vld [vmem:[%s10543_s30 + $0x68] sm:$0xff] }
   0xd   :  { %v128_v18 = vmul.f32 %v5870_v15, %v127_v17  ;;  %v95_v44 = vsel %vm73_vm0, %v6339_v39, 0.0  ;;  %522 = vmatpush.msra.mxu0 %v469_v47  ;;  %v467_v52 = vld [vmem:[%s10543_s30 + $0x60] sm:$0xff]  ;;  %v6384_v60 = vld [vmem:[%s10542_s26 + $0x50] sm:$0xff]  ;;  %v6406_v4 = vld [vmem:[%s10542_s26 + $0x58] sm:$0xff] }
   0xe   :  { %v6371_v53 = vld [vmem:[%s10542_s26 + $0x40] sm:$0xff]  ;;  %v461_v14 = vld [vmem:[%s10543_s30 + $0x30] sm:$0xff]  ;;  %v458_v17 = vld [vmem:[%s10543_s30 + $0x18] sm:$0xff] }
   0xf   :  { %v129_v19 = vadd.f32 %v5870_v15, %v128_v18  ;;  %523 = vmatpush.msra.mxu0 %v468_v48  ;;  %v98_v57 = vsel %vm73_vm0, %v6371_v53, 0.0  ;;  %v6391_v62 = vld [vmem:[%s10542_s26 + $0x60] sm:$0xff]  ;;  %v457_v18 = vld [vmem:[%s10543_s30 + $0x10] sm:$0xff] }
  0x10   :  { %v459_v16 = vld [vmem:[%s10543_s30 + $0x20] sm:$0xff] }
  0x11   :  { %v6314_v20 = vsel %vm130_vm1, %v5870_v15, %v129_v19  ;;  %524 = vmatpush.msra.mxu0 %v467_v52  ;;  %v460_v15 = vld [vmem:[%s10543_s30 + $0x28] sm:$0xff] }
  0x12   :  { %v456_v19 = vld [vmem:[%s10543_s30 + $0x8] sm:$0xff] }
  0x13   :  { %78 = vadd.xlane.f32.xlu0 %v77_v9  ;;  %84 = vadd.xlane.f32.xlu1 %v83_v10  ;;  %v466_v9 = vld [vmem:[%s10543_s30 + $0x58] sm:$0xff]  ;;  %v465_v10 = vld [vmem:[%s10543_s30 + $0x50] sm:$0xff] }
  0x14   :  { %90 = vadd.xlane.f32.xlu2 %v89_v11  ;;  %525 = vmatpush.msra.mxu0 %v466_v9  ;;  %v464_v11 = vld [vmem:[%s10543_s30 + $0x48] sm:$0xff] }
  0x16   :  { %526 = vmatpush.msra.mxu0 %v465_v10 }
  0x18   :  { %527 = vmatpush.msra.mxu0 %v464_v11 }
  0x1b   :  { %93 = vadd.xlane.f32.xlu1 %v92_v13  ;;  %v462_v13 = vld [vmem:[%s10543_s30 + $0x38] sm:$0xff] }
  0x7e   :  { %v82_v21 = vpop.xlane.xlu1 %81  ;;  %v76_v22 = vpop.xlane.xlu0 %75 }
  0x7f   :  { %v134_v23 = vmul.f32 %v6314_v20, %v82_v21  ;;  %v132_v24 = vmul.f32 %v6314_v20, %v76_v22  ;;  %v88_v25 = vpop.xlane.xlu2 %87  ;;  %v455_v21 = vld [vmem:[%s10543_s30] sm:$0xff] }
  0x80   :  { %v136_v51 = vmul.f32 %v6314_v20, %v88_v25 }
  0x81   :  { %v6318_v26 = vsub.f32 %v58_v0, %v134_v23  ;;  %v6320_v27 = vsub.f32 %v56_v1, %v132_v24  ;;  %v104_v0 = vsel %vm73_vm0, %v6384_v60, 0.0  ;;  %v110_v1 = vsel %vm73_vm0, %v6391_v62, 0.0 }
  0x82   :  { %v6376_v56 = vsub.f32 %v6289_v2, %v136_v51 }
  0x83   :  { %v168_v28 = vmul.f32 %v6318_v26, %v6318_v26  ;;  %v166_v29 = vmul.f32 %v6320_v27, %v6320_v27 }
  0x84   :  { %v170_v61 = vmul.f32 %v6376_v56, %v6376_v56 }
  0x85   :  { %v189_v30 = vsel %vm73_vm0, %v168_v28, 0.0  ;;  %v183_v31 = vsel %vm73_vm0, %v166_v29, 0.0 }
  0x86   :  { %190 = vadd.xlane.f32.xlu1 %v189_v30  ;;  %184 = vadd.xlane.f32.xlu0 %v183_v31  ;;  %v79_v32 = vpop.xlane.xlu0 %78  ;;  %v85_v33 = vpop.xlane.xlu1 %84  ;;  %v195_v2 = vsel %vm73_vm0, %v170_v61, 0.0 }
  0x87   :  { %v133_v34 = vmul.f32 %v6314_v20, %v79_v32  ;;  %v91_v35 = vpop.xlane.xlu2 %90  ;;  %v135_v37 = vmul.f32 %v6314_v20, %v85_v33 }
  0x88   :  { %v137_v38 = vmul.f32 %v6314_v20, %v91_v35 }
  0x89   :  { %v6341_v40 = vsub.f32 %v57_v6, %v133_v34  ;;  %v6347_v43 = vsub.f32 %v59_v7, %v135_v37  ;;  %v107_v6 = vsel %vm73_vm0, %v6406_v4, 0.0  ;;  %v6414_v7 = vld [vmem:[%s10542_s26 + $0x68] sm:$0xff] }
  0x8a   :  { %v6345_v42 = vsub.f32 %v61_v8, %v137_v38  ;;  %v113_v8 = vsel %vm73_vm0, %v6414_v7, 0.0 }
  0x8b   :  { %v167_v45 = vmul.f32 %v6341_v40, %v6341_v40  ;;  %v169_v50 = vmul.f32 %v6347_v43, %v6347_v43 }
  0x8c   :  { %v171_v49 = vmul.f32 %v6345_v42, %v6345_v42 }
  0x8d   :  { %v186_v46 = vsel %vm73_vm0, %v167_v45, 0.0  ;;  %v192_v55 = vsel %vm73_vm0, %v169_v50, 0.0 }
  0x8e   :  { %102 = vadd.xlane.f32.xlu1 %v101_v41  ;;  %96 = vadd.xlane.f32.xlu0 %v95_v44  ;;  %v198_v54 = vsel %vm73_vm0, %v171_v49, 0.0  ;;  %v94_v58 = vpop.xlane.xlu1 %93 }
  0x8f   :  { %187 = vadd.xlane.f32.xlu2 %v186_v46  ;;  %v138_v59 = vmul.f32 %v6314_v20, %v94_v58 }
  0x91   :  { %v6394_v63 = vsub.f32 %v6310_v12, %v138_v59  ;;  %v463_v12 = vld [vmem:[%s10543_s30 + $0x40] sm:$0xff]  ;;  %v6486_v59 = vld [vmem:[%s10542_s26 + $0x70] sm:$0xff] }
  0x92   :  { %528 = vmatpush.msra.mxu0 %v463_v12 }
  0x93   :  { %v172_v3 = vmul.f32 %v6394_v63, %v6394_v63 }
  0x94   :  { %529 = vmatpush.msra.mxu0 %v462_v13 }
  0x95   :  { %v201_v5 = vsel %vm73_vm0, %v172_v3, 0.0 }
  0x96   :  { %199 = vadd.xlane.f32.xlu1 %v198_v54  ;;  %193 = vadd.xlane.f32.xlu0 %v192_v55 }
  0x97   :  { %99 = vadd.xlane.f32.xlu2 %v98_v57  ;;  %530 = vmatpush.msra.mxu0 %v461_v14 }
  0x99   :  { %531 = vmatpush.msra.mxu0 %v460_v15 }
  0x9b   :  { %532 = vmatpush.msra.mxu0 %v459_v16 }
  0x9d   :  { %533 = vmatpush.msra.mxu0 %v458_v17 }
  0x9e   :  { %105 = vadd.xlane.f32.xlu0 %v104_v0  ;;  %111 = vadd.xlane.f32.xlu1 %v110_v1 }
  0x9f   :  { %196 = vadd.xlane.f32.xlu2 %v195_v2  ;;  %534 = vmatpush.msra.mxu0 %v457_v18 }
  0xa1   :  { %535 = vmatpush.msra.mxu0 %v456_v19 }
  0xa3   :  { %536 = vmatpush.msra.mxu0 %v455_v21 }
  0xa6   :  { %202 = vadd.xlane.f32.xlu0 %v201_v5  ;;  %v116_v5 = vsel %vm73_vm0, %v6486_v59, 0.0 }
  0xa7   :  { %108 = vadd.xlane.f32.xlu2 %v107_v6 }
  0xae   :  { %114 = vadd.xlane.f32.xlu0 %v113_v8 }
  0xf9   :  { %v191_v22 = vpop.xlane.xlu1 %190  ;;  %v185_v23 = vpop.xlane.xlu0 %184 }
  0xfa   :  { %v236_v24 = vmul.f32 %v191_v22, %v6314_v20  ;;  %v234_v25 = vmul.f32 %v185_v23, %v6314_v20 }
  0xfc   :  { %v251_v28 = vadd.f32 1e-05, %v234_v25  ;;  %v6456_v29 = vadd.f32 1e-05, %v236_v24  ;;  %v6513_v25 = vld [vmem:[%s10542_s26 + $0x78] sm:$0xff] }
  0xfe   :  { %5871 = vrsqrt.f32 %v251_v28  ;;  %vm274_vm3 = vweird.f32 %v251_v28  ;;  %vm294_vm8 = vweird.f32 %v6456_v29 }
  0xff   :  { %5873 = vrsqrt.f32 %v6456_v29 }
 0x101   :  { %v103_v30 = vpop.xlane.xlu1 %102  ;;  %v97_v31 = vpop.xlane.xlu0 %96 }
 0x102   :  { %v141_v32 = vmul.f32 %v6314_v20, %v103_v30  ;;  %v188_v33 = vpop.xlane.xlu2 %187  ;;  %v139_v34 = vmul.f32 %v6314_v20, %v97_v31 }
 0x103   :  { %v235_v35 = vmul.f32 %v188_v33, %v6314_v20 }
 0x104   :  { %v6463_v37 = vsub.f32 %v6332_v36, %v141_v32  ;;  %v6466_v38 = vsub.f32 %v6339_v39, %v139_v34  ;;  %v5872_v41 = vpop.eup %5871 }
 0x105   :  { %v6468_v44 = vadd.f32 1e-05, %v235_v35  ;;  %v269_v45 = vmul.f32 %v5872_v41, %v251_v28  ;;  %v6475_v48 = vpop.eup %5873  ;;  %vm275_vm2 = vweird.f32 %v5872_v41  ;;  %v119_v35 = vsel %vm73_vm0, %v6513_v25, 0.0 }
 0x106   :  { %v175_v46 = vmul.f32 %v6463_v37, %v6463_v37  ;;  %v173_v47 = vmul.f32 %v6466_v38, %v6466_v38  ;;  %v289_v57 = vmul.f32 %v6475_v48, %v6456_v29  ;;  %vm276_vm4 = vmor %vm274_vm3, %vm275_vm2  ;;  %vm295_vm9 = vweird.f32 %v6475_v48 }
 0x107   :  { %5875 = vrsqrt.f32 %v6468_v44  ;;  %v270_v49 = vmul.f32 %v5872_v41, %v269_v45  ;;  %vm284_vm6 = vweird.f32 %v6468_v44  ;;  %vm6551_vm10 = vmor %vm294_vm8, %vm295_vm9 }
 0x108   :  { %v210_v36 = vsel %vm73_vm0, %v175_v46, 0.0  ;;  %v204_v39 = vsel %vm73_vm0, %v173_v47, 0.0  ;;  %v290_v6 = vmul.f32 %v6475_v48, %v289_v57 }
 0x109   :  { %v200_v50 = vpop.xlane.xlu1 %199  ;;  %211 = vadd.xlane.f32.xlu0 %v210_v36  ;;  %205 = vadd.xlane.f32.xlu2 %v204_v39  ;;  %v194_v51 = vpop.xlane.xlu0 %193  ;;  %v271_v52 = vmul.f32 0.5, %v270_v49 }
 0x10a   :  { %v100_v54 = vpop.xlane.xlu2 %99  ;;  %v237_v55 = vmul.f32 %v194_v51, %v6314_v20  ;;  %v239_v15 = vmul.f32 %v200_v50, %v6314_v20  ;;  %v291_v19 = vmul.f32 0.5, %v290_v6  ;;  %v6545_v51 = vld [vmem:[%s10542_s26 + $0x80] sm:$0xff] }
 0x10b   :  { %v140_v58 = vmul.f32 %v6314_v20, %v100_v54  ;;  %v272_v61 = vsub.f32 1.5, %v271_v52 }
 0x10c   :  { %v6488_v0 = vadd.f32 1e-05, %v237_v55  ;;  %v6520_v30 = vadd.f32 1e-05, %v239_v15  ;;  %v292_v33 = vsub.f32 1.5, %v291_v19 }
 0x10d   :  { %v5876_v1 = vpop.eup %5875  ;;  %v6491_v2 = vsub.f32 %v6371_v53, %v140_v58  ;;  %v273_v9 = vmul.f32 %v5872_v41, %v272_v61  ;;  %v122_v61 = vsel %vm73_vm0, %v6545_v51, 0.0 }
 0x10e   :  { %v279_v3 = vmul.f32 %v5876_v1, %v6468_v44  ;;  %5877 = vrsqrt.f32 %v6488_v0  ;;  %vm285_vm5 = vweird.f32 %v5876_v1  ;;  %vm304_vm11 = vweird.f32 %v6488_v0 }
 0x10f   :  { %v174_v8 = vmul.f32 %v6491_v2, %v6491_v2  ;;  %v277_v12 = vsel %vm276_vm4, %v5872_v41, %v273_v9  ;;  %vm286_vm7 = vmor %vm284_vm6, %vm285_vm5  ;;  %vm324_vm2 = vweird.f32 %v6520_v30 }
 0x110   :  { %v280_v10 = vmul.f32 %v5876_v1, %v279_v3  ;;  %v438_v18 = vmul.f32 %v277_v12, %v6320_v27 }
 0x111   :  { %v207_v53 = vsel %vm73_vm0, %v174_v8, 0.0  ;;  %117 = vadd.xlane.f32.xlu2 %v116_v5  ;;  %v106_v11 = vpop.xlane.xlu0 %105  ;;  %v112_v13 = vpop.xlane.xlu1 %111 }
 0x112   :  { %v281_v14 = vmul.f32 0.5, %v280_v10  ;;  %208 = vadd.xlane.f32.xlu1 %v207_v53  ;;  %v197_v16 = vpop.xlane.xlu2 %196  ;;  %v142_v17 = vmul.f32 %v6314_v20, %v106_v11  ;;  %v144_v22 = vmul.f32 %v6314_v20, %v112_v13  ;;  %5534 = vmatmul.msk.f32.vlgmr.msra.gmra.mxu0 %vm73_vm0, %v438_v18 }
 0x113   :  { %v238_v21 = vmul.f32 %v197_v16, %v6314_v20 }
 0x114   :  { %v282_v23 = vsub.f32 1.5, %v281_v14  ;;  %v6507_v24 = vsub.f32 %v6384_v60, %v142_v17  ;;  %v6515_v28 = vpop.eup %5877  ;;  %v6528_v34 = vsub.f32 %v6391_v62, %v144_v22 }
 0x115   :  { %v6518_v27 = vadd.f32 1e-05, %v238_v21  ;;  %v299_v60 = vmul.f32 %v6515_v28, %v6488_v0  ;;  %vm305_vm12 = vweird.f32 %v6515_v28 }
 0x116   :  { %v176_v31 = vmul.f32 %v6507_v24, %v6507_v24  ;;  %v283_v32 = vmul.f32 %v5876_v1, %v282_v23  ;;  %v178_v50 = vmul.f32 %v6528_v34, %v6528_v34  ;;  %vm306_vm13 = vmor %vm304_vm11, %vm305_vm12 }
 0x117   :  { %5879 = vrsqrt.f32 %v6518_v27  ;;  %v300_v41 = vmul.f32 %v6515_v28, %v299_v60  ;;  %vm314_vm14 = vweird.f32 %v6518_v27 }
 0x118   :  { %v213_v44 = vsel %vm73_vm0, %v176_v31, 0.0  ;;  %v287_v45 = vsel %vm286_vm7, %v5876_v1, %v283_v32  ;;  %5881 = vrsqrt.f32 %v6520_v30  ;;  %v219_v3 = vsel %vm73_vm0, %v178_v50, 0.0 }
 0x119   :  { %214 = vadd.xlane.f32.xlu2 %v213_v44  ;;  %v203_v46 = vpop.xlane.xlu0 %202  ;;  %v439_v47 = vmul.f32 %v287_v45, %v6341_v40  ;;  %v301_v36 = vmul.f32 0.5, %v300_v41  ;;  %v293_v40 = vmul.f32 %v6475_v48, %v292_v33 }
 0x11a   :  { %120 = vadd.xlane.f32.xlu1 %v119_v35  ;;  %v109_v62 = vpop.xlane.xlu2 %108  ;;  %v240_v49 = vmul.f32 %v203_v46, %v6314_v20 }
 0x11b   :  { %v143_v39 = vmul.f32 %v6314_v20, %v109_v62  ;;  %5535 = vmatmul.msk.f32.gmra.mxu0 %vm73_vm0, %v439_v47  ;;  %v302_v1 = vsub.f32 1.5, %v301_v36  ;;  %v297_v5 = vsel %vm6551_vm10, %v6475_v48, %v293_v40 }
 0x11c   :  { %v257_v58 = vadd.f32 1e-05, %v240_v49  ;;  %v440_v53 = vmul.f32 %v297_v5, %v6318_v26 }
 0x11d   :  { %v5880_v54 = vpop.eup %5879  ;;  %v6556_v55 = vsub.f32 %v6406_v4, %v143_v39  ;;  %v303_v12 = vmul.f32 %v6515_v28, %v302_v1 }
 0x11e   :  { %v309_v57 = vmul.f32 %v5880_v54, %v6518_v27  ;;  %v5882_v6 = vpop.eup %5881  ;;  %5883 = vrsqrt.f32 %v257_v58  ;;  %vm315_vm15 = vweird.f32 %v5880_v54  ;;  %vm334_vm5 = vweird.f32 %v257_v58 }
 0x11f   :  { %v177_v29 = vmul.f32 %v6556_v55, %v6556_v55  ;;  %v319_v11 = vmul.f32 %v5882_v6, %v6520_v30  ;;  %v307_v26 = vsel %vm306_vm13, %v6515_v28, %v303_v12  ;;  %vm316_vm1 = vmor %vm314_vm14, %vm315_vm15  ;;  %vm325_vm3 = vweird.f32 %v5882_v6 }
 0x120   :  { %v310_v8 = vmul.f32 %v5880_v54, %v309_v57  ;;  %vm326_vm4 = vmor %vm324_vm2, %vm325_vm3 }
 0x121   :  { %v216_v4 = vsel %vm73_vm0, %v177_v29, 0.0  ;;  %123 = vadd.xlane.f32.xlu2 %v122_v61  ;;  %v115_v9 = vpop.xlane.xlu0 %114  ;;  %v320_v15 = vmul.f32 %v5882_v6, %v319_v11 }
 0x122   :  { %220 = vadd.xlane.f32.xlu1 %v219_v3  ;;  %217 = vadd.xlane.f32.xlu0 %v216_v4  ;;  %v145_v10 = vmul.f32 %v6314_v20, %v115_v9  ;;  %v311_v48 = vmul.f32 0.5, %v310_v8 }
 0x123   :  { %5536 = vmatmul.msk.f32.gmra.mxu0 %vm73_vm0, %v440_v53  ;;  %v321_v19 = vmul.f32 0.5, %v320_v15 }
 0x124   :  { %v6575_v13 = vsub.f32 %v6414_v7, %v145_v10  ;;  %v312_v16 = vsub.f32 1.5, %v311_v48  ;;  %v5884_v17 = vpop.eup %5883  ;;  %v441_v7 = vmul.f32 %v307_v26, %v6347_v43 }
 0x125   :  { %v329_v21 = vmul.f32 %v5884_v17, %v257_v58  ;;  %v322_v22 = vsub.f32 1.5, %v321_v19  ;;  %vm335_vm6 = vweird.f32 %v5884_v17 }
 0x126   :  { %v179_v14 = vmul.f32 %v6575_v13, %v6575_v13  ;;  %v313_v0 = vmul.f32 %v5880_v54, %v312_v16  ;;  %vm336_vm7 = vmor %vm334_vm5, %vm335_vm6 }
 0x127   :  { %v330_v23 = vmul.f32 %v5884_v17, %v329_v21  ;;  %v323_v27 = vmul.f32 %v5882_v6, %v322_v22 }
 0x128   :  { %v222_v18 = vsel %vm73_vm0, %v179_v14, 0.0  ;;  %v317_v60 = vsel %vm316_vm1, %v5880_v54, %v313_v0 }
 0x129   :  { %v442_v28 = vmul.f32 %v317_v60, %v6376_v56  ;;  %v331_v31 = vmul.f32 0.5, %v330_v23  ;;  %v327_v32 = vsel %vm326_vm4, %v5882_v6, %v323_v27 }
 0x12a   :  { %223 = vadd.xlane.f32.xlu0 %v222_v18  ;;  %v443_v33 = vmul.f32 %v327_v32, %v6345_v42 }
 0x12b   :  { %5537 = vmatmul.msk.f32.gmra.mxu0 %vm73_vm0, %v441_v7  ;;  %v332_v43 = vsub.f32 1.5, %v331_v31 }
 0x12d   :  { %v333_v35 = vmul.f32 %v5884_v17, %v332_v43 }
 0x12f   :  { %v337_v41 = vsel %vm336_vm7, %v5884_v17, %v333_v35 }
 0x130   :  { %v444_v30 = vmul.f32 %v337_v41, %v6394_v63 }
 0x133   :  { %5538 = vmatmul.msk.f32.gmra.mxu0 %vm73_vm0, %v442_v28 }
 0x13b   :  { %5539 = vmatmul.msk.f32.gmra.mxu0 %vm73_vm0, %v443_v33 }
 0x143   :  { %5540 = vmatmul.msk.f32.gmra.mxu0 %vm73_vm0, %v444_v30 }
 0x17c   :  { %v206_v56 = vpop.xlane.xlu2 %205  ;;  %v212_v44 = vpop.xlane.xlu0 %211 }
 0x17d   :  { %v241_v45 = vmul.f32 %v206_v56, %v6314_v20  ;;  %v243_v46 = vmul.f32 %v212_v44, %v6314_v20 }
 0x17f   :  { %v258_v47 = vadd.f32 1e-05, %v241_v45  ;;  %v6596_v62 = vadd.f32 1e-05, %v243_v46 }
 0x181   :  { %5885 = vrsqrt.f32 %v258_v47  ;;  %vm344_vm9 = vweird.f32 %v258_v47  ;;  %vm364_vm13 = vweird.f32 %v6596_v62 }
 0x182   :  { %5887 = vrsqrt.f32 %v6596_v62 }
 0x184   :  { %v118_v42 = vpop.xlane.xlu2 %117 }
 0x185   :  { %v209_v49 = vpop.xlane.xlu1 %208  ;;  %v146_v36 = vmul.f32 %v6314_v20, %v118_v42 }
 0x186   :  { %v242_v63 = vmul.f32 %v209_v49, %v6314_v20 }
 0x187   :  { %v5886_v39 = vpop.eup %5885  ;;  %v6602_v50 = vsub.f32 %v6486_v59, %v146_v36 }
 0x188   :  { %v339_v40 = vmul.f32 %v5886_v39, %v258_v47  ;;  %v259_v52 = vadd.f32 1e-05, %v242_v63  ;;  %v6606_v57 = vpop.eup %5887  ;;  %vm345_vm8 = vweird.f32 %v5886_v39 }
 0x189   :  { %v180_v54 = vmul.f32 %v6602_v50, %v6602_v50  ;;  %v359_v29 = vmul.f32 %v6606_v57, %v6596_v62  ;;  %vm346_vm10 = vmor %vm344_vm9, %vm345_vm8  ;;  %vm365_vm15 = vweird.f32 %v6606_v57 }
 0x18a   :  { %v340_v58 = vmul.f32 %v5886_v39, %v339_v40  ;;  %5889 = vrsqrt.f32 %v259_v52  ;;  %vm354_vm12 = vweird.f32 %v259_v52  ;;  %vm366_vm1 = vmor %vm364_vm13, %vm365_vm15 }
 0x18b   :  { %v225_v61 = vsel %vm73_vm0, %v180_v54, 0.0  ;;  %v360_v11 = vmul.f32 %v6606_v57, %v359_v29 }
 0x18c   :  { %v341_v1 = vmul.f32 0.5, %v340_v58  ;;  %226 = vadd.xlane.f32.xlu1 %v225_v61  ;;  %v215_v3 = vpop.xlane.xlu2 %214 }
 0x18d   :  { %v121_v5 = vpop.xlane.xlu1 %120  ;;  %v244_v59 = vmul.f32 %v215_v3, %v6314_v20  ;;  %v361_v18 = vmul.f32 0.5, %v360_v11 }
 0x18e   :  { %v342_v6 = vsub.f32 1.5, %v341_v1  ;;  %v147_v8 = vmul.f32 %v6314_v20, %v121_v5 }
 0x18f   :  { %v6613_v4 = vadd.f32 1e-05, %v244_v59  ;;  %v362_v43 = vsub.f32 1.5, %v361_v18 }
 0x190   :  { %v5890_v9 = vpop.eup %5889  ;;  %v6616_v10 = vsub.f32 %v6513_v25, %v147_v8  ;;  %v343_v53 = vmul.f32 %v5886_v39, %v342_v6 }
 0x191   :  { %v349_v48 = vmul.f32 %v5890_v9, %v259_v52  ;;  %5891 = vrsqrt.f32 %v6613_v4  ;;  %vm355_vm11 = vweird.f32 %v5890_v9  ;;  %v363_v45 = vmul.f32 %v6606_v57, %v362_v43 }
 0x192   :  { %v181_v12 = vmul.f32 %v6616_v10, %v6616_v10  ;;  %v347_v14 = vsel %vm346_vm10, %v5886_v39, %v343_v53  ;;  %vm356_vm14 = vmor %vm354_vm12, %vm355_vm11  ;;  %vm374_vm2 = vweird.f32 %v6613_v4 }
 0x193   :  { %v350_v15 = vmul.f32 %v5890_v9, %v349_v48  ;;  %v445_v16 = vmul.f32 %v347_v14, %v6466_v38  ;;  %v367_v36 = vsel %vm366_vm1, %v6606_v57, %v363_v45 }
 0x194   :  { %v228_v26 = vsel %vm73_vm0, %v181_v12, 0.0  ;;  %v124_v17 = vpop.xlane.xlu2 %123  ;;  %v447_v40 = vmul.f32 %v367_v36, %v6463_v37 }
 0x195   :  { %v351_v25 = vmul.f32 0.5, %v350_v15  ;;  %v221_v7 = vpop.xlane.xlu1 %220  ;;  %229 = vadd.xlane.f32.xlu2 %v228_v26  ;;  %v148_v19 = vmul.f32 %v6314_v20, %v124_v17  ;;  %v218_v21 = vpop.xlane.xlu0 %217  ;;  %5541 = vmatmul.msk.f32.gmra.mxu0 %vm73_vm0, %v445_v16 }
 0x196   :  { %v246_v0 = vmul.f32 %v221_v7, %v6314_v20  ;;  %v245_v22 = vmul.f32 %v218_v21, %v6314_v20 }
 0x197   :  { %v5892_v23 = vpop.eup %5891  ;;  %v352_v60 = vsub.f32 1.5, %v351_v25  ;;  %v6629_v38 = vsub.f32 %v6545_v51, %v148_v19 }
 0x198   :  { %v369_v28 = vmul.f32 %v5892_v23, %v6613_v4  ;;  %v263_v31 = vadd.f32 1e-05, %v246_v0  ;;  %v262_v27 = vadd.f32 1e-05, %v245_v22  ;;  %vm375_vm3 = vweird.f32 %v5892_v23 }
 0x199   :  { %v182_v32 = vmul.f32 %v6629_v38, %v6629_v38  ;;  %v353_v33 = vmul.f32 %v5890_v9, %v352_v60  ;;  %vm376_vm4 = vmor %vm374_vm2, %vm375_vm3 }
 0x19a   :  { %v370_v35 = vmul.f32 %v5892_v23, %v369_v28  ;;  %5893 = vrsqrt.f32 %v262_v27  ;;  %vm384_vm5 = vweird.f32 %v262_v27  ;;  %vm394_vm8 = vweird.f32 %v263_v31 }
 0x19b   :  { %v231_v41 = vsel %vm73_vm0, %v182_v32, 0.0  ;;  %v357_v30 = vsel %vm356_vm14, %v5890_v9, %v353_v33  ;;  %5895 = vrsqrt.f32 %v263_v31 }
 0x19c   :  { %232 = vadd.xlane.f32.xlu0 %v231_v41  ;;  %v446_v51 = vmul.f32 %v357_v30, %v6491_v2  ;;  %v371_v56 = vmul.f32 0.5, %v370_v35 }
 0x19d   :  { %v224_v44 = vpop.xlane.xlu0 %223 }
 0x19e   :  { %v247_v46 = vmul.f32 %v224_v44, %v6314_v20  ;;  %5542 = vmatmul.msk.f32.gmra.mxu0 %vm73_vm0, %v446_v51  ;;  %v372_v49 = vsub.f32 1.5, %v371_v56 }
 0x1a0   :  { %v264_v47 = vadd.f32 1e-05, %v247_v46  ;;  %v5894_v42 = vpop.eup %5893  ;;  %v373_v54 = vmul.f32 %v5892_v23, %v372_v49 }
 0x1a1   :  { %v5896_v63 = vpop.eup %5895  ;;  %v379_v39 = vmul.f32 %v5894_v42, %v262_v27  ;;  %vm385_vm6 = vweird.f32 %v5894_v42 }
 0x1a2   :  { %5897 = vrsqrt.f32 %v264_v47  ;;  %v389_v52 = vmul.f32 %v5896_v63, %v263_v31  ;;  %v377_v1 = vsel %vm376_vm4, %v5892_v23, %v373_v54  ;;  %vm386_vm7 = vmor %vm384_vm5, %vm385_vm6  ;;  %vm395_vm9 = vweird.f32 %v5896_v63 }
 0x1a3   :  { %v380_v2 = vmul.f32 %v5894_v42, %v379_v39  ;;  %v448_v57 = vmul.f32 %v377_v1, %v6507_v24  ;;  %vm396_vm10 = vmor %vm394_vm8, %vm395_vm9  ;;  %vm404_vm11 = vweird.f32 %v264_v47  ;;  %v599_v1 = vld [vmem:[%s10519_s2 + $0x50] sm:$0xff] }
 0x1a4   :  { %v390_v62 = vmul.f32 %v5896_v63, %v389_v52 }
 0x1a5   :  { %v381_v58 = vmul.f32 0.5, %v380_v2 }
 0x1a6   :  { %5543 = vmatmul.msk.f32.gmra.mxu0 %vm73_vm0, %v447_v40  ;;  %v391_v29 = vmul.f32 0.5, %v390_v62 }
 0x1a7   :  { %v382_v61 = vsub.f32 1.5, %v381_v58 }
 0x1a8   :  { %v5898_v3 = vpop.eup %5897  ;;  %v392_v37 = vsub.f32 1.5, %v391_v29 }
 0x1a9   :  { %v399_v5 = vmul.f32 %v5898_v3, %v264_v47  ;;  %v383_v59 = vmul.f32 %v5894_v42, %v382_v61  ;;  %vm405_vm12 = vweird.f32 %v5898_v3 }
 0x1aa   :  { %v393_v53 = vmul.f32 %v5896_v63, %v392_v37  ;;  %vm406_vm13 = vmor %vm404_vm11, %vm405_vm12 }
 0x1ab   :  { %v400_v6 = vmul.f32 %v5898_v3, %v399_v5  ;;  %v387_v8 = vsel %vm386_vm7, %v5894_v42, %v383_v59  ;;  %v593_v59 = vld [vmem:[%s10519_s2 + $0x20] sm:$0xff] }
 0x1ac   :  { %v449_v4 = vmul.f32 %v387_v8, %v6556_v55  ;;  %v397_v24 = vsel %vm396_vm10, %v5896_v63, %v393_v53  ;;  %v6655_v55 = vpop.f32.mrf.mxu0  ;;  %v602_v53 = vld [vmem:[%s10519_s2 + $0x68] sm:$0xff] }
 0x1ad   :  { %v401_v9 = vmul.f32 0.5, %v400_v6  ;;  %v450_v48 = vmul.f32 %v397_v24, %v6528_v34 }
 0x1ae   :  { %5544 = vmatmul.msk.f32.gmra.mxu0 %vm73_vm0, %v448_v57 }
 0x1af   :  { %v402_v11 = vsub.f32 1.5, %v401_v9  ;;  %v601_v9 = vld [vmem:[%s10519_s2 + $0x60] sm:$0xff] }
 0x1b1   :  { %v403_v12 = vmul.f32 %v5898_v3, %v402_v11  ;;  %v589_v11 = vld [vmem:[%s10519_s2] sm:$0xff] }
 0x1b3   :  { %v407_v14 = vsel %vm406_vm13, %v5898_v3, %v403_v12 }
 0x1b4   :  { %v451_v15 = vmul.f32 %v407_v14, %v6575_v13  ;;  %v6657_v16 = vpop.f32.mrf.mxu0  ;;  %v6722_v14 = vmul.f32 %v589_v11, %v6655_v55  ;;  %v632_v11 = vld [vmem:[%s10520_s4 + $0x48] sm:$0xff] }
 0x1b6   :  { %5545 = vmatmul.msk.f32.gmra.mxu0 %vm73_vm0, %v449_v4 }
 0x1bc   :  { %v6659_v26 = vpop.f32.mrf.mxu0 }
 0x1be   :  { %5546 = vmatmul.msk.f32.gmra.mxu0 %vm73_vm0, %v450_v48 }
 0x1c4   :  { %v6661_v17 = vpop.f32.mrf.mxu0 }
 0x1c6   :  { %5547 = vmatmul.msk.f32.gmra.mxu0 %vm73_vm0, %v451_v15 }
 0x1cc   :  { %v6663_v18 = vpop.f32.mrf.mxu0 }
 0x1cd   :  { %v6703_v8 = vmul.f32 %v593_v59, %v6663_v18  ;;  %v598_v18 = vld [vmem:[%s10519_s2 + $0x48] sm:$0xff] }
 0x1d4   :  { %v6665_v25 = vpop.f32.mrf.mxu0 }
 0x1dc   :  { %v6669_v22 = vpop.f32.mrf.mxu0 }
 0x1ff   :  { %v227_v34 = vpop.xlane.xlu1 %226 }
 0x200   :  { %v248_v7 = vmul.f32 %v227_v34, %v6314_v20  ;;  %v597_v34 = vld [vmem:[%s10519_s2 + $0x40] sm:$0xff] }
 0x202   :  { %v265_v19 = vadd.f32 1e-05, %v248_v7 }
 0x204   :  { %5899 = vrsqrt.f32 %v265_v19  ;;  %vm414_vm15 = vweird.f32 %v265_v19 }
 0x208   :  { %v230_v13 = vpop.xlane.xlu2 %229 }
 0x209   :  { %v249_v21 = vmul.f32 %v230_v13, %v6314_v20  ;;  %v603_v13 = vld [vmem:[%s10519_s2 + $0x70] sm:$0xff] }
 0x20a   :  { %v5900_v0 = vpop.eup %5899 }
 0x20b   :  { %v409_v23 = vmul.f32 %v5900_v0, %v265_v19  ;;  %v266_v60 = vadd.f32 1e-05, %v249_v21  ;;  %vm415_vm14 = vweird.f32 %v5900_v0  ;;  %v604_v21 = vld [vmem:[%s10519_s2 + $0x78] sm:$0xff] }
 0x20c   :  { %vm416_vm1 = vmor %vm414_vm15, %vm415_vm14 }
 0x20d   :  { %v410_v28 = vmul.f32 %v5900_v0, %v409_v23  ;;  %5901 = vrsqrt.f32 %v266_v60  ;;  %vm424_vm3 = vweird.f32 %v266_v60 }
 0x20f   :  { %v411_v31 = vmul.f32 0.5, %v410_v28  ;;  %v233_v27 = vpop.xlane.xlu0 %232 }
 0x210   :  { %v250_v43 = vmul.f32 %v233_v27, %v6314_v20  ;;  %v592_v27 = vld [vmem:[%s10519_s2 + $0x18] sm:$0xff] }
 0x211   :  { %v412_v32 = vsub.f32 1.5, %v411_v31  ;;  %v596_v31 = vld [vmem:[%s10519_s2 + $0x38] sm:$0xff] }
 0x212   :  { %v267_v33 = vadd.f32 1e-05, %v250_v43  ;;  %v6672_v35 = vpop.f32.mrf.mxu0  ;;  %v595_v43 = vld [vmem:[%s10519_s2 + $0x30] sm:$0xff] }
 0x213   :  { %v5902_v41 = vpop.eup %5901  ;;  %v413_v30 = vmul.f32 %v5900_v0, %v412_v32  ;;  %v605_v32 = vld [vmem:[%s10519_s2 + $0x80] sm:$0xff] }
 0x214   :  { %v419_v51 = vmul.f32 %v5902_v41, %v266_v60  ;;  %5903 = vrsqrt.f32 %v267_v33  ;;  %vm425_vm2 = vweird.f32 %v5902_v41  ;;  %vm434_vm5 = vweird.f32 %v267_v33 }
 0x215   :  { %v417_v56 = vsel %vm416_vm1, %v5900_v0, %v413_v30  ;;  %vm426_vm4 = vmor %vm424_vm3, %vm425_vm2  ;;  %v6771_v30 = vmul.f32 %v592_v27, %v6661_v17  ;;  %v590_v17 = vld [vmem:[%s10519_s2 + $0x8] sm:$0xff]  ;;  %v631_v27 = vld [vmem:[%s10520_s4 + $0x40] sm:$0xff] }
 0x216   :  { %v420_v44 = vmul.f32 %v5902_v41, %v419_v51  ;;  %v452_v45 = vmul.f32 %v417_v56, %v6602_v50  ;;  %v6774_v51 = vmul.f32 %v595_v43, %v6669_v22  ;;  %v642_v43 = vld [vmem:[%s10520_s4 + $0x98] sm:$0xff] }
 0x218   :  { %v421_v46 = vmul.f32 0.5, %v420_v44  ;;  %5548 = vmatmul.msk.f32.gmra.mxu0 %vm73_vm0, %v452_v45 }
 0x21a   :  { %v5904_v47 = vpop.eup %5903  ;;  %v422_v20 = vsub.f32 1.5, %v421_v46  ;;  %v6794_v46 = vmul.f32 %v590_v17, %v6657_v16  ;;  %v648_v17 = vld [vmem:[%s10520_s4 + $0xc8] sm:$0xff] }
 0x21b   :  { %v429_v42 = vmul.f32 %v5904_v47, %v267_v33  ;;  %v562_v49 = vpop.f32.mrf.mxu0  ;;  %vm435_vm6 = vweird.f32 %v5904_v47  ;;  %v6768_v33 = vmul.f32 %v596_v31, %v6672_v35  ;;  %v591_v35 = vld [vmem:[%s10519_s2 + $0x10] sm:$0xff]  ;;  %v640_v31 = vld [vmem:[%s10520_s4 + $0x88] sm:$0xff] }
 0x21c   :  { %v423_v36 = vmul.f32 %v5902_v41, %v422_v20  ;;  %vm436_vm7 = vmor %vm434_vm5, %vm435_vm6  ;;  %v6737_v55 = vmul.f32 %v597_v34, %v562_v49  ;;  %v6791_v22 = vmul.f32 %v591_v35, %v6659_v26  ;;  %v637_v35 = vld [vmem:[%s10520_s4 + $0x70] sm:$0xff] }
 0x21d   :  { %v430_v63 = vmul.f32 %v5904_v47, %v429_v42  ;;  %v5729_v44 = vpack.i.bf16 %v6774_v51, %v6768_v33 }
 0x21e   :  { %v427_v39 = vsel %vm426_vm4, %v5902_v41, %v423_v36 }
 0x21f   :  { %v431_v2 = vmul.f32 0.5, %v430_v63  ;;  %v453_v40 = vmul.f32 %v427_v39, %v6616_v10  ;;  %v600_v10 = vld [vmem:[%s10519_s2 + $0x58] sm:$0xff]  ;;  %v624_v63 = vld [vmem:[%s10520_s4 + $0x8] sm:$0xff] }
 0x220   :  { %v626_v39 = vld [vmem:[%s10520_s4 + $0x18] sm:$0xff] }
 0x221   :  { %v432_v52 = vsub.f32 1.5, %v431_v2  ;;  %5549 = vmatmul.msk.f32.gmra.mxu0 %vm73_vm0, %v453_v40 }
 0x223   :  { %v565_v50 = vpop.f32.mrf.mxu0  ;;  %v433_v54 = vmul.f32 %v5904_v47, %v432_v52 }
 0x225   :  { %v437_v58 = vsel %vm436_vm7, %v5904_v47, %v433_v54  ;;  %v5744_v47 = vpack.i.bf16 %v6794_v46, %v6791_v22  ;;  %vm1644_vm7 = vcmask 261120  }
 0x226   :  { %v454_v62 = vmul.f32 %v437_v58, %v6629_v38  ;;  %v594_v38 = vld [vmem:[%s10519_s2 + $0x28] sm:$0xff] }
 0x227   :  { %v6700_v37 = vmul.f32 %v594_v38, %v6665_v25  ;;  %v6735_v25 = vmul.f32 %v598_v18, %v565_v50  ;;  %v628_v58 = vld [vmem:[%s10520_s4 + $0x28] sm:$0xff]  ;;  %v630_v38 = vld [vmem:[%s10520_s4 + $0x38] sm:$0xff]  ;;  %v623_v18 = vld [vmem:[%s10520_s4] sm:$0xff] }
 0x229   :  { %5550 = vmatmul.msk.f32.gmra.mxu0 %vm73_vm0, %v454_v62  ;;  %v5734_v4 = vpack.i.bf16 %v6703_v8, %v6700_v37  ;;  %v5724_v7 = vpack.i.bf16 %v6737_v55, %v6735_v25  ;;  %vm725_vm0 = vcmask 64512  }
 0x22b   :  { %v568_v61 = vpop.f32.mrf.mxu0 }
 0x22c   :  { %v6686_v57 = vmul.f32 %v599_v1, %v568_v61 }
 0x233   :  { %v571_v3 = vpop.f32.mrf.mxu0 }
 0x234   :  { %v6688_v29 = vmul.f32 %v600_v10, %v571_v3 }
 0x236   :  { %v5719_v5 = vpack.i.bf16 %v6686_v57, %v6688_v29 }
 0x238   :  { %5720 = vrot.lane.b32.xlu0 %v5719_v5, %s6184_s27 }
 0x23b   :  { %v574_v6 = vpop.f32.mrf.mxu0 }
 0x23c   :  { %v6717_v48 = vmul.f32 %v601_v9, %v574_v6 }
 0x240   :  { %5735 = vrot.lane.b32.xlu0 %v5734_v4, %s6184_s27 }
 0x243   :  { %v577_v24 = vpop.f32.mrf.mxu0 }
 0x244   :  { %v6719_v12 = vmul.f32 %v602_v53, %v577_v24 }
 0x246   :  { %v5714_v15 = vpack.i.bf16 %v6717_v48, %v6719_v12 }
 0x248   :  { %674 = vrot.lane.b32.xlu0 %v6722_v14, %s6184_s27  ;;  %5715 = vrot.lane.b32.xlu2 %v5714_v15, %s6184_s27 }
 0x250   :  { %5725 = vrot.lane.b32.xlu2 %v5724_v7, %s6184_s27  ;;  %v634_v7 = vld [vmem:[%s10520_s4 + $0x58] sm:$0xff] }
 0x295   :  { %v580_v19 = vpop.f32.mrf.mxu0 }
 0x296   :  { %v6748_v23 = vmul.f32 %v603_v13, %v580_v19  ;;  %v625_v19 = vld [vmem:[%s10520_s4 + $0x10] sm:$0xff]  ;;  %v636_v13 = vld [vmem:[%s10520_s4 + $0x68] sm:$0xff] }
 0x29e   :  { %v583_v0 = vpop.f32.mrf.mxu0 }
 0x29f   :  { %v6750_v60 = vmul.f32 %v604_v21, %v583_v0  ;;  %v627_v21 = vld [vmem:[%s10520_s4 + $0x20] sm:$0xff]  ;;  %v638_v0 = vld [vmem:[%s10520_s4 + $0x78] sm:$0xff] }
 0x2a1   :  { %v5709_v28 = vpack.i.bf16 %v6748_v23, %v6750_v60 }
 0x2a2   :  { %v5716_v20 = vpop.permute.xlu2 %5715 }
 0x2a3   :  { %5710 = vrot.lane.b32.xlu1 %v5709_v28, %s6184_s27  ;;  %v5717_v40 = vunpack.i.l.bf16 %v5716_v20  ;;  %v5718_v50 = vunpack.i.h.bf16 %v5716_v20  ;;  %v629_v28 = vld [vmem:[%s10520_s4 + $0x30] sm:$0xff]  ;;  %v650_v20 = vld [vmem:[%s10520_s4 + $0xd8] sm:$0xff] }
 0x2a6   :  { %v586_v41 = vpop.f32.mrf.mxu0 }
 0x2a7   :  { %v6776_v56 = vmul.f32 %v605_v32, %v586_v41  ;;  %v633_v32 = vld [vmem:[%s10520_s4 + $0x50] sm:$0xff]  ;;  %v644_v41 = vld [vmem:[%s10520_s4 + $0xa8] sm:$0xff] }
 0x2a9   :  { %v5739_v45 = vpack.i.bf16 %v6776_v56, %v6771_v30 }
 0x2aa   :  { %v5726_v42 = vpop.permute.xlu2 %5725  ;;  %v5721_v52 = vpop.permute.xlu0 %5720 }
 0x2ab   :  { %5730 = vrot.lane.b32.xlu1 %v5729_v44, %s6184_s27  ;;  %5740 = vrot.lane.b32.xlu2 %v5739_v45, %s6184_s27  ;;  %v5722_v54 = vunpack.i.l.bf16 %v5721_v52  ;;  %v5723_v62 = vunpack.i.h.bf16 %v5721_v52  ;;  %v5727_v61 = vunpack.i.l.bf16 %v5726_v42  ;;  %v5728_v10 = vunpack.i.h.bf16 %v5726_v42  ;;  %v635_v44 = vld [vmem:[%s10520_s4 + $0x60] sm:$0xff]  ;;  %v646_v45 = vld [vmem:[%s10520_s4 + $0xb8] sm:$0xff] }
 0x2ac   :  { %v641_v42 = vld [vmem:[%s10520_s4 + $0x90] sm:$0xff] }
 0x2b2   :  { %v5736_v5 = vpop.permute.xlu0 %5735 }
 0x2b3   :  { %5745 = vrot.lane.b32.xlu1 %v5744_v47, %s6184_s27  ;;  %v5737_v6 = vunpack.i.l.bf16 %v5736_v5  ;;  %v5738_v4 = vunpack.i.h.bf16 %v5736_v5  ;;  %v639_v47 = vld [vmem:[%s10520_s4 + $0x80] sm:$0xff] }
 0x2ba   :  { %v675_v34 = vpop.permute.xlu0 %674 }
 0x305   :  { %v5741_v49 = vpop.permute.xlu2 %5740 }
 0x306   :  { %v5743_v36 = vunpack.i.h.bf16 %v5741_v49  ;;  %v5742_v53 = vunpack.i.l.bf16 %v5741_v49  ;;  %v652_v49 = vld [vmem:[%s10520_s4 + $0xe8] sm:$0xff] }
 0x308   :  { %860 = vmatpush.msra.mxu2 %v5743_v36  ;;  %v643_v36 = vld [vmem:[%s10520_s4 + $0xa0] sm:$0xff] }
 0x309   :  { %5551 = vmatmul.msk.f32.vlgmr.msra.gmra.mxu2 %vm725_vm0, %v624_v63  ;;  %v654_v63 = vld [vmem:[%s10520_s4 + $0xf8] sm:$0xff] }
 0x311   :  { %5552 = vmatmul.msk.f32.gmra.mxu2 %vm725_vm0, %v626_v39  ;;  %v647_v39 = vld [vmem:[%s10520_s4 + $0xc0] sm:$0xff] }
 0x315   :  { %v5711_v26 = vpop.permute.xlu1 %5710 }
 0x316   :  { %v5712_v16 = vunpack.i.l.bf16 %v5711_v26  ;;  %v5713_v2 = vunpack.i.h.bf16 %v5711_v26  ;;  %v645_v26 = vld [vmem:[%s10520_s4 + $0xb0] sm:$0xff] }
 0x318   :  { %777 = vmatpush.msra.mxu1 %v5712_v16  ;;  %v656_v16 = vld [vmem:[%s10520_s4 + $0x108] sm:$0xff] }
 0x319   :  { %5553 = vmatmul.msk.f32.gmra.mxu2 %vm725_vm0, %v628_v58 }
 0x31a   :  { %778 = vmatpush.msra.mxu1 %v5713_v2  ;;  %v649_v2 = vld [vmem:[%s10520_s4 + $0xd0] sm:$0xff] }
 0x31c   :  { %779 = vmatpush.msra.mxu1 %v5717_v40  ;;  %v651_v40 = vld [vmem:[%s10520_s4 + $0xe0] sm:$0xff] }
 0x31d   :  { %v5731_v1 = vpop.permute.xlu1 %5730 }
 0x31e   :  { %780 = vmatpush.msra.mxu1 %v5718_v50  ;;  %v5732_v3 = vunpack.i.l.bf16 %v5731_v1  ;;  %v5733_v59 = vunpack.i.h.bf16 %v5731_v1  ;;  %v653_v50 = vld [vmem:[%s10520_s4 + $0xf0] sm:$0xff]  ;;  %v930_v1 = vld [vmem:[%s10521_s3] sm:$0xff] }
 0x320   :  { %781 = vmatpush.msra.mxu1 %v5722_v54 }
 0x321   :  { %5554 = vmatmul.msk.f32.gmra.mxu2 %vm725_vm0, %v630_v38 }
 0x322   :  { %782 = vmatpush.msra.mxu1 %v5723_v62  ;;  %v655_v62 = vld [vmem:[%s10520_s4 + $0x100] sm:$0xff]  ;;  %s6189_s4 = smov 125  }
 0x324   :  { %783 = vmatpush.msra.mxu1 %v5727_v61 }
 0x325   :  { %v5746_v9 = vpop.permute.xlu1 %5745 }
 0x326   :  { %784 = vmatpush.msra.mxu1 %v5728_v10  ;;  %v5747_v24 = vunpack.i.l.bf16 %v5746_v9  ;;  %v5748_v15 = vunpack.i.h.bf16 %v5746_v9  ;;  %v931_v9 = vld [vmem:[%s10521_s3 + $0x8] sm:$0xff] }
 0x328   :  { %785 = vmatpush.msra.mxu1 %v5732_v3 }
 0x329   :  { %5555 = vmatmul.msk.f32.gmra.mxu2 %vm725_vm0, %v632_v11 }
 0x32a   :  { %786 = vmatpush.msra.mxu1 %v5733_v59 }
 0x32c   :  { %787 = vmatpush.msra.mxu1 %v5737_v6 }
 0x32e   :  { %788 = vmatpush.msra.mxu1 %v5738_v4 }
 0x330   :  { %789 = vmatpush.msra.mxu1 %v5742_v53 }
 0x331   :  { %5556 = vmatmul.msk.f32.gmra.mxu2 %vm725_vm0, %v634_v7 }
 0x332   :  { %790 = vmatpush.msra.mxu1 %v5747_v24 }
 0x334   :  { %791 = vmatpush.msra.mxu1 %v5748_v15 }
 0x336   :  { %792 = vmatpush.msra.mxu1 %v675_v34 }
 0x337   :  { %793 = vmatmul.f32.vlgmr.msra.gmra.mxu1 %v623_v18 }
 0x339   :  { %5557 = vmatmul.msk.f32.gmra.mxu2 %vm725_vm0, %v636_v13  ;;  %v932_v13 = vld [vmem:[%s10521_s3 + $0x10] sm:$0xff] }
 0x33f   :  { %796 = vmatmul.f32.gmra.mxu1 %v625_v19 }
 0x341   :  { %5558 = vmatmul.msk.f32.gmra.mxu2 %vm725_vm0, %v638_v0 }
 0x347   :  { %799 = vmatmul.f32.gmra.mxu1 %v627_v21 }
 0x349   :  { %5559 = vmatmul.msk.f32.gmra.mxu2 %vm725_vm0, %v640_v31 }
 0x34f   :  { %802 = vmatmul.f32.gmra.mxu1 %v629_v28 }
 0x351   :  { %5560 = vmatmul.msk.f32.gmra.mxu2 %vm725_vm0, %v642_v43 }
 0x357   :  { %805 = vmatmul.f32.gmra.mxu1 %v631_v27 }
 0x359   :  { %5561 = vmatmul.msk.f32.gmra.mxu2 %vm725_vm0, %v644_v41 }
 0x35f   :  { %808 = vmatmul.f32.gmra.mxu1 %v633_v32 }
 0x361   :  { %5562 = vmatmul.msk.f32.gmra.mxu2 %vm725_vm0, %v646_v45 }
 0x367   :  { %811 = vmatmul.f32.gmra.mxu1 %v635_v44 }
 0x369   :  { %5563 = vmatmul.msk.f32.gmra.mxu2 %vm725_vm0, %v648_v17 }
 0x36f   :  { %814 = vmatmul.f32.gmra.mxu1 %v637_v35 }
 0x371   :  { %5564 = vmatmul.msk.f32.gmra.mxu2 %vm725_vm0, %v650_v20 }
 0x377   :  { %817 = vmatmul.f32.gmra.mxu1 %v639_v47 }
 0x379   :  { %5565 = vmatmul.msk.f32.gmra.mxu2 %vm725_vm0, %v652_v49 }
 0x37f   :  { %820 = vmatmul.f32.gmra.mxu1 %v641_v42  ;;  %v933_v42 = vld [vmem:[%s10521_s3 + $0x18] sm:$0xff] }
 0x381   :  { %5566 = vmatmul.msk.f32.gmra.mxu2 %vm725_vm0, %v654_v63 }
 0x387   :  { %823 = vmatmul.f32.gmra.mxu1 %v643_v36 }
 0x389   :  { %5567 = vmatmul.msk.f32.gmra.mxu2 %vm725_vm0, %v656_v16 }
 0x38c   :  { %v862_v52 = vpop.f32.mrf.mxu2 }
 0x38f   :  { %826 = vmatmul.f32.gmra.mxu1 %v645_v26 }
 0x394   :  { %v865_v54 = vpop.f32.mrf.mxu2 }
 0x397   :  { %829 = vmatmul.f32.gmra.mxu1 %v647_v39 }
 0x39c   :  { %v868_v5 = vpop.f32.mrf.mxu2 }
 0x39f   :  { %832 = vmatmul.f32.gmra.mxu1 %v649_v2 }
 0x3a4   :  { %v871_v34 = vpop.f32.mrf.mxu2 }
 0x3a7   :  { %835 = vmatmul.f32.gmra.mxu1 %v651_v40 }
 0x3ac   :  { %v874_v47 = vpop.f32.mrf.mxu2 }
 0x3af   :  { %838 = vmatmul.f32.gmra.mxu1 %v653_v50 }
 0x3b4   :  { %v794_v58 = vpop.f32.mrf.mxu1 }
 0x3b5   :  { %v863_v61 = vadd.f32 %v862_v52, %v794_v58 }
 0x3b7   :  { %v913_v10 = vadd.f32 %v863_v61, %v6722_v14  ;;  %841 = vmatmul.f32.gmra.mxu1 %v655_v62 }
 0x3b9   :  { %v6922_v3 = vadd.f32 %v930_v1, %v913_v10 }
 0x3bb   :  { %v6925_v38 = vmul.f32 0.70710677, %v6922_v3 }
 0x3bc   :  { %v797_v59 = vpop.f32.mrf.mxu1 }
 0x3bd   :  { %v998_v6 = vand.u32 2147483647, %v6925_v38  ;;  %v866_v4 = vadd.f32 %v865_v54, %v797_v59  ;;  %vm1559_vm5 = vcmp.lt.f32.partialorder %v6925_v38, 0.0 }
 0x3bf   :  { %v1015_v53 = vmul.f32 0.3275911, %v998_v6  ;;  %v914_v11 = vadd.f32 %v866_v4, %v6794_v46  ;;  %v1457_v2 = vsub.f32 0.0, %v998_v6 }
 0x3c1   :  { %v1032_v24 = vadd.f32 1.0, %v1015_v53  ;;  %v6932_v14 = vadd.f32 %v931_v9, %v914_v11  ;;  %v1474_v1 = vmul.f32 %v1457_v2, %v998_v6 }
 0x3c3   :  { %5905 = vrcp.f32 %v1032_v24  ;;  %v6935_v15 = vmul.f32 0.70710677, %v6932_v14  ;;  %v1060_v44 = vand.u32 2147483648, %v1032_v24  ;;  %vm1054_vm9 = vweird.f32 %v1032_v24 }
 0x3c4   :  { %v800_v18 = vpop.f32.mrf.mxu1 }
 0x3c5   :  { %v869_v7 = vadd.f32 %v868_v5, %v800_v18  ;;  %v6938_v19 = vand.u32 2147483647, %v6935_v15  ;;  %v1061_v63 = vor.u32 1.1754944e-38, %v1060_v44  ;;  %v934_v18 = vld [vmem:[%s10521_s3 + $0x20] sm:$0xff] }
 0x3c7   :  { %v915_v21 = vadd.f32 %v869_v7, %v6791_v22  ;;  %v1016_v46 = vmul.f32 0.3275911, %v6938_v19  ;;  %v1058_v22 = vand.u32 2147483647, %v1032_v24  ;;  %v1458_v11 = vsub.f32 0.0, %v6938_v19 }
 0x3c9   :  { %v5906_v0 = vpop.eup %5905  ;;  %v6945_v28 = vadd.f32 %v932_v13, %v915_v21  ;;  %v1033_v27 = vadd.f32 1.0, %v1016_v46  ;;  %vm1059_vm11 = vcmp.eq.f32.partialorder %v1058_v22, 8.507059e+37  ;;  %v1491_v46 = vmul.f32 1.442695, %v1474_v1 }
 0x3ca   :  { %v1050_v31 = vmul.f32 %v5906_v0, %v1032_v24  ;;  %vm1055_vm8 = vweird.f32 %v5906_v0 }
 0x3cb   :  { %v6948_v43 = vmul.f32 0.70710677, %v6945_v28  ;;  %5907 = vrcp.f32 %v1033_v27  ;;  %vm1056_vm10 = vmor %vm1054_vm9, %vm1055_vm8  ;;  %v1075_v10 = vand.u32 2147483648, %v1033_v27  ;;  %v1073_v4 = vand.u32 2147483647, %v1033_v27 }
 0x3cc   :  { %v1051_v32 = vsub.f32 1.0, %v1050_v31  ;;  %v803_v41 = vpop.f32.mrf.mxu1  ;;  %vm1069_vm13 = vweird.f32 %v1033_v27 }
 0x3cd   :  { %v6951_v45 = vand.u32 2147483647, %v6948_v43  ;;  %v872_v17 = vadd.f32 %v871_v34, %v803_v41  ;;  %v877_v34 = vpop.f32.mrf.mxu2  ;;  %vm1074_vm15 = vcmp.eq.f32.partialorder %v1073_v4, 8.507059e+37 }
 0x3ce   :  { %v1052_v35 = vmul.f32 %v5906_v0, %v1051_v32 }
 0x3cf   :  { %v1017_v20 = vmul.f32 0.3275911, %v6951_v45  ;;  %v916_v36 = vadd.f32 %v872_v17, %v6771_v30 }
 0x3d0   :  { %v1053_v49 = vadd.f32 %v5906_v0, %v1052_v35 }
 0x3d1   :  { %v6958_v26 = vadd.f32 1.0, %v1017_v20  ;;  %v5908_v16 = vpop.eup %5907  ;;  %v6960_v40 = vadd.f32 %v933_v42, %v916_v36 }
 0x3d2   :  { %v1057_v39 = vsel %vm1056_vm10, %v5906_v0, %v1053_v49  ;;  %v1065_v50 = vmul.f32 %v5908_v16, %v1033_v27  ;;  %vm1070_vm12 = vweird.f32 %v5908_v16  ;;  %v1076_v0 = vor.u32 1.1754944e-38, %v1075_v10 }
 0x3d3   :  { %v6962_v52 = vsel %vm1059_vm11, %v1061_v63, %v1057_v39  ;;  %5909 = vrcp.f32 %v6958_v26  ;;  %v6967_v30 = vmul.f32 0.70710677, %v6960_v40  ;;  %vm1071_vm14 = vmor %vm1069_vm13, %vm1070_vm12  ;;  %v1475_v27 = vmul.f32 %v1458_v11, %v6938_v19 }
 0x3d4   :  { %v1304_v54 = vmul.f32 1.0614054, %v6962_v52  ;;  %v806_v58 = vpop.f32.mrf.mxu1  ;;  %v1066_v62 = vsub.f32 1.0, %v1065_v50  ;;  %v1090_v42 = vand.u32 2147483648, %v6958_v26  ;;  %v1088_v63 = vand.u32 2147483647, %v6958_v26 }
 0x3d5   :  { %v875_v5 = vadd.f32 %v874_v47, %v806_v58  ;;  %v6970_v9 = vand.u32 2147483647, %v6967_v30  ;;  %v6989_v47 = vmul.f32 0.5, %v6922_v3  ;;  %v1493_v2 = vmul.f32 1.442695, %v1475_v27 }
 0x3d6   :  { %v1321_v61 = vadd.f32 -1.4531521, %v1304_v54  ;;  %v1067_v59 = vmul.f32 %v5908_v16, %v1066_v62  ;;  %vm1084_vm2 = vweird.f32 %v6958_v26  ;;  %v1091_v58 = vor.u32 1.1754944e-38, %v1090_v42 }
 0x3d7   :  { %v917_v24 = vadd.f32 %v875_v5, %v6703_v8  ;;  %v1018_v13 = vmul.f32 0.3275911, %v6970_v9  ;;  %v1459_v62 = vsub.f32 0.0, %v6951_v45  ;;  %v7006_v10 = vmul.f32 0.5, %v6932_v14 }
 0x3d8   :  { %v1338_v53 = vmul.f32 %v1321_v61, %v6962_v52  ;;  %v1068_v7 = vadd.f32 %v5908_v16, %v1067_v59  ;;  %vm1089_vm4 = vcmp.eq.f32.partialorder %v1088_v63, 8.507059e+37  ;;  %v880_v59 = vpop.f32.mrf.mxu2  ;;  %vm1560_vm10 = vcmp.lt.f32.partialorder %v6935_v15, 0.0 }
 0x3d9   :  { %v5910_v6 = vpop.eup %5909  ;;  %v6980_v41 = vadd.f32 1.0, %v1018_v13  ;;  %v6982_v8 = vadd.f32 %v934_v18, %v917_v24 }
 0x3da   :  { %v1355_v21 = vadd.f32 1.4214138, %v1338_v53  ;;  %v1080_v31 = vmul.f32 %v5910_v6, %v6958_v26  ;;  %v1072_v32 = vsel %vm1071_vm14, %v5908_v16, %v1068_v7  ;;  %vm1085_vm1 = vweird.f32 %v5910_v6 }
 0x3db   :  { %v6985_v35 = vsel %vm1074_vm15, %v1076_v0, %v1072_v32  ;;  %5911 = vrcp.f32 %v6980_v41  ;;  %v6996_v19 = vmul.f32 0.70710677, %v6982_v8  ;;  %vm1086_vm3 = vmor %vm1084_vm2, %vm1085_vm1  ;;  %v1460_v0 = vsub.f32 0.0, %v6970_v9 }
 0x3dc   :  { %v1372_v44 = vmul.f32 %v1355_v21, %v6962_v52  ;;  %v1081_v22 = vsub.f32 1.0, %v1080_v31  ;;  %v809_v17 = vpop.f32.mrf.mxu1  ;;  %v1305_v20 = vmul.f32 1.0614054, %v6985_v35  ;;  %5913 = vpow2.f32 %v1491_v46 }
 0x3dd   :  { %v878_v39 = vadd.f32 %v877_v34, %v809_v17  ;;  %v7003_v61 = vand.u32 2147483647, %v6996_v19  ;;  %5915 = vpow2.f32 %v1493_v2  ;;  %v1476_v46 = vmul.f32 %v1459_v62, %v6951_v45 }
 0x3de   :  { %v1389_v49 = vadd.f32 -0.28449672, %v1372_v44  ;;  %v1082_v36 = vmul.f32 %v5910_v6, %v1081_v22  ;;  %v1322_v16 = vadd.f32 -1.4531521, %v1305_v20  ;;  %v1103_v44 = vand.u32 2147483647, %v6980_v41 }
 0x3df   :  { %v1019_v11 = vmul.f32 0.3275911, %v7003_v61  ;;  %v918_v24 = vadd.f32 %v878_v39, %v6700_v37  ;;  %v1105_v22 = vand.u32 2147483648, %v6980_v41  ;;  %v1477_v63 = vmul.f32 %v1460_v0, %v6970_v9 }
 0x3e0   :  { %v1406_v3 = vmul.f32 %v1389_v49, %v6962_v52  ;;  %v1083_v50 = vadd.f32 %v5910_v6, %v1082_v36  ;;  %v1339_v54 = vmul.f32 %v1322_v16, %v6985_v35  ;;  %v1495_v36 = vmul.f32 1.442695, %v1476_v46 }
 0x3e1   :  { %v5912_v4 = vpop.eup %5911  ;;  %v7022_v37 = vadd.f32 1.0, %v1019_v11  ;;  %vm1099_vm8 = vweird.f32 %v6980_v41  ;;  %vm1104_vm11 = vcmp.eq.f32.partialorder %v1103_v44, 8.507059e+37  ;;  %v883_v11 = vpop.f32.mrf.mxu2  ;;  %v1497_v0 = vmul.f32 1.442695, %v1477_v63 }
 0x3e2   :  { %v1423_v1 = vadd.f32 0.2548296, %v1406_v3  ;;  %v1087_v5 = vsel %vm1086_vm3, %v5910_v6, %v1083_v50  ;;  %v1356_v26 = vadd.f32 1.4214138, %v1339_v54  ;;  %v1095_v14 = vmul.f32 %v5912_v4, %v6980_v41  ;;  %v935_v6 = vld [vmem:[%s10521_s3 + $0x28] sm:$0xff]  ;;  %v5914_v13 = vpop.eup %5913 }
 0x3e3   :  { %v7009_v53 = vsel %vm1089_vm4, %v1091_v58, %v1087_v5  ;;  %5917 = vrcp.f32 %v7022_v37  ;;  %v7027_v17 = vadd.f32 %v935_v6, %v918_v24  ;;  %vm1100_vm6 = vweird.f32 %v5912_v4  ;;  %v5916_v16 = vpop.eup %5915 }
 0x3e4   :  { %v1440_v18 = vmul.f32 %v1423_v1, %v6962_v52  ;;  %v1306_v34 = vmul.f32 1.0614054, %v7009_v53  ;;  %v812_v7 = vpop.f32.mrf.mxu1  ;;  %v1373_v21 = vmul.f32 %v1356_v26, %v6985_v35  ;;  %v1096_v32 = vsub.f32 1.0, %v1095_v14  ;;  %vm1101_vm9 = vmor %vm1099_vm8, %vm1100_vm6 }
 0x3e5   :  { %v1106_v54 = vor.u32 1.1754944e-38, %v1105_v22  ;;  %v7034_v58 = vmul.f32 0.70710677, %v7027_v17  ;;  %v881_v62 = vadd.f32 %v880_v59, %v812_v7  ;;  %5919 = vpow2.f32 %v1495_v36 }
 0x3e6   :  { %v1525_v52 = vmul.f32 %v5914_v13, %v1440_v18  ;;  %v1323_v31 = vadd.f32 -1.4531521, %v1306_v34  ;;  %v1390_v27 = vadd.f32 -0.28449672, %v1373_v21  ;;  %v1097_v45 = vmul.f32 %v5912_v4, %v1096_v32 }
 0x3e7   :  { %v7044_v14 = vand.u32 2147483647, %v7034_v58  ;;  %v919_v21 = vadd.f32 %v881_v62, %v6774_v51  ;;  %v1118_v44 = vand.u32 2147483647, %v7022_v37  ;;  %vm1114_vm13 = vweird.f32 %v7022_v37 }
 0x3e8   :  { %v1542_v20 = vsub.f32 1.0, %v1525_v52  ;;  %v1340_v42 = vmul.f32 %v1323_v31, %v7009_v53  ;;  %v1407_v49 = vmul.f32 %v1390_v27, %v6985_v35  ;;  %v1098_v2 = vadd.f32 %v5912_v4, %v1097_v45  ;;  %v936_v31 = vld [vmem:[%s10521_s3 + $0x30] sm:$0xff] }
 0x3e9   :  { %v5918_v24 = vpop.eup %5917  ;;  %v1020_v13 = vmul.f32 0.3275911, %v7044_v14  ;;  %v1461_v45 = vsub.f32 0.0, %v7003_v61  ;;  %vm1119_vm15 = vcmp.eq.f32.partialorder %v1118_v44, 8.507059e+37  ;;  %vm1561_vm1 = vcmp.lt.f32.partialorder %v6948_v43, 0.0 }
 0x3ea   :  { %v1576_v39 = vsub.f32 0.0, %v1542_v20  ;;  %v1357_v3 = vadd.f32 1.4214138, %v1340_v42  ;;  %v1424_v50 = vadd.f32 0.2548296, %v1407_v49  ;;  %v1102_v5 = vsel %vm1101_vm9, %v5912_v4, %v1098_v2 }
 0x3eb   :  { %v7041_v34 = vsel %vm1104_vm11, %v1106_v54, %v1102_v5  ;;  %v1110_v6 = vmul.f32 %v5918_v24, %v7022_v37  ;;  %v7058_v27 = vadd.f32 1.0, %v1020_v13  ;;  %vm1115_vm12 = vweird.f32 %v5918_v24  ;;  %v5920_v36 = vpop.eup %5919 }
 0x3ec   :  { %v1593_v1 = vsel %vm1559_vm5, %v1576_v39, %v1542_v20  ;;  %v1374_v9 = vmul.f32 %v1357_v3, %v7009_v53  ;;  %v815_v26 = vpop.f32.mrf.mxu1  ;;  %v1441_v18 = vmul.f32 %v1424_v50, %v6985_v35  ;;  %v1307_v38 = vmul.f32 1.0614054, %v7041_v34  ;;  %vm1116_vm14 = vmor %vm1114_vm13, %vm1115_vm12 }
 0x3ed   :  { %v1610_v41 = vadd.f32 1.0, %v1593_v1  ;;  %v1111_v52 = vsub.f32 1.0, %v1110_v6  ;;  %5921 = vrcp.f32 %v7058_v27  ;;  %v7063_v49 = vadd.f32 %v936_v31, %v919_v21 }
 0x3ee   :  { %v1391_v59 = vadd.f32 -0.28449672, %v1374_v9  ;;  %v1526_v7 = vmul.f32 %v5916_v16, %v1441_v18  ;;  %v1324_v46 = vadd.f32 -1.4531521, %v1307_v38  ;;  %v884_v50 = vadd.f32 %v883_v11, %v815_v26 }
 0x3ef   :  { %v1627_v4 = vmul.f32 %v1610_v41, %v6989_v47  ;;  %v1120_v47 = vand.u32 2147483648, %v7022_v37  ;;  %v1112_v20 = vmul.f32 %v5918_v24, %v1111_v52  ;;  %v886_v41 = vpop.f32.mrf.mxu2  ;;  %v7075_v15 = vmul.f32 0.70710677, %v7063_v49 }
 0x3f0   :  { %v1408_v35 = vmul.f32 %v1391_v59, %v7009_v53  ;;  %v1543_v32 = vsub.f32 1.0, %v1526_v7  ;;  %v1341_v51 = vmul.f32 %v1324_v46, %v7041_v34  ;;  %5923 = vpow2.f32 %v1497_v0 }
 0x3f1   :  { %1645 = vst.msk [vmem:[#allocation2] sm:$0xff] %vm1644_vm7, %v1627_v4  ;;  %v1113_v39 = vadd.f32 %v5918_v24, %v1112_v20  ;;  %v1121_v2 = vor.u32 1.1754944e-38, %v1120_v47  ;;  %v7084_v6 = vand.u32 2147483647, %v7075_v15  ;;  %v920_v4 = vadd.f32 %v884_v50, %v6768_v33 }
 0x3f2   :  { %v1425_v22 = vadd.f32 0.2548296, %v1408_v35  ;;  %v1577_v42 = vsub.f32 0.0, %v1543_v32  ;;  %v1358_v16 = vadd.f32 1.4214138, %v1341_v51  ;;  %v1462_v46 = vsub.f32 0.0, %v7044_v14 }
 0x3f3   :  { %v1117_v9 = vsel %vm1116_vm14, %v5918_v24, %v1113_v39  ;;  %v937_v24 = vld [vmem:[%s10521_s3 + $0x38] sm:$0xff]  ;;  %v5922_v38 = vpop.eup %5921  ;;  %v1133_v35 = vand.u32 2147483647, %v7058_v27  ;;  %v1021_v0 = vmul.f32 0.3275911, %v7084_v6  ;;  %v1135_v47 = vand.u32 2147483648, %v7058_v27 }
 0x3f4   :  { %v1442_v63 = vmul.f32 %v1425_v22, %v7009_v53  ;;  %v1594_v3 = vsel %vm1560_vm10, %v1577_v42, %v1543_v32  ;;  %v1375_v1 = vmul.f32 %v1358_v16, %v7041_v34  ;;  %v818_v5 = vpop.f32.mrf.mxu1  ;;  %v966_v53 = vmul.f32 0.5, %v6945_v28 }
 0x3f5   :  { %v1611_v54 = vadd.f32 1.0, %v1594_v3  ;;  %v7072_v18 = vsel %vm1119_vm15, %v1121_v2, %v1117_v9  ;;  %v1478_v28 = vmul.f32 %v1461_v45, %v7003_v61  ;;  %v1125_v21 = vmul.f32 %v5922_v38, %v7058_v27 }
 0x3f6   :  { %v1527_v62 = vmul.f32 %v5920_v36, %v1442_v63  ;;  %v1392_v26 = vadd.f32 -0.28449672, %v1375_v1  ;;  %v1308_v11 = vmul.f32 1.0614054, %v7072_v18  ;;  %v7093_v61 = vadd.f32 %v937_v24, %v920_v4  ;;  %v5924_v36 = vpop.eup %5923  ;;  %v938_v24 = vld [vmem:[%s10521_s3 + $0x40] sm:$0xff] }
 0x3f7   :  { %v1628_v37 = vmul.f32 %v1611_v54, %v7006_v10  ;;  %v1126_v32 = vsub.f32 1.0, %v1125_v21  ;;  %vm1130_vm2 = vweird.f32 %v5922_v38  ;;  %v7099_v22 = vadd.f32 1.0, %v1021_v0  ;;  %v889_v54 = vpop.f32.mrf.mxu2 }
 0x3f8   :  { %v1544_v59 = vsub.f32 1.0, %v1527_v62  ;;  %v1409_v7 = vmul.f32 %v1392_v26, %v7041_v34  ;;  %v1325_v13 = vadd.f32 -1.4531521, %v1308_v11  ;;  %v7103_v45 = vmul.f32 0.70710677, %v7093_v61 }
 0x3f9   :  { %1646 = vst.msk [vmem:[#allocation2 + $0x8] sm:$0xff] %vm1644_vm7, %v1628_v37  ;;  %v1127_v42 = vmul.f32 %v5922_v38, %v1126_v32  ;;  %v1499_v63 = vmul.f32 1.442695, %v1478_v28  ;;  %5925 = vrcp.f32 %v7099_v22  ;;  %v887_v16 = vadd.f32 %v886_v41, %v818_v5  ;;  %v1662_v37 = vld [vmem:[#allocation2] sm:$0xff] }
 0x3fa   :  { %v1578_v10 = vsub.f32 0.0, %v1544_v59  ;;  %v1426_v33 = vadd.f32 0.2548296, %v1409_v7  ;;  %v1342_v31 = vmul.f32 %v1325_v13, %v7072_v18  ;;  %vm1129_vm3 = vweird.f32 %v7058_v27 }
 0x3fb   :  { %v1128_v2 = vadd.f32 %v5922_v38, %v1127_v42  ;;  %vm1131_vm4 = vmor %vm1129_vm3, %vm1130_vm2  ;;  %v1136_v62 = vor.u32 1.1754944e-38, %v1135_v47  ;;  %v1479_v1 = vmul.f32 %v1462_v46, %v7044_v14  ;;  %v7113_v9 = vand.u32 2147483647, %v7103_v45 }
 0x3fc   :  { %v1595_v52 = vsel %vm1561_vm1, %v1578_v10, %v1544_v59  ;;  %v1443_v51 = vmul.f32 %v1426_v33, %v7041_v34  ;;  %v1359_v20 = vadd.f32 1.4214138, %v1342_v31  ;;  %v821_v50 = vpop.f32.mrf.mxu1  ;;  %v967_v34 = vmul.f32 0.5, %v6960_v40 }
 0x3fd   :  { %v1612_v44 = vadd.f32 1.0, %v1595_v52  ;;  %vm1134_vm5 = vcmp.eq.f32.partialorder %v1133_v35, 8.507059e+37  ;;  %5927 = vpow2.f32 %v1499_v63  ;;  %v1022_v59 = vmul.f32 0.3275911, %v7113_v9 }
 0x3fe   :  { %v1528_v39 = vmul.f32 %v5924_v36, %v1443_v51  ;;  %v1376_v3 = vmul.f32 %v1359_v20, %v7072_v18  ;;  %v921_v40 = vadd.f32 %v887_v16, %v6737_v55  ;;  %vm1562_vm6 = vcmp.lt.f32.partialorder %v6967_v30, 0.0 }
 0x3ff   :  { %v1629_v43 = vmul.f32 %v1612_v44, %v966_v53  ;;  %v1132_v53 = vsel %vm1131_vm4, %v5922_v38, %v1128_v2  ;;  %v5926_v38 = vpop.eup %5925  ;;  %v7126_v28 = vmul.f32 0.5, %v6982_v8  ;;  %v1501_v4 = vmul.f32 1.442695, %v1479_v1 }
 0x400   :  { %v1545_v5 = vsub.f32 1.0, %v1528_v39  ;;  %v1393_v41 = vadd.f32 -0.28449672, %v1376_v3  ;;  %v7115_v27 = vsel %vm1134_vm5, %v1136_v62, %v1132_v53  ;;  %v7128_v10 = vadd.f32 1.0, %v1022_v59  ;;  %v1663_v20 = vld [vmem:[#allocation2 + $0x8] sm:$0xff] }
 0x401   :  { %1647 = vst.msk [vmem:[#allocation2 + $0x10] sm:$0xff] %vm1644_vm7, %v1629_v43  ;;  %v1309_v11 = vmul.f32 1.0614054, %v7115_v27  ;;  %v1679_v55 = vsel %vm1644_vm7, %v1662_v37, 0.0  ;;  %v1140_v21 = vmul.f32 %v5926_v38, %v7099_v22  ;;  %vm1563_vm8 = vcmp.lt.f32.partialorder %v6996_v19, 0.0 }
 0x402   :  { %v1579_v26 = vsub.f32 0.0, %v1545_v5  ;;  %v1410_v14 = vmul.f32 %v1393_v41, %v7072_v18  ;;  %1680 = vadd.xlane.f32.xlu2 %v1679_v55  ;;  %v1463_v46 = vsub.f32 0.0, %v7084_v6  ;;  %5929 = vrcp.f32 %v7128_v10 }
 0x403   :  { %v1326_v13 = vadd.f32 -1.4531521, %v1309_v11  ;;  %v7135_v8 = vadd.f32 %v938_v24, %v921_v40  ;;  %v7139_v52 = vmul.f32 0.5, %v7027_v17  ;;  %v1141_v31 = vsub.f32 1.0, %v1140_v21  ;;  %v5928_v32 = vpop.eup %5927 }
 0x404   :  { %v1596_v7 = vsel %vm1562_vm6, %v1579_v26, %v1545_v5  ;;  %v1427_v30 = vadd.f32 0.2548296, %v1410_v14  ;;  %5931 = vpow2.f32 %v1501_v4  ;;  %v1148_v47 = vand.u32 2147483647, %v7099_v22  ;;  %v824_v63 = vpop.f32.mrf.mxu1 }
 0x405   :  { %v1613_v35 = vadd.f32 1.0, %v1596_v7  ;;  %v1343_v33 = vmul.f32 %v1326_v13, %v7115_v27  ;;  %v1150_v51 = vand.u32 2147483648, %v7099_v22  ;;  %v1142_v43 = vmul.f32 %v5926_v38, %v1141_v31 }
 0x406   :  { %v1444_v0 = vmul.f32 %v1427_v30, %v7072_v18  ;;  %vm1145_vm9 = vweird.f32 %v5926_v38  ;;  %v892_v18 = vpop.f32.mrf.mxu2  ;;  %vm1144_vm10 = vweird.f32 %v7099_v22  ;;  %v1480_v17 = vmul.f32 %v1463_v46, %v7084_v6  ;;  %v940_v46 = vld [vmem:[%s10521_s3 + $0x50] sm:$0xff] }
 0x407   :  { %v1630_v44 = vmul.f32 %v1613_v35, %v967_v34  ;;  %v1360_v36 = vadd.f32 1.4214138, %v1343_v33  ;;  %v7148_v16 = vmul.f32 0.70710677, %v7135_v8  ;;  %v890_v39 = vadd.f32 %v889_v54, %v821_v50  ;;  %vm1146_vm11 = vmor %vm1144_vm10, %vm1145_vm9 }
 0x408   :  { %v1529_v42 = vmul.f32 %v5928_v32, %v1444_v0  ;;  %v1143_v34 = vadd.f32 %v5926_v38, %v1142_v43  ;;  %v1682_v62 = vsel %vm1644_vm7, %v1663_v20, 0.0  ;;  %v5930_v1 = vpop.eup %5929  ;;  %vm1149_vm12 = vcmp.eq.f32.partialorder %v1148_v47, 8.507059e+37 }
 0x409   :  { %1648 = vst.msk [vmem:[#allocation2 + $0x18] sm:$0xff] %vm1644_vm7, %v1630_v44  ;;  %v1377_v2 = vmul.f32 %v1360_v36, %v7115_v27  ;;  %v1151_v5 = vor.u32 1.1754944e-38, %v1150_v51  ;;  %v7153_v41 = vand.u32 2147483647, %v7148_v16  ;;  %1683 = vadd.xlane.f32.xlu1 %v1682_v62  ;;  %v893_v22 = vadd.f32 %v892_v18, %v824_v63 }
 0x40a   :  { %v1546_v3 = vsub.f32 1.0, %v1529_v42  ;;  %v1147_v37 = vsel %vm1146_vm11, %v5926_v38, %v1143_v34  ;;  %v1155_v50 = vmul.f32 %v5930_v1, %v7128_v10  ;;  %v5932_v54 = vpop.eup %5931  ;;  %v1163_v40 = vand.u32 2147483647, %v7128_v10  ;;  %v939_v38 = vld [vmem:[%s10521_s3 + $0x48] sm:$0xff] }
 0x40b   :  { %v1394_v53 = vadd.f32 -0.28449672, %v1377_v2  ;;  %v7156_v59 = vsel %vm1149_vm12, %v1151_v5, %v1147_v37  ;;  %v1023_v26 = vmul.f32 0.3275911, %v7153_v41  ;;  %v922_v14 = vadd.f32 %v890_v39, %v6735_v25 }
 0x40c   :  { %v1580_v6 = vsub.f32 0.0, %v1546_v3  ;;  %v1310_v4 = vmul.f32 1.0614054, %v7156_v59  ;;  %v1156_v55 = vsub.f32 1.0, %v1155_v50  ;;  %vm1160_vm13 = vweird.f32 %v5930_v1 }
 0x40d   :  { %v1411_v24 = vmul.f32 %v1394_v53, %v7115_v27  ;;  %v1165_v30 = vand.u32 2147483648, %v7128_v10  ;;  %v7169_v13 = vadd.f32 1.0, %v1023_v26  ;;  %v923_v19 = vadd.f32 %v893_v22, %v6686_v57 }
 0x40e   :  { %v1597_v11 = vsel %vm1563_vm8, %v1580_v6, %v1546_v3  ;;  %v1327_v25 = vadd.f32 -1.4531521, %v1310_v4  ;;  %v1157_v35 = vmul.f32 %v5930_v1, %v1156_v55  ;;  %vm1564_vm14 = vcmp.lt.f32.partialorder %v7034_v58, 0.0  ;;  %v895_v26 = vpop.f32.mrf.mxu2 }
 0x40f   :  { %v1614_v7 = vadd.f32 1.0, %v1597_v11  ;;  %v1428_v21 = vadd.f32 0.2548296, %v1411_v24  ;;  %5933 = vrcp.f32 %v7169_v13  ;;  %v7178_v33 = vadd.f32 %v939_v38, %v922_v14 }
 0x410   :  { %v1344_v32 = vmul.f32 %v1327_v25, %v7156_v59  ;;  %v1158_v44 = vadd.f32 %v5930_v1, %v1157_v35  ;;  %vm1159_vm15 = vweird.f32 %v7128_v10  ;;  %v1503_v57 = vmul.f32 1.442695, %v1480_v17 }
 0x411   :  { %v1631_v0 = vmul.f32 %v1614_v7, %v7126_v28  ;;  %v1445_v31 = vmul.f32 %v1428_v21, %v7115_v27  ;;  %vm1161_vm1 = vmor %vm1159_vm15, %vm1160_vm13  ;;  %v1166_v47 = vor.u32 1.1754944e-38, %v1165_v30  ;;  %v1464_v28 = vsub.f32 0.0, %v7113_v9  ;;  %v7188_v27 = vld [vmem:[#allocation2 + $0x10] sm:$0xff] }
 0x412   :  { %v7186_v51 = vadd.f32 %v940_v46, %v923_v19  ;;  %v1361_v42 = vadd.f32 1.4214138, %v1344_v32  ;;  %v1162_v36 = vsel %vm1161_vm1, %v5930_v1, %v1158_v44  ;;  %vm1164_vm2 = vcmp.eq.f32.partialorder %v1163_v40, 8.507059e+37 }
 0x413   :  { %1649 = vst.msk [vmem:[#allocation2 + $0x20] sm:$0xff] %vm1644_vm7, %v1631_v0  ;;  %v1530_v20 = vmul.f32 %v5932_v54, %v1445_v31  ;;  %v7191_v43 = vmul.f32 0.5, %v7063_v49  ;;  %v7193_v10 = vsel %vm1164_vm2, %v1166_v47, %v1162_v36  ;;  %v1465_v63 = vsub.f32 0.0, %v7153_v41 }
 0x414   :  { %v7197_v18 = vmul.f32 0.70710677, %v7178_v33  ;;  %v1378_v39 = vmul.f32 %v1361_v42, %v7156_v59  ;;  %v1311_v3 = vmul.f32 1.0614054, %v7193_v10  ;;  %v7202_v2 = vmul.f32 0.70710677, %v7186_v51 }
 0x415   :  { %v1547_v17 = vsub.f32 1.0, %v1530_v20  ;;  %v5934_v34 = vpop.eup %5933  ;;  %5935 = vpow2.f32 %v1503_v57  ;;  %v1481_v49 = vmul.f32 %v1464_v28, %v7113_v9  ;;  %v1685_v1 = vsel %vm1644_vm7, %v7188_v27, 0.0  ;;  %v827_v9 = vpop.f32.mrf.mxu1 }
 0x416   :  { %v1007_v62 = vand.u32 2147483647, %v7197_v18  ;;  %v1395_v22 = vadd.f32 -0.28449672, %v1378_v39  ;;  %v1328_v6 = vadd.f32 -1.4531521, %v1311_v3  ;;  %v1170_v53 = vmul.f32 %v5934_v34, %v7169_v13  ;;  %1686 = vadd.xlane.f32.xlu0 %v1685_v1 }
 0x417   :  { %v1581_v5 = vsub.f32 0.0, %v1547_v17  ;;  %v1178_v37 = vand.u32 2147483647, %v7169_v13  ;;  %v1482_v50 = vmul.f32 %v1465_v63, %v7153_v41  ;;  %v7212_v40 = vand.u32 2147483647, %v7202_v2 }
 0x418   :  { %v1024_v54 = vmul.f32 0.3275911, %v1007_v62  ;;  %v1412_v11 = vmul.f32 %v1395_v22, %v7156_v59  ;;  %v1345_v24 = vmul.f32 %v1328_v6, %v7193_v10  ;;  %v1171_v4 = vsub.f32 1.0, %v1170_v53 }
 0x419   :  { %v1598_v14 = vsel %vm1564_vm14, %v1581_v5, %v1547_v17  ;;  %v1180_v38 = vand.u32 2147483648, %v7169_v13  ;;  %v1025_v41 = vmul.f32 0.3275911, %v7212_v40  ;;  %vm1175_vm3 = vweird.f32 %v5934_v34  ;;  %v898_v5 = vpop.f32.mrf.mxu2 }
 0x41a   :  { %v1615_v55 = vadd.f32 1.0, %v1598_v14  ;;  %v7219_v7 = vadd.f32 1.0, %v1024_v54  ;;  %v1429_v30 = vadd.f32 0.2548296, %v1412_v11  ;;  %v1362_v21 = vadd.f32 1.4214138, %v1345_v24 }
 0x41b   :  { %v1172_v25 = vmul.f32 %v5934_v34, %v1171_v4  ;;  %v5936_v35 = vpop.eup %5935  ;;  %vm1565_vm4 = vcmp.lt.f32.partialorder %v7075_v15, 0.0  ;;  %v7225_v19 = vmul.f32 0.5, %v7093_v61  ;;  %v1505_v46 = vmul.f32 1.442695, %v1481_v49  ;;  %v941_v49 = vld [vmem:[%s10521_s3 + $0x58] sm:$0xff] }
 0x41c   :  { %v1632_v58 = vmul.f32 %v1615_v55, %v7139_v52  ;;  %5937 = vrcp.f32 %v7219_v7  ;;  %v1446_v0 = vmul.f32 %v1429_v30, %v7156_v59  ;;  %v1379_v31 = vmul.f32 %v1362_v21, %v7193_v10 }
 0x41d   :  { %v1173_v32 = vadd.f32 %v5934_v34, %v1172_v25  ;;  %vm1174_vm5 = vweird.f32 %v7169_v13  ;;  %v1181_v44 = vor.u32 1.1754944e-38, %v1180_v38  ;;  %v1507_v52 = vmul.f32 1.442695, %v1482_v50  ;;  %v830_v1 = vpop.f32.mrf.mxu1  ;;  %v7248_v50 = vld [vmem:[#allocation2 + $0x18] sm:$0xff] }
 0x41e   :  { %1650 = vst.msk [vmem:[#allocation2 + $0x28] sm:$0xff] %vm1644_vm7, %v1632_v58  ;;  %vm1176_vm6 = vmor %vm1174_vm5, %vm1175_vm3  ;;  %v1466_v57 = vsub.f32 0.0, %v1007_v62  ;;  %v7232_v47 = vadd.f32 1.0, %v1025_v41  ;;  %v1531_v61 = vmul.f32 %v5936_v35, %v1446_v0  ;;  %v1396_v28 = vadd.f32 -0.28449672, %v1379_v31 }
 0x41f   :  { %v1177_v20 = vsel %vm1176_vm6, %v5934_v34, %v1173_v32  ;;  %vm1179_vm8 = vcmp.eq.f32.partialorder %v1178_v37, 8.507059e+37  ;;  %5939 = vpow2.f32 %v1505_v46  ;;  %v1193_v59 = vand.u32 2147483647, %v7219_v7 }
 0x420   :  { %v7234_v42 = vsel %vm1179_vm8, %v1181_v44, %v1177_v20  ;;  %v896_v36 = vadd.f32 %v895_v26, %v827_v9  ;;  %v1548_v63 = vsub.f32 1.0, %v1531_v61  ;;  %v1413_v13 = vmul.f32 %v1396_v28, %v7193_v10  ;;  %v7257_v26 = vld [vmem:[#allocation2 + $0x20] sm:$0xff] }
 0x421   :  { %v1312_v17 = vmul.f32 1.0614054, %v7234_v42  ;;  %5941 = vrcp.f32 %v7232_v47  ;;  %vm1189_vm9 = vweird.f32 %v7219_v7  ;;  %v7241_v3 = vmul.f32 %v1466_v57, %v1007_v62  ;;  %v942_v20 = vld [vmem:[%s10521_s3 + $0x60] sm:$0xff] }
 0x422   :  { %v5938_v39 = vpop.eup %5937  ;;  %5943 = vpow2.f32 %v1507_v52  ;;  %v1467_v34 = vsub.f32 0.0, %v7212_v40  ;;  %v1582_v22 = vsub.f32 0.0, %v1548_v63  ;;  %v1430_v6 = vadd.f32 0.2548296, %v1413_v13 }
 0x423   :  { %v1329_v53 = vadd.f32 -1.4531521, %v1312_v17  ;;  %v1185_v37 = vmul.f32 %v5938_v39, %v7219_v7  ;;  %vm1566_vm10 = vcmp.lt.f32.partialorder %v7103_v45, 0.0  ;;  %vm1190_vm11 = vweird.f32 %v5938_v39 }
 0x424   :  { %vm7251_vm12 = vcmp.eq.f32.partialorder %v1193_v59, 8.507059e+37  ;;  %v1195_v54 = vand.u32 2147483648, %v7219_v7  ;;  %v924_v9 = vadd.f32 %v896_v36, %v6688_v29  ;;  %v1599_v14 = vsel %vm1565_vm4, %v1582_v22, %v1548_v63  ;;  %vm1191_vm13 = vmor %vm1189_vm9, %vm1190_vm11 }
 0x425   :  { %v1447_v11 = vmul.f32 %v1430_v6, %v7193_v10  ;;  %v1346_v24 = vmul.f32 %v1329_v53, %v7234_v42  ;;  %v1186_v4 = vsub.f32 1.0, %v1185_v37  ;;  %v5940_v55 = vpop.eup %5939  ;;  %v1616_v38 = vadd.f32 1.0, %v1599_v14  ;;  %v7269_v10 = vld [vmem:[#allocation2 + $0x28] sm:$0xff]  ;;  %v833_v6 = vpop.f32.mrf.mxu1 }
 0x426   :  { %v7263_v41 = vadd.f32 %v941_v49, %v924_v9  ;;  %v1688_v30 = vsel %vm1644_vm7, %v7248_v50, 0.0  ;;  %v899_v21 = vadd.f32 %v898_v5, %v830_v1  ;;  %v1691_v15 = vsel %vm1644_vm7, %v7257_v26, 0.0 }
 0x427   :  { %v5942_v25 = vpop.eup %5941  ;;  %v1532_v29 = vmul.f32 %v5940_v55, %v1447_v11  ;;  %v1363_v35 = vadd.f32 1.4214138, %v1346_v24  ;;  %v1187_v58 = vmul.f32 %v5938_v39, %v1186_v4  ;;  %1689 = vadd.xlane.f32.xlu2 %v1688_v30  ;;  %v1633_v0 = vmul.f32 %v1616_v38, %v7191_v43  ;;  %1692 = vadd.xlane.f32.xlu1 %v1691_v15 }
 0x428   :  { %v5944_v46 = vpop.eup %5943  ;;  %v1196_v31 = vor.u32 1.1754944e-38, %v1195_v54  ;;  %v1200_v32 = vmul.f32 %v5942_v25, %v7232_v47  ;;  %v1208_v44 = vand.u32 2147483647, %v7232_v47  ;;  %v7276_v28 = vmul.f32 0.70710677, %v7263_v41 }
 0x429   :  { %v1549_v52 = vsub.f32 1.0, %v1532_v29  ;;  %v1380_v57 = vmul.f32 %v1363_v35, %v7234_v42  ;;  %v1188_v61 = vadd.f32 %v5938_v39, %v1187_v58  ;;  %1651 = vst.msk [vmem:[#allocation2 + $0x30] sm:$0xff] %vm1644_vm7, %v1633_v0  ;;  %v1210_v59 = vand.u32 2147483648, %v7232_v47 }
 0x42a   :  { %v1201_v43 = vsub.f32 1.0, %v1200_v32  ;;  %v925_v36 = vadd.f32 %v899_v21, %v6717_v48  ;;  %v1694_v63 = vsel %vm1644_vm7, %v7269_v10, 0.0  ;;  %v7290_v1 = vand.u32 2147483647, %v7276_v28  ;;  %v901_v48 = vpop.f32.mrf.mxu2 }
 0x42b   :  { %v1583_v13 = vsub.f32 0.0, %v1549_v52  ;;  %v1397_v17 = vadd.f32 -0.28449672, %v1380_v57  ;;  %v1192_v49 = vsel %vm1191_vm13, %v5938_v39, %v1188_v61  ;;  %1695 = vadd.xlane.f32.xlu0 %v1694_v63  ;;  %vm1205_vm14 = vweird.f32 %v5942_v25 }
 0x42c   :  { %v7294_v5 = vsel %vm7251_vm12, %v1196_v31, %v1192_v49  ;;  %v1202_v7 = vmul.f32 %v5942_v25, %v1201_v43  ;;  %v7296_v22 = vadd.f32 %v942_v20, %v925_v36  ;;  %v1026_v54 = vmul.f32 0.3275911, %v7290_v1 }
 0x42d   :  { %v1600_v53 = vsel %vm1566_vm10, %v1583_v13, %v1549_v52  ;;  %v1414_v37 = vmul.f32 %v1397_v17, %v7234_v42  ;;  %v1313_v39 = vmul.f32 1.0614054, %v7294_v5  ;;  %vm1204_vm15 = vweird.f32 %v7232_v47 }
 0x42e   :  { %v1617_v9 = vadd.f32 1.0, %v1600_v53  ;;  %v1203_v14 = vadd.f32 %v5942_v25, %v1202_v7  ;;  %vm1209_vm1 = vcmp.eq.f32.partialorder %v1208_v44, 8.507059e+37  ;;  %vm1206_vm2 = vmor %vm1204_vm15, %vm1205_vm14  ;;  %v1211_v24 = vor.u32 1.1754944e-38, %v1210_v59 }
 0x42f   :  { %v1431_v62 = vadd.f32 0.2548296, %v1414_v37  ;;  %v1330_v11 = vadd.f32 -1.4531521, %v1313_v39  ;;  %v7304_v4 = vadd.f32 1.0, %v1026_v54  ;;  %v902_v30 = vadd.f32 %v901_v48, %v833_v6 }
 0x430   :  { %v1634_v45 = vmul.f32 %v1617_v9, %v7225_v19  ;;  %v1207_v55 = vsel %vm1206_vm2, %v5942_v25, %v1203_v14  ;;  %v7308_v38 = vmul.f32 0.70710677, %v7296_v22  ;;  %v1509_v25 = vmul.f32 1.442695, %v7241_v3  ;;  %v7324_v31 = vld [vmem:[#allocation2 + $0x30] sm:$0xff] }
 0x431   :  { %v1448_v21 = vmul.f32 %v1431_v62, %v7234_v42  ;;  %v1347_v29 = vmul.f32 %v1330_v11, %v7294_v5  ;;  %v7312_v35 = vsel %vm1209_vm1, %v1211_v24, %v1207_v55  ;;  %5945 = vrcp.f32 %v7304_v4 }
 0x432   :  { %1652 = vst.msk [vmem:[#allocation2 + $0x38] sm:$0xff] %vm1644_vm7, %v1634_v45  ;;  %v1314_v47 = vmul.f32 1.0614054, %v7312_v35  ;;  %v7318_v19 = vand.u32 2147483647, %v7308_v38  ;;  %v1484_v42 = vmul.f32 %v1467_v34, %v7212_v40  ;;  %v972_v57 = vmul.f32 0.5, %v7135_v8  ;;  %v836_v34 = vpop.f32.mrf.mxu1  ;;  %v904_v20 = vpop.f32.mrf.mxu2 }
 0x433   :  { %v1533_v58 = vmul.f32 %v5944_v46, %v1448_v21  ;;  %v1364_v15 = vadd.f32 1.4214138, %v1347_v29  ;;  %v926_v46 = vadd.f32 %v902_v30, %v6719_v12  ;;  %vm1567_vm3 = vcmp.lt.f32.partialorder %v7148_v16, 0.0  ;;  %v943_v40 = vld [vmem:[%s10521_s3 + $0x68] sm:$0xff] }
 0x434   :  { %v1331_v0 = vadd.f32 -1.4531521, %v1314_v47  ;;  %v1027_v52 = vmul.f32 0.3275911, %v7318_v19  ;;  %v7332_v3 = vmul.f32 0.5, %v7178_v33  ;;  %v1697_v12 = vsel %vm1644_vm7, %v7324_v31, 0.0 }
 0x435   :  { %v1550_v32 = vsub.f32 1.0, %v1533_v58  ;;  %v1381_v44 = vmul.f32 %v1364_v15, %v7294_v5  ;;  %5947 = vpow2.f32 %v1509_v25  ;;  %v1511_v33 = vmul.f32 1.442695, %v1484_v42  ;;  %1698 = vadd.xlane.f32.xlu1 %v1697_v12 }
 0x436   :  { %v1348_v61 = vmul.f32 %v1331_v0, %v7312_v35  ;;  %v7338_v63 = vadd.f32 1.0, %v1027_v52  ;;  %v7347_v7 = vadd.f32 %v943_v40, %v926_v46  ;;  %v1468_v37 = vsub.f32 0.0, %v7290_v1 }
 0x437   :  { %v5946_v43 = vpop.eup %5945  ;;  %v1584_v59 = vsub.f32 0.0, %v1550_v32  ;;  %v1398_v36 = vadd.f32 -0.28449672, %v1381_v44  ;;  %v1223_v54 = vand.u32 2147483647, %v7304_v4  ;;  %v1225_v9 = vand.u32 2147483648, %v7304_v4 }
 0x438   :  { %v1365_v8 = vadd.f32 1.4214138, %v1348_v61  ;;  %v1215_v13 = vmul.f32 %v5946_v43, %v7304_v4  ;;  %5949 = vrcp.f32 %v7338_v63  ;;  %v905_v14 = vadd.f32 %v904_v20, %v836_v34 }
 0x439   :  { %v1601_v17 = vsel %vm1567_vm3, %v1584_v59, %v1550_v32  ;;  %v1415_v49 = vmul.f32 %v1398_v36, %v7294_v5  ;;  %vm1220_vm4 = vweird.f32 %v5946_v43  ;;  %vm1568_vm5 = vcmp.lt.f32.partialorder %v7197_v18, 0.0 }
 0x43a   :  { %v1618_v6 = vadd.f32 1.0, %v1601_v17  ;;  %v1382_v48 = vmul.f32 %v1365_v8, %v7312_v35  ;;  %v1216_v53 = vsub.f32 1.0, %v1215_v13  ;;  %5951 = vpow2.f32 %v1511_v33  ;;  %v839_v44 = vpop.f32.mrf.mxu1 }
 0x43b   :  { %v1432_v39 = vadd.f32 0.2548296, %v1415_v49  ;;  %v7356_v45 = vmul.f32 0.70710677, %v7347_v7  ;;  %v5948_v55 = vpop.eup %5947  ;;  %vm1219_vm6 = vweird.f32 %v7304_v4  ;;  %v1485_v29 = vmul.f32 %v1468_v37, %v7290_v1  ;;  %v944_v4 = vld [vmem:[%s10521_s3 + $0x70] sm:$0xff]  ;;  %v907_v1 = vpop.f32.mrf.mxu2 }
 0x43c   :  { %v1635_v16 = vmul.f32 %v1618_v6, %v972_v57  ;;  %v1399_v62 = vadd.f32 -0.28449672, %v1382_v48  ;;  %v1217_v11 = vmul.f32 %v5946_v43, %v1216_v53  ;;  %vm1221_vm8 = vmor %vm1219_vm6, %vm1220_vm4  ;;  %v927_v25 = vadd.f32 %v905_v14, %v6748_v23 }
 0x43d   :  { %v1449_v24 = vmul.f32 %v1432_v39, %v7294_v5  ;;  %v1226_v5 = vor.u32 1.1754944e-38, %v1225_v9  ;;  %v7363_v15 = vand.u32 2147483647, %v7356_v45  ;;  %vm1224_vm9 = vcmp.eq.f32.partialorder %v1223_v54, 8.507059e+37 }
 0x43e   :  { %1653 = vst.msk [vmem:[#allocation2 + $0x40] sm:$0xff] %vm1644_vm7, %v1635_v16  ;;  %v1416_v30 = vmul.f32 %v1399_v62, %v7312_v35  ;;  %v1218_v21 = vadd.f32 %v5946_v43, %v1217_v11  ;;  %v5950_v47 = vpop.eup %5949  ;;  %v1238_v57 = vand.u32 2147483647, %v7338_v63  ;;  %v1240_v20 = vand.u32 2147483648, %v7338_v63  ;;  %v945_v62 = vld [vmem:[%s10521_s3 + $0x78] sm:$0xff] }
 0x43f   :  { %v1534_v58 = vmul.f32 %v5948_v55, %v1449_v24  ;;  %v1230_v32 = vmul.f32 %v5950_v47, %v7338_v63  ;;  %v1028_v61 = vmul.f32 0.3275911, %v7363_v15  ;;  %v7379_v12 = vadd.f32 %v944_v4, %v927_v25 }
 0x440   :  { %v1433_v0 = vadd.f32 0.2548296, %v1416_v30  ;;  %v1222_v42 = vsel %vm1221_vm8, %v5946_v43, %v1218_v21  ;;  %v5952_v43 = vpop.eup %5951  ;;  %v908_v8 = vadd.f32 %v907_v1, %v839_v44  ;;  %vm1235_vm10 = vweird.f32 %v5950_v47 }
 0x441   :  { %v1551_v52 = vsub.f32 1.0, %v1534_v58  ;;  %v7370_v46 = vsel %vm1224_vm9, %v1226_v5, %v1222_v42  ;;  %v1231_v34 = vsub.f32 1.0, %v1230_v32  ;;  %v7377_v36 = vadd.f32 1.0, %v1028_v61 }
 0x442   :  { %v1450_v23 = vmul.f32 %v1433_v0, %v7312_v35  ;;  %v1315_v40 = vmul.f32 1.0614054, %v7370_v46  ;;  %v1513_v35 = vmul.f32 1.442695, %v1485_v29  ;;  %vm1234_vm11 = vweird.f32 %v7338_v63  ;;  %v842_v21 = vpop.f32.mrf.mxu1 }
 0x443   :  { %v1585_v59 = vsub.f32 0.0, %v1551_v52  ;;  %v1232_v17 = vmul.f32 %v5950_v47, %v1231_v34  ;;  %5953 = vrcp.f32 %v7377_v36  ;;  %vm1236_vm12 = vmor %vm1234_vm11, %vm1235_vm10  ;;  %vm1239_vm13 = vcmp.eq.f32.partialorder %v1238_v57, 8.507059e+37  ;;  %v910_v29 = vpop.f32.mrf.mxu2 }
 0x444   :  { %v1535_v33 = vmul.f32 %v5952_v43, %v1450_v23  ;;  %v1332_v13 = vadd.f32 -1.4531521, %v1315_v40  ;;  %v1241_v39 = vor.u32 1.1754944e-38, %v1240_v20  ;;  %v7387_v54 = vmul.f32 0.70710677, %v7379_v12 }
 0x445   :  { %v1602_v49 = vsel %vm1568_vm5, %v1585_v59, %v1551_v52  ;;  %v1233_v37 = vadd.f32 %v5950_v47, %v1232_v17  ;;  %v928_v9 = vadd.f32 %v908_v8, %v6750_v60  ;;  %vm1569_vm14 = vcmp.lt.f32.partialorder %v7202_v2, 0.0 }
 0x446   :  { %v1619_v6 = vadd.f32 1.0, %v1602_v49  ;;  %v1552_v48 = vsub.f32 1.0, %v1535_v33  ;;  %v1349_v53 = vmul.f32 %v1332_v13, %v7370_v46  ;;  %v1469_v24 = vsub.f32 0.0, %v7318_v19 }
 0x447   :  { %v1237_v63 = vsel %vm1236_vm12, %v5950_v47, %v1233_v37  ;;  %v7399_v55 = vand.u32 2147483647, %v7387_v54  ;;  %v974_v58 = vmul.f32 0.5, %v7186_v51  ;;  %v7406_v25 = vadd.f32 %v945_v62, %v928_v9 }
 0x448   :  { %v1636_v18 = vmul.f32 %v1619_v6, %v7332_v3  ;;  %v1586_v14 = vsub.f32 0.0, %v1552_v48  ;;  %v1366_v16 = vadd.f32 1.4214138, %v1349_v53  ;;  %v7395_v11 = vsel %vm1239_vm13, %v1241_v39, %v1237_v63 }
 0x449   :  { %v1316_v30 = vmul.f32 1.0614054, %v7395_v11  ;;  %v5954_v47 = vpop.eup %5953  ;;  %v1029_v5 = vmul.f32 0.3275911, %v7399_v55  ;;  %5955 = vpow2.f32 %v1513_v35  ;;  %v1486_v44 = vmul.f32 %v1469_v24, %v7318_v19 }
 0x44a   :  { %1654 = vst.msk [vmem:[#allocation2 + $0x48] sm:$0xff] %vm1644_vm7, %v1636_v18  ;;  %v1603_v60 = vsel %vm1569_vm14, %v1586_v14, %v1552_v48  ;;  %v1383_v3 = vmul.f32 %v1366_v16, %v7370_v46  ;;  %v1245_v32 = vmul.f32 %v5954_v47, %v7377_v36  ;;  %v911_v52 = vadd.f32 %v910_v29, %v842_v21 }
 0x44b   :  { %v1620_v2 = vadd.f32 1.0, %v1603_v60  ;;  %v1333_v42 = vadd.f32 -1.4531521, %v1316_v30  ;;  %v7410_v1 = vadd.f32 1.0, %v1029_v5  ;;  %v7415_v23 = vmul.f32 0.70710677, %v7406_v25 }
 0x44c   :  { %v1400_v0 = vadd.f32 -0.28449672, %v1383_v3  ;;  %v1246_v61 = vsub.f32 1.0, %v1245_v32  ;;  %v1253_v40 = vand.u32 2147483647, %v7377_v36  ;;  %v1255_v34 = vand.u32 2147483648, %v7377_v36 }
 0x44d   :  { %v1637_v4 = vmul.f32 %v1620_v2, %v974_v58  ;;  %v1350_v51 = vmul.f32 %v1333_v42, %v7395_v11  ;;  %v1470_v20 = vsub.f32 0.0, %v7363_v15  ;;  %5957 = vrcp.f32 %v7410_v1 }
 0x44e   :  { %v1417_v57 = vmul.f32 %v1400_v0, %v7370_v46  ;;  %v1247_v59 = vmul.f32 %v5954_v47, %v1246_v61  ;;  %vm1250_vm15 = vweird.f32 %v5954_v47  ;;  %v1515_v8 = vmul.f32 1.442695, %v1486_v44 }
 0x44f   :  { %1655 = vst.msk [vmem:[#allocation2 + $0x50] sm:$0xff] %vm1644_vm7, %v1637_v4  ;;  %v1367_v43 = vadd.f32 1.4214138, %v1350_v51  ;;  %v7423_v33 = vand.u32 2147483647, %v7415_v23  ;;  %v5956_v13 = vpop.eup %5955  ;;  %vm1249_vm1 = vweird.f32 %v7377_v36  ;;  %v1256_v6 = vor.u32 1.1754944e-38, %v1255_v34 }
 0x450   :  { %v1434_v19 = vadd.f32 0.2548296, %v1417_v57  ;;  %v1248_v35 = vadd.f32 %v5954_v47, %v1247_v59  ;;  %vm1251_vm2 = vmor %vm1249_vm1, %vm1250_vm15  ;;  %v1487_v48 = vmul.f32 %v1470_v20, %v7363_v15  ;;  %v929_v37 = vadd.f32 %v911_v52, %v6776_v56 }
 0x451   :  { %v1384_v49 = vmul.f32 %v1367_v43, %v7395_v11  ;;  %v1030_v53 = vmul.f32 0.3275911, %v7423_v33  ;;  %vm1254_vm3 = vcmp.eq.f32.partialorder %v1253_v40, 8.507059e+37  ;;  %5959 = vpow2.f32 %v1515_v8 }
 0x452   :  { %v1451_v17 = vmul.f32 %v1434_v19, %v7370_v46  ;;  %v1252_v18 = vsel %vm1251_vm2, %v5954_v47, %v1248_v35  ;;  %v946_v46 = vld [vmem:[%s10521_s3 + $0x80] sm:$0xff]  ;;  %v975_v24 = vmul.f32 0.5, %v7263_v41  ;;  %v1517_v60 = vmul.f32 1.442695, %v1487_v48 }
 0x453   :  { %v1401_v9 = vadd.f32 -0.28449672, %v1384_v49  ;;  %v5958_v14 = vpop.eup %5957  ;;  %v7434_v16 = vsel %vm1254_vm3, %v1256_v6, %v1252_v18  ;;  %v7436_v36 = vadd.f32 1.0, %v1030_v53  ;;  %v7443_v3 = vadd.f32 %v946_v46, %v929_v37 }
 0x454   :  { %v1536_v39 = vmul.f32 %v5956_v13, %v1451_v17  ;;  %v1317_v62 = vmul.f32 1.0614054, %v7434_v16  ;;  %v1260_v56 = vmul.f32 %v5958_v14, %v7410_v1  ;;  %vm1570_vm4 = vcmp.lt.f32.partialorder %v7276_v28, 0.0 }
 0x455   :  { %v1418_v15 = vmul.f32 %v1401_v9, %v7395_v11  ;;  %5961 = vrcp.f32 %v7436_v36  ;;  %vm1265_vm5 = vweird.f32 %v5958_v14  ;;  %v1268_v58 = vand.u32 2147483647, %v7410_v1 }
 0x456   :  { %v1553_v63 = vsub.f32 1.0, %v1536_v39  ;;  %v1334_v29 = vadd.f32 -1.4531521, %v1317_v62  ;;  %v1261_v47 = vsub.f32 1.0, %v1260_v56  ;;  %v1270_v2 = vand.u32 2147483648, %v7410_v1 }
 0x457   :  { %v1435_v21 = vadd.f32 0.2548296, %v1418_v15  ;;  %v5960_v32 = vpop.eup %5959  ;;  %vm1571_vm6 = vcmp.lt.f32.partialorder %v7308_v38, 0.0  ;;  %5963 = vpow2.f32 %v1517_v60  ;;  %v7452_v44 = vmul.f32 0.70710677, %v7443_v3 }
 0x458   :  { %v1587_v30 = vsub.f32 0.0, %v1553_v63  ;;  %v1351_v41 = vmul.f32 %v1334_v29, %v7434_v16  ;;  %v1262_v42 = vmul.f32 %v5958_v14, %v1261_v47  ;;  %vm1264_vm8 = vweird.f32 %v7410_v1 }
 0x459   :  { %v1452_v0 = vmul.f32 %v1435_v21, %v7395_v11  ;;  %vm1266_vm9 = vmor %vm1264_vm8, %vm1265_vm5  ;;  %vm1269_vm10 = vcmp.eq.f32.partialorder %v1268_v58, 8.507059e+37  ;;  %v1271_v11 = vor.u32 1.1754944e-38, %v1270_v2  ;;  %v7457_v40 = vand.u32 2147483647, %v7452_v44 }
 0x45a   :  { %v1604_v5 = vsel %vm1570_vm4, %v1587_v30, %v1553_v63  ;;  %v1368_v52 = vadd.f32 1.4214138, %v1351_v41  ;;  %v1263_v57 = vadd.f32 %v5958_v14, %v1262_v42  ;;  %v1471_v1 = vsub.f32 0.0, %v7399_v55 }
 0x45b   :  { %v1621_v4 = vadd.f32 1.0, %v1604_v5  ;;  %v1537_v28 = vmul.f32 %v5960_v32, %v1452_v0  ;;  %v5962_v51 = vpop.eup %5961  ;;  %v1283_v8 = vand.u32 2147483647, %v7436_v36  ;;  %v1031_v13 = vmul.f32 0.3275911, %v7457_v40 }
 0x45c   :  { %v1385_v20 = vmul.f32 %v1368_v52, %v7434_v16  ;;  %v1267_v19 = vsel %vm1266_vm9, %v5958_v14, %v1263_v57  ;;  %v1275_v43 = vmul.f32 %v5962_v51, %v7436_v36  ;;  %vm1280_vm11 = vweird.f32 %v5962_v51 }
 0x45d   :  { %v1638_v61 = vmul.f32 %v1621_v4, %v975_v24  ;;  %v1554_v34 = vsub.f32 1.0, %v1537_v28  ;;  %v7462_v59 = vsel %vm1269_vm10, %v1271_v11, %v1267_v19  ;;  %v5964_v48 = vpop.eup %5963  ;;  %v1285_v53 = vand.u32 2147483648, %v7436_v36 }
 0x45e   :  { %v1402_v49 = vadd.f32 -0.28449672, %v1385_v20  ;;  %v1318_v35 = vmul.f32 1.0614054, %v7462_v59  ;;  %v1276_v6 = vsub.f32 1.0, %v1275_v43  ;;  %v1048_v37 = vadd.f32 1.0, %v1031_v13 }
 0x45f   :  { %1656 = vst.msk [vmem:[#allocation2 + $0x58] sm:$0xff] %vm1644_vm7, %v1638_v61  ;;  %v1588_v17 = vsub.f32 0.0, %v1554_v34  ;;  %v976_v14 = vmul.f32 0.5, %v7296_v22  ;;  %v1488_v15 = vmul.f32 %v1471_v1, %v7399_v55  ;;  %vm1279_vm12 = vweird.f32 %v7436_v36 }
 0x460   :  { %v1419_v9 = vmul.f32 %v1402_v49, %v7434_v16  ;;  %v1335_v18 = vadd.f32 -1.4531521, %v1318_v35  ;;  %v1277_v46 = vmul.f32 %v5962_v51, %v1276_v6  ;;  %5965 = vrcp.f32 %v1048_v37  ;;  %vm1281_vm13 = vmor %vm1279_vm12, %vm1280_vm11 }
 0x461   :  { %v1605_v39 = vsel %vm1571_vm6, %v1588_v17, %v1554_v34  ;;  %v1286_v38 = vor.u32 1.1754944e-38, %v1285_v53  ;;  %v6185_v30 = vmov 32.0   ;;  %vm1284_vm14 = vcmp.eq.f32.partialorder %v1283_v8, 8.507059e+37 }
 0x462   :  { %v1622_v63 = vadd.f32 1.0, %v1605_v39  ;;  %v1436_v62 = vadd.f32 0.2548296, %v1419_v9  ;;  %v1352_v56 = vmul.f32 %v1335_v18, %v7462_v59  ;;  %v1278_v24 = vadd.f32 %v5962_v51, %v1277_v46 }
 0x463   :  { %5967 = vrcp.f32 %v6185_v30  ;;  %v1519_v55 = vmul.f32 1.442695, %v1488_v15  ;;  %v1472_v58 = vsub.f32 0.0, %v7423_v33  ;;  %vm1572_vm15 = vcmp.lt.f32.partialorder %v7356_v45, 0.0 }
 0x464   :  { %v1639_v60 = vmul.f32 %v1622_v63, %v976_v14  ;;  %v1453_v21 = vmul.f32 %v1436_v62, %v7434_v16  ;;  %v1369_v29 = vadd.f32 1.4214138, %v1352_v56  ;;  %v1282_v22 = vsel %vm1281_vm13, %v5962_v51, %v1278_v24 }
 0x465   :  { %v1287_v47 = vsel %vm1284_vm14, %v1286_v38, %v1282_v22  ;;  %5969 = vpow2.f32 %v1519_v55  ;;  %v1489_v16 = vmul.f32 %v1472_v58, %v7423_v33  ;;  %v1298_v11 = vand.u32 2147483647, %v1048_v37 }
 0x466   :  { %1657 = vst.msk [vmem:[#allocation2 + $0x60] sm:$0xff] %vm1644_vm7, %v1639_v60  ;;  %v1538_v2 = vmul.f32 %v5964_v48, %v1453_v21  ;;  %v1386_v36 = vmul.f32 %v1369_v29, %v7462_v59  ;;  %v1319_v5 = vmul.f32 1.0614054, %v1287_v47  ;;  %v5966_v0 = vpop.eup %5965  ;;  %v1300_v34 = vand.u32 2147483648, %v1048_v37 }
 0x467   :  { %v1290_v4 = vmul.f32 %v5966_v0, %v1048_v37  ;;  %vm1295_vm1 = vweird.f32 %v5966_v0  ;;  %v977_v13 = vmul.f32 0.5, %v7347_v7  ;;  %v1521_v45 = vmul.f32 1.442695, %v1489_v16 }
 0x468   :  { %v1555_v41 = vsub.f32 1.0, %v1538_v2  ;;  %v1403_v42 = vadd.f32 -0.28449672, %v1386_v36  ;;  %v1336_v32 = vadd.f32 -1.4531521, %v1319_v5  ;;  %vm1294_vm2 = vweird.f32 %v1048_v37 }
 0x469   :  { %v5968_v28 = vpop.eup %5967  ;;  %v1291_v61 = vsub.f32 1.0, %v1290_v4  ;;  %vm1296_vm3 = vmor %vm1294_vm2, %vm1295_vm1  ;;  %vm1299_vm4 = vcmp.eq.f32.partialorder %v1298_v11, 8.507059e+37  ;;  %v1301_v39 = vor.u32 1.1754944e-38, %v1300_v34  ;;  %5971 = vpow2.f32 %v1521_v45  ;;  %v6182_v34 = vld [vmem:[#allocation2 + $0x8] sm:$0xff] }
 0x46a   :  { %v1589_v52 = vsub.f32 0.0, %v1555_v41  ;;  %v1420_v57 = vmul.f32 %v1403_v42, %v7462_v59  ;;  %v1353_v51 = vmul.f32 %v1336_v32, %v1287_v47  ;;  %v1731_v20 = vmul.f32 32.0, %v5968_v28 }
 0x46b   :  { %v1292_v8 = vmul.f32 %v5966_v0, %v1291_v61  ;;  %v5970_v48 = vpop.eup %5969  ;;  %vm1735_vm5 = vweird.f32 %v5968_v28  ;;  %vm1573_vm6 = vcmp.lt.f32.partialorder %v7387_v54, 0.0  ;;  %v978_v36 = vmul.f32 0.5, %v7379_v12 }
 0x46c   :  { %v1606_v19 = vsel %vm1572_vm15, %v1589_v52, %v1555_v41  ;;  %v1437_v43 = vadd.f32 0.2548296, %v1420_v57  ;;  %v1370_v1 = vadd.f32 1.4214138, %v1353_v51  ;;  %v1732_v49 = vsub.f32 1.0, %v1731_v20 }
 0x46d   :  { %v1623_v17 = vadd.f32 1.0, %v1606_v19  ;;  %v1293_v6 = vadd.f32 %v5966_v0, %v1292_v8  ;;  %vm1574_vm8 = vcmp.lt.f32.partialorder %v7415_v23, 0.0  ;;  %v979_v19 = vmul.f32 0.5, %v7406_v25 }
 0x46e   :  { %v1454_v33 = vmul.f32 %v1437_v43, %v7462_v59  ;;  %v1387_v35 = vmul.f32 %v1370_v1, %v1287_v47  ;;  %v1733_v9 = vmul.f32 %v5968_v28, %v1732_v49  ;;  %v1473_v59 = vsub.f32 0.0, %v7457_v40 }
 0x46f   :  { %v1640_v53 = vmul.f32 %v1623_v17, %v977_v13  ;;  %v1297_v14 = vsel %vm1296_vm3, %v5966_v0, %v1293_v6  ;;  %v5972_v2 = vpop.eup %5971  ;;  %v6181_v0 = vld [vmem:[#allocation2] sm:$0xff]  ;;  %v7508_v13 = vld [vmem:[#allocation2 + $0x38] sm:$0xff]  ;;  %vm1575_vm9 = vcmp.lt.f32.partialorder %v7452_v44, 0.0 }
 0x470   :  { %v1539_v18 = vmul.f32 %v5970_v48, %v1454_v33  ;;  %v1404_v46 = vadd.f32 -0.28449672, %v1387_v35  ;;  %v1302_v7 = vsel %vm1299_vm4, %v1301_v39, %v1297_v14  ;;  %v1734_v63 = vadd.f32 %v5968_v28, %v1733_v9  ;;  %v7514_v6 = vld [vmem:[#allocation2 + $0x40] sm:$0xff] }
 0x471   :  { %1658 = vst.msk [vmem:[#allocation2 + $0x68] sm:$0xff] %vm1644_vm7, %v1640_v53  ;;  %v1320_v62 = vmul.f32 1.0614054, %v1302_v7  ;;  %v1490_v21 = vmul.f32 %v1473_v59, %v7457_v40  ;;  %v1700_v33 = vsel %vm1644_vm7, %v7508_v13, 0.0 }
 0x472   :  { %v1556_v15 = vsub.f32 1.0, %v1539_v18  ;;  %v1421_v37 = vmul.f32 %v1404_v46, %v1287_v47  ;;  %v7489_v56 = vsel %vm1735_vm5, %v5968_v28, %v1734_v63  ;;  %v1703_v18 = vsel %vm1644_vm7, %v7514_v6, 0.0 }
 0x473   :  { %v1337_v38 = vadd.f32 -1.4531521, %v1320_v62  ;;  %v1523_v28 = vmul.f32 1.442695, %v1490_v21  ;;  %v980_v46 = vmul.f32 0.5, %v7443_v3 }
 0x474   :  { %v1590_v24 = vsub.f32 0.0, %v1556_v15  ;;  %v1438_v60 = vadd.f32 0.2548296, %v1421_v37 }
 0x475   :  { %v1681_v30 = vpop.xlane.xlu2 %1680  ;;  %v1354_v58 = vmul.f32 %v1337_v38, %v1302_v7  ;;  %5973 = vpow2.f32 %v1523_v28 }
 0x476   :  { %v1737_v29 = vmul.f32 %v7489_v56, %v1681_v30  ;;  %v1607_v22 = vsel %vm1573_vm6, %v1590_v24, %v1556_v15  ;;  %v1455_v55 = vmul.f32 %v1438_v60, %v1287_v47  ;;  %v7528_v15 = vld [vmem:[#allocation2 + $0x48] sm:$0xff] }
 0x477   :  { %v1624_v5 = vadd.f32 1.0, %v1607_v22  ;;  %v1371_v32 = vadd.f32 1.4214138, %v1354_v58  ;;  %v1706_v37 = vsel %vm1644_vm7, %v7528_v15, 0.0 }
 0x478   :  { %v7495_v41 = vsub.f32 %v6181_v0, %v1737_v29  ;;  %v1540_v42 = vmul.f32 %v5972_v2, %v1455_v55 }
 0x479   :  { %v1641_v4 = vmul.f32 %v1624_v5, %v978_v36  ;;  %v1388_v16 = vmul.f32 %v1371_v32, %v1302_v7  ;;  %v7553_v36 = vld [vmem:[#allocation2 + $0x50] sm:$0xff]  ;;  %v7555_v5 = vld [vmem:[#allocation2 + $0x58] sm:$0xff] }
 0x47a   :  { %v1771_v54 = vmul.f32 %v7495_v41, %v7495_v41  ;;  %v1557_v40 = vsub.f32 1.0, %v1540_v42  ;;  %v1709_v0 = vsel %vm1644_vm7, %v7553_v36, 0.0  ;;  %v7561_v42 = vld [vmem:[#allocation2 + $0x60] sm:$0xff] }
 0x47b   :  { %1659 = vst.msk [vmem:[#allocation2 + $0x70] sm:$0xff] %vm1644_vm7, %v1641_v4  ;;  %v1405_v12 = vadd.f32 -0.28449672, %v1388_v16  ;;  %v5974_v23 = vpop.eup %5973  ;;  %v1715_v28 = vsel %vm1644_vm7, %v7561_v42, 0.0 }
 0x47c   :  { %v1684_v47 = vpop.xlane.xlu1 %1683  ;;  %v1788_v52 = vsel %vm1644_vm7, %v1771_v54, 0.0  ;;  %v1591_v57 = vsub.f32 0.0, %v1557_v40 }
 0x47d   :  { %v1738_v51 = vmul.f32 %v7489_v56, %v1684_v47  ;;  %1789 = vadd.xlane.f32.xlu2 %v1788_v52  ;;  %v1422_v11 = vmul.f32 %v1405_v12, %v1302_v7  ;;  %v7572_v47 = vld [vmem:[#allocation2 + $0x68] sm:$0xff] }
 0x47e   :  { %v1608_v61 = vsel %vm1574_vm8, %v1591_v57, %v1557_v40  ;;  %v1718_v52 = vsel %vm1644_vm7, %v7572_v47, 0.0 }
 0x47f   :  { %v7503_v20 = vsub.f32 %v6182_v34, %v1738_v51  ;;  %v1625_v43 = vadd.f32 1.0, %v1608_v61  ;;  %v1439_v1 = vadd.f32 0.2548296, %v1422_v11  ;;  %v2062_v61 = vld [vmem:[%s10522_s5 + $0x10] sm:$0xff] }
 0x481   :  { %v1772_v8 = vmul.f32 %v7503_v20, %v7503_v20  ;;  %v1642_v17 = vmul.f32 %v1625_v43, %v979_v19  ;;  %v1456_v45 = vmul.f32 %v1439_v1, %v1302_v7  ;;  %v2061_v43 = vld [vmem:[%s10522_s5 + $0x8] sm:$0xff] }
 0x483   :  { %v1791_v49 = vsel %vm1644_vm7, %v1772_v8, 0.0  ;;  %1660 = vst.msk [vmem:[#allocation2 + $0x78] sm:$0xff] %vm1644_vm7, %v1642_v17  ;;  %v1541_v35 = vmul.f32 %v5974_v23, %v1456_v45  ;;  %v2060_v17 = vld [vmem:[%s10522_s5] sm:$0xff] }
 0x484   :  { %1792 = vadd.xlane.f32.xlu0 %v1791_v49 }
 0x485   :  { %1701 = vadd.xlane.f32.xlu2 %v1700_v33  ;;  %v1558_v25 = vsub.f32 1.0, %v1541_v35 }
 0x487   :  { %v1592_v48 = vsub.f32 0.0, %v1558_v25 }
 0x489   :  { %v1687_v53 = vpop.xlane.xlu0 %1686  ;;  %v1609_v9 = vsel %vm1575_vm9, %v1592_v48, %v1558_v25 }
 0x48a   :  { %v1739_v39 = vmul.f32 %v7489_v56, %v1687_v53  ;;  %v1626_v14 = vadd.f32 1.0, %v1609_v9 }
 0x48c   :  { %v7522_v7 = vsub.f32 %v7188_v27, %v1739_v39  ;;  %1704 = vadd.xlane.f32.xlu0 %v1703_v18  ;;  %v1643_v59 = vmul.f32 %v1626_v14, %v980_v46 }
 0x48e   :  { %v1773_v63 = vmul.f32 %v7522_v7, %v7522_v7  ;;  %1661 = vst.msk [vmem:[#allocation2 + $0x80] sm:$0xff] %vm1644_vm7, %v1643_v59 }
 0x490   :  { %v1794_v44 = vsel %vm1644_vm7, %v1773_v63, 0.0  ;;  %v7603_v63 = vld [vmem:[#allocation2 + $0x70] sm:$0xff] }
 0x491   :  { %1795 = vadd.xlane.f32.xlu1 %v1794_v44 }
 0x499   :  { %1707 = vadd.xlane.f32.xlu1 %v1706_v37 }
 0x49a   :  { %v1690_v3 = vpop.xlane.xlu2 %1689  ;;  %v1693_v62 = vpop.xlane.xlu1 %1692 }
 0x49b   :  { %v1740_v27 = vmul.f32 %v7489_v56, %v1690_v3  ;;  %v1741_v24 = vmul.f32 %v7489_v56, %v1693_v62 }
 0x49d   :  { %v7535_v60 = vsub.f32 %v7248_v50, %v1740_v27  ;;  %v7538_v38 = vsub.f32 %v7257_v26, %v1741_v24 }
 0x49e   :  { %v1696_v30 = vpop.xlane.xlu0 %1695 }
 0x49f   :  { %v1774_v21 = vmul.f32 %v7535_v60, %v7535_v60  ;;  %v1742_v29 = vmul.f32 %v7489_v56, %v1696_v30  ;;  %v1775_v22 = vmul.f32 %v7538_v38, %v7538_v38 }
 0x4a1   :  { %v1797_v55 = vsel %vm1644_vm7, %v1774_v21, 0.0  ;;  %v7547_v58 = vsub.f32 %v7269_v10, %v1742_v29  ;;  %v1800_v50 = vsel %vm1644_vm7, %v1775_v22, 0.0  ;;  %v1712_v10 = vsel %vm1644_vm7, %v7555_v5, 0.0  ;;  %v7611_v22 = vld [vmem:[#allocation2 + $0x78] sm:$0xff] }
 0x4a2   :  { %1798 = vadd.xlane.f32.xlu2 %v1797_v55  ;;  %1801 = vadd.xlane.f32.xlu0 %v1800_v50 }
 0x4a3   :  { %v1776_v26 = vmul.f32 %v7547_v58, %v7547_v58 }
 0x4a5   :  { %v1803_v2 = vsel %vm1644_vm7, %v1776_v26, 0.0 }
 0x4a6   :  { %1804 = vadd.xlane.f32.xlu1 %v1803_v2 }
 0x4a8   :  { %v1699_v32 = vpop.xlane.xlu1 %1698 }
 0x4a9   :  { %v1743_v4 = vmul.f32 %v7489_v56, %v1699_v32 }
 0x4aa   :  { %1710 = vadd.xlane.f32.xlu2 %v1709_v0  ;;  %1713 = vadd.xlane.f32.xlu0 %v1712_v10  ;;  %v1724_v0 = vsel %vm1644_vm7, %v7611_v22, 0.0 }
 0x4ab   :  { %v7567_v54 = vsub.f32 %v7324_v31, %v1743_v4  ;;  %v2063_v31 = vld [vmem:[%s10522_s5 + $0x18] sm:$0xff] }
 0x4ac   :  { %2127 = vmatpush.msra.mxu3 %v2063_v31 }
 0x4ad   :  { %v1777_v40 = vmul.f32 %v7567_v54, %v7567_v54 }
 0x4ae   :  { %1716 = vadd.xlane.f32.xlu1 %v1715_v28  ;;  %2128 = vmatpush.msra.mxu3 %v2062_v61 }
 0x4af   :  { %v1806_v16 = vsel %vm1644_vm7, %v1777_v40, 0.0 }
 0x4b0   :  { %2129 = vmatpush.msra.mxu3 %v2061_v43 }
 0x4b2   :  { %1807 = vadd.xlane.f32.xlu2 %v1806_v16  ;;  %2130 = vmatpush.msra.mxu3 %v2060_v17 }
 0x4ba   :  { %1719 = vadd.xlane.f32.xlu2 %v1718_v52 }
 0x4f0   :  { %v1790_v57 = vpop.xlane.xlu2 %1789 }
 0x4f1   :  { %v1839_v12 = vmul.f32 %v1790_v57, %v7489_v56 }
 0x4f3   :  { %v1856_v51 = vadd.f32 1e-05, %v1839_v12 }
 0x4f5   :  { %5975 = vrsqrt.f32 %v1856_v51  ;;  %vm1879_vm11 = vweird.f32 %v1856_v51 }
 0x4f7   :  { %v1793_v11 = vpop.xlane.xlu0 %1792 }
 0x4f8   :  { %v1840_v34 = vmul.f32 %v1793_v11, %v7489_v56  ;;  %v1702_v19 = vpop.xlane.xlu2 %1701 }
 0x4f9   :  { %v1744_v1 = vmul.f32 %v7489_v56, %v1702_v19 }
 0x4fa   :  { %v1857_v8 = vadd.f32 1e-05, %v1840_v34 }
 0x4fb   :  { %v5976_v45 = vpop.eup %5975  ;;  %v7592_v49 = vsub.f32 %v7508_v13, %v1744_v1 }
 0x4fc   :  { %v1874_v23 = vmul.f32 %v5976_v45, %v1856_v51  ;;  %5977 = vrsqrt.f32 %v1857_v8  ;;  %vm1880_vm10 = vweird.f32 %v5976_v45  ;;  %vm1889_vm14 = vweird.f32 %v1857_v8 }
 0x4fd   :  { %v1778_v33 = vmul.f32 %v7592_v49, %v7592_v49  ;;  %vm1881_vm12 = vmor %vm1879_vm11, %vm1880_vm10 }
 0x4fe   :  { %v1875_v35 = vmul.f32 %v5976_v45, %v1874_v23 }
 0x4ff   :  { %v1705_v25 = vpop.xlane.xlu0 %1704  ;;  %v1809_v48 = vsel %vm1644_vm7, %v1778_v33, 0.0 }
 0x500   :  { %v1876_v53 = vmul.f32 0.5, %v1875_v35  ;;  %v1745_v39 = vmul.f32 %v7489_v56, %v1705_v25  ;;  %1810 = vadd.xlane.f32.xlu0 %v1809_v48 }
 0x502   :  { %v5978_v9 = vpop.eup %5977  ;;  %v1877_v18 = vsub.f32 1.5, %v1876_v53  ;;  %v7599_v13 = vsub.f32 %v7514_v6, %v1745_v39  ;;  %v1721_v6 = vsel %vm1644_vm7, %v7603_v63, 0.0 }
 0x503   :  { %v1884_v46 = vmul.f32 %v5978_v9, %v1857_v8  ;;  %vm1890_vm13 = vweird.f32 %v5978_v9 }
 0x504   :  { %v1796_v14 = vpop.xlane.xlu1 %1795  ;;  %v1779_v59 = vmul.f32 %v7599_v13, %v7599_v13  ;;  %v1878_v44 = vmul.f32 %v5976_v45, %v1877_v18  ;;  %vm1891_vm15 = vmor %vm1889_vm14, %vm1890_vm13 }
 0x505   :  { %v1885_v37 = vmul.f32 %v5978_v9, %v1884_v46  ;;  %v1841_v3 = vmul.f32 %v1796_v14, %v7489_v56 }
 0x506   :  { %v1812_v27 = vsel %vm1644_vm7, %v1779_v59, 0.0  ;;  %v1882_v62 = vsel %vm1881_vm12, %v5976_v45, %v1878_v44 }
 0x507   :  { %v1886_v24 = vmul.f32 0.5, %v1885_v37  ;;  %v1858_v30 = vadd.f32 1e-05, %v1841_v3  ;;  %1813 = vadd.xlane.f32.xlu1 %v1812_v27  ;;  %v2043_v21 = vmul.f32 %v1882_v62, %v7495_v41 }
 0x508   :  { %1722 = vadd.xlane.f32.xlu0 %v1721_v6 }
 0x509   :  { %v1887_v29 = vsub.f32 1.5, %v1886_v24  ;;  %5979 = vrsqrt.f32 %v1858_v30  ;;  %5568 = vmatmul.msk.f32.vlgmr.msra.gmra.mxu3 %vm1644_vm7, %v2043_v21  ;;  %vm1899_vm2 = vweird.f32 %v1858_v30 }
 0x50b   :  { %v1888_v55 = vmul.f32 %v5978_v9, %v1887_v29 }
 0x50c   :  { %v1708_v50 = vpop.xlane.xlu1 %1707 }
 0x50d   :  { %v1746_v26 = vmul.f32 %v7489_v56, %v1708_v50  ;;  %v1892_v2 = vsel %vm1891_vm15, %v5978_v9, %v1888_v55 }
 0x50e   :  { %v2044_v41 = vmul.f32 %v1892_v2, %v7503_v20  ;;  %v7655_v2 = vld [vmem:[#allocation2 + $0x80] sm:$0xff] }
 0x50f   :  { %v5980_v10 = vpop.eup %5979  ;;  %v7618_v32 = vsub.f32 %v7528_v15, %v1746_v26  ;;  %1725 = vadd.xlane.f32.xlu1 %v1724_v0 }
 0x510   :  { %v1894_v4 = vmul.f32 %v5980_v10, %v1858_v30  ;;  %vm1900_vm1 = vweird.f32 %v5980_v10 }
 0x511   :  { %v1780_v28 = vmul.f32 %v7618_v32, %v7618_v32  ;;  %5569 = vmatmul.msk.f32.gmra.mxu3 %vm1644_vm7, %v2044_v41  ;;  %vm1901_vm3 = vmor %vm1899_vm2, %vm1900_vm1 }
 0x512   :  { %v1895_v40 = vmul.f32 %v5980_v10, %v1894_v4 }
 0x513   :  { %v1815_v16 = vsel %vm1644_vm7, %v1780_v28, 0.0  ;;  %v1727_v28 = vsel %vm1644_vm7, %v7655_v2, 0.0 }
 0x514   :  { %v1896_v52 = vmul.f32 0.5, %v1895_v40  ;;  %1816 = vadd.xlane.f32.xlu2 %v1815_v16 }
 0x515   :  { %v1799_v57 = vpop.xlane.xlu2 %1798  ;;  %v1802_v20 = vpop.xlane.xlu0 %1801 }
 0x516   :  { %v1842_v12 = vmul.f32 %v1799_v57, %v7489_v56  ;;  %v1897_v51 = vsub.f32 1.5, %v1896_v52  ;;  %v1843_v15 = vmul.f32 %v1802_v20, %v7489_v56 }
 0x518   :  { %v1859_v31 = vadd.f32 1e-05, %v1842_v12  ;;  %v1860_v61 = vadd.f32 1e-05, %v1843_v15  ;;  %v1898_v34 = vmul.f32 %v5980_v10, %v1897_v51 }
 0x519   :  { %v1805_v11 = vpop.xlane.xlu1 %1804 }
 0x51a   :  { %5981 = vrsqrt.f32 %v1859_v31  ;;  %v1844_v19 = vmul.f32 %v1805_v11, %v7489_v56  ;;  %v1902_v43 = vsel %vm1901_vm3, %v5980_v10, %v1898_v34  ;;  %vm1909_vm5 = vweird.f32 %v1859_v31 }
 0x51b   :  { %5983 = vrsqrt.f32 %v1860_v61  ;;  %v2045_v8 = vmul.f32 %v1902_v43, %v7522_v7  ;;  %vm1919_vm9 = vweird.f32 %v1860_v61 }
 0x51c   :  { %v7627_v1 = vadd.f32 1e-05, %v1844_v19 }
 0x51d   :  { %v1711_v17 = vpop.xlane.xlu2 %1710  ;;  %v1714_v23 = vpop.xlane.xlu0 %1713  ;;  %5570 = vmatmul.msk.f32.gmra.mxu3 %vm1644_vm7, %v2045_v8 }
 0x51e   :  { %v1747_v45 = vmul.f32 %v7489_v56, %v1711_v17  ;;  %5985 = vrsqrt.f32 %v7627_v1  ;;  %v1748_v33 = vmul.f32 %v7489_v56, %v1714_v23  ;;  %vm1929_vm12 = vweird.f32 %v7627_v1 }
 0x520   :  { %v5982_v35 = vpop.eup %5981  ;;  %v7635_v25 = vsub.f32 %v7553_v36, %v1747_v45  ;;  %v7638_v39 = vsub.f32 %v7555_v5, %v1748_v33 }
 0x521   :  { %v5984_v48 = vpop.eup %5983  ;;  %v1904_v53 = vmul.f32 %v5982_v35, %v1859_v31  ;;  %v1717_v7 = vpop.xlane.xlu1 %1716  ;;  %vm1910_vm4 = vweird.f32 %v5982_v35 }
 0x522   :  { %v1914_v9 = vmul.f32 %v5984_v48, %v1860_v61  ;;  %v1781_v18 = vmul.f32 %v7635_v25, %v7635_v25  ;;  %v1749_v46 = vmul.f32 %v7489_v56, %v1717_v7  ;;  %v1782_v59 = vmul.f32 %v7638_v39, %v7638_v39  ;;  %vm1911_vm6 = vmor %vm1909_vm5, %vm1910_vm4 }
 0x523   :  { %v1905_v14 = vmul.f32 %v5982_v35, %v1904_v53  ;;  %vm1920_vm8 = vweird.f32 %v5984_v48 }
 0x524   :  { %v5986_v44 = vpop.eup %5985  ;;  %v1915_v37 = vmul.f32 %v5984_v48, %v1914_v9  ;;  %v1818_v36 = vsel %vm1644_vm7, %v1781_v18, 0.0  ;;  %v7647_v3 = vsub.f32 %v7561_v42, %v1749_v46  ;;  %v1821_v62 = vsel %vm1644_vm7, %v1782_v59, 0.0  ;;  %vm1921_vm10 = vmor %vm1919_vm9, %vm1920_vm8 }
 0x525   :  { %v1906_v5 = vmul.f32 0.5, %v1905_v14  ;;  %v1924_v27 = vmul.f32 %v5986_v44, %v7627_v1  ;;  %1819 = vadd.xlane.f32.xlu0 %v1818_v36  ;;  %v1808_v30 = vpop.xlane.xlu2 %1807  ;;  %1822 = vadd.xlane.f32.xlu2 %v1821_v62  ;;  %vm1930_vm11 = vweird.f32 %v5986_v44 }
 0x526   :  { %v1916_v24 = vmul.f32 0.5, %v1915_v37  ;;  %v1783_v6 = vmul.f32 %v7647_v3, %v7647_v3  ;;  %v1845_v55 = vmul.f32 %v1808_v30, %v7489_v56  ;;  %vm1931_vm13 = vmor %vm1929_vm12, %vm1930_vm11 }
 0x527   :  { %v1907_v21 = vsub.f32 1.5, %v1906_v5  ;;  %v1925_v29 = vmul.f32 %v5986_v44, %v1924_v27 }
 0x528   :  { %v1917_v50 = vsub.f32 1.5, %v1916_v24  ;;  %v1824_v42 = vsel %vm1644_vm7, %v1783_v6, 0.0  ;;  %v1862_v26 = vadd.f32 1e-05, %v1845_v55 }
 0x529   :  { %v1908_v0 = vmul.f32 %v5982_v35, %v1907_v21  ;;  %1825 = vadd.xlane.f32.xlu1 %v1824_v42  ;;  %v1926_v41 = vmul.f32 0.5, %v1925_v29 }
 0x52a   :  { %5987 = vrsqrt.f32 %v1862_v26  ;;  %v1918_v4 = vmul.f32 %v5984_v48, %v1917_v50  ;;  %vm1939_vm15 = vweird.f32 %v1862_v26 }
 0x52b   :  { %v1912_v10 = vsel %vm1911_vm6, %v5982_v35, %v1908_v0  ;;  %v1927_v52 = vsub.f32 1.5, %v1926_v41 }
 0x52c   :  { %v2046_v40 = vmul.f32 %v1912_v10, %v7535_v60  ;;  %v1922_v12 = vsel %vm1921_vm10, %v5984_v48, %v1918_v4 }
 0x52d   :  { %1728 = vadd.xlane.f32.xlu0 %v1727_v28  ;;  %v1720_v16 = vpop.xlane.xlu2 %1719  ;;  %v2047_v31 = vmul.f32 %v1922_v12, %v7538_v38  ;;  %v1928_v61 = vmul.f32 %v5986_v44, %v1927_v52 }
 0x52e   :  { %5571 = vmatmul.msk.f32.gmra.mxu3 %vm1644_vm7, %v2046_v40  ;;  %v1750_v57 = vmul.f32 %v7489_v56, %v1720_v16 }
 0x530   :  { %v5988_v20 = vpop.eup %5987  ;;  %v7663_v51 = vsub.f32 %v7572_v47, %v1750_v57  ;;  %v1932_v47 = vsel %vm1931_vm13, %v5986_v44, %v1928_v61 }
 0x531   :  { %v1934_v15 = vmul.f32 %v5988_v20, %v1862_v26  ;;  %v2048_v8 = vmul.f32 %v1932_v47, %v7547_v58  ;;  %vm1940_vm14 = vweird.f32 %v5988_v20 }
 0x532   :  { %v1784_v60 = vmul.f32 %v7663_v51, %v7663_v51  ;;  %vm1941_vm1 = vmor %vm1939_vm15, %vm1940_vm14 }
 0x533   :  { %v1935_v11 = vmul.f32 %v5988_v20, %v1934_v15 }
 0x534   :  { %v1827_v34 = vsel %vm1644_vm7, %v1784_v60, 0.0 }
 0x535   :  { %v1936_v19 = vmul.f32 0.5, %v1935_v11  ;;  %1828 = vadd.xlane.f32.xlu2 %v1827_v34 }
 0x536   :  { %5572 = vmatmul.msk.f32.gmra.mxu3 %vm1644_vm7, %v2047_v31 }
 0x537   :  { %v1937_v43 = vsub.f32 1.5, %v1936_v19 }
 0x539   :  { %v1938_v38 = vmul.f32 %v5988_v20, %v1937_v43 }
 0x53b   :  { %v1942_v17 = vsel %vm1941_vm1, %v5988_v20, %v1938_v38 }
 0x53c   :  { %v2049_v1 = vmul.f32 %v1942_v17, %v7567_v54 }
 0x53e   :  { %5573 = vmatmul.msk.f32.gmra.mxu3 %vm1644_vm7, %v2048_v8 }
 0x546   :  { %5574 = vmatmul.msk.f32.gmra.mxu3 %vm1644_vm7, %v2049_v1 }
 0x573   :  { %v1811_v45 = vpop.xlane.xlu0 %1810 }
 0x574   :  { %v1846_v23 = vmul.f32 %v1811_v45, %v7489_v56 }
 0x576   :  { %v1863_v33 = vadd.f32 1e-05, %v1846_v23 }
 0x578   :  { %5989 = vrsqrt.f32 %v1863_v33  ;;  %vm1949_vm3 = vweird.f32 %v1863_v33 }
 0x57a   :  { %v1814_v35 = vpop.xlane.xlu1 %1813 }
 0x57b   :  { %v1847_v48 = vmul.f32 %v1814_v35, %v7489_v56  ;;  %v1723_v58 = vpop.xlane.xlu0 %1722 }
 0x57c   :  { %v1751_v53 = vmul.f32 %v7489_v56, %v1723_v58 }
 0x57d   :  { %v1864_v7 = vadd.f32 1e-05, %v1847_v48 }
 0x57e   :  { %v5990_v9 = vpop.eup %5989  ;;  %v7679_v18 = vsub.f32 %v7603_v63, %v1751_v53 }
 0x57f   :  { %v1944_v46 = vmul.f32 %v5990_v9, %v1863_v33  ;;  %5991 = vrsqrt.f32 %v1864_v7  ;;  %vm1950_vm2 = vweird.f32 %v5990_v9  ;;  %vm1959_vm6 = vweird.f32 %v1864_v7 }
 0x580   :  { %v1785_v54 = vmul.f32 %v7679_v18, %v7679_v18  ;;  %vm1951_vm4 = vmor %vm1949_vm3, %vm1950_vm2 }
 0x581   :  { %v1945_v14 = vmul.f32 %v5990_v9, %v1944_v46 }
 0x582   :  { %v1830_v59 = vsel %vm1644_vm7, %v1785_v54, 0.0  ;;  %v1726_v44 = vpop.xlane.xlu1 %1725 }
 0x583   :  { %v1946_v37 = vmul.f32 0.5, %v1945_v14  ;;  %1831 = vadd.xlane.f32.xlu1 %v1830_v59  ;;  %v1752_v36 = vmul.f32 %v7489_v56, %v1726_v44 }
 0x585   :  { %v5992_v5 = vpop.eup %5991  ;;  %v1947_v27 = vsub.f32 1.5, %v1946_v37  ;;  %v7686_v62 = vsub.f32 %v7611_v22, %v1752_v36 }
 0x586   :  { %v1954_v63 = vmul.f32 %v5992_v5, %v1864_v7  ;;  %vm1960_vm5 = vweird.f32 %v5992_v5 }
 0x587   :  { %v1817_v24 = vpop.xlane.xlu2 %1816  ;;  %v1786_v30 = vmul.f32 %v7686_v62, %v7686_v62  ;;  %v1948_v6 = vmul.f32 %v5990_v9, %v1947_v27  ;;  %vm1961_vm8 = vmor %vm1959_vm6, %vm1960_vm5 }
 0x588   :  { %v1955_v21 = vmul.f32 %v5992_v5, %v1954_v63  ;;  %v1848_v29 = vmul.f32 %v1817_v24, %v7489_v56 }
 0x589   :  { %v1833_v55 = vsel %vm1644_vm7, %v1786_v30, 0.0  ;;  %v1952_v50 = vsel %vm1951_vm4, %v5990_v9, %v1948_v6 }
 0x58a   :  { %v1956_v42 = vmul.f32 0.5, %v1955_v21  ;;  %v1865_v26 = vadd.f32 1e-05, %v1848_v29  ;;  %1834 = vadd.xlane.f32.xlu0 %v1833_v55  ;;  %v2050_v22 = vmul.f32 %v1952_v50, %v7592_v49 }
 0x58c   :  { %v1957_v0 = vsub.f32 1.5, %v1956_v42  ;;  %5993 = vrsqrt.f32 %v1865_v26  ;;  %5575 = vmatmul.msk.f32.gmra.mxu3 %vm1644_vm7, %v2050_v22  ;;  %vm1969_vm10 = vweird.f32 %v1865_v26 }
 0x58e   :  { %v1958_v41 = vmul.f32 %v5992_v5, %v1957_v0 }
 0x590   :  { %v1962_v10 = vsel %vm1961_vm8, %v5992_v5, %v1958_v41 }
 0x591   :  { %v2051_v4 = vmul.f32 %v1962_v10, %v7599_v13  ;;  %v7717_v10 = vpop.f32.mrf.mxu3 }
 0x592   :  { %v5994_v28 = vpop.eup %5993 }
 0x593   :  { %v1964_v40 = vmul.f32 %v5994_v28, %v1865_v26  ;;  %vm1970_vm9 = vweird.f32 %v5994_v28 }
 0x594   :  { %5576 = vmatmul.msk.f32.gmra.mxu3 %vm1644_vm7, %v2051_v4  ;;  %vm1971_vm11 = vmor %vm1969_vm10, %vm1970_vm9 }
 0x595   :  { %v1965_v16 = vmul.f32 %v5994_v28, %v1964_v40 }
 0x597   :  { %v1966_v52 = vmul.f32 0.5, %v1965_v16 }
 0x598   :  { %v1820_v57 = vpop.xlane.xlu0 %1819  ;;  %v1823_v12 = vpop.xlane.xlu2 %1822 }
 0x599   :  { %v1849_v49 = vmul.f32 %v1820_v57, %v7489_v56  ;;  %v1967_v20 = vsub.f32 1.5, %v1966_v52  ;;  %v1850_v15 = vmul.f32 %v1823_v12, %v7489_v56  ;;  %v7719_v4 = vpop.f32.mrf.mxu3 }
 0x59b   :  { %v1866_v31 = vadd.f32 1e-05, %v1849_v49  ;;  %v1867_v60 = vadd.f32 1e-05, %v1850_v15  ;;  %v1968_v11 = vmul.f32 %v5994_v28, %v1967_v20 }
 0x59c   :  { %v1826_v61 = vpop.xlane.xlu1 %1825 }
 0x59d   :  { %5995 = vrsqrt.f32 %v1866_v31  ;;  %v1851_v13 = vmul.f32 %v1826_v61, %v7489_v56  ;;  %v1972_v34 = vsel %vm1971_vm11, %v5994_v28, %v1968_v11  ;;  %vm1979_vm13 = vweird.f32 %v1866_v31 }
 0x59e   :  { %5997 = vrsqrt.f32 %v1867_v60  ;;  %v2052_v47 = vmul.f32 %v1972_v34, %v7618_v32  ;;  %vm1989_vm1 = vweird.f32 %v1867_v60 }
 0x59f   :  { %v1868_v19 = vadd.f32 1e-05, %v1851_v13 }
 0x5a0   :  { %v1729_v43 = vpop.xlane.xlu0 %1728  ;;  %5577 = vmatmul.msk.f32.gmra.mxu3 %vm1644_vm7, %v2052_v47 }
 0x5a1   :  { %v1753_v8 = vmul.f32 %v7489_v56, %v1729_v43  ;;  %5999 = vrsqrt.f32 %v1868_v19  ;;  %vm1999_vm4 = vweird.f32 %v1868_v19  ;;  %v7721_v28 = vpop.f32.mrf.mxu3 }
 0x5a3   :  { %v5996_v38 = vpop.eup %5995  ;;  %v7703_v17 = vsub.f32 %v7655_v2, %v1753_v8 }
 0x5a4   :  { %v5998_v1 = vpop.eup %5997  ;;  %v1974_v45 = vmul.f32 %v5996_v38, %v1866_v31  ;;  %vm1980_vm12 = vweird.f32 %v5996_v38 }
 0x5a5   :  { %v1984_v23 = vmul.f32 %v5998_v1, %v1867_v60  ;;  %v1787_v33 = vmul.f32 %v7703_v17, %v7703_v17  ;;  %vm1981_vm14 = vmor %vm1979_vm13, %vm1980_vm12  ;;  %vm1990_vm15 = vweird.f32 %v5998_v1 }
 0x5a6   :  { %v1975_v35 = vmul.f32 %v5996_v38, %v1974_v45  ;;  %vm1991_vm2 = vmor %vm1989_vm1, %vm1990_vm15 }
 0x5a7   :  { %v6000_v48 = vpop.eup %5999  ;;  %v1985_v58 = vmul.f32 %v5998_v1, %v1984_v23  ;;  %v1836_v32 = vsel %vm1644_vm7, %v1787_v33, 0.0 }
 0x5a8   :  { %v1976_v53 = vmul.f32 0.5, %v1975_v35  ;;  %v1994_v7 = vmul.f32 %v6000_v48, %v1868_v19  ;;  %1837 = vadd.xlane.f32.xlu2 %v1836_v32  ;;  %v1829_v46 = vpop.xlane.xlu2 %1828  ;;  %vm2000_vm3 = vweird.f32 %v6000_v48 }
 0x5a9   :  { %v1986_v9 = vmul.f32 0.5, %v1985_v58  ;;  %v1852_v14 = vmul.f32 %v1829_v46, %v7489_v56  ;;  %vm2001_vm5 = vmor %vm1999_vm4, %vm2000_vm3 }
 0x5aa   :  { %v1977_v54 = vsub.f32 1.5, %v1976_v53  ;;  %v1995_v2 = vmul.f32 %v6000_v48, %v1994_v7 }
 0x5ab   :  { %v1987_v59 = vsub.f32 1.5, %v1986_v9  ;;  %v1869_v44 = vadd.f32 1e-05, %v1852_v14 }
 0x5ac   :  { %v1978_v37 = vmul.f32 %v5996_v38, %v1977_v54  ;;  %v1996_v36 = vmul.f32 0.5, %v1995_v2 }
 0x5ad   :  { %6001 = vrsqrt.f32 %v1869_v44  ;;  %v1988_v27 = vmul.f32 %v5998_v1, %v1987_v59  ;;  %vm2009_vm8 = vweird.f32 %v1869_v44 }
 0x5ae   :  { %v1982_v5 = vsel %vm1981_vm14, %v5996_v38, %v1978_v37  ;;  %v1997_v24 = vsub.f32 1.5, %v1996_v36  ;;  %v2194_v36 = vld [vmem:[%s10523_s6 + $0x58] sm:$0xff] }
 0x5af   :  { %v2053_v63 = vmul.f32 %v1982_v5, %v7635_v25  ;;  %v1992_v30 = vsel %vm1991_vm2, %v5998_v1, %v1988_v27 }
 0x5b0   :  { %v2054_v29 = vmul.f32 %v1992_v30, %v7638_v39  ;;  %v1998_v55 = vmul.f32 %v6000_v48, %v1997_v24  ;;  %v2187_v30 = vld [vmem:[%s10523_s6 + $0x20] sm:$0xff] }
 0x5b1   :  { %5578 = vmatmul.msk.f32.gmra.mxu3 %vm1644_vm7, %v2053_v63  ;;  %v7723_v40 = vpop.f32.mrf.mxu3 }
 0x5b2   :  { %v2002_v26 = vsel %vm2001_vm5, %v6000_v48, %v1998_v55 }
 0x5b3   :  { %v6002_v6 = vpop.eup %6001  ;;  %v2055_v22 = vmul.f32 %v2002_v26, %v7647_v3 }
 0x5b4   :  { %v2004_v21 = vmul.f32 %v6002_v6, %v1869_v44  ;;  %vm2010_vm6 = vweird.f32 %v6002_v6 }
 0x5b5   :  { %vm2011_vm9 = vmor %vm2009_vm8, %vm2010_vm6 }
 0x5b6   :  { %v2005_v50 = vmul.f32 %v6002_v6, %v2004_v21 }
 0x5b8   :  { %v2006_v42 = vmul.f32 0.5, %v2005_v50  ;;  %v2195_v50 = vld [vmem:[%s10523_s6 + $0x60] sm:$0xff] }
 0x5b9   :  { %5579 = vmatmul.msk.f32.gmra.mxu3 %vm1644_vm7, %v2054_v29  ;;  %v7726_v52 = vpop.f32.mrf.mxu3 }
 0x5ba   :  { %v2007_v25 = vsub.f32 1.5, %v2006_v42  ;;  %v7762_v29 = vmul.f32 %v2187_v30, %v7726_v52  ;;  %v2196_v42 = vld [vmem:[%s10523_s6 + $0x68] sm:$0xff] }
 0x5bc   :  { %v2008_v0 = vmul.f32 %v6002_v6, %v2007_v25 }
 0x5be   :  { %v2012_v41 = vsel %vm2011_vm9, %v6002_v6, %v2008_v0 }
 0x5bf   :  { %v2056_v39 = vmul.f32 %v2012_v41, %v7663_v51  ;;  %v2192_v41 = vld [vmem:[%s10523_s6 + $0x48] sm:$0xff] }
 0x5c1   :  { %5580 = vmatmul.msk.f32.gmra.mxu3 %vm1644_vm7, %v2055_v22  ;;  %v2147_v31 = vpop.f32.mrf.mxu3 }
 0x5c9   :  { %5581 = vmatmul.msk.f32.gmra.mxu3 %vm1644_vm7, %v2056_v39  ;;  %v7729_v8 = vpop.f32.mrf.mxu3  ;;  %v2191_v39 = vld [vmem:[%s10523_s6 + $0x40] sm:$0xff] }
 0x5f6   :  { %v1832_v3 = vpop.xlane.xlu1 %1831 }
 0x5f7   :  { %v1853_v16 = vmul.f32 %v1832_v3, %v7489_v56 }
 0x5f9   :  { %v1870_v57 = vadd.f32 1e-05, %v1853_v16 }
 0x5fb   :  { %6003 = vrsqrt.f32 %v1870_v57  ;;  %vm2019_vm11 = vweird.f32 %v1870_v57 }
 0x5fd   :  { %v1835_v49 = vpop.xlane.xlu0 %1834 }
 0x5fe   :  { %v1854_v51 = vmul.f32 %v1835_v49, %v7489_v56  ;;  %v2185_v49 = vld [vmem:[%s10523_s6 + $0x10] sm:$0xff] }
 0x600   :  { %v1871_v12 = vadd.f32 1e-05, %v1854_v51 }
 0x601   :  { %v6004_v20 = vpop.eup %6003 }
 0x602   :  { %v2014_v15 = vmul.f32 %v6004_v20, %v1870_v57  ;;  %6005 = vrsqrt.f32 %v1871_v12  ;;  %vm2020_vm10 = vweird.f32 %v6004_v20  ;;  %vm2029_vm14 = vweird.f32 %v1871_v12  ;;  %v2186_v57 = vld [vmem:[%s10523_s6 + $0x18] sm:$0xff] }
 0x603   :  { %vm2021_vm12 = vmor %vm2019_vm11, %vm2020_vm10  ;;  %v7800_v51 = vmul.f32 %v2186_v57, %v7723_v40  ;;  %v2219_v57 = vld [vmem:[%s10524_s8 + $0x10] sm:$0xff] }
 0x604   :  { %v2015_v60 = vmul.f32 %v6004_v20, %v2014_v15 }
 0x606   :  { %v2016_v61 = vmul.f32 0.5, %v2015_v60  ;;  %v2198_v60 = vld [vmem:[%s10523_s6 + $0x78] sm:$0xff] }
 0x608   :  { %v6006_v11 = vpop.eup %6005  ;;  %v2017_v13 = vsub.f32 1.5, %v2016_v61 }
 0x609   :  { %v2024_v34 = vmul.f32 %v6006_v11, %v1871_v12  ;;  %vm2030_vm13 = vweird.f32 %v6006_v11  ;;  %v7803_v12 = vmul.f32 %v2185_v49, %v7721_v28  ;;  %v2228_v49 = vld [vmem:[%s10524_s8 + $0x58] sm:$0xff] }
 0x60a   :  { %v2018_v19 = vmul.f32 %v6004_v20, %v2017_v13  ;;  %vm2031_vm15 = vmor %vm2029_vm14, %vm2030_vm13  ;;  %v2190_v13 = vld [vmem:[%s10523_s6 + $0x38] sm:$0xff] }
 0x60b   :  { %v2025_v47 = vmul.f32 %v6006_v11, %v2024_v34  ;;  %v2189_v34 = vld [vmem:[%s10523_s6 + $0x30] sm:$0xff] }
 0x60c   :  { %v2022_v43 = vsel %vm2021_vm12, %v6004_v20, %v2018_v19  ;;  %v5779_v20 = vpack.i.bf16 %v7803_v12, %v7800_v51 }
 0x60d   :  { %v2026_v38 = vmul.f32 0.5, %v2025_v47  ;;  %v2057_v1 = vmul.f32 %v2022_v43, %v7679_v18  ;;  %v7831_v47 = vmul.f32 %v2189_v34, %v7729_v8  ;;  %v2236_v34 = vld [vmem:[%s10524_s8 + $0x98] sm:$0xff] }
 0x60f   :  { %v2027_v45 = vsub.f32 1.5, %v2026_v38  ;;  %5582 = vmatmul.msk.f32.gmra.mxu3 %vm1644_vm7, %v2057_v1  ;;  %v7734_v48 = vpop.f32.mrf.mxu3  ;;  %v2184_v38 = vld [vmem:[%s10523_s6 + $0x8] sm:$0xff]  ;;  %v2183_v1 = vld [vmem:[%s10523_s6] sm:$0xff] }
 0x610   :  { %v7828_v19 = vmul.f32 %v2190_v13, %v7734_v48  ;;  %v2227_v13 = vld [vmem:[%s10524_s8 + $0x50] sm:$0xff] }
 0x611   :  { %v2028_v23 = vmul.f32 %v6006_v11, %v2027_v45  ;;  %v7843_v45 = vmul.f32 %v2184_v38, %v7719_v4  ;;  %v2238_v38 = vld [vmem:[%s10524_s8 + $0xa8] sm:$0xff] }
 0x612   :  { %v5769_v43 = vpack.i.bf16 %v7831_v47, %v7828_v19 }
 0x613   :  { %v2032_v33 = vsel %vm2031_vm15, %v6006_v11, %v2028_v23  ;;  %v7846_v23 = vmul.f32 %v2183_v1, %v7717_v10  ;;  %v2231_v1 = vld [vmem:[%s10524_s8 + $0x70] sm:$0xff] }
 0x614   :  { %v2058_v35 = vmul.f32 %v2032_v33, %v7686_v62  ;;  %v2199_v33 = vld [vmem:[%s10523_s6 + $0x80] sm:$0xff] }
 0x615   :  { %v5784_v8 = vpack.i.bf16 %v7846_v23, %v7843_v45 }
 0x617   :  { %5583 = vmatmul.msk.f32.gmra.mxu3 %vm1644_vm7, %v2058_v35  ;;  %v2156_v18 = vpop.f32.mrf.mxu3 }
 0x618   :  { %v7788_v16 = vmul.f32 %v2191_v39, %v2156_v18  ;;  %v2217_v39 = vld [vmem:[%s10524_s8] sm:$0xff] }
 0x61b   :  { %v1838_v58 = vpop.xlane.xlu2 %1837 }
 0x61c   :  { %v1855_v32 = vmul.f32 %v1838_v58, %v7489_v56  ;;  %v2193_v56 = vld [vmem:[%s10523_s6 + $0x50] sm:$0xff] }
 0x61e   :  { %v1872_v53 = vadd.f32 1e-05, %v1855_v32 }
 0x620   :  { %6007 = vrsqrt.f32 %v1872_v53  ;;  %vm2039_vm2 = vweird.f32 %v1872_v53 }
 0x623   :  { %v2159_v54 = vpop.f32.mrf.mxu3 }
 0x624   :  { %v7786_v3 = vmul.f32 %v2192_v41, %v2159_v54 }
 0x626   :  { %v6008_v7 = vpop.eup %6007  ;;  %v5764_v52 = vpack.i.bf16 %v7788_v16, %v7786_v3 }
 0x627   :  { %v2034_v9 = vmul.f32 %v6008_v7, %v1872_v53  ;;  %vm2040_vm1 = vweird.f32 %v6008_v7 }
 0x628   :  { %vm2041_vm3 = vmor %vm2039_vm2, %vm2040_vm1 }
 0x629   :  { %v2035_v46 = vmul.f32 %v6008_v7, %v2034_v9 }
 0x62b   :  { %v2036_v2 = vmul.f32 0.5, %v2035_v46 }
 0x62d   :  { %v2037_v14 = vsub.f32 1.5, %v2036_v2 }
 0x62f   :  { %v2038_v59 = vmul.f32 %v6008_v7, %v2037_v14 }
 0x631   :  { %v2042_v62 = vsel %vm2041_vm3, %v6008_v7, %v2038_v59  ;;  %v2218_v7 = vld [vmem:[%s10524_s8 + $0x8] sm:$0xff]  ;;  %v2220_v59 = vld [vmem:[%s10524_s8 + $0x18] sm:$0xff] }
 0x632   :  { %v2059_v44 = vmul.f32 %v2042_v62, %v7703_v17  ;;  %v2188_v17 = vld [vmem:[%s10523_s6 + $0x28] sm:$0xff] }
 0x633   :  { %v7759_v6 = vmul.f32 %v2188_v17, %v2147_v31  ;;  %v2197_v31 = vld [vmem:[%s10523_s6 + $0x70] sm:$0xff] }
 0x634   :  { %v2162_v37 = vpop.f32.mrf.mxu3  ;;  %5584 = vmatmul.msk.f32.gmra.mxu3 %vm1644_vm7, %v2059_v44 }
 0x635   :  { %v7746_v27 = vmul.f32 %v2193_v56, %v2162_v37  ;;  %v5774_v55 = vpack.i.bf16 %v7762_v29, %v7759_v6 }
 0x63c   :  { %v2165_v5 = vpop.f32.mrf.mxu3 }
 0x63d   :  { %v7748_v63 = vmul.f32 %v2194_v36, %v2165_v5  ;;  %v2222_v5 = vld [vmem:[%s10524_s8 + $0x28] sm:$0xff] }
 0x63f   :  { %v5759_v24 = vpack.i.bf16 %v7746_v27, %v7748_v63 }
 0x641   :  { %5760 = vrot.lane.b32.xlu2 %v5759_v24, %s6184_s27 }
 0x644   :  { %v2168_v21 = vpop.f32.mrf.mxu3 }
 0x645   :  { %v7773_v25 = vmul.f32 %v2195_v50, %v2168_v21 }
 0x649   :  { %5775 = vrot.lane.b32.xlu2 %v5774_v55, %s6184_s27 }
 0x64c   :  { %v2171_v26 = vpop.f32.mrf.mxu3 }
 0x64d   :  { %v7775_v22 = vmul.f32 %v2196_v42, %v2171_v26  ;;  %v2224_v42 = vld [vmem:[%s10524_s8 + $0x38] sm:$0xff] }
 0x64f   :  { %v5754_v0 = vpack.i.bf16 %v7773_v25, %v7775_v22 }
 0x651   :  { %5755 = vrot.lane.b32.xlu0 %v5754_v0, %s6184_s27 }
 0x659   :  { %5765 = vrot.lane.b32.xlu0 %v5764_v52, %s6184_s27  ;;  %v2226_v52 = vld [vmem:[%s10524_s8 + $0x48] sm:$0xff] }
 0x661   :  { %5780 = vrot.lane.b32.xlu0 %v5779_v20, %s6184_s27  ;;  %v2221_v20 = vld [vmem:[%s10524_s8 + $0x20] sm:$0xff] }
 0x692   :  { %v2174_v15 = vpop.f32.mrf.mxu3 }
 0x693   :  { %v7814_v40 = vmul.f32 %v2197_v31, %v2174_v15  ;;  %v2230_v15 = vld [vmem:[%s10524_s8 + $0x68] sm:$0xff]  ;;  %v2223_v31 = vld [vmem:[%s10524_s8 + $0x30] sm:$0xff] }
 0x69a   :  { %v2177_v61 = vpop.f32.mrf.mxu3 }
 0x69b   :  { %v7816_v11 = vmul.f32 %v2198_v60, %v2177_v61  ;;  %v5761_v4 = vpop.permute.xlu2 %5760  ;;  %v2232_v60 = vld [vmem:[%s10524_s8 + $0x78] sm:$0xff]  ;;  %v2225_v61 = vld [vmem:[%s10524_s8 + $0x40] sm:$0xff] }
 0x69c   :  { %v5762_v2 = vunpack.i.l.bf16 %v5761_v4  ;;  %v5763_v62 = vunpack.i.h.bf16 %v5761_v4  ;;  %v2235_v4 = vld [vmem:[%s10524_s8 + $0x90] sm:$0xff] }
 0x69d   :  { %v5749_v28 = vpack.i.bf16 %v7814_v40, %v7816_v11 }
 0x69f   :  { %5750 = vrot.lane.b32.xlu1 %v5749_v28, %s6184_s27  ;;  %v2234_v28 = vld [vmem:[%s10524_s8 + $0x88] sm:$0xff] }
 0x6a3   :  { %v5776_v58 = vpop.permute.xlu2 %5775 }
 0x6a4   :  { %v5777_v17 = vunpack.i.l.bf16 %v5776_v58  ;;  %v5778_v21 = vunpack.i.h.bf16 %v5776_v58  ;;  %v2244_v58 = vld [vmem:[%s10524_s8 + $0xd8] sm:$0xff] }
 0x6a7   :  { %5770 = vrot.lane.b32.xlu1 %v5769_v43, %s6184_s27  ;;  %v2229_v43 = vld [vmem:[%s10524_s8 + $0x60] sm:$0xff] }
 0x6af   :  { %5785 = vrot.lane.b32.xlu1 %v5784_v8, %s6184_s27  ;;  %v2240_v8 = vld [vmem:[%s10524_s8 + $0xb8] sm:$0xff] }
 0x6b7   :  { %v2180_v35 = vpop.f32.mrf.mxu3 }
 0x6b8   :  { %v7854_v48 = vmul.f32 %v2199_v33, %v2180_v35  ;;  %v2233_v33 = vld [vmem:[%s10524_s8 + $0x80] sm:$0xff]  ;;  %v2242_v35 = vld [vmem:[%s10524_s8 + $0xc8] sm:$0xff] }
 0x6ba   :  { %2300 = vrot.lane.b32.xlu2 %v7854_v48, %s6184_s27 }
 0x6c3   :  { %v5756_v32 = vpop.permute.xlu0 %5755 }
 0x6c4   :  { %v5757_v46 = vunpack.i.l.bf16 %v5756_v32  ;;  %v5758_v54 = vunpack.i.h.bf16 %v5756_v32  ;;  %v2237_v32 = vld [vmem:[%s10524_s8 + $0xa0] sm:$0xff] }
 0x6cb   :  { %v5766_v14 = vpop.permute.xlu0 %5765 }
 0x6cc   :  { %v5767_v44 = vunpack.i.l.bf16 %v5766_v14  ;;  %v5768_v56 = vunpack.i.h.bf16 %v5766_v14  ;;  %v2247_v14 = vld [vmem:[%s10524_s8 + $0xf0] sm:$0xff] }
 0x6d3   :  { %v5781_v30 = vpop.permute.xlu0 %5780 }
 0x6d4   :  { %v5782_v55 = vunpack.i.l.bf16 %v5781_v30  ;;  %v5783_v26 = vunpack.i.h.bf16 %v5781_v30 }
 0x711   :  { %v5751_v10 = vpop.permute.xlu1 %5750 }
 0x712   :  { %v5752_v53 = vunpack.i.l.bf16 %v5751_v10  ;;  %v5753_v9 = vunpack.i.h.bf16 %v5751_v10  ;;  %v2246_v10 = vld [vmem:[%s10524_s8 + $0xe8] sm:$0xff] }
 0x714   :  { %v2301_v18 = vpop.permute.xlu2 %2300  ;;  %2370 = vmatpush.msrb.mxu2 %v5752_v53  ;;  %v2239_v53 = vld [vmem:[%s10524_s8 + $0xb0] sm:$0xff] }
 0x715   :  { %2453 = vmatpush.msrb.mxu3 %v2301_v18  ;;  %v2248_v18 = vld [vmem:[%s10524_s8 + $0xf8] sm:$0xff] }
 0x716   :  { %5585 = vmatmul.msk.f32.vlgmr.msrb.gmra.mxu3 %vm725_vm0, %v2218_v7  ;;  %2371 = vmatpush.msrb.mxu2 %v5753_v9  ;;  %v2241_v7 = vld [vmem:[%s10524_s8 + $0xc0] sm:$0xff]  ;;  %v2250_v9 = vld [vmem:[%s10524_s8 + $0x108] sm:$0xff] }
 0x718   :  { %2372 = vmatpush.msrb.mxu2 %v5757_v46  ;;  %v2243_v46 = vld [vmem:[%s10524_s8 + $0xd0] sm:$0xff] }
 0x719   :  { %v5771_v37 = vpop.permute.xlu1 %5770 }
 0x71a   :  { %2373 = vmatpush.msrb.mxu2 %v5758_v54  ;;  %v5772_v36 = vunpack.i.l.bf16 %v5771_v37  ;;  %v5773_v24 = vunpack.i.h.bf16 %v5771_v37  ;;  %v2245_v54 = vld [vmem:[%s10524_s8 + $0xe0] sm:$0xff] }
 0x71c   :  { %2374 = vmatpush.msrb.mxu2 %v5762_v2 }
 0x71e   :  { %5586 = vmatmul.msk.f32.gmra.mxu3 %vm725_vm0, %v2220_v59  ;;  %2375 = vmatpush.msrb.mxu2 %v5763_v62  ;;  %v2249_v62 = vld [vmem:[%s10524_s8 + $0x100] sm:$0xff] }
 0x720   :  { %2376 = vmatpush.msrb.mxu2 %v5767_v44 }
 0x721   :  { %v5786_v50 = vpop.permute.xlu1 %5785 }
 0x722   :  { %2377 = vmatpush.msrb.mxu2 %v5768_v56  ;;  %v5787_v0 = vunpack.i.l.bf16 %v5786_v50  ;;  %v5788_v41 = vunpack.i.h.bf16 %v5786_v50 }
 0x724   :  { %2378 = vmatpush.msrb.mxu2 %v5772_v36  ;;  %v2523_v36 = vld [vmem:[%s10525_s7] sm:$0xff] }
 0x726   :  { %5587 = vmatmul.msk.f32.gmra.mxu3 %vm725_vm0, %v2222_v5  ;;  %2379 = vmatpush.msrb.mxu2 %v5773_v24 }
 0x728   :  { %2380 = vmatpush.msrb.mxu2 %v5777_v17 }
 0x72a   :  { %2381 = vmatpush.msrb.mxu2 %v5778_v21 }
 0x72c   :  { %2382 = vmatpush.msrb.mxu2 %v5782_v55 }
 0x72e   :  { %5588 = vmatmul.msk.f32.gmra.mxu3 %vm725_vm0, %v2224_v42  ;;  %2383 = vmatpush.msrb.mxu2 %v5783_v26  ;;  %v2524_v42 = vld [vmem:[%s10525_s7 + $0x8] sm:$0xff] }
 0x730   :  { %2384 = vmatpush.msrb.mxu2 %v5787_v0 }
 0x732   :  { %2385 = vmatpush.msrb.mxu2 %v5788_v41 }
 0x733   :  { %2386 = vmatmul.f32.vlgmr.msrb.gmra.mxu2 %v2217_v39 }
 0x736   :  { %5589 = vmatmul.msk.f32.gmra.mxu3 %vm725_vm0, %v2226_v52 }
 0x73b   :  { %2389 = vmatmul.f32.gmra.mxu2 %v2219_v57 }
 0x73e   :  { %5590 = vmatmul.msk.f32.gmra.mxu3 %vm725_vm0, %v2228_v49 }
 0x743   :  { %2392 = vmatmul.f32.gmra.mxu2 %v2221_v20 }
 0x746   :  { %5591 = vmatmul.msk.f32.gmra.mxu3 %vm725_vm0, %v2230_v15  ;;  %v2525_v15 = vld [vmem:[%s10525_s7 + $0x10] sm:$0xff] }
 0x74b   :  { %2395 = vmatmul.f32.gmra.mxu2 %v2223_v31 }
 0x74e   :  { %5592 = vmatmul.msk.f32.gmra.mxu3 %vm725_vm0, %v2232_v60 }
 0x753   :  { %2398 = vmatmul.f32.gmra.mxu2 %v2225_v61 }
 0x756   :  { %5593 = vmatmul.msk.f32.gmra.mxu3 %vm725_vm0, %v2234_v28 }
 0x75b   :  { %2401 = vmatmul.f32.gmra.mxu2 %v2227_v13 }
 0x75e   :  { %5594 = vmatmul.msk.f32.gmra.mxu3 %vm725_vm0, %v2236_v34 }
 0x763   :  { %2404 = vmatmul.f32.gmra.mxu2 %v2229_v43 }
 0x766   :  { %5595 = vmatmul.msk.f32.gmra.mxu3 %vm725_vm0, %v2238_v38 }
 0x76b   :  { %2407 = vmatmul.f32.gmra.mxu2 %v2231_v1 }
 0x76e   :  { %5596 = vmatmul.msk.f32.gmra.mxu3 %vm725_vm0, %v2240_v8 }
 0x773   :  { %2410 = vmatmul.f32.gmra.mxu2 %v2233_v33 }
 0x776   :  { %5597 = vmatmul.msk.f32.gmra.mxu3 %vm725_vm0, %v2242_v35 }
 0x77b   :  { %2413 = vmatmul.f32.gmra.mxu2 %v2235_v4 }
 0x77e   :  { %5598 = vmatmul.msk.f32.gmra.mxu3 %vm725_vm0, %v2244_v58 }
 0x783   :  { %2416 = vmatmul.f32.gmra.mxu2 %v2237_v32 }
 0x786   :  { %5599 = vmatmul.msk.f32.gmra.mxu3 %vm725_vm0, %v2246_v10 }
 0x78b   :  { %2419 = vmatmul.f32.gmra.mxu2 %v2239_v53 }
 0x78e   :  { %5600 = vmatmul.msk.f32.gmra.mxu3 %vm725_vm0, %v2248_v18 }
 0x793   :  { %2422 = vmatmul.f32.gmra.mxu2 %v2241_v7 }
 0x796   :  { %5601 = vmatmul.msk.f32.gmra.mxu3 %vm725_vm0, %v2250_v9 }
 0x799   :  { %v2455_v2 = vpop.f32.mrf.mxu3 }
 0x79b   :  { %2425 = vmatmul.f32.gmra.mxu2 %v2243_v46 }
 0x7a1   :  { %v2458_v59 = vpop.f32.mrf.mxu3 }
 0x7a3   :  { %2428 = vmatmul.f32.gmra.mxu2 %v2245_v54 }
 0x7a9   :  { %v2461_v37 = vpop.f32.mrf.mxu3 }
 0x7ab   :  { %2431 = vmatmul.f32.gmra.mxu2 %v2247_v14 }
 0x7b1   :  { %v2464_v21 = vpop.f32.mrf.mxu3 }
 0x7b3   :  { %2434 = vmatmul.f32.gmra.mxu2 %v2249_v62 }
 0x7b6   :  { %v2387_v44 = vpop.f32.mrf.mxu2 }
 0x7b7   :  { %v2456_v56 = vadd.f32 %v2455_v2, %v2387_v44 }
 0x7b9   :  { %v2506_v5 = vadd.f32 %v2456_v56, %v7846_v23  ;;  %v2467_v57 = vpop.f32.mrf.mxu3 }
 0x7bb   :  { %v7981_v24 = vadd.f32 %v2523_v36, %v2506_v5 }
 0x7bd   :  { %v7984_v17 = vmul.f32 0.70710677, %v7981_v24 }
 0x7be   :  { %v2390_v30 = vpop.f32.mrf.mxu2 }
 0x7bf   :  { %v2591_v55 = vand.u32 2147483647, %v7984_v17  ;;  %v2459_v50 = vadd.f32 %v2458_v59, %v2390_v30  ;;  %vm3152_vm1 = vcmp.lt.f32.partialorder %v7984_v17, 0.0 }
 0x7c1   :  { %v2608_v26 = vmul.f32 0.3275911, %v2591_v55  ;;  %v2507_v0 = vadd.f32 %v2459_v50, %v7843_v45  ;;  %v8009_v1 = vpop.f32.mrf.mxu3  ;;  %v3050_v53 = vsub.f32 0.0, %v2591_v55 }
 0x7c3   :  { %v2625_v41 = vadd.f32 1.0, %v2608_v26  ;;  %v7991_v39 = vadd.f32 %v2524_v42, %v2507_v0  ;;  %v3067_v44 = vmul.f32 %v3050_v53, %v2591_v55  ;;  %v2527_v26 = vld [vmem:[%s10525_s7 + $0x20] sm:$0xff] }
 0x7c5   :  { %6009 = vrcp.f32 %v2625_v41  ;;  %v7994_v23 = vmul.f32 0.70710677, %v7991_v39  ;;  %v2653_v35 = vand.u32 2147483648, %v2625_v41  ;;  %v2651_v58 = vand.u32 2147483647, %v2625_v41 }
 0x7c6   :  { %v2393_v52 = vpop.f32.mrf.mxu2  ;;  %vm2647_vm4 = vweird.f32 %v2625_v41 }
 0x7c7   :  { %v2592_v49 = vand.u32 2147483647, %v7994_v23  ;;  %v2462_v20 = vadd.f32 %v2461_v37, %v2393_v52  ;;  %v2654_v2 = vor.u32 1.1754944e-38, %v2653_v35  ;;  %vm2652_vm6 = vcmp.eq.f32.partialorder %v2651_v58, 8.507059e+37 }
 0x7c9   :  { %v2609_v31 = vmul.f32 0.3275911, %v2592_v49  ;;  %v2508_v60 = vadd.f32 %v2462_v20, %v7803_v12  ;;  %v2526_v12 = vld [vmem:[%s10525_s7 + $0x18] sm:$0xff]  ;;  %v3051_v9 = vsub.f32 0.0, %v2592_v49  ;;  %v8027_v36 = vpop.f32.mrf.mxu3 }
 0x7cb   :  { %v6010_v45 = vpop.eup %6009  ;;  %v8001_v61 = vadd.f32 1.0, %v2609_v31  ;;  %v8003_v28 = vadd.f32 %v2525_v15, %v2508_v60  ;;  %v3068_v30 = vmul.f32 %v3051_v9, %v2592_v49  ;;  %v8041_v15 = vmul.f32 0.5, %v7981_v24 }
 0x7cc   :  { %v2643_v13 = vmul.f32 %v6010_v45, %v2625_v41  ;;  %vm2648_vm7 = vweird.f32 %v6010_v45 }
 0x7cd   :  { %6011 = vrcp.f32 %v8001_v61  ;;  %v8007_v34 = vmul.f32 0.70710677, %v8003_v28  ;;  %vm2649_vm5 = vmor %vm2647_vm4, %vm2648_vm7  ;;  %v2668_v42 = vand.u32 2147483648, %v8001_v61  ;;  %v2666_v55 = vand.u32 2147483647, %v8001_v61 }
 0x7ce   :  { %v2644_v43 = vsub.f32 1.0, %v2643_v13  ;;  %v2396_v38 = vpop.f32.mrf.mxu2  ;;  %vm2662_vm9 = vweird.f32 %v8001_v61  ;;  %v3086_v13 = vmul.f32 1.442695, %v3068_v30 }
 0x7cf   :  { %v2593_v8 = vand.u32 2147483647, %v8007_v34  ;;  %v2465_v33 = vadd.f32 %v2464_v21, %v2396_v38  ;;  %vm2667_vm11 = vcmp.eq.f32.partialorder %v2666_v55, 8.507059e+37 }
 0x7d0   :  { %v2645_v4 = vmul.f32 %v6010_v45, %v2644_v43 }
 0x7d1   :  { %v2610_v32 = vmul.f32 0.3275911, %v2593_v8  ;;  %v2509_v10 = vadd.f32 %v2465_v33, %v7800_v51  ;;  %v3052_v52 = vsub.f32 0.0, %v2593_v8  ;;  %v2669_v33 = vor.u32 1.1754944e-38, %v2668_v42 }
 0x7d2   :  { %v2646_v18 = vadd.f32 %v6010_v45, %v2645_v4 }
 0x7d3   :  { %v6012_v7 = vpop.eup %6011  ;;  %v8016_v46 = vadd.f32 1.0, %v2610_v32  ;;  %v8018_v54 = vadd.f32 %v2526_v12, %v2509_v10  ;;  %v3069_v24 = vmul.f32 %v3052_v52, %v2593_v8 }
 0x7d4   :  { %v2658_v14 = vmul.f32 %v6012_v7, %v8001_v61  ;;  %v2650_v59 = vsel %vm2649_vm5, %v6010_v45, %v2646_v18  ;;  %vm2663_vm8 = vweird.f32 %v6012_v7  ;;  %vm3153_vm5 = vcmp.lt.f32.partialorder %v7994_v23, 0.0 }
 0x7d5   :  { %6013 = vrcp.f32 %v8016_v46  ;;  %v8023_v62 = vmul.f32 0.70710677, %v8018_v54  ;;  %v8025_v51 = vsel %vm2652_vm6, %v2654_v2, %v2650_v59  ;;  %vm2664_vm10 = vmor %vm2662_vm9, %vm2663_vm8  ;;  %v2681_v8 = vand.u32 2147483647, %v8016_v46  ;;  %v2528_v2 = vld [vmem:[%s10525_s7 + $0x28] sm:$0xff] }
 0x7d6   :  { %v2659_v37 = vsub.f32 1.0, %v2658_v14  ;;  %v2399_v56 = vpop.f32.mrf.mxu2  ;;  %v2897_v5 = vmul.f32 1.0614054, %v8025_v51  ;;  %v2683_v9 = vand.u32 2147483648, %v8016_v46  ;;  %v8067_v14 = vpop.f32.mrf.mxu3  ;;  %vm2677_vm13 = vweird.f32 %v8016_v46 }
 0x7d7   :  { %v8031_v21 = vand.u32 2147483647, %v8023_v62  ;;  %v2468_v50 = vadd.f32 %v2467_v57, %v2399_v56  ;;  %v3084_v57 = vmul.f32 1.442695, %v3067_v44  ;;  %v3088_v56 = vmul.f32 1.442695, %v3069_v24 }
 0x7d8   :  { %v2914_v0 = vadd.f32 -1.4531521, %v2897_v5  ;;  %v2660_v41 = vmul.f32 %v6012_v7, %v2659_v37  ;;  %vm2682_vm15 = vcmp.eq.f32.partialorder %v2681_v8, 8.507059e+37  ;;  %v2684_v55 = vor.u32 1.1754944e-38, %v2683_v9 }
 0x7d9   :  { %v2611_v20 = vmul.f32 0.3275911, %v8031_v21  ;;  %v2510_v49 = vadd.f32 %v2468_v50, %v7762_v29 }
 0x7da   :  { %v2931_v31 = vmul.f32 %v2914_v0, %v8025_v51  ;;  %v2661_v60 = vadd.f32 %v6012_v7, %v2660_v41 }
 0x7db   :  { %v6014_v45 = vpop.eup %6013  ;;  %v8045_v43 = vadd.f32 1.0, %v2611_v20  ;;  %v8047_v38 = vadd.f32 %v2527_v26, %v2510_v49 }
 0x7dc   :  { %v2673_v35 = vmul.f32 %v6014_v45, %v8016_v46  ;;  %v2948_v29 = vadd.f32 1.4214138, %v2931_v31  ;;  %v2665_v12 = vsel %vm2664_vm10, %v6012_v7, %v2661_v60  ;;  %vm2678_vm12 = vweird.f32 %v6014_v45 }
 0x7dd   :  { %6015 = vrcp.f32 %v8045_v43  ;;  %v8052_v4 = vmul.f32 0.70710677, %v8047_v38  ;;  %v8054_v61 = vsel %vm2667_vm11, %v2669_v33, %v2665_v12  ;;  %vm2679_vm14 = vmor %vm2677_vm13, %vm2678_vm12  ;;  %vm2692_vm3 = vweird.f32 %v8045_v43 }
 0x7de   :  { %6017 = vpow2.f32 %v3084_v57  ;;  %v2674_v58 = vsub.f32 1.0, %v2673_v35  ;;  %v2402_v32 = vpop.f32.mrf.mxu2  ;;  %v2965_v10 = vmul.f32 %v2948_v29, %v8025_v51  ;;  %v2898_v53 = vmul.f32 1.0614054, %v8054_v61 }
 0x7df   :  { %v8059_v18 = vand.u32 2147483647, %v8052_v4  ;;  %v2471_v7 = vadd.f32 %v8009_v1, %v2402_v32  ;;  %6019 = vpow2.f32 %v3086_v13  ;;  %v2529_v32 = vld [vmem:[%s10525_s7 + $0x30] sm:$0xff]  ;;  %vm3154_vm11 = vcmp.lt.f32.partialorder %v8007_v34, 0.0 }
 0x7e0   :  { %v2982_v59 = vadd.f32 -0.28449672, %v2965_v10  ;;  %v2915_v44 = vadd.f32 -1.4531521, %v2898_v53  ;;  %v2675_v37 = vmul.f32 %v6014_v45, %v2674_v58 }
 0x7e1   :  { %v2612_v5 = vmul.f32 0.3275911, %v8059_v18  ;;  %v2511_v1 = vadd.f32 %v2471_v7, %v7759_v6 }
 0x7e2   :  { %v2999_v30 = vmul.f32 %v2982_v59, %v8025_v51  ;;  %v2932_v50 = vmul.f32 %v2915_v44, %v8054_v61  ;;  %v2676_v42 = vadd.f32 %v6014_v45, %v2675_v37  ;;  %v2479_v44 = vpop.f32.mrf.mxu3 }
 0x7e3   :  { %v8074_v26 = vpop.eup %6015  ;;  %v8076_v0 = vadd.f32 1.0, %v2612_v5  ;;  %v8078_v41 = vadd.f32 %v2528_v2, %v2511_v1  ;;  %v2698_v2 = vand.u32 2147483648, %v8045_v43 }
 0x7e4   :  { %v6018_v52 = vpop.eup %6017  ;;  %v2688_v6 = vmul.f32 %v8074_v26, %v8045_v43  ;;  %v3016_v20 = vadd.f32 0.2548296, %v2999_v30  ;;  %v2949_v49 = vadd.f32 1.4214138, %v2932_v50  ;;  %v2680_v57 = vsel %vm2679_vm14, %v6014_v45, %v2676_v42 }
 0x7e5   :  { %6021 = vrcp.f32 %v8076_v0  ;;  %v8084_v46 = vmul.f32 0.70710677, %v8078_v41  ;;  %v8087_v31 = vsel %vm2682_vm15, %v2684_v55, %v2680_v57  ;;  %v6020_v12 = vpop.eup %6019  ;;  %v3053_v45 = vsub.f32 0.0, %v8031_v21 }
 0x7e6   :  { %v2689_v60 = vsub.f32 1.0, %v2688_v6  ;;  %v2405_v13 = vpop.f32.mrf.mxu2  ;;  %v3033_v33 = vmul.f32 %v3016_v20, %v8025_v51  ;;  %v2966_v35 = vmul.f32 %v2949_v49, %v8054_v61  ;;  %v2899_v29 = vmul.f32 1.0614054, %v8087_v31 }
 0x7e7   :  { %6023 = vpow2.f32 %v3088_v56  ;;  %v8094_v24 = vand.u32 2147483647, %v8084_v46  ;;  %v2474_v58 = vadd.f32 %v8027_v36, %v2405_v13  ;;  %vm2693_vm2 = vweird.f32 %v8074_v26 }
 0x7e8   :  { %v3118_v10 = vmul.f32 %v6018_v52, %v3033_v33  ;;  %v2983_v53 = vadd.f32 -0.28449672, %v2966_v35  ;;  %v2916_v51 = vadd.f32 -1.4531521, %v2899_v29  ;;  %v2690_v7 = vmul.f32 %v8074_v26, %v2689_v60  ;;  %vm8120_vm7 = vmor %vm2692_vm3, %vm2693_vm2 }
 0x7e9   :  { %v2613_v8 = vmul.f32 0.3275911, %v8094_v24  ;;  %v2512_v9 = vadd.f32 %v2474_v58, %v7831_v47  ;;  %v2696_v47 = vand.u32 2147483647, %v8045_v43  ;;  %v2699_v57 = vor.u32 1.1754944e-38, %v2698_v2 }
 0x7ea   :  { %v3135_v59 = vsub.f32 1.0, %v3118_v10  ;;  %v3000_v36 = vmul.f32 %v2983_v53, %v8054_v61  ;;  %v2933_v37 = vmul.f32 %v2916_v51, %v8087_v31  ;;  %v2691_v56 = vadd.f32 %v8074_v26, %v2690_v7 }
 0x7eb   :  { %v8108_v5 = vpop.eup %6021  ;;  %v8110_v1 = vadd.f32 1.0, %v2613_v8  ;;  %v8112_v30 = vadd.f32 %v2529_v32, %v2512_v9  ;;  %vm2697_vm4 = vcmp.eq.f32.partialorder %v2696_v47, 8.507059e+37  ;;  %v3070_v53 = vmul.f32 %v3053_v45, %v8031_v21 }
 0x7ec   :  { %v2703_v50 = vmul.f32 %v8108_v5, %v8076_v0  ;;  %v3169_v42 = vsub.f32 0.0, %v3135_v59  ;;  %v3017_v55 = vadd.f32 0.2548296, %v3000_v36  ;;  %v2950_v52 = vadd.f32 1.4214138, %v2933_v37  ;;  %v2482_v37 = vpop.f32.mrf.mxu3 }
 0x7ed   :  { %v6024_v20 = vpop.eup %6023  ;;  %6025 = vrcp.f32 %v8110_v1  ;;  %v8126_v49 = vmul.f32 0.70710677, %v8112_v30  ;;  %v2695_v43 = vsel %vm8120_vm7, %v8074_v26, %v2691_v56  ;;  %v2530_v26 = vld [vmem:[%s10525_s7 + $0x38] sm:$0xff]  ;;  %vm2708_vm6 = vweird.f32 %v8108_v5 }
 0x7ee   :  { %v2704_v60 = vsub.f32 1.0, %v2703_v50  ;;  %v2408_v13 = vpop.f32.mrf.mxu2  ;;  %v3186_v33 = vsel %vm3152_vm1, %v3169_v42, %v3135_v59  ;;  %v3034_v35 = vmul.f32 %v3017_v55, %v8054_v61  ;;  %v2967_v29 = vmul.f32 %v2950_v52, %v8087_v31 }
 0x7ef   :  { %v8136_v58 = vand.u32 2147483647, %v8126_v49  ;;  %v2477_v32 = vadd.f32 %v8067_v14, %v2408_v13  ;;  %v3203_v10 = vadd.f32 1.0, %v3186_v33  ;;  %v8143_v7 = vsel %vm2697_vm4, %v2699_v57, %v2695_v43 }
 0x7f0   :  { %v3119_v51 = vmul.f32 %v6020_v12, %v3034_v35  ;;  %v2984_v17 = vadd.f32 -0.28449672, %v2967_v29  ;;  %v2705_v14 = vmul.f32 %v8108_v5, %v2704_v60  ;;  %v2900_v21 = vmul.f32 1.0614054, %v8143_v7 }
 0x7f1   :  { %v2614_v61 = vmul.f32 0.3275911, %v8136_v58  ;;  %v2513_v8 = vadd.f32 %v2477_v32, %v7828_v19  ;;  %v3220_v9 = vmul.f32 %v3203_v10, %v8041_v15  ;;  %v2558_v12 = vmul.f32 0.5, %v7991_v39  ;;  %v2531_v10 = vld [vmem:[%s10525_s7 + $0x40] sm:$0xff] }
 0x7f2   :  { %v3136_v2 = vsub.f32 1.0, %v3119_v51  ;;  %v3001_v59 = vmul.f32 %v2984_v17, %v8087_v31  ;;  %v2917_v47 = vadd.f32 -1.4531521, %v2900_v21  ;;  %v3090_v50 = vmul.f32 1.442695, %v3070_v53 }
 0x7f3   :  { %v8151_v45 = vpop.eup %6025  ;;  %v8153_v36 = vadd.f32 %v2530_v26, %v2513_v8  ;;  %3254 = vrot.lane.b32.xlu0 %v3220_v9, %s6186_s0  ;;  %v8158_v19 = vadd.f32 1.0, %v2614_v61  ;;  %v2706_v55 = vadd.f32 %v8108_v5, %v2705_v14  ;;  %vm2707_vm8 = vweird.f32 %v8076_v0 }
 0x7f4   :  { %v3170_v15 = vsub.f32 0.0, %v3136_v2  ;;  %v3018_v56 = vadd.f32 0.2548296, %v3001_v59  ;;  %v2718_v52 = vmul.f32 %v8151_v45, %v8110_v1  ;;  %v2934_v43 = vmul.f32 %v2917_v47, %v8143_v7  ;;  %vm8172_vm9 = vmor %vm2707_vm8, %vm2708_vm6 }
 0x7f5   :  { %v8161_v42 = vmul.f32 0.70710677, %v8153_v36  ;;  %v2711_v13 = vand.u32 2147483647, %v8076_v0  ;;  %6027 = vrcp.f32 %v8158_v19  ;;  %v2713_v32 = vand.u32 2147483648, %v8076_v0 }
 0x7f6   :  { %v2411_v39 = vpop.f32.mrf.mxu2  ;;  %v3187_v6 = vsel %vm3153_vm5, %v3170_v15, %v3136_v2  ;;  %v3035_v23 = vmul.f32 %v3018_v56, %v8087_v31  ;;  %v2951_v35 = vadd.f32 1.4214138, %v2934_v43  ;;  %v2719_v26 = vsub.f32 1.0, %v2718_v52  ;;  %v2485_v15 = vpop.f32.mrf.mxu3 }
 0x7f7   :  { %v2480_v57 = vadd.f32 %v2479_v44, %v2411_v39  ;;  %v3204_v60 = vadd.f32 1.0, %v3187_v6  ;;  %v8178_v31 = vand.u32 2147483647, %v8161_v42  ;;  %v2714_v61 = vor.u32 1.1754944e-38, %v2713_v32 }
 0x7f8   :  { %v3120_v33 = vmul.f32 %v6024_v20, %v3035_v23  ;;  %v2710_v20 = vsel %vm8172_vm9, %v8108_v5, %v2706_v55  ;;  %v2968_v17 = vmul.f32 %v2951_v35, %v8143_v7  ;;  %v3054_v0 = vsub.f32 0.0, %v8059_v18 }
 0x7f9   :  { %v2514_v44 = vadd.f32 %v2480_v57, %v7788_v16  ;;  %v3221_v53 = vmul.f32 %v3204_v60, %v2558_v12  ;;  %vm2712_vm10 = vcmp.eq.f32.partialorder %v2711_v13, 8.507059e+37  ;;  %6029 = vpow2.f32 %v3090_v50 }
 0x7fa   :  { %v3137_v51 = vsub.f32 1.0, %v3120_v33  ;;  %v2985_v9 = vadd.f32 -0.28449672, %v2968_v17  ;;  %v8192_v14 = vsel %vm2712_vm10, %v2714_v61, %v2710_v20  ;;  %v2615_v2 = vmul.f32 0.3275911, %v8178_v31 }
 0x7fb   :  { %3256 = vrot.lane.b32.xlu1 %v3221_v53, %s6186_s0  ;;  %v8190_v16 = vadd.f32 %v2531_v10, %v2514_v44  ;;  %v2901_v5 = vmul.f32 1.0614054, %v8192_v14  ;;  %v8197_v59 = vpop.eup %6027  ;;  %v2720_v47 = vmul.f32 %v8151_v45, %v2719_v26  ;;  %v2559_v55 = vmul.f32 0.5, %v8003_v28 }
 0x7fc   :  { %v3171_v8 = vsub.f32 0.0, %v3137_v51  ;;  %v3002_v56 = vmul.f32 %v2985_v9, %v8143_v7  ;;  %v3071_v50 = vmul.f32 %v3054_v0, %v8059_v18  ;;  %v8206_v23 = vadd.f32 1.0, %v2615_v2 }
 0x7fd   :  { %v8204_v39 = vmul.f32 0.70710677, %v8190_v16  ;;  %v2918_v6 = vadd.f32 -1.4531521, %v2901_v5  ;;  %v2721_v60 = vadd.f32 %v8151_v45, %v2720_v47  ;;  %v2733_v13 = vmul.f32 %v8197_v59, %v8158_v19 }
 0x7fe   :  { %v2414_v21 = vpop.f32.mrf.mxu2  ;;  %v3188_v12 = vsel %vm3154_vm11, %v3171_v8, %v3137_v51  ;;  %v3019_v34 = vadd.f32 0.2548296, %v3002_v56  ;;  %vm2723_vm12 = vweird.f32 %v8151_v45  ;;  %vm2722_vm13 = vweird.f32 %v8110_v1  ;;  %v2488_v2 = vpop.f32.mrf.mxu3 }
 0x7ff   :  { %v3205_v52 = vadd.f32 1.0, %v3188_v12  ;;  %v2483_v43 = vadd.f32 %v2482_v37, %v2414_v21  ;;  %v2935_v28 = vmul.f32 %v2918_v6, %v8192_v14  ;;  %v6030_v18 = vpop.eup %6029  ;;  %v2726_v35 = vand.u32 2147483647, %v8110_v1  ;;  %vm8221_vm14 = vmor %vm2722_vm13, %vm2723_vm12 }
 0x800   :  { %v3036_v33 = vmul.f32 %v3019_v34, %v8143_v7  ;;  %v2728_v37 = vand.u32 2147483648, %v8110_v1  ;;  %v8219_v29 = vand.u32 2147483647, %v8204_v39  ;;  %v3092_v10 = vmul.f32 1.442695, %v3071_v50  ;;  %v2532_v1 = vld [vmem:[%s10525_s7 + $0x48] sm:$0xff] }
 0x801   :  { %v3222_v57 = vmul.f32 %v3205_v52, %v2559_v55  ;;  %v2952_v44 = vadd.f32 1.4214138, %v2935_v28  ;;  %6031 = vrcp.f32 %v8206_v23  ;;  %v2515_v53 = vadd.f32 %v2483_v43, %v7786_v3 }
 0x802   :  { %v3121_v32 = vmul.f32 %v6030_v18, %v3036_v33  ;;  %v2725_v20 = vsel %vm8221_vm14, %v8151_v45, %v2721_v60  ;;  %v2734_v26 = vsub.f32 1.0, %v2733_v13  ;;  %v2729_v0 = vor.u32 1.1754944e-38, %v2728_v37 }
 0x803   :  { %3258 = vrot.lane.b32.xlu2 %v3222_v57, %s6186_s0  ;;  %v2969_v61 = vmul.f32 %v2952_v44, %v8192_v14  ;;  %v3055_v8 = vsub.f32 0.0, %v8094_v24  ;;  %vm2727_vm15 = vcmp.eq.f32.partialorder %v2726_v35, 8.507059e+37  ;;  %v2616_v9 = vmul.f32 0.3275911, %v8219_v29 }
 0x804   :  { %v3138_v17 = vsub.f32 1.0, %v3121_v32  ;;  %v8236_v21 = vsel %vm2727_vm15, %v2729_v0, %v2725_v20  ;;  %6033 = vpow2.f32 %v3092_v10  ;;  %v8238_v45 = vadd.f32 %v2532_v1, %v2515_v53 }
 0x805   :  { %v2986_v5 = vadd.f32 -0.28449672, %v2969_v61  ;;  %vm3155_vm1 = vcmp.lt.f32.partialorder %v8023_v62, 0.0  ;;  %v2902_v12 = vmul.f32 1.0614054, %v8236_v21  ;;  %v2735_v55 = vmul.f32 %v8197_v59, %v2734_v26 }
 0x806   :  { %v2417_v51 = vpop.f32.mrf.mxu2  ;;  %v3172_v3 = vsub.f32 0.0, %v3138_v17  ;;  %v3072_v50 = vmul.f32 %v3055_v8, %v8094_v24  ;;  %v2560_v34 = vmul.f32 0.5, %v8018_v54  ;;  %v8248_v43 = vadd.f32 1.0, %v2616_v9  ;;  %v2491_v61 = vpop.f32.mrf.mxu3 }
 0x807   :  { %v3003_v47 = vmul.f32 %v2986_v5, %v8192_v14  ;;  %v8244_v52 = vpop.eup %6031  ;;  %v2919_v60 = vadd.f32 -1.4531521, %v2902_v12  ;;  %v8251_v62 = vmul.f32 0.70710677, %v8238_v45  ;;  %v2486_v13 = vadd.f32 %v2485_v15, %v2417_v51  ;;  %v2533_v51 = vld [vmem:[%s10525_s7 + $0x50] sm:$0xff] }
 0x808   :  { %v3189_v56 = vsel %vm3155_vm1, %v3172_v3, %v3138_v17  ;;  %v2736_v28 = vadd.f32 %v8197_v59, %v2735_v55  ;;  %v2748_v18 = vmul.f32 %v8244_v52, %v8206_v23  ;;  %vm2738_vm2 = vweird.f32 %v8197_v59 }
 0x809   :  { %v3206_v6 = vadd.f32 1.0, %v3189_v56  ;;  %v3020_v57 = vadd.f32 0.2548296, %v3003_v47  ;;  %v2936_v54 = vmul.f32 %v2919_v60, %v8236_v21  ;;  %v3094_v32 = vmul.f32 1.442695, %v3072_v50 }
 0x80a   :  { %v6034_v37 = vpop.eup %6033  ;;  %vm2737_vm3 = vweird.f32 %v8158_v19  ;;  %v2741_v15 = vand.u32 2147483647, %v8158_v19  ;;  %6035 = vrcp.f32 %v8248_v43  ;;  %v8269_v53 = vand.u32 2147483647, %v8251_v62 }
 0x80b   :  { %v3223_v33 = vmul.f32 %v3206_v6, %v2560_v34  ;;  %v3037_v24 = vmul.f32 %v3020_v57, %v8192_v14  ;;  %v2953_v7 = vadd.f32 1.4214138, %v2936_v54  ;;  %vm8262_vm7 = vmor %vm2737_vm3, %vm2738_vm2  ;;  %v2743_v14 = vand.u32 2147483648, %v8158_v19 }
 0x80c   :  { %v2516_v20 = vadd.f32 %v2486_v13, %v7746_v27  ;;  %v2740_v26 = vsel %vm8262_vm7, %v8197_v59, %v2736_v28  ;;  %v2749_v1 = vsub.f32 1.0, %v2748_v18  ;;  %6037 = vpow2.f32 %v3094_v32 }
 0x80d   :  { %3260 = vrot.lane.b32.xlu0 %v3223_v33, %s6186_s0  ;;  %v3122_v44 = vmul.f32 %v6034_v37, %v3037_v24  ;;  %v2970_v19 = vmul.f32 %v2953_v7, %v8236_v21  ;;  %v2744_v0 = vor.u32 1.1754944e-38, %v2743_v14  ;;  %vm2742_vm4 = vcmp.eq.f32.partialorder %v2741_v15, 8.507059e+37 }
 0x80e   :  { %v2420_v35 = vpop.f32.mrf.mxu2  ;;  %v3056_v9 = vsub.f32 0.0, %v8136_v58  ;;  %v2617_v59 = vmul.f32 0.3275911, %v8269_v53  ;;  %v8283_v12 = vadd.f32 %v2533_v51, %v2516_v20  ;;  %vm3156_vm5 = vcmp.lt.f32.partialorder %v8052_v4, 0.0  ;;  %v2534_v4 = vld [vmem:[%s10525_s7 + $0x58] sm:$0xff]  ;;  %v2494_v14 = vpop.f32.mrf.mxu3 }
 0x80f   :  { %v3139_v17 = vsub.f32 1.0, %v3122_v44  ;;  %v2489_v8 = vadd.f32 %v2488_v2, %v2420_v35  ;;  %v2987_v3 = vadd.f32 -0.28449672, %v2970_v19  ;;  %v8280_v5 = vsel %vm2742_vm4, %v2744_v0, %v2740_v26 }
 0x810   :  { %v2903_v56 = vmul.f32 1.0614054, %v8280_v5  ;;  %v2750_v2 = vmul.f32 %v8244_v52, %v2749_v1  ;;  %v8289_v34 = vpop.eup %6035  ;;  %v2561_v57 = vmul.f32 0.5, %v8047_v38  ;;  %v3073_v13 = vmul.f32 %v3056_v9, %v8136_v58 }
 0x811   :  { %v3173_v27 = vsub.f32 0.0, %v3139_v17  ;;  %v3004_v50 = vmul.f32 %v2987_v3, %v8236_v21  ;;  %v2517_v6 = vadd.f32 %v2489_v8, %v7748_v63  ;;  %v8297_v35 = vadd.f32 1.0, %v2617_v59 }
 0x812   :  { %v2920_v28 = vadd.f32 -1.4531521, %v2903_v56  ;;  %v6038_v18 = vpop.eup %6037  ;;  %v8300_v24 = vmul.f32 0.70710677, %v8283_v12  ;;  %v2751_v63 = vadd.f32 %v8244_v52, %v2750_v2  ;;  %v2763_v38 = vmul.f32 %v8289_v34, %v8248_v43 }
 0x813   :  { %v3190_v47 = vsel %vm3156_vm5, %v3173_v27, %v3139_v17  ;;  %v3021_v33 = vadd.f32 0.2548296, %v3004_v50  ;;  %vm2753_vm6 = vweird.f32 %v8244_v52  ;;  %v8308_v32 = vadd.f32 %v2534_v4, %v2517_v6 }
 0x814   :  { %v3207_v60 = vadd.f32 1.0, %v3190_v47  ;;  %v2937_v37 = vmul.f32 %v2920_v28, %v8280_v5  ;;  %vm2752_vm8 = vweird.f32 %v8206_v23  ;;  %v2756_v15 = vand.u32 2147483647, %v8206_v23 }
 0x815   :  { %v3038_v58 = vmul.f32 %v3021_v33, %v8236_v21  ;;  %v2758_v44 = vand.u32 2147483648, %v8206_v23  ;;  %vm8314_vm9 = vmor %vm2752_vm8, %vm2753_vm6  ;;  %v3096_v26 = vmul.f32 1.442695, %v3073_v13  ;;  %6039 = vrcp.f32 %v8297_v35 }
 0x816   :  { %v2423_v55 = vpop.f32.mrf.mxu2  ;;  %v3224_v54 = vmul.f32 %v3207_v60, %v2561_v57  ;;  %v2954_v20 = vadd.f32 1.4214138, %v2937_v37  ;;  %v8320_v1 = vand.u32 2147483647, %v8300_v24  ;;  %v2755_v51 = vsel %vm8314_vm9, %v8244_v52, %v2751_v63 }
 0x817   :  { %v2492_v7 = vadd.f32 %v2491_v61, %v2423_v55  ;;  %v3123_v10 = vmul.f32 %v6038_v18, %v3038_v58  ;;  %v2764_v17 = vsub.f32 1.0, %v2763_v38  ;;  %v2759_v0 = vor.u32 1.1754944e-38, %v2758_v44  ;;  %v2535_v55 = vld [vmem:[%s10525_s7 + $0x60] sm:$0xff] }
 0x818   :  { %3262 = vrot.lane.b32.xlu1 %v3224_v54, %s6186_s0  ;;  %v2971_v19 = vmul.f32 %v2954_v20, %v8280_v5  ;;  %v3057_v8 = vsub.f32 0.0, %v8178_v31  ;;  %v8328_v9 = vmul.f32 0.70710677, %v8308_v32  ;;  %vm2757_vm10 = vcmp.eq.f32.partialorder %v2756_v15, 8.507059e+37 }
 0x819   :  { %v3140_v23 = vsub.f32 1.0, %v3123_v10  ;;  %v2518_v3 = vadd.f32 %v2492_v7, %v7773_v25  ;;  %v8331_v47 = vsel %vm2757_vm10, %v2759_v0, %v2755_v51  ;;  %6041 = vpow2.f32 %v3096_v26 }
 0x81a   :  { %v2988_v56 = vadd.f32 -0.28449672, %v2971_v19  ;;  %v2618_v52 = vmul.f32 0.3275911, %v8320_v1  ;;  %vm3157_vm11 = vcmp.lt.f32.partialorder %v8084_v46, 0.0  ;;  %v2765_v25 = vmul.f32 %v8289_v34, %v2764_v17  ;;  %v2536_v46 = vld [vmem:[%s10525_s7 + $0x68] sm:$0xff] }
 0x81b   :  { %v3174_v59 = vsub.f32 0.0, %v3140_v23  ;;  %v2904_v50 = vmul.f32 1.0614054, %v8331_v47  ;;  %v8341_v57 = vpop.eup %6039  ;;  %v8344_v60 = vand.u32 2147483647, %v8328_v9  ;;  %v2562_v13 = vmul.f32 0.5, %v8078_v41 }
 0x81c   :  { %v3005_v6 = vmul.f32 %v2988_v56, %v8280_v5  ;;  %v8348_v28 = vadd.f32 %v2535_v55, %v2518_v3  ;;  %v3074_v63 = vmul.f32 %v3057_v8, %v8178_v31  ;;  %v8354_v38 = vadd.f32 1.0, %v2618_v52 }
 0x81d   :  { %v3191_v2 = vsel %vm3157_vm11, %v3174_v59, %v3140_v23  ;;  %v2921_v54 = vadd.f32 -1.4531521, %v2904_v50  ;;  %v2766_v37 = vadd.f32 %v8289_v34, %v2765_v25  ;;  %v2778_v41 = vmul.f32 %v8341_v57, %v8297_v35 }
 0x81e   :  { %v2426_v61 = vpop.f32.mrf.mxu2  ;;  %v3208_v4 = vadd.f32 1.0, %v3191_v2  ;;  %v3022_v18 = vadd.f32 0.2548296, %v3005_v6  ;;  %vm2768_vm12 = vweird.f32 %v8289_v34  ;;  %v2619_v7 = vmul.f32 0.3275911, %v8344_v60 }
 0x81f   :  { %v2495_v27 = vadd.f32 %v2494_v14, %v2426_v61  ;;  %v2938_v15 = vmul.f32 %v2921_v54, %v8331_v47  ;;  %v6042_v44 = vpop.eup %6041  ;;  %vm2767_vm13 = vweird.f32 %v8248_v43  ;;  %v2771_v10 = vand.u32 2147483647, %v8248_v43 }
 0x820   :  { %v3225_v58 = vmul.f32 %v3208_v4, %v2562_v13  ;;  %v8369_v14 = vmul.f32 0.70710677, %v8348_v28  ;;  %vm8371_vm14 = vmor %vm2767_vm13, %vm2768_vm12  ;;  %v2773_v26 = vand.u32 2147483648, %v8248_v43  ;;  %v3098_v51 = vmul.f32 1.442695, %v3074_v63 }
 0x821   :  { %v2519_v33 = vadd.f32 %v2495_v27, %v7775_v22  ;;  %v3039_v22 = vmul.f32 %v3022_v18, %v8280_v5  ;;  %v2955_v5 = vadd.f32 1.4214138, %v2938_v15  ;;  %6043 = vrcp.f32 %v8354_v38 }
 0x822   :  { %3264 = vrot.lane.b32.xlu2 %v3225_v58, %s6186_s0  ;;  %v2770_v17 = vsel %vm8371_vm14, %v8289_v34, %v2766_v37  ;;  %v2779_v23 = vsub.f32 1.0, %v2778_v41  ;;  %v2774_v0 = vor.u32 1.1754944e-38, %v2773_v26  ;;  %v8381_v8 = vadd.f32 1.0, %v2619_v7 }
 0x823   :  { %v8364_v31 = vadd.f32 %v2536_v46, %v2519_v33  ;;  %v3124_v20 = vmul.f32 %v6042_v44, %v3039_v22  ;;  %v2972_v19 = vmul.f32 %v2955_v5, %v8331_v47  ;;  %vm2772_vm15 = vcmp.eq.f32.partialorder %v2771_v10, 8.507059e+37 }
 0x824   :  { %v8387_v43 = vand.u32 2147483647, %v8369_v14  ;;  %v8389_v56 = vsel %vm2772_vm15, %v2774_v0, %v2770_v17  ;;  %6045 = vpow2.f32 %v3098_v51  ;;  %v3058_v34 = vsub.f32 0.0, %v8219_v29 }
 0x825   :  { %v3141_v61 = vsub.f32 1.0, %v3124_v20  ;;  %v8384_v27 = vmul.f32 0.70710677, %v8364_v31  ;;  %v2989_v59 = vadd.f32 -0.28449672, %v2972_v19  ;;  %vm3158_vm1 = vcmp.lt.f32.partialorder %v8126_v49, 0.0 }
 0x826   :  { %v2905_v52 = vmul.f32 1.0614054, %v8389_v56  ;;  %v2780_v2 = vmul.f32 %v8341_v57, %v2779_v23  ;;  %v2563_v13 = vmul.f32 0.5, %v8112_v30  ;;  %6047 = vrcp.f32 %v8381_v8 }
 0x827   :  { %v3175_v3 = vsub.f32 0.0, %v3141_v61  ;;  %v3006_v50 = vmul.f32 %v2989_v59, %v8331_v47  ;;  %v8396_v6 = vpop.eup %6043  ;;  %v8399_v25 = vand.u32 2147483647, %v8384_v27  ;;  %v2620_v33 = vmul.f32 0.3275911, %v8387_v43 }
 0x828   :  { %v2922_v46 = vadd.f32 -1.4531521, %v2905_v52  ;;  %v3075_v18 = vmul.f32 %v3058_v34, %v8219_v29  ;;  %v2781_v63 = vadd.f32 %v8341_v57, %v2780_v2  ;;  %v2793_v58 = vmul.f32 %v8396_v6, %v8354_v38 }
 0x829   :  { %v3192_v55 = vsel %vm3158_vm1, %v3175_v3, %v3141_v61  ;;  %v3023_v49 = vadd.f32 0.2548296, %v3006_v50  ;;  %vm2783_vm2 = vweird.f32 %v8341_v57  ;;  %v2621_v22 = vmul.f32 0.3275911, %v8399_v25 }
 0x82a   :  { %v3209_v4 = vadd.f32 1.0, %v3192_v55  ;;  %v2939_v41 = vmul.f32 %v2922_v46, %v8389_v56  ;;  %v6046_v30 = vpop.eup %6045  ;;  %vm2782_vm3 = vweird.f32 %v8297_v35  ;;  %v2786_v29 = vand.u32 2147483647, %v8297_v35 }
 0x82b   :  { %v3040_v37 = vmul.f32 %v3023_v49, %v8331_v47  ;;  %v2788_v15 = vand.u32 2147483648, %v8297_v35  ;;  %v8416_v44 = vadd.f32 1.0, %v2620_v33  ;;  %vm2784_vm7 = vmor %vm2782_vm3, %vm2783_vm2  ;;  %v3100_v47 = vmul.f32 1.442695, %v3075_v18 }
 0x82c   :  { %v3226_v54 = vmul.f32 %v3209_v4, %v2563_v13  ;;  %v2956_v10 = vadd.f32 1.4214138, %v2939_v41  ;;  %v3059_v20 = vsub.f32 0.0, %v8269_v53  ;;  %v2785_v5 = vsel %vm2784_vm7, %v8341_v57, %v2781_v63  ;;  %v8420_v21 = vpop.eup %6047 }
 0x82d   :  { %v3125_v7 = vmul.f32 %v6046_v30, %v3040_v37  ;;  %v2794_v26 = vsub.f32 1.0, %v2793_v58  ;;  %v2789_v23 = vor.u32 1.1754944e-38, %v2788_v15  ;;  %v8423_v61 = vadd.f32 1.0, %v2621_v22 }
 0x82e   :  { %3266 = vrot.lane.b32.xlu0 %v3226_v54, %s6186_s0  ;;  %v2973_v17 = vmul.f32 %v2956_v10, %v8389_v56  ;;  %vm2787_vm4 = vcmp.eq.f32.partialorder %v2786_v29, 8.507059e+37  ;;  %6049 = vrcp.f32 %v8416_v44  ;;  %v2808_v57 = vmul.f32 %v8420_v21, %v8381_v8 }
 0x82f   :  { %v3142_v51 = vsub.f32 1.0, %v3125_v7  ;;  %v8426_v0 = vsel %vm2787_vm4, %v2789_v23, %v2785_v5  ;;  %6051 = vpow2.f32 %v3100_v47  ;;  %vm3159_vm5 = vcmp.lt.f32.partialorder %v8161_v42, 0.0 }
 0x830   :  { %v2990_v19 = vadd.f32 -0.28449672, %v2973_v17  ;;  %v2906_v3 = vmul.f32 1.0614054, %v8426_v0  ;;  %v3076_v59 = vmul.f32 %v3059_v20, %v8269_v53  ;;  %v2795_v55 = vmul.f32 %v8396_v6, %v2794_v26 }
 0x831   :  { %v3176_v35 = vsub.f32 0.0, %v3142_v51  ;;  %v3060_v50 = vsub.f32 0.0, %v8320_v1  ;;  %6053 = vrcp.f32 %v8423_v61  ;;  %v2564_v2 = vmul.f32 0.5, %v8153_v36 }
 0x832   :  { %v3007_v52 = vmul.f32 %v2990_v19, %v8389_v56  ;;  %v2923_v33 = vadd.f32 -1.4531521, %v2906_v3  ;;  %v2796_v42 = vadd.f32 %v8396_v6, %v2795_v55  ;;  %v2809_v49 = vsub.f32 1.0, %v2808_v57 }
 0x833   :  { %v3193_v34 = vsel %vm3159_vm5, %v3176_v35, %v3142_v51  ;;  %vm2797_vm6 = vweird.f32 %v8354_v38  ;;  %vm2798_vm8 = vweird.f32 %v8396_v6  ;;  %v3102_v58 = vmul.f32 1.442695, %v3076_v59 }
 0x834   :  { %v3210_v13 = vadd.f32 1.0, %v3193_v34  ;;  %v3024_v4 = vadd.f32 0.2548296, %v3007_v52  ;;  %v8439_v18 = vpop.eup %6049  ;;  %v2940_v54 = vmul.f32 %v2923_v33, %v8426_v0  ;;  %v3077_v36 = vmul.f32 %v3060_v50, %v8320_v1  ;;  %vm8447_vm9 = vmor %vm2797_vm6, %vm2798_vm8 }
 0x835   :  { %v6052_v63 = vpop.eup %6051  ;;  %v2801_v41 = vand.u32 2147483647, %v8354_v38  ;;  %v2800_v29 = vsel %vm8447_vm9, %v8396_v6, %v2796_v42  ;;  %v2823_v1 = vmul.f32 %v8439_v18, %v8416_v44  ;;  %v2810_v20 = vmul.f32 %v8420_v21, %v2809_v49 }
 0x836   :  { %v3227_v46 = vmul.f32 %v3210_v13, %v2564_v2  ;;  %v3041_v53 = vmul.f32 %v3024_v4, %v8389_v56  ;;  %v2803_v56 = vand.u32 2147483648, %v8354_v38  ;;  %v2957_v22 = vadd.f32 1.4214138, %v2940_v54 }
 0x837   :  { %v8456_v15 = vpop.eup %6053  ;;  %vm2802_vm10 = vcmp.eq.f32.partialorder %v2801_v41, 8.507059e+37  ;;  %6055 = vpow2.f32 %v3102_v58  ;;  %v3104_v38 = vmul.f32 1.442695, %v3077_v36  ;;  %v3061_v5 = vsub.f32 0.0, %v8344_v60 }
 0x838   :  { %3268 = vrot.lane.b32.xlu2 %v3227_v46, %s6186_s0  ;;  %v3126_v30 = vmul.f32 %v6052_v63, %v3041_v53  ;;  %v2804_v7 = vor.u32 1.1754944e-38, %v2803_v56  ;;  %v2974_v47 = vmul.f32 %v2957_v22, %v8426_v0  ;;  %v2838_v6 = vmul.f32 %v8456_v15, %v8423_v61 }
 0x839   :  { %v2824_v35 = vsub.f32 1.0, %v2823_v1  ;;  %vm3160_vm11 = vcmp.lt.f32.partialorder %v8204_v39, 0.0  ;;  %v2811_v19 = vadd.f32 %v8420_v21, %v2810_v20  ;;  %vm2813_vm12 = vweird.f32 %v8420_v21 }
 0x83a   :  { %v3143_v10 = vsub.f32 1.0, %v3126_v30  ;;  %v8463_v26 = vsel %vm2802_vm10, %v2804_v7, %v2800_v29  ;;  %v2991_v17 = vadd.f32 -0.28449672, %v2974_v47  ;;  %v2565_v57 = vmul.f32 0.5, %v8190_v16 }
 0x83b   :  { %v2907_v23 = vmul.f32 1.0614054, %v8463_v26  ;;  %v3062_v52 = vsub.f32 0.0, %v8387_v43  ;;  %vm2812_vm13 = vweird.f32 %v8381_v8  ;;  %v2816_v50 = vand.u32 2147483647, %v8381_v8 }
 0x83c   :  { %v3177_v51 = vsub.f32 0.0, %v3143_v10  ;;  %v3008_v59 = vmul.f32 %v2991_v17, %v8426_v0  ;;  %v2839_v2 = vsub.f32 1.0, %v2838_v6  ;;  %vm8477_vm14 = vmor %vm2812_vm13, %vm2813_vm12  ;;  %v2818_v16 = vand.u32 2147483648, %v8381_v8 }
 0x83d   :  { %v2924_v34 = vadd.f32 -1.4531521, %v2907_v23  ;;  %v6056_v33 = vpop.eup %6055  ;;  %v2815_v49 = vsel %vm8477_vm14, %v8420_v21, %v2811_v19  ;;  %vm2817_vm15 = vcmp.eq.f32.partialorder %v2816_v50, 8.507059e+37  ;;  %v2825_v46 = vmul.f32 %v8439_v18, %v2824_v35 }
 0x83e   :  { %v3194_v3 = vsel %vm3160_vm11, %v3177_v51, %v3143_v10  ;;  %v3025_v13 = vadd.f32 0.2548296, %v3008_v59  ;;  %v2819_v63 = vor.u32 1.1754944e-38, %v2818_v16  ;;  %vm2827_vm1 = vweird.f32 %v8416_v44 }
 0x83f   :  { %v3211_v55 = vadd.f32 1.0, %v3194_v3  ;;  %v2941_v39 = vmul.f32 %v2924_v34, %v8463_v26  ;;  %v2826_v58 = vadd.f32 %v8439_v18, %v2825_v46  ;;  %vm2828_vm2 = vweird.f32 %v8439_v18 }
 0x840   :  { %v3042_v53 = vmul.f32 %v3025_v13, %v8426_v0  ;;  %v2831_v8 = vand.u32 2147483647, %v8416_v44  ;;  %v2833_v36 = vand.u32 2147483648, %v8416_v44  ;;  %6057 = vpow2.f32 %v3104_v38  ;;  %vm2829_vm3 = vmor %vm2827_vm1, %vm2828_vm2 }
 0x841   :  { %v3228_v42 = vmul.f32 %v3211_v55, %v2565_v57  ;;  %v2958_v54 = vadd.f32 1.4214138, %v2941_v39  ;;  %v8494_v41 = vsel %vm2817_vm15, %v2819_v63, %v2815_v49  ;;  %v3078_v0 = vmul.f32 %v3061_v5, %v8344_v60 }
 0x842   :  { %v3127_v21 = vmul.f32 %v6056_v33, %v3042_v53  ;;  %v2908_v56 = vmul.f32 1.0614054, %v8494_v41  ;;  %v2830_v30 = vsel %vm2829_vm3, %v8439_v18, %v2826_v58  ;;  %v2834_v22 = vor.u32 1.1754944e-38, %v2833_v36 }
 0x843   :  { %3270 = vrot.lane.b32.xlu2 %v3228_v42, %s6186_s0  ;;  %v2975_v37 = vmul.f32 %v2958_v54, %v8463_v26  ;;  %v3079_v29 = vmul.f32 %v3062_v52, %v8387_v43  ;;  %vm2832_vm7 = vcmp.eq.f32.partialorder %v2831_v8, 8.507059e+37  ;;  %vm3161_vm4 = vcmp.lt.f32.partialorder %v8251_v62, 0.0 }
 0x844   :  { %v3144_v1 = vsub.f32 1.0, %v3127_v21  ;;  %v2925_v44 = vadd.f32 -1.4531521, %v2908_v56  ;;  %v8501_v10 = vsel %vm2832_vm7, %v2834_v22, %v2830_v30  ;;  %v2840_v47 = vmul.f32 %v8456_v15, %v2839_v2 }
 0x845   :  { %v2992_v7 = vadd.f32 -0.28449672, %v2975_v37  ;;  %v2909_v38 = vmul.f32 1.0614054, %v8501_v10  ;;  %vm2842_vm5 = vweird.f32 %v8423_v61  ;;  %vm2843_vm6 = vweird.f32 %v8456_v15 }
 0x846   :  { %v3178_v20 = vsub.f32 0.0, %v3144_v1  ;;  %v2942_v18 = vmul.f32 %v2925_v44, %v8494_v41  ;;  %v2841_v43 = vadd.f32 %v8456_v15, %v2840_v47  ;;  %v2846_v62 = vand.u32 2147483647, %v8423_v61  ;;  %v6058_v5 = vpop.eup %6057  ;;  %vm8511_vm8 = vmor %vm2842_vm5, %vm2843_vm6 }
 0x847   :  { %v3009_v60 = vmul.f32 %v2992_v7, %v8463_v26  ;;  %v2926_v17 = vadd.f32 -1.4531521, %v2909_v38  ;;  %v2848_v35 = vand.u32 2147483648, %v8423_v61  ;;  %v2566_v19 = vmul.f32 0.5, %v8238_v45 }
 0x848   :  { %v3195_v6 = vsel %vm3161_vm4, %v3178_v20, %v3144_v1  ;;  %v2959_v3 = vadd.f32 1.4214138, %v2942_v18  ;;  %v2845_v59 = vsel %vm8511_vm8, %v8456_v15, %v2841_v43  ;;  %v3106_v34 = vmul.f32 1.442695, %v3078_v0 }
 0x849   :  { %v3026_v51 = vadd.f32 0.2548296, %v3009_v60  ;;  %v3212_v57 = vadd.f32 1.0, %v3195_v6  ;;  %v2943_v55 = vmul.f32 %v2926_v17, %v8501_v10  ;;  %v2849_v50 = vor.u32 1.1754944e-38, %v2848_v35 }
 0x84a   :  { %v3108_v2 = vmul.f32 1.442695, %v3079_v29  ;;  %v2976_v39 = vmul.f32 %v2959_v3, %v8494_v41  ;;  %vm2847_vm9 = vcmp.eq.f32.partialorder %v2846_v62, 8.507059e+37  ;;  %v3063_v61 = vsub.f32 0.0, %v8399_v25 }
 0x84b   :  { %v3043_v52 = vmul.f32 %v3026_v51, %v8463_v26  ;;  %v3229_v13 = vmul.f32 %v3212_v57, %v2566_v19  ;;  %v2960_v4 = vadd.f32 1.4214138, %v2943_v55  ;;  %v2850_v16 = vsel %vm2847_vm9, %v2849_v50, %v2845_v59 }
 0x84c   :  { %v2993_v33 = vadd.f32 -0.28449672, %v2976_v39  ;;  %v2910_v15 = vmul.f32 1.0614054, %v2850_v16  ;;  %6059 = vpow2.f32 %v3106_v34  ;;  %v3080_v53 = vmul.f32 %v3063_v61, %v8399_v25 }
 0x84d   :  { %v3128_v45 = vmul.f32 %v6058_v5, %v3043_v52  ;;  %3272 = vrot.lane.b32.xlu1 %v3229_v13, %s6186_s0  ;;  %v2977_v26 = vmul.f32 %v2960_v4, %v8501_v10  ;;  %6061 = vpow2.f32 %v3108_v2  ;;  %vm3162_vm10 = vcmp.lt.f32.partialorder %v8300_v24, 0.0 }
 0x84e   :  { %v3010_v49 = vmul.f32 %v2993_v33, %v8494_v41  ;;  %v2927_v46 = vadd.f32 -1.4531521, %v2910_v15  ;;  %vm3305_vm11 = vcmask 523520   ;;  %v2567_v37 = vmul.f32 0.5, %v8283_v12 }
 0x84f   :  { %v3145_v42 = vsub.f32 1.0, %v3128_v45  ;;  %v2994_v63 = vadd.f32 -0.28449672, %v2977_v26  ;;  %v3110_v1 = vmul.f32 1.442695, %v3080_v53  ;;  %vm3163_vm12 = vcmp.lt.f32.partialorder %v8328_v9, 0.0 }
 0x850   :  { %v3027_v58 = vadd.f32 0.2548296, %v3010_v49  ;;  %v2944_v8 = vmul.f32 %v2927_v46, %v2850_v16  ;;  %v2568_v51 = vmul.f32 0.5, %v8308_v32  ;;  %vm3164_vm13 = vcmp.lt.f32.partialorder %v8369_v14, 0.0 }
 0x851   :  { %v3179_v54 = vsub.f32 0.0, %v3145_v42  ;;  %v3011_v21 = vmul.f32 %v2994_v63, %v8501_v10  ;;  %6063 = vpow2.f32 %v3110_v1  ;;  %v2569_v3 = vmul.f32 0.5, %v8348_v28 }
 0x852   :  { %v3044_v56 = vmul.f32 %v3027_v58, %v8494_v41  ;;  %v2961_v30 = vadd.f32 1.4214138, %v2944_v8  ;;  %v6060_v29 = vpop.eup %6059  ;;  %vm3165_vm14 = vcmp.lt.f32.partialorder %v8384_v27, 0.0  ;;  %v2570_v50 = vmul.f32 0.5, %v8364_v31 }
 0x853   :  { %v3196_v36 = vsel %vm3162_vm10, %v3179_v54, %v3145_v42  ;;  %v3028_v25 = vadd.f32 0.2548296, %v3011_v21  ;;  %v6062_v47 = vpop.eup %6061  ;;  %vm3340_vm15 = vcmask 523264   ;;  %v2429_v21 = vpop.f32.mrf.mxu2 }
 0x854   :  { %v3213_v0 = vadd.f32 1.0, %v3196_v36  ;;  %v3129_v24 = vmul.f32 %v6060_v29, %v3044_v56  ;;  %v2978_v44 = vmul.f32 %v2961_v30, %v2850_v16 }
 0x855   :  { %v3045_v20 = vmul.f32 %v3028_v25, %v8501_v10  ;;  %v2537_v25 = vld [vmem:[%s10525_s7 + $0x70] sm:$0xff] }
 0x856   :  { %v3230_v7 = vmul.f32 %v3213_v0, %v2567_v37  ;;  %v3146_v60 = vsub.f32 1.0, %v3129_v24  ;;  %v2995_v12 = vadd.f32 -0.28449672, %v2978_v44  ;;  %v2497_v37 = vpop.f32.mrf.mxu3 }
 0x857   :  { %v3130_v38 = vmul.f32 %v6062_v47, %v3045_v20  ;;  %v6064_v35 = vpop.eup %6063  ;;  %v2498_v30 = vadd.f32 %v2497_v37, %v2429_v21  ;;  %v2538_v47 = vld [vmem:[%s10525_s7 + $0x78] sm:$0xff] }
 0x858   :  { %3274 = vrot.lane.b32.xlu0 %v3230_v7, %s6186_s0  ;;  %v3180_v41 = vsub.f32 0.0, %v3146_v60  ;;  %v3012_v18 = vmul.f32 %v2995_v12, %v2850_v16 }
 0x859   :  { %v3147_v43 = vsub.f32 1.0, %v3130_v38  ;;  %v2520_v1 = vadd.f32 %v2498_v30, %v7814_v40 }
 0x85a   :  { %v3197_v62 = vsel %vm3163_vm12, %v3180_v41, %v3146_v60  ;;  %v3029_v5 = vadd.f32 0.2548296, %v3012_v18 }
 0x85b   :  { %v3214_v17 = vadd.f32 1.0, %v3197_v62  ;;  %v3181_v23 = vsub.f32 0.0, %v3147_v43  ;;  %v8588_v24 = vadd.f32 %v2537_v25, %v2520_v1 }
 0x85c   :  { %v3046_v10 = vmul.f32 %v3029_v5, %v2850_v16 }
 0x85d   :  { %v3259_v22 = vpop.permute.xlu2 %3258  ;;  %v3231_v19 = vmul.f32 %v3214_v17, %v2568_v51  ;;  %v3198_v57 = vsel %vm3164_vm13, %v3181_v23, %v3147_v43  ;;  %v8595_v20 = vmul.f32 0.70710677, %v8588_v24 }
 0x85e   :  { %3308 = vst.msk [vmem:[#allocation2 + $0x10] sm:$0xff] %vm3305_vm11, %v3259_v22  ;;  %v3215_v59 = vadd.f32 1.0, %v3198_v57  ;;  %v3131_v9 = vmul.f32 %v6064_v35, %v3046_v10  ;;  %v2432_v22 = vpop.f32.mrf.mxu2  ;;  %v2500_v29 = vpop.f32.mrf.mxu3 }
 0x85f   :  { %3276 = vrot.lane.b32.xlu1 %v3231_v19, %s6186_s0  ;;  %v2501_v7 = vadd.f32 %v2500_v29, %v2432_v22  ;;  %v8601_v40 = vand.u32 2147483647, %v8595_v20 }
 0x860   :  { %v3232_v34 = vmul.f32 %v3215_v59, %v2569_v3  ;;  %v3148_v52 = vsub.f32 1.0, %v3131_v9 }
 0x861   :  { %v2521_v44 = vadd.f32 %v2501_v7, %v7816_v11  ;;  %v2622_v11 = vmul.f32 0.3275911, %v8601_v40 }
 0x862   :  { %3278 = vrot.lane.b32.xlu0 %v3232_v34, %s6186_s0  ;;  %v3182_v32 = vsub.f32 0.0, %v3148_v52 }
 0x863   :  { %v8597_v12 = vadd.f32 %v2538_v47, %v2521_v44  ;;  %v2639_v62 = vadd.f32 1.0, %v2622_v11 }
 0x864   :  { %v3199_v14 = vsel %vm3165_vm14, %v3182_v32, %v3148_v52 }
 0x865   :  { %v3255_v6 = vpop.permute.xlu0 %3254  ;;  %v3216_v2 = vadd.f32 1.0, %v3199_v14  ;;  %v8557_v16 = vld [vmem:[#allocation2 + $0x10] sm:$0xff]  ;;  %v8604_v38 = vmul.f32 0.70710677, %v8597_v12  ;;  %6065 = vrcp.f32 %v2639_v62  ;;  %vm2857_vm2 = vweird.f32 %v2639_v62 }
 0x866   :  { %3306 = vst.msk [vmem:[#allocation2] sm:$0xff] %vm3305_vm11, %v3255_v6  ;;  %v3347_v42 = vsel %vm3340_vm15, %v8557_v16, 0.0  ;;  %v2435_v19 = vpop.f32.mrf.mxu2  ;;  %v2503_v57 = vpop.f32.mrf.mxu3 }
 0x867   :  { %v3233_v13 = vmul.f32 %v3216_v2, %v2570_v50  ;;  %v8609_v18 = vand.u32 2147483647, %v8604_v38  ;;  %v2504_v59 = vadd.f32 %v2503_v57, %v2435_v19 }
 0x869   :  { %3280 = vrot.lane.b32.xlu2 %v3233_v13, %s6186_s0  ;;  %v2623_v5 = vmul.f32 0.3275911, %v8609_v18  ;;  %v2522_v32 = vadd.f32 %v2504_v59, %v7854_v48  ;;  %v6187_v13 = vmov 64.0  }
 0x86b   :  { %v2640_v6 = vadd.f32 1.0, %v2623_v5  ;;  %v6066_v10 = vpop.eup %6065 }
 0x86c   :  { %v2853_v3 = vmul.f32 %v6066_v10, %v2639_v62  ;;  %vm2858_vm1 = vweird.f32 %v6066_v10 }
 0x86d   :  { %v3257_v55 = vpop.permute.xlu1 %3256  ;;  %v8549_v45 = vld [vmem:[#allocation2] sm:$0xff]  ;;  %6067 = vrcp.f32 %v2640_v6  ;;  %vm2859_vm3 = vmor %vm2857_vm2, %vm2858_vm1  ;;  %vm2872_vm5 = vweird.f32 %v2640_v6  ;;  %vm3166_vm1 = vcmp.lt.f32.partialorder %v8595_v20, 0.0  ;;  %vm3167_vm2 = vcmp.lt.f32.partialorder %v8604_v38, 0.0 }
 0x86e   :  { %3307 = vst.msk [vmem:[#allocation2 + $0x8] sm:$0xff] %vm3305_vm11, %v3257_v55  ;;  %v3341_v27 = vsel %vm3340_vm15, %v8549_v45, 0.0  ;;  %v2854_v34 = vsub.f32 1.0, %v2853_v3  ;;  %v2539_v55 = vld [vmem:[%s10525_s7 + $0x80] sm:$0xff]  ;;  %6069 = vrcp.f32 %v6187_v13  ;;  %v2572_v38 = vmul.f32 0.5, %v8597_v12 }
 0x86f   :  { %v8623_v2 = vadd.f32 %v2539_v55, %v2522_v32 }
 0x870   :  { %v2855_v14 = vmul.f32 %v6066_v10, %v2854_v34 }
 0x873   :  { %v6068_v9 = vpop.eup %6067 }
 0x874   :  { %v2868_v52 = vmul.f32 %v6068_v9, %v2640_v6  ;;  %v6070_v48 = vpop.eup %6069  ;;  %vm2873_vm7 = vweird.f32 %v6068_v9 }
 0x875   :  { %v8553_v31 = vld [vmem:[#allocation2 + $0x8] sm:$0xff]  ;;  %vm2874_vm6 = vmor %vm2872_vm5, %vm2873_vm7  ;;  %vm3397_vm9 = vweird.f32 %v6070_v48 }
 0x876   :  { %v3344_v4 = vsel %vm3340_vm15, %v8553_v31, 0.0  ;;  %v2869_v50 = vsub.f32 1.0, %v2868_v52 }
 0x87c   :  { %v3265_v28 = vpop.permute.xlu2 %3264 }
 0x87d   :  { %3311 = vst.msk [vmem:[#allocation2 + $0x28] sm:$0xff] %vm3305_vm11, %v3265_v28  ;;  %v2856_v28 = vadd.f32 %v6066_v10, %v2855_v14 }
 0x87f   :  { %v3261_v39 = vpop.permute.xlu0 %3260 }
 0x880   :  { %3309 = vst.msk [vmem:[#allocation2 + $0x18] sm:$0xff] %vm3305_vm11, %v3261_v39  ;;  %v8626_v39 = vmul.f32 0.70710677, %v8623_v2 }
 0x884   :  { %v8572_v63 = vld [vmem:[#allocation2 + $0x28] sm:$0xff] }
 0x885   :  { %v3356_v58 = vsel %vm3340_vm15, %v8572_v63, 0.0 }
 0x887   :  { %v8559_v15 = vld [vmem:[#allocation2 + $0x18] sm:$0xff] }
 0x888   :  { %v3350_v26 = vsel %vm3340_vm15, %v8559_v15, 0.0 }
 0x889   :  { %3342 = vadd.xlane.f32.xlu1 %v3341_v27  ;;  %v2870_v27 = vmul.f32 %v6068_v9, %v2869_v50  ;;  %v3065_v50 = vsub.f32 0.0, %v8609_v18 }
 0x88a   :  { %v3263_v61 = vpop.permute.xlu1 %3262 }
 0x88b   :  { %3310 = vst.msk [vmem:[#allocation2 + $0x20] sm:$0xff] %vm3305_vm11, %v3263_v61  ;;  %v2863_v61 = vand.u32 2147483648, %v2639_v62 }
 0x88c   :  { %3345 = vadd.xlane.f32.xlu0 %v3344_v4  ;;  %v2861_v4 = vand.u32 2147483647, %v2639_v62 }
 0x88e   :  { %vm2862_vm4 = vcmp.eq.f32.partialorder %v2861_v4, 8.507059e+37 }
 0x892   :  { %v3269_v33 = vpop.permute.xlu2 %3268  ;;  %3348 = vadd.xlane.f32.xlu2 %v3347_v42  ;;  %v8566_v49 = vld [vmem:[#allocation2 + $0x20] sm:$0xff]  ;;  %v8629_v42 = vand.u32 2147483647, %v8626_v39 }
 0x893   :  { %3313 = vst.msk [vmem:[#allocation2 + $0x38] sm:$0xff] %vm3305_vm11, %v3269_v33  ;;  %v3353_v46 = vsel %vm3340_vm15, %v8566_v49, 0.0  ;;  %v2860_v33 = vsel %vm2859_vm3, %v6066_v10, %v2856_v28  ;;  %vm3168_vm3 = vcmp.lt.f32.partialorder %v8626_v39, 0.0 }
 0x894   :  { %3351 = vadd.xlane.f32.xlu0 %v3350_v26  ;;  %v2864_v26 = vor.u32 1.1754944e-38, %v2863_v61  ;;  %v2624_v21 = vmul.f32 0.3275911, %v8629_v42 }
 0x896   :  { %v8637_v1 = vadd.f32 1.0, %v2624_v21 }
 0x898   :  { %6071 = vrcp.f32 %v8637_v1  ;;  %vm2887_vm12 = vweird.f32 %v8637_v1 }
 0x89a   :  { %3354 = vadd.xlane.f32.xlu2 %v3353_v46  ;;  %v8580_v0 = vld [vmem:[#allocation2 + $0x38] sm:$0xff]  ;;  %v2871_v46 = vadd.f32 %v6068_v9, %v2870_v27 }
 0x89b   :  { %v3362_v56 = vsel %vm3340_vm15, %v8580_v0, 0.0 }
 0x89c   :  { %v2875_v37 = vsel %vm2874_vm6, %v6068_v9, %v2871_v46 }
 0x89d   :  { %v3271_v53 = vpop.permute.xlu2 %3270 }
 0x89e   :  { %3314 = vst.msk [vmem:[#allocation2 + $0x40] sm:$0xff] %vm3305_vm11, %v3271_v53  ;;  %v2878_v53 = vand.u32 2147483648, %v2640_v6 }
 0x8a0   :  { %v3267_v54 = vpop.permute.xlu0 %3266  ;;  %v2879_v30 = vor.u32 1.1754944e-38, %v2878_v53 }
 0x8a1   :  { %3312 = vst.msk [vmem:[#allocation2 + $0x30] sm:$0xff] %vm3305_vm11, %v3267_v54  ;;  %v3393_v54 = vmul.f32 64.0, %v6070_v48 }
 0x8a2   :  { %3357 = vadd.xlane.f32.xlu2 %v3356_v58  ;;  %v8631_v58 = vsel %vm2862_vm4, %v2864_v26, %v2860_v33  ;;  %v3082_v33 = vmul.f32 %v3065_v50, %v8609_v18 }
 0x8a3   :  { %v3394_v22 = vsub.f32 1.0, %v3393_v54 }
 0x8a5   :  { %v3395_v7 = vmul.f32 %v6070_v48, %v3394_v22  ;;  %v8681_v18 = vld [vmem:[#allocation2 + $0x40] sm:$0xff] }
 0x8a8   :  { %v8576_v8 = vld [vmem:[#allocation2 + $0x30] sm:$0xff] }
 0x8a9   :  { %v3359_v36 = vsel %vm3340_vm15, %v8576_v8, 0.0 }
 0x8aa   :  { %3360 = vadd.xlane.f32.xlu2 %v3359_v36  ;;  %v2876_v36 = vand.u32 2147483647, %v2640_v6 }
 0x8ac   :  { %vm2877_vm8 = vcmp.eq.f32.partialorder %v2876_v36, 8.507059e+37 }
 0x8ad   :  { %v8635_v29 = vsel %vm2877_vm8, %v2879_v30, %v2875_v37 }
 0x8ae   :  { %v2912_v44 = vmul.f32 1.0614054, %v8635_v29 }
 0x8b2   :  { %3363 = vadd.xlane.f32.xlu2 %v3362_v56  ;;  %v2911_v56 = vmul.f32 1.0614054, %v8631_v58 }
 0x8b4   :  { %v2928_v25 = vadd.f32 -1.4531521, %v2911_v56  ;;  %v3114_v56 = vmul.f32 1.442695, %v3082_v33 }
 0x8b6   :  { %v2945_v47 = vmul.f32 %v2928_v25, %v8631_v58  ;;  %v2891_v25 = vand.u32 2147483647, %v8637_v1 }
 0x8b8   :  { %v2962_v11 = vadd.f32 1.4214138, %v2945_v47  ;;  %vm2892_vm14 = vcmp.eq.f32.partialorder %v2891_v25, 8.507059e+37 }
 0x8ba   :  { %v2979_v10 = vmul.f32 %v2962_v11, %v8631_v58 }
 0x8bc   :  { %v2996_v52 = vadd.f32 -0.28449672, %v2979_v10 }
 0x8be   :  { %v3013_v61 = vmul.f32 %v2996_v52, %v8631_v58 }
 0x8bf   :  { %v3273_v60 = vpop.permute.xlu1 %3272 }
 0x8c0   :  { %3315 = vst.msk [vmem:[#allocation2 + $0x48] sm:$0xff] %vm3305_vm11, %v3273_v60  ;;  %v3396_v60 = vadd.f32 %v6070_v48, %v3395_v7  ;;  %v3030_v53 = vadd.f32 0.2548296, %v3013_v61 }
 0x8c2   :  { %v8644_v62 = vsel %vm3397_vm9, %v6070_v48, %v3396_v60 }
 0x8c3   :  { %v3281_v41 = vpop.permute.xlu2 %3280 }
 0x8c4   :  { %3319 = vst.msk [vmem:[#allocation2 + $0x68] sm:$0xff] %vm3305_vm11, %v3281_v41  ;;  %v2929_v41 = vadd.f32 -1.4531521, %v2912_v44  ;;  %v3047_v44 = vmul.f32 %v3030_v53, %v8631_v58 }
 0x8c6   :  { %v2946_v5 = vmul.f32 %v2929_v41, %v8635_v29  ;;  %v3365_v41 = vsel %vm3340_vm15, %v8681_v18, 0.0 }
 0x8c8   :  { %v2963_v19 = vadd.f32 1.4214138, %v2946_v5 }
 0x8ca   :  { %v3275_v43 = vpop.permute.xlu0 %3274  ;;  %v2980_v14 = vmul.f32 %v2963_v19, %v8635_v29 }
 0x8cb   :  { %3316 = vst.msk [vmem:[#allocation2 + $0x50] sm:$0xff] %vm3305_vm11, %v3275_v43  ;;  %v8642_v43 = vpop.eup %6071 }
 0x8cc   :  { %v2997_v48 = vadd.f32 -0.28449672, %v2980_v14  ;;  %vm2888_vm10 = vweird.f32 %v8642_v43 }
 0x8cd   :  { %vm8686_vm13 = vmor %vm2887_vm12, %vm2888_vm10 }
 0x8ce   :  { %v3014_v37 = vmul.f32 %v2997_v48, %v8635_v29  ;;  %v2571_v48 = vmul.f32 0.5, %v8588_v24 }
 0x8d0   :  { %v3031_v5 = vadd.f32 0.2548296, %v3014_v37 }
 0x8d1   :  { %v3277_v17 = vpop.permute.xlu1 %3276 }
 0x8d2   :  { %v8613_v51 = vld [vmem:[#allocation2 + $0x50] sm:$0xff]  ;;  %3317 = vst.msk [vmem:[#allocation2 + $0x58] sm:$0xff] %vm3305_vm11, %v3277_v17  ;;  %v2883_v17 = vmul.f32 %v8642_v43, %v8637_v1  ;;  %v3048_v10 = vmul.f32 %v3031_v5, %v8635_v29 }
 0x8d3   :  { %v3371_v23 = vsel %vm3340_vm15, %v8613_v51, 0.0 }
 0x8d4   :  { %3372 = vadd.xlane.f32.xlu2 %v3371_v23  ;;  %v3279_v35 = vpop.permute.xlu0 %3278  ;;  %v2884_v9 = vsub.f32 1.0, %v2883_v17 }
 0x8d5   :  { %3318 = vst.msk [vmem:[#allocation2 + $0x60] sm:$0xff] %vm3305_vm11, %v3279_v35  ;;  %v3064_v35 = vsub.f32 0.0, %v8601_v40 }
 0x8d6   :  { %v2885_v27 = vmul.f32 %v8642_v43, %v2884_v9 }
 0x8d7   :  { %v3081_v32 = vmul.f32 %v3064_v35, %v8601_v40 }
 0x8d8   :  { %v2886_v54 = vadd.f32 %v8642_v43, %v2885_v27 }
 0x8d9   :  { %v3112_v4 = vmul.f32 1.442695, %v3081_v32  ;;  %v8711_v32 = vld [vmem:[#allocation2 + $0x58] sm:$0xff] }
 0x8da   :  { %v2890_v47 = vsel %vm8686_vm13, %v8642_v43, %v2886_v54 }
 0x8db   :  { %6073 = vpow2.f32 %v3112_v4 }
 0x8dc   :  { %6075 = vpow2.f32 %v3114_v56 }
 0x8fc   :  { %v3343_v6 = vpop.xlane.xlu1 %3342 }
 0x8fd   :  { %v3399_v23 = vmul.f32 %v8644_v62, %v3343_v6  ;;  %v6074_v6 = vpop.eup %6073 }
 0x8fe   :  { %v3132_v58 = vmul.f32 %v6074_v6, %v3047_v44 }
 0x8ff   :  { %v8653_v57 = vsub.f32 %v8549_v45, %v3399_v23  ;;  %v3346_v3 = vpop.xlane.xlu0 %3345 }
 0x900   :  { %v3400_v59 = vmul.f32 %v8644_v62, %v3346_v3  ;;  %v6076_v3 = vpop.eup %6075  ;;  %v3149_v9 = vsub.f32 1.0, %v3132_v58 }
 0x901   :  { %v3433_v34 = vmul.f32 %v8653_v57, %v8653_v57 }
 0x902   :  { %v8660_v55 = vsub.f32 %v8553_v31, %v3400_v59  ;;  %v3183_v14 = vsub.f32 0.0, %v3149_v9 }
 0x903   :  { %v3450_v45 = vsel %vm3340_vm15, %v3433_v34, 0.0  ;;  %v3133_v34 = vmul.f32 %v6076_v3, %v3048_v10 }
 0x904   :  { %3451 = vadd.xlane.f32.xlu1 %v3450_v45  ;;  %v3434_v13 = vmul.f32 %v8660_v55, %v8660_v55  ;;  %v3374_v45 = vsel %vm3340_vm15, %v8711_v32, 0.0 }
 0x905   :  { %v3349_v28 = vpop.xlane.xlu2 %3348  ;;  %v3150_v50 = vsub.f32 1.0, %v3133_v34  ;;  %v3726_v34 = vld [vmem:[%s10526_s9 + $0x20] sm:$0xff] }
 0x906   :  { %v3401_v40 = vmul.f32 %v8644_v62, %v3349_v28  ;;  %v3453_v31 = vsel %vm3340_vm15, %v3434_v13, 0.0  ;;  %v3200_v28 = vsel %vm3166_vm1, %v3183_v14, %v3149_v9  ;;  %v3728_v9 = vld [vmem:[%s10526_s9 + $0x30] sm:$0xff] }
 0x907   :  { %3454 = vadd.xlane.f32.xlu0 %v3453_v31  ;;  %v3352_v26 = vpop.xlane.xlu0 %3351  ;;  %v3184_v61 = vsub.f32 0.0, %v3150_v50  ;;  %v3217_v4 = vadd.f32 1.0, %v3200_v28  ;;  %v8717_v31 = vld [vmem:[#allocation2 + $0x60] sm:$0xff]  ;;  %v3724_v14 = vld [vmem:[%s10526_s9 + $0x10] sm:$0xff] }
 0x908   :  { %v8673_v46 = vsub.f32 %v8557_v16, %v3401_v40  ;;  %v3402_v36 = vmul.f32 %v8644_v62, %v3352_v26  ;;  %v2893_v16 = vand.u32 2147483648, %v8637_v1  ;;  %v3377_v53 = vsel %vm3340_vm15, %v8717_v31, 0.0 }
 0x909   :  { %v3201_v33 = vsel %vm3167_vm2, %v3184_v61, %v3150_v50  ;;  %v3234_v20 = vmul.f32 %v3217_v4, %v2571_v48  ;;  %v3723_v50 = vld [vmem:[%s10526_s9 + $0x8] sm:$0xff] }
 0x90a   :  { %v3435_v21 = vmul.f32 %v8673_v46, %v8673_v46  ;;  %v8696_v60 = vsub.f32 %v8559_v15, %v3402_v36  ;;  %v2894_v1 = vor.u32 1.1754944e-38, %v2893_v16  ;;  %v3066_v36 = vsub.f32 0.0, %v8629_v42 }
 0x90b   :  { %v3218_v37 = vadd.f32 1.0, %v3201_v33 }
 0x90c   :  { %v3456_v30 = vsel %vm3340_vm15, %v3435_v21, 0.0  ;;  %v2895_v23 = vsel %vm2892_vm14, %v2894_v1, %v2890_v47  ;;  %v3436_v15 = vmul.f32 %v8696_v60, %v8696_v60  ;;  %v3083_v16 = vmul.f32 %v3066_v36, %v8629_v42 }
 0x90d   :  { %3457 = vadd.xlane.f32.xlu1 %v3456_v30  ;;  %v3355_v7 = vpop.xlane.xlu2 %3354  ;;  %v2913_v19 = vmul.f32 1.0614054, %v2895_v23  ;;  %v3235_v30 = vmul.f32 %v3218_v37, %v2572_v38 }
 0x90e   :  { %v3403_v11 = vmul.f32 %v8644_v62, %v3355_v7  ;;  %v3116_v44 = vmul.f32 1.442695, %v3083_v16 }
 0x90f   :  { %3366 = vadd.xlane.f32.xlu0 %v3365_v41  ;;  %v2930_v52 = vadd.f32 -1.4531521, %v2913_v19  ;;  %v8747_v19 = vld [vmem:[#allocation2 + $0x48] sm:$0xff] }
 0x910   :  { %v8702_v17 = vsub.f32 %v8566_v49, %v3403_v11  ;;  %v3459_v49 = vsel %vm3340_vm15, %v3436_v15, 0.0  ;;  %6077 = vpow2.f32 %v3116_v44 }
 0x911   :  { %v2947_v29 = vmul.f32 %v2930_v52, %v2895_v23  ;;  %v3725_v52 = vld [vmem:[%s10526_s9 + $0x18] sm:$0xff] }
 0x912   :  { %v3437_v43 = vmul.f32 %v8702_v17, %v8702_v17 }
 0x913   :  { %v2964_v40 = vadd.f32 1.4214138, %v2947_v29 }
 0x914   :  { %v3462_v35 = vsel %vm3340_vm15, %v3437_v43, 0.0  ;;  %v2573_v43 = vmul.f32 0.5, %v8623_v2  ;;  %v3729_v2 = vld [vmem:[%s10526_s9 + $0x38] sm:$0xff] }
 0x915   :  { %3463 = vadd.xlane.f32.xlu2 %v3462_v35  ;;  %v3358_v59 = vpop.xlane.xlu2 %3357  ;;  %v2981_v54 = vmul.f32 %v2964_v40, %v2895_v23  ;;  %3789 = vmatpush.msrb.mxu0 %v3729_v2 }
 0x916   :  { %v6078_v42 = vpop.eup %6077  ;;  %v3404_v15 = vmul.f32 %v8644_v62, %v3358_v59  ;;  %v8755_v59 = vld [vmem:[#allocation2 + $0x68] sm:$0xff] }
 0x917   :  { %3460 = vadd.xlane.f32.xlu0 %v3459_v49  ;;  %v2998_v56 = vadd.f32 -0.28449672, %v2981_v54  ;;  %v3727_v49 = vld [vmem:[%s10526_s9 + $0x28] sm:$0xff]  ;;  %3790 = vmatpush.msrb.mxu0 %v3728_v9 }
 0x918   :  { %v8745_v35 = vsub.f32 %v8572_v63, %v3404_v15  ;;  %v3380_v63 = vsel %vm3340_vm15, %v8755_v59, 0.0 }
 0x919   :  { %v3015_v7 = vmul.f32 %v2998_v56, %v2895_v23  ;;  %3791 = vmatpush.msrb.mxu0 %v3727_v49 }
 0x91a   :  { %v3438_v39 = vmul.f32 %v8745_v35, %v8745_v35 }
 0x91b   :  { %v3032_v47 = vadd.f32 0.2548296, %v3015_v7  ;;  %3792 = vmatpush.msrb.mxu0 %v3726_v34 }
 0x91c   :  { %v3465_v3 = vsel %vm3340_vm15, %v3438_v39, 0.0 }
 0x91d   :  { %3375 = vadd.xlane.f32.xlu2 %v3374_v45  ;;  %v3361_v13 = vpop.xlane.xlu2 %3360  ;;  %v3049_v11 = vmul.f32 %v3032_v47, %v2895_v23  ;;  %v3368_v23 = vsel %vm3340_vm15, %v8747_v19, 0.0  ;;  %3793 = vmatpush.msrb.mxu0 %v3725_v52 }
 0x91e   :  { %v3405_v27 = vmul.f32 %v8644_v62, %v3361_v13  ;;  %v3722_v13 = vld [vmem:[%s10526_s9] sm:$0xff] }
 0x91f   :  { %v3134_v5 = vmul.f32 %v6078_v42, %v3049_v11  ;;  %3794 = vmatpush.msrb.mxu0 %v3724_v14 }
 0x920   :  { %v8722_v26 = vsub.f32 %v8576_v8, %v3405_v27 }
 0x921   :  { %v3151_v1 = vsub.f32 1.0, %v3134_v5  ;;  %3795 = vmatpush.msrb.mxu0 %v3723_v50 }
 0x922   :  { %v3439_v8 = vmul.f32 %v8722_v26, %v8722_v26 }
 0x923   :  { %v3185_v6 = vsub.f32 0.0, %v3151_v1  ;;  %3796 = vmatpush.msrb.mxu0 %v3722_v13 }
 0x924   :  { %v3468_v25 = vsel %vm3340_vm15, %v3439_v8, 0.0 }
 0x925   :  { %3378 = vadd.xlane.f32.xlu2 %v3377_v53  ;;  %v3364_v21 = vpop.xlane.xlu2 %3363 }
 0x926   :  { %3282 = vrot.lane.b32.xlu1 %v3234_v20, %s6186_s0  ;;  %v3406_v24 = vmul.f32 %v8644_v62, %v3364_v21 }
 0x928   :  { %v8735_v22 = vsub.f32 %v8580_v0, %v3406_v24  ;;  %v3202_v0 = vsel %vm3168_vm3, %v3185_v6, %v3151_v1 }
 0x929   :  { %v3219_v58 = vadd.f32 1.0, %v3202_v0 }
 0x92a   :  { %v3440_v12 = vmul.f32 %v8735_v22, %v8735_v22 }
 0x92b   :  { %3284 = vrot.lane.b32.xlu0 %v3235_v30, %s6186_s0  ;;  %v3236_v10 = vmul.f32 %v3219_v58, %v2573_v43 }
 0x92c   :  { %v3471_v41 = vsel %vm3340_vm15, %v3440_v12, 0.0 }
 0x92d   :  { %3469 = vadd.xlane.f32.xlu2 %v3468_v25 }
 0x935   :  { %3472 = vadd.xlane.f32.xlu2 %v3471_v41 }
 0x947   :  { %v8785_v40 = vpop.xlane.xlu2 %3372 }
 0x94d   :  { %3286 = vrot.lane.b32.xlu2 %v3236_v10, %s6186_s0 }
 0x950   :  { %3369 = vadd.xlane.f32.xlu1 %v3368_v23 }
 0x955   :  { %3466 = vadd.xlane.f32.xlu0 %v3465_v3 }
 0x958   :  { %3381 = vadd.xlane.f32.xlu1 %v3380_v63 }
 0x977   :  { %v3452_v45 = vpop.xlane.xlu1 %3451 }
 0x978   :  { %v3501_v29 = vmul.f32 %v3452_v45, %v8644_v62 }
 0x97a   :  { %v3518_v28 = vadd.f32 1e-05, %v3501_v29  ;;  %v3455_v61 = vpop.xlane.xlu0 %3454 }
 0x97b   :  { %v3502_v27 = vmul.f32 %v3455_v61, %v8644_v62 }
 0x97c   :  { %6079 = vrsqrt.f32 %v3518_v28  ;;  %vm3541_vm4 = vweird.f32 %v3518_v28 }
 0x97d   :  { %v3519_v4 = vadd.f32 1e-05, %v3502_v27 }
 0x97f   :  { %6081 = vrsqrt.f32 %v3519_v4  ;;  %vm3551_vm8 = vweird.f32 %v3519_v4 }
 0x980   :  { %v3458_v48 = vpop.xlane.xlu1 %3457 }
 0x981   :  { %v3503_v33 = vmul.f32 %v3458_v48, %v8644_v62 }
 0x982   :  { %v6080_v20 = vpop.eup %6079  ;;  %v3367_v53 = vpop.xlane.xlu0 %3366 }
 0x983   :  { %v3536_v54 = vmul.f32 %v6080_v20, %v3518_v28  ;;  %v3520_v36 = vadd.f32 1e-05, %v3503_v33  ;;  %v3407_v21 = vmul.f32 %v8644_v62, %v3367_v53  ;;  %vm3542_vm7 = vweird.f32 %v6080_v20 }
 0x984   :  { %vm3543_vm5 = vmor %vm3541_vm4, %vm3542_vm7 }
 0x985   :  { %v6082_v37 = vpop.eup %6081  ;;  %v3537_v38 = vmul.f32 %v6080_v20, %v3536_v54  ;;  %6083 = vrsqrt.f32 %v3520_v36  ;;  %v8790_v24 = vsub.f32 %v8681_v18, %v3407_v21  ;;  %vm3561_vm12 = vweird.f32 %v3520_v36 }
 0x986   :  { %v3546_v8 = vmul.f32 %v6082_v37, %v3519_v4  ;;  %vm3552_vm6 = vweird.f32 %v6082_v37 }
 0x987   :  { %v3538_v56 = vmul.f32 0.5, %v3537_v38  ;;  %v3441_v16 = vmul.f32 %v8790_v24, %v8790_v24  ;;  %vm3553_vm9 = vmor %vm3551_vm8, %vm3552_vm6 }
 0x988   :  { %v3547_v30 = vmul.f32 %v6082_v37, %v3546_v8  ;;  %v3464_v25 = vpop.xlane.xlu2 %3463 }
 0x989   :  { %v3539_v7 = vsub.f32 1.5, %v3538_v56  ;;  %v3474_v44 = vsel %vm3340_vm15, %v3441_v16, 0.0  ;;  %v3505_v12 = vmul.f32 %v3464_v25, %v8644_v62 }
 0x98a   :  { %v3548_v47 = vmul.f32 0.5, %v3547_v30  ;;  %v3461_v41 = vpop.xlane.xlu0 %3460  ;;  %3475 = vadd.xlane.f32.xlu1 %v3474_v44 }
 0x98b   :  { %v6084_v11 = vpop.eup %6083  ;;  %v3540_v42 = vmul.f32 %v6080_v20, %v3539_v7  ;;  %v3504_v18 = vmul.f32 %v3461_v41, %v8644_v62  ;;  %v8797_v5 = vadd.f32 1e-05, %v3505_v12 }
 0x98c   :  { %v3549_v1 = vsub.f32 1.5, %v3548_v47  ;;  %v3556_v6 = vmul.f32 %v6084_v11, %v3520_v36  ;;  %vm3562_vm10 = vweird.f32 %v6084_v11 }
 0x98d   :  { %v3521_v0 = vadd.f32 1e-05, %v3504_v18  ;;  %v3544_v58 = vsel %vm3543_vm5, %v6080_v20, %v3540_v42  ;;  %6085 = vrsqrt.f32 %v8797_v5  ;;  %vm3563_vm13 = vmor %vm3561_vm12, %vm3562_vm10  ;;  %vm3581_vm7 = vweird.f32 %v8797_v5 }
 0x98e   :  { %v3557_v15 = vmul.f32 %v6084_v11, %v3556_v6  ;;  %v3705_v43 = vmul.f32 %v3544_v58, %v8653_v57  ;;  %v3550_v10 = vmul.f32 %v6082_v37, %v3549_v1  ;;  %v3409_v1 = vmul.f32 %v8644_v62, %v8785_v40 }
 0x98f   :  { %6087 = vrsqrt.f32 %v3521_v0  ;;  %vm3571_vm1 = vweird.f32 %v3521_v0 }
 0x990   :  { %v3558_v23 = vmul.f32 0.5, %v3557_v15  ;;  %5602 = vmatmul.msk.f32.vlgmr.msrb.gmra.mxu0 %vm3340_vm15, %v3705_v43  ;;  %v3376_v39 = vpop.xlane.xlu2 %3375  ;;  %v3554_v3 = vsel %vm3553_vm9, %v6082_v37, %v3550_v10  ;;  %v8853_v10 = vsub.f32 %v8613_v51, %v3409_v1 }
 0x991   :  { %v3706_v9 = vmul.f32 %v3554_v3, %v8660_v55  ;;  %v3410_v8 = vmul.f32 %v8644_v62, %v3376_v39 }
 0x992   :  { %v3559_v63 = vsub.f32 1.5, %v3558_v23 }
 0x993   :  { %v6086_v2 = vpop.eup %6085  ;;  %v8827_v25 = vsub.f32 %v8711_v32, %v3410_v8 }
 0x994   :  { %v3560_v34 = vmul.f32 %v6084_v11, %v3559_v63  ;;  %v3576_v57 = vmul.f32 %v6086_v2, %v8797_v5  ;;  %vm3582_vm3 = vweird.f32 %v6086_v2 }
 0x995   :  { %v6088_v49 = vpop.eup %6087  ;;  %vm3583_vm4 = vmor %vm3581_vm7, %vm3582_vm3  ;;  %v3444_v44 = vmul.f32 %v8827_v25, %v8827_v25 }
 0x996   :  { %v3566_v52 = vmul.f32 %v6088_v49, %v3521_v0  ;;  %v3564_v29 = vsel %vm3563_vm13, %v6084_v11, %v3560_v34  ;;  %v3577_v55 = vmul.f32 %v6086_v2, %v3576_v57  ;;  %vm3572_vm14 = vweird.f32 %v6088_v49 }
 0x997   :  { %v3707_v4 = vmul.f32 %v3564_v29, %v8673_v46  ;;  %vm3573_vm2 = vmor %vm3571_vm1, %vm3572_vm14  ;;  %v3483_v41 = vsel %vm3340_vm15, %v3444_v44, 0.0 }
 0x998   :  { %v3567_v14 = vmul.f32 %v6088_v49, %v3566_v52  ;;  %5603 = vmatmul.msk.f32.gmra.mxu0 %vm3340_vm15, %v3706_v9  ;;  %v3283_v50 = vpop.permute.xlu1 %3282  ;;  %v3379_v45 = vpop.xlane.xlu2 %3378  ;;  %v3578_v53 = vmul.f32 0.5, %v3577_v55 }
 0x999   :  { %3320 = vst.msk [vmem:[#allocation2 + $0x70] sm:$0xff] %vm3305_vm11, %v3283_v50  ;;  %v3411_v13 = vmul.f32 %v8644_v62, %v3379_v45 }
 0x99a   :  { %v3568_v28 = vmul.f32 0.5, %v3567_v14  ;;  %v3579_v37 = vsub.f32 1.5, %v3578_v53 }
 0x99b   :  { %v8808_v61 = vsub.f32 %v8717_v31, %v3411_v13 }
 0x99c   :  { %v3569_v27 = vsub.f32 1.5, %v3568_v28  ;;  %v3580_v16 = vmul.f32 %v6086_v2, %v3579_v37 }
 0x99d   :  { %v3285_v48 = vpop.permute.xlu0 %3284  ;;  %v3445_v33 = vmul.f32 %v8808_v61, %v8808_v61 }
 0x99e   :  { %3321 = vst.msk [vmem:[#allocation2 + $0x78] sm:$0xff] %vm3305_vm11, %v3285_v48  ;;  %v3570_v20 = vmul.f32 %v6088_v49, %v3569_v27 }
 0x99f   :  { %v3486_v54 = vsel %vm3340_vm15, %v3445_v33, 0.0 }
 0x9a0   :  { %5604 = vmatmul.msk.f32.gmra.mxu0 %vm3340_vm15, %v3707_v4  ;;  %v8816_v31 = vld [vmem:[#allocation2 + $0x70] sm:$0xff]  ;;  %v3470_v36 = vpop.xlane.xlu2 %3469  ;;  %3487 = vadd.xlane.f32.xlu2 %v3486_v54  ;;  %v3574_v46 = vsel %vm3573_vm2, %v6088_v49, %v3570_v20 }
 0x9a1   :  { %v3383_v21 = vsel %vm3340_vm15, %v8816_v31, 0.0  ;;  %v3708_v38 = vmul.f32 %v3574_v46, %v8696_v60  ;;  %v3584_v60 = vsel %vm3583_vm4, %v6086_v2, %v3580_v16  ;;  %v3507_v42 = vmul.f32 %v3470_v36, %v8644_v62 }
 0x9a2   :  { %3384 = vadd.xlane.f32.xlu0 %v3383_v21  ;;  %v3709_v12 = vmul.f32 %v3584_v60, %v8702_v17  ;;  %v3443_v2 = vmul.f32 %v8853_v10, %v8853_v10 }
 0x9a3   :  { %v3524_v18 = vadd.f32 1e-05, %v3507_v42 }
 0x9a4   :  { %v3480_v51 = vsel %vm3340_vm15, %v3443_v2, 0.0 }
 0x9a5   :  { %v8822_v56 = vld [vmem:[#allocation2 + $0x78] sm:$0xff]  ;;  %6089 = vrsqrt.f32 %v3524_v18  ;;  %vm3601_vm9 = vweird.f32 %v3524_v18 }
 0x9a6   :  { %v3386_v7 = vsel %vm3340_vm15, %v8822_v56, 0.0 }
 0x9a8   :  { %5605 = vmatmul.msk.f32.gmra.mxu0 %vm3340_vm15, %v3708_v38  ;;  %v3473_v30 = vpop.xlane.xlu2 %3472 }
 0x9a9   :  { %v3508_v0 = vmul.f32 %v3473_v30, %v8644_v62 }
 0x9aa   :  { %3387 = vadd.xlane.f32.xlu0 %v3386_v7 }
 0x9ab   :  { %v3525_v39 = vadd.f32 1e-05, %v3508_v0 }
 0x9ad   :  { %vm3611_vm13 = vweird.f32 %v3525_v39 }
 0x9b0   :  { %5606 = vmatmul.msk.f32.gmra.mxu0 %vm3340_vm15, %v3709_v12  ;;  %v3287_v47 = vpop.permute.xlu2 %3286 }
 0x9b1   :  { %3322 = vst.msk [vmem:[#allocation2 + $0x80] sm:$0xff] %vm3305_vm11, %v3287_v47 }
 0x9b2   :  { %3484 = vadd.xlane.f32.xlu0 %v3483_v41 }
 0x9b8   :  { %v8837_v32 = vld [vmem:[#allocation2 + $0x80] sm:$0xff] }
 0x9b9   :  { %v3389_v11 = vsel %vm3340_vm15, %v8837_v32, 0.0 }
 0x9ba   :  { %3390 = vadd.xlane.f32.xlu0 %v3389_v11 }
 0x9c3   :  { %v3370_v5 = vpop.xlane.xlu1 %3369 }
 0x9c4   :  { %v3408_v17 = vmul.f32 %v8644_v62, %v3370_v5 }
 0x9c6   :  { %v8846_v6 = vsub.f32 %v8747_v19, %v3408_v17  ;;  %v6090_v19 = vpop.eup %6089 }
 0x9c7   :  { %v3596_v9 = vmul.f32 %v6090_v19, %v3524_v18  ;;  %vm3602_vm8 = vweird.f32 %v6090_v19 }
 0x9c8   :  { %v3467_v58 = vpop.xlane.xlu0 %3466  ;;  %v3442_v15 = vmul.f32 %v8846_v6, %v8846_v6  ;;  %vm3603_vm10 = vmor %vm3601_vm9, %vm3602_vm8 }
 0x9c9   :  { %v3506_v43 = vmul.f32 %v3467_v58, %v8644_v62  ;;  %v3597_v52 = vmul.f32 %v6090_v19, %v3596_v9 }
 0x9ca   :  { %v3477_v23 = vsel %vm3340_vm15, %v3442_v15, 0.0 }
 0x9cb   :  { %v3523_v3 = vadd.f32 1e-05, %v3506_v43  ;;  %3478 = vadd.xlane.f32.xlu1 %v3477_v23  ;;  %v3382_v40 = vpop.xlane.xlu1 %3381  ;;  %v3598_v29 = vmul.f32 0.5, %v3597_v52 }
 0x9cc   :  { %v3412_v63 = vmul.f32 %v8644_v62, %v3382_v40 }
 0x9cd   :  { %6091 = vrsqrt.f32 %v3523_v3  ;;  %vm3591_vm5 = vweird.f32 %v3523_v3 }
 0x9ce   :  { %6093 = vrsqrt.f32 %v3525_v39  ;;  %v8860_v49 = vsub.f32 %v8755_v59, %v3412_v63  ;;  %v3599_v59 = vsub.f32 1.5, %v3598_v29 }
 0x9d0   :  { %v3446_v45 = vmul.f32 %v8860_v49, %v8860_v49  ;;  %v3600_v54 = vmul.f32 %v6090_v19, %v3599_v59 }
 0x9d2   :  { %v3489_v27 = vsel %vm3340_vm15, %v3446_v45, 0.0  ;;  %v3604_v46 = vsel %vm3603_vm10, %v6090_v19, %v3600_v54 }
 0x9d3   :  { %v6092_v34 = vpop.eup %6091  ;;  %3481 = vadd.xlane.f32.xlu1 %v3480_v51  ;;  %v3711_v21 = vmul.f32 %v3604_v46, %v8722_v26 }
 0x9d4   :  { %v3586_v57 = vmul.f32 %v6092_v34, %v3523_v3  ;;  %v6094_v14 = vpop.eup %6093  ;;  %vm3592_vm11 = vweird.f32 %v6092_v34 }
 0x9d5   :  { %v3606_v13 = vmul.f32 %v6094_v14, %v3525_v39  ;;  %vm3593_vm6 = vmor %vm3591_vm5, %vm3592_vm11  ;;  %vm3612_vm12 = vweird.f32 %v6094_v14 }
 0x9d6   :  { %v3587_v50 = vmul.f32 %v6092_v34, %v3586_v57  ;;  %vm3613_vm14 = vmor %vm3611_vm13, %vm3612_vm12 }
 0x9d7   :  { %v3607_v4 = vmul.f32 %v6094_v14, %v3606_v13 }
 0x9d8   :  { %v3588_v28 = vmul.f32 0.5, %v3587_v50 }
 0x9d9   :  { %v3608_v53 = vmul.f32 0.5, %v3607_v4 }
 0x9da   :  { %v3589_v55 = vsub.f32 1.5, %v3588_v28 }
 0x9db   :  { %3490 = vadd.xlane.f32.xlu1 %v3489_v27  ;;  %v3609_v36 = vsub.f32 1.5, %v3608_v53 }
 0x9dc   :  { %v3590_v48 = vmul.f32 %v6092_v34, %v3589_v55 }
 0x9dd   :  { %v3610_v37 = vmul.f32 %v6094_v14, %v3609_v36 }
 0x9de   :  { %v3594_v33 = vsel %vm3593_vm6, %v6092_v34, %v3590_v48 }
 0x9df   :  { %v3710_v20 = vmul.f32 %v3594_v33, %v8745_v35  ;;  %v3614_v38 = vsel %vm3613_vm14, %v6094_v14, %v3610_v37 }
 0x9e0   :  { %v3712_v35 = vmul.f32 %v3614_v38, %v8735_v22 }
 0x9e1   :  { %5607 = vmatmul.msk.f32.gmra.mxu0 %vm3340_vm15, %v3710_v20 }
 0x9e9   :  { %5608 = vmatmul.msk.f32.gmra.mxu0 %vm3340_vm15, %v3711_v21 }
 0x9f1   :  { %5609 = vmatmul.msk.f32.gmra.mxu0 %vm3340_vm15, %v3712_v35 }
 0x9fd   :  { %v3476_v8 = vpop.xlane.xlu1 %3475 }
 0x9fe   :  { %v3509_v16 = vmul.f32 %v3476_v8, %v8644_v62 }
 0xa00   :  { %v3526_v30 = vadd.f32 1e-05, %v3509_v16 }
 0xa02   :  { %6095 = vrsqrt.f32 %v3526_v30  ;;  %vm3621_vm2 = vweird.f32 %v3526_v30 }
 0xa08   :  { %v6096_v7 = vpop.eup %6095 }
 0xa09   :  { %v3616_v60 = vmul.f32 %v6096_v7, %v3526_v30  ;;  %vm3622_vm1 = vweird.f32 %v6096_v7 }
 0xa0a   :  { %vm3623_vm3 = vmor %vm3621_vm2, %vm3622_vm1 }
 0xa0b   :  { %v3617_v44 = vmul.f32 %v6096_v7, %v3616_v60 }
 0xa0d   :  { %v3618_v26 = vmul.f32 0.5, %v3617_v44 }
 0xa0f   :  { %v3619_v12 = vsub.f32 1.5, %v3618_v26 }
 0xa11   :  { %v3620_v47 = vmul.f32 %v6096_v7, %v3619_v12 }
 0xa13   :  { %v3624_v41 = vsel %vm3623_vm3, %v6096_v7, %v3620_v47  ;;  %v3488_v51 = vpop.xlane.xlu2 %3487 }
 0xa14   :  { %v3713_v11 = vmul.f32 %v3624_v41, %v8790_v24  ;;  %v3513_v34 = vmul.f32 %v3488_v51, %v8644_v62 }
 0xa15   :  { %v3385_v22 = vpop.xlane.xlu0 %3384 }
 0xa16   :  { %5610 = vmatmul.msk.f32.gmra.mxu0 %vm3340_vm15, %v3713_v11  ;;  %v3413_v42 = vmul.f32 %v8644_v62, %v3385_v22  ;;  %v3530_v14 = vadd.f32 1e-05, %v3513_v34 }
 0xa18   :  { %v8877_v18 = vsub.f32 %v8816_v31, %v3413_v42  ;;  %vm3661_vm14 = vweird.f32 %v3530_v14 }
 0xa1a   :  { %v3447_v5 = vmul.f32 %v8877_v18, %v8877_v18 }
 0xa1c   :  { %v3492_v17 = vsel %vm3340_vm15, %v3447_v5, 0.0 }
 0xa1d   :  { %3493 = vadd.xlane.f32.xlu1 %v3492_v17  ;;  %v3388_v1 = vpop.xlane.xlu0 %3387 }
 0xa1e   :  { %v3414_v0 = vmul.f32 %v8644_v62, %v3388_v1 }
 0xa20   :  { %v8884_v58 = vsub.f32 %v8822_v56, %v3414_v0 }
 0xa22   :  { %v3448_v24 = vmul.f32 %v8884_v58, %v8884_v58 }
 0xa24   :  { %v3495_v15 = vsel %vm3340_vm15, %v3448_v24, 0.0 }
 0xa25   :  { %v3485_v43 = vpop.xlane.xlu0 %3484  ;;  %3496 = vadd.xlane.f32.xlu0 %v3495_v15 }
 0xa26   :  { %v3512_v56 = vmul.f32 %v3485_v43, %v8644_v62 }
 0xa28   :  { %v3529_v2 = vadd.f32 1e-05, %v3512_v56 }
 0xa2a   :  { %vm3651_vm10 = vweird.f32 %v3529_v2 }
 0xa2d   :  { %v3391_v31 = vpop.xlane.xlu0 %3390 }
 0xa2e   :  { %v3415_v23 = vmul.f32 %v8644_v62, %v3391_v31  ;;  %v8911_v31 = vpop.f32.mrf.mxu0 }
 0xa30   :  { %v8891_v39 = vsub.f32 %v8837_v32, %v3415_v23 }
 0xa32   :  { %v3449_v3 = vmul.f32 %v8891_v39, %v8891_v39 }
 0xa34   :  { %v3498_v40 = vsel %vm3340_vm15, %v3449_v3, 0.0 }
 0xa35   :  { %3499 = vadd.xlane.f32.xlu1 %v3498_v40 }
 0xa36   :  { %v8913_v23 = vpop.f32.mrf.mxu0 }
 0xa3e   :  { %v3479_v19 = vpop.xlane.xlu1 %3478 }
 0xa3f   :  { %v3510_v63 = vmul.f32 %v3479_v19, %v8644_v62 }
 0xa41   :  { %v3527_v9 = vadd.f32 1e-05, %v3510_v63 }
 0xa43   :  { %6097 = vrsqrt.f32 %v3527_v9  ;;  %vm3631_vm4 = vweird.f32 %v3527_v9 }
 0xa44   :  { %6099 = vrsqrt.f32 %v3529_v2 }
 0xa46   :  { %v3482_v32 = vpop.xlane.xlu1 %3481 }
 0xa47   :  { %v3511_v52 = vmul.f32 %v3482_v32, %v8644_v62 }
 0xa49   :  { %v6098_v57 = vpop.eup %6097  ;;  %v3528_v50 = vadd.f32 1e-05, %v3511_v52 }
 0xa4a   :  { %v3626_v45 = vmul.f32 %v6098_v57, %v3527_v9  ;;  %v6100_v29 = vpop.eup %6099  ;;  %vm3632_vm7 = vweird.f32 %v6098_v57 }
 0xa4b   :  { %6101 = vrsqrt.f32 %v3528_v50  ;;  %v3646_v28 = vmul.f32 %v6100_v29, %v3529_v2  ;;  %vm3633_vm11 = vmor %vm3631_vm4, %vm3632_vm7  ;;  %vm3641_vm6 = vweird.f32 %v3528_v50  ;;  %vm3652_vm9 = vweird.f32 %v6100_v29 }
 0xa4c   :  { %v3627_v13 = vmul.f32 %v6098_v57, %v3626_v45  ;;  %6103 = vrsqrt.f32 %v3530_v14  ;;  %vm3653_vm12 = vmor %vm3651_vm10, %vm3652_vm9 }
 0xa4d   :  { %v3647_v20 = vmul.f32 %v6100_v29, %v3646_v28 }
 0xa4e   :  { %v3628_v55 = vmul.f32 0.5, %v3627_v13  ;;  %v3491_v27 = vpop.xlane.xlu1 %3490 }
 0xa4f   :  { %v3514_v59 = vmul.f32 %v3491_v27, %v8644_v62  ;;  %v3648_v35 = vmul.f32 0.5, %v3647_v20 }
 0xa50   :  { %v3629_v4 = vsub.f32 1.5, %v3628_v55 }
 0xa51   :  { %v6102_v48 = vpop.eup %6101  ;;  %v3531_v33 = vadd.f32 1e-05, %v3514_v59  ;;  %v3649_v7 = vsub.f32 1.5, %v3648_v35 }
 0xa52   :  { %v3630_v53 = vmul.f32 %v6098_v57, %v3629_v4  ;;  %v3636_v54 = vmul.f32 %v6102_v48, %v3528_v50  ;;  %v6104_v36 = vpop.eup %6103  ;;  %vm3642_vm5 = vweird.f32 %v6102_v48 }
 0xa53   :  { %6105 = vrsqrt.f32 %v3531_v33  ;;  %v3656_v38 = vmul.f32 %v6104_v36, %v3530_v14  ;;  %vm3643_vm8 = vmor %vm3641_vm6, %vm3642_vm5  ;;  %v3650_v41 = vmul.f32 %v6100_v29, %v3649_v7  ;;  %vm3662_vm13 = vweird.f32 %v6104_v36  ;;  %v3858_v7 = vld [vmem:[%s10527_s10 + $0x48] sm:$0xff] }
 0xa54   :  { %v3637_v46 = vmul.f32 %v6102_v48, %v3636_v54  ;;  %v3634_v21 = vsel %vm3633_vm11, %v6098_v57, %v3630_v53  ;;  %vm3663_vm1 = vmor %vm3661_vm14, %vm3662_vm13  ;;  %vm3671_vm3 = vweird.f32 %v3531_v33 }
 0xa55   :  { %v3714_v37 = vmul.f32 %v3634_v21, %v8846_v6  ;;  %v3657_v30 = vmul.f32 %v6104_v36, %v3656_v38  ;;  %v3654_v42 = vsel %vm3653_vm12, %v6100_v29, %v3650_v41 }
 0xa56   :  { %v3638_v8 = vmul.f32 0.5, %v3637_v46  ;;  %v3716_v5 = vmul.f32 %v3654_v42, %v8827_v25 }
 0xa57   :  { %5611 = vmatmul.msk.f32.gmra.mxu0 %vm3340_vm15, %v3714_v37  ;;  %v3658_v47 = vmul.f32 0.5, %v3657_v30  ;;  %v3857_v30 = vld [vmem:[%s10527_s10 + $0x40] sm:$0xff] }
 0xa58   :  { %v3639_v16 = vsub.f32 1.5, %v3638_v8 }
 0xa59   :  { %v6106_v44 = vpop.eup %6105  ;;  %v3659_v11 = vsub.f32 1.5, %v3658_v47 }
 0xa5a   :  { %v3640_v60 = vmul.f32 %v6102_v48, %v3639_v16  ;;  %v3666_v6 = vmul.f32 %v6106_v44, %v3531_v33  ;;  %vm3672_vm2 = vweird.f32 %v6106_v44 }
 0xa5b   :  { %v3660_v17 = vmul.f32 %v6104_v36, %v3659_v11  ;;  %vm3673_vm7 = vmor %vm3671_vm3, %vm3672_vm2  ;;  %v3862_v11 = vld [vmem:[%s10527_s10 + $0x68] sm:$0xff] }
 0xa5c   :  { %v3644_v26 = vsel %vm3643_vm8, %v6102_v48, %v3640_v60  ;;  %v3667_v22 = vmul.f32 %v6106_v44, %v3666_v6  ;;  %v3861_v6 = vld [vmem:[%s10527_s10 + $0x60] sm:$0xff] }
 0xa5d   :  { %v3715_v12 = vmul.f32 %v3644_v26, %v8853_v10  ;;  %v3664_v0 = vsel %vm3663_vm1, %v6104_v36, %v3660_v17 }
 0xa5e   :  { %v3668_v1 = vmul.f32 0.5, %v3667_v22  ;;  %v3717_v24 = vmul.f32 %v3664_v0, %v8808_v61  ;;  %v8916_v61 = vpop.f32.mrf.mxu0 }
 0xa5f   :  { %5612 = vmatmul.msk.f32.gmra.mxu0 %vm3340_vm15, %v3715_v12 }
 0xa60   :  { %v3669_v10 = vsub.f32 1.5, %v3668_v1  ;;  %v3854_v1 = vld [vmem:[%s10527_s10 + $0x28] sm:$0xff] }
 0xa62   :  { %v3670_v15 = vmul.f32 %v6106_v44, %v3669_v10  ;;  %v3853_v10 = vld [vmem:[%s10527_s10 + $0x20] sm:$0xff] }
 0xa64   :  { %v3674_v43 = vsel %vm3673_vm7, %v6106_v44, %v3670_v15 }
 0xa65   :  { %v3718_v25 = vmul.f32 %v3674_v43, %v8860_v49  ;;  %v3850_v43 = vld [vmem:[%s10527_s10 + $0x8] sm:$0xff] }
 0xa66   :  { %v8919_v49 = vpop.f32.mrf.mxu0 }
 0xa67   :  { %5613 = vmatmul.msk.f32.gmra.mxu0 %vm3340_vm15, %v3716_v5 }
 0xa6e   :  { %v3810_v28 = vpop.f32.mrf.mxu0 }
 0xa6f   :  { %5614 = vmatmul.msk.f32.gmra.mxu0 %vm3340_vm15, %v3717_v24  ;;  %v8962_v24 = vmul.f32 %v3853_v10, %v3810_v28 }
 0xa76   :  { %v3813_v54 = vpop.f32.mrf.mxu0 }
 0xa77   :  { %5615 = vmatmul.msk.f32.gmra.mxu0 %vm3340_vm15, %v3718_v25  ;;  %v8960_v0 = vmul.f32 %v3854_v1, %v3813_v54  ;;  %v3849_v25 = vld [vmem:[%s10527_s10] sm:$0xff] }
 0xa78   :  { %v3883_v1 = vld [vmem:[%s10528_s12] sm:$0xff] }
 0xa79   :  { %v5814_v15 = vpack.i.bf16 %v8962_v24, %v8960_v0 }
 0xa7e   :  { %v3816_v37 = vpop.f32.mrf.mxu0 }
 0xa86   :  { %v3819_v16 = vpop.f32.mrf.mxu0 }
 0xa90   :  { %v3494_v3 = vpop.xlane.xlu1 %3493 }
 0xa91   :  { %v3515_v40 = vmul.f32 %v3494_v3, %v8644_v62  ;;  %v8974_v3 = vmul.f32 %v3850_v43, %v8913_v23  ;;  %v3885_v43 = vld [vmem:[%s10528_s12 + $0x10] sm:$0xff] }
 0xa93   :  { %v3532_v56 = vadd.f32 1e-05, %v3515_v40  ;;  %v8977_v40 = vmul.f32 %v3849_v25, %v8911_v31  ;;  %v3886_v25 = vld [vmem:[%s10528_s12 + $0x18] sm:$0xff] }
 0xa95   :  { %6107 = vrsqrt.f32 %v3532_v56  ;;  %vm3681_vm11 = vweird.f32 %v3532_v56 }
 0xa98   :  { %v3497_v19 = vpop.xlane.xlu0 %3496 }
 0xa99   :  { %v3516_v63 = vmul.f32 %v3497_v19, %v8644_v62 }
 0xa9b   :  { %v6108_v2 = vpop.eup %6107  ;;  %v3533_v9 = vadd.f32 1e-05, %v3516_v63  ;;  %v3863_v63 = vld [vmem:[%s10527_s10 + $0x70] sm:$0xff] }
 0xa9c   :  { %v3676_v51 = vmul.f32 %v6108_v2, %v3532_v56  ;;  %vm3682_vm4 = vweird.f32 %v6108_v2  ;;  %v5824_v56 = vpack.i.bf16 %v8977_v40, %v8974_v3 }
 0xa9d   :  { %6109 = vrsqrt.f32 %v3533_v9  ;;  %vm3683_vm5 = vmor %vm3681_vm11, %vm3682_vm4  ;;  %vm3691_vm8 = vweird.f32 %v3533_v9 }
 0xa9e   :  { %v3677_v34 = vmul.f32 %v6108_v2, %v3676_v51 }
 0xaa0   :  { %v3678_v32 = vmul.f32 0.5, %v3677_v34  ;;  %v3860_v34 = vld [vmem:[%s10527_s10 + $0x58] sm:$0xff] }
 0xaa2   :  { %v3679_v52 = vsub.f32 1.5, %v3678_v32  ;;  %v3859_v32 = vld [vmem:[%s10527_s10 + $0x50] sm:$0xff] }
 0xaa3   :  { %v6110_v57 = vpop.eup %6109 }
 0xaa4   :  { %v3680_v14 = vmul.f32 %v6108_v2, %v3679_v52  ;;  %v3686_v50 = vmul.f32 %v6110_v57, %v3533_v9  ;;  %vm3692_vm6 = vweird.f32 %v6110_v57 }
 0xaa5   :  { %vm3693_vm9 = vmor %vm3691_vm8, %vm3692_vm6 }
 0xaa6   :  { %v3687_v45 = vmul.f32 %v6110_v57, %v3686_v50  ;;  %v3684_v29 = vsel %vm3683_vm5, %v6108_v2, %v3680_v14  ;;  %v3864_v2 = vld [vmem:[%s10527_s10 + $0x78] sm:$0xff] }
 0xaa7   :  { %v3719_v13 = vmul.f32 %v3684_v29, %v8877_v18  ;;  %v3856_v50 = vld [vmem:[%s10527_s10 + $0x38] sm:$0xff] }
 0xaa8   :  { %v3688_v55 = vmul.f32 0.5, %v3687_v45  ;;  %v3500_v27 = vpop.xlane.xlu1 %3499  ;;  %v3855_v45 = vld [vmem:[%s10527_s10 + $0x30] sm:$0xff]  ;;  %v9014_v29 = vmul.f32 %v3856_v50, %v3819_v16  ;;  %v3896_v50 = vld [vmem:[%s10528_s12 + $0x68] sm:$0xff] }
 0xaa9   :  { %5616 = vmatmul.msk.f32.gmra.mxu0 %vm3340_vm15, %v3719_v13  ;;  %v3517_v59 = vmul.f32 %v3500_v27, %v8644_v62  ;;  %v9016_v13 = vmul.f32 %v3855_v45, %v3816_v37  ;;  %v3851_v27 = vld [vmem:[%s10527_s10 + $0x10] sm:$0xff] }
 0xaaa   :  { %v3689_v4 = vsub.f32 1.5, %v3688_v55  ;;  %v3852_v55 = vld [vmem:[%s10527_s10 + $0x18] sm:$0xff]  ;;  %v3897_v45 = vld [vmem:[%s10528_s12 + $0x70] sm:$0xff] }
 0xaab   :  { %v3534_v48 = vadd.f32 1e-05, %v3517_v59  ;;  %v5809_v28 = vpack.i.bf16 %v9016_v13, %v9014_v29  ;;  %v9028_v59 = vmul.f32 %v3852_v55, %v8919_v49  ;;  %v3899_v55 = vld [vmem:[%s10528_s12 + $0x80] sm:$0xff] }
 0xaac   :  { %v3690_v33 = vmul.f32 %v6110_v57, %v3689_v4  ;;  %v9031_v4 = vmul.f32 %v3851_v27, %v8916_v61  ;;  %v3900_v27 = vld [vmem:[%s10528_s12 + $0x88] sm:$0xff] }
 0xaad   :  { %6111 = vrsqrt.f32 %v3534_v48  ;;  %vm3701_vm12 = vweird.f32 %v3534_v48 }
 0xaae   :  { %v3694_v20 = vsel %vm3693_vm9, %v6110_v57, %v3690_v33 }
 0xaaf   :  { %v3720_v53 = vmul.f32 %v3694_v20, %v8884_v58  ;;  %v3822_v58 = vpop.f32.mrf.mxu0  ;;  %v3865_v20 = vld [vmem:[%s10527_s10 + $0x80] sm:$0xff] }
 0xab0   :  { %v8934_v44 = vmul.f32 %v3857_v30, %v3822_v58 }
 0xab1   :  { %5617 = vmatmul.msk.f32.gmra.mxu0 %vm3340_vm15, %v3720_v53 }
 0xab3   :  { %v6112_v18 = vpop.eup %6111 }
 0xab4   :  { %v3696_v36 = vmul.f32 %v6112_v18, %v3534_v48  ;;  %vm3702_vm10 = vweird.f32 %v6112_v18  ;;  %v5819_v48 = vpack.i.bf16 %v9031_v4, %v9028_v59 }
 0xab5   :  { %vm3703_vm13 = vmor %vm3701_vm12, %vm3702_vm10 }
 0xab6   :  { %v3697_v46 = vmul.f32 %v6112_v18, %v3696_v36 }
 0xab8   :  { %v3698_v21 = vmul.f32 0.5, %v3697_v46 }
 0xaba   :  { %v3699_v38 = vsub.f32 1.5, %v3698_v21 }
 0xabc   :  { %v3700_v62 = vmul.f32 %v6112_v18, %v3699_v38 }
 0xabe   :  { %v3704_v35 = vsel %vm3703_vm13, %v6112_v18, %v3700_v62 }
 0xabf   :  { %v3721_v8 = vmul.f32 %v3704_v35, %v8891_v39 }
 0xac1   :  { %5618 = vmatmul.msk.f32.gmra.mxu0 %vm3340_vm15, %v3721_v8 }
 0xad4   :  { %v3825_v60 = vpop.f32.mrf.mxu0 }
 0xad5   :  { %v8936_v26 = vmul.f32 %v3858_v7, %v3825_v60 }
 0xad7   :  { %v5804_v39 = vpack.i.bf16 %v8934_v44, %v8936_v26 }
 0xad9   :  { %5805 = vrot.lane.b32.xlu2 %v5804_v39, %s6184_s27 }
 0xadc   :  { %v3828_v12 = vpop.f32.mrf.mxu0 }
 0xadd   :  { %v9003_v57 = vmul.f32 %v3859_v32, %v3828_v12  ;;  %v3894_v32 = vld [vmem:[%s10528_s12 + $0x58] sm:$0xff] }
 0xae4   :  { %v3831_v47 = vpop.f32.mrf.mxu0 }
 0xae5   :  { %v9001_v52 = vmul.f32 %v3860_v34, %v3831_v47  ;;  %v3893_v34 = vld [vmem:[%s10528_s12 + $0x50] sm:$0xff] }
 0xae7   :  { %v5799_v14 = vpack.i.bf16 %v9003_v57, %v9001_v52 }
 0xaec   :  { %v3834_v41 = vpop.f32.mrf.mxu0 }
 0xaed   :  { %v8947_v42 = vmul.f32 %v3861_v6, %v3834_v41 }
 0xaf4   :  { %v3837_v22 = vpop.f32.mrf.mxu0 }
 0xaf5   :  { %v8949_v5 = vmul.f32 %v3862_v11, %v3837_v22 }
 0xaf7   :  { %v5789_v17 = vpack.i.bf16 %v8947_v42, %v8949_v5 }
 0xaf9   :  { %5790 = vrot.lane.b32.xlu1 %v5789_v17, %s6184_s27  ;;  %v3915_v17 = vld [vmem:[%s10528_s12 + $0x100] sm:$0xff] }
 0xb01   :  { %5815 = vrot.lane.b32.xlu1 %v5814_v15, %s6184_s27  ;;  %v3884_v15 = vld [vmem:[%s10528_s12 + $0x8] sm:$0xff] }
 0xb09   :  { %5825 = vrot.lane.b32.xlu1 %v5824_v56, %s6184_s27  ;;  %v3887_v56 = vld [vmem:[%s10528_s12 + $0x20] sm:$0xff] }
 0xb26   :  { %v3840_v19 = vpop.f32.mrf.mxu0 }
 0xb27   :  { %v8988_v23 = vmul.f32 %v3863_v63, %v3840_v19  ;;  %v3888_v19 = vld [vmem:[%s10528_s12 + $0x28] sm:$0xff]  ;;  %v3889_v63 = vld [vmem:[%s10528_s12 + $0x30] sm:$0xff] }
 0xb2e   :  { %v3843_v9 = vpop.f32.mrf.mxu0 }
 0xb2f   :  { %v8990_v51 = vmul.f32 %v3864_v2, %v3843_v9  ;;  %v3890_v2 = vld [vmem:[%s10528_s12 + $0x38] sm:$0xff]  ;;  %v3891_v9 = vld [vmem:[%s10528_s12 + $0x40] sm:$0xff] }
 0xb31   :  { %v5794_v31 = vpack.i.bf16 %v8988_v23, %v8990_v51 }
 0xb33   :  { %5795 = vrot.lane.b32.xlu0 %v5794_v31, %s6184_s27  ;;  %v5806_v38 = vpop.permute.xlu2 %5805  ;;  %v3892_v31 = vld [vmem:[%s10528_s12 + $0x48] sm:$0xff] }
 0xb34   :  { %v5807_v35 = vunpack.i.l.bf16 %v5806_v38  ;;  %v5808_v8 = vunpack.i.h.bf16 %v5806_v38  ;;  %v3912_v38 = vld [vmem:[%s10528_s12 + $0xe8] sm:$0xff] }
 0xb3b   :  { %5800 = vrot.lane.b32.xlu0 %v5799_v14, %s6184_s27  ;;  %v3895_v14 = vld [vmem:[%s10528_s12 + $0x60] sm:$0xff] }
 0xb3e   :  { %v3846_v33 = vpop.f32.mrf.mxu0 }
 0xb3f   :  { %v9039_v53 = vmul.f32 %v3865_v20, %v3846_v33  ;;  %v3902_v33 = vld [vmem:[%s10528_s12 + $0x98] sm:$0xff]  ;;  %v3903_v20 = vld [vmem:[%s10528_s12 + $0xa0] sm:$0xff] }
 0xb43   :  { %5810 = vrot.lane.b32.xlu0 %v5809_v28, %s6184_s27  ;;  %v3898_v28 = vld [vmem:[%s10528_s12 + $0x78] sm:$0xff] }
 0xb4b   :  { %5820 = vrot.lane.b32.xlu0 %v5819_v48, %s6184_s27  ;;  %v3901_v48 = vld [vmem:[%s10528_s12 + $0x90] sm:$0xff] }
 0xb53   :  { %3966 = vrot.lane.b32.xlu0 %v9039_v53, %s6184_s27 }
 0xb6b   :  { %v5791_v18 = vpop.permute.xlu1 %5790 }
 0xb6c   :  { %v5792_v36 = vunpack.i.l.bf16 %v5791_v18  ;;  %v5793_v46 = vunpack.i.h.bf16 %v5791_v18  ;;  %v3906_v18 = vld [vmem:[%s10528_s12 + $0xb8] sm:$0xff] }
 0xb73   :  { %v5816_v16 = vpop.permute.xlu1 %5815 }
 0xb74   :  { %v5817_v60 = vunpack.i.l.bf16 %v5816_v16  ;;  %v5818_v39 = vunpack.i.h.bf16 %v5816_v16 }
 0xb7b   :  { %v5826_v41 = vpop.permute.xlu1 %5825 }
 0xb7c   :  { %v5827_v11 = vunpack.i.l.bf16 %v5826_v41  ;;  %v5828_v22 = vunpack.i.h.bf16 %v5826_v41 }
 0xba5   :  { %v5796_v49 = vpop.permute.xlu0 %5795 }
 0xba6   :  { %v5797_v54 = vunpack.i.l.bf16 %v5796_v49  ;;  %v5798_v61 = vunpack.i.h.bf16 %v5796_v49  ;;  %v3904_v49 = vld [vmem:[%s10528_s12 + $0xa8] sm:$0xff] }
 0xba8   :  { %4036 = vmatpush.msrb.mxu1 %v5797_v54  ;;  %5670 = vmatpush.msra.mxu2 %v5797_v54  ;;  %v3905_v54 = vld [vmem:[%s10528_s12 + $0xb0] sm:$0xff] }
 0xbaa   :  { %4037 = vmatpush.msrb.mxu1 %v5798_v61  ;;  %5671 = vmatpush.msra.mxu2 %v5798_v61  ;;  %v3907_v61 = vld [vmem:[%s10528_s12 + $0xc0] sm:$0xff] }
 0xbac   :  { %4038 = vmatpush.msrb.mxu1 %v5792_v36  ;;  %5672 = vmatpush.msra.mxu2 %v5792_v36  ;;  %v3908_v36 = vld [vmem:[%s10528_s12 + $0xc8] sm:$0xff] }
 0xbad   :  { %v5801_v21 = vpop.permute.xlu0 %5800 }
 0xbae   :  { %4039 = vmatpush.msrb.mxu1 %v5793_v46  ;;  %5673 = vmatpush.msra.mxu2 %v5793_v46  ;;  %v5802_v37 = vunpack.i.l.bf16 %v5801_v21  ;;  %v5803_v62 = vunpack.i.h.bf16 %v5801_v21  ;;  %v3909_v46 = vld [vmem:[%s10528_s12 + $0xd0] sm:$0xff]  ;;  %v3910_v21 = vld [vmem:[%s10528_s12 + $0xd8] sm:$0xff] }
 0xbb0   :  { %4040 = vmatpush.msrb.mxu1 %v5802_v37  ;;  %5674 = vmatpush.msra.mxu2 %v5802_v37  ;;  %v3911_v37 = vld [vmem:[%s10528_s12 + $0xe0] sm:$0xff] }
 0xbb2   :  { %4041 = vmatpush.msrb.mxu1 %v5803_v62  ;;  %5675 = vmatpush.msra.mxu2 %v5803_v62  ;;  %v3913_v62 = vld [vmem:[%s10528_s12 + $0xf0] sm:$0xff] }
 0xbb4   :  { %4042 = vmatpush.msrb.mxu1 %v5807_v35  ;;  %5676 = vmatpush.msra.mxu2 %v5807_v35  ;;  %v3914_v35 = vld [vmem:[%s10528_s12 + $0xf8] sm:$0xff] }
 0xbb5   :  { %v5811_v58 = vpop.permute.xlu0 %5810 }
 0xbb6   :  { %4043 = vmatpush.msrb.mxu1 %v5808_v8  ;;  %5677 = vmatpush.msra.mxu2 %v5808_v8  ;;  %v5812_v30 = vunpack.i.l.bf16 %v5811_v58  ;;  %v5813_v7 = vunpack.i.h.bf16 %v5811_v58  ;;  %v3916_v58 = vld [vmem:[%s10528_s12 + $0x108] sm:$0xff] }
 0xbb8   :  { %4044 = vmatpush.msrb.mxu1 %v5812_v30  ;;  %5678 = vmatpush.msra.mxu2 %v5812_v30 }
 0xbba   :  { %4045 = vmatpush.msrb.mxu1 %v5813_v7  ;;  %5679 = vmatpush.msra.mxu2 %v5813_v7 }
 0xbbc   :  { %4046 = vmatpush.msrb.mxu1 %v5817_v60  ;;  %5680 = vmatpush.msra.mxu2 %v5817_v60 }
 0xbbd   :  { %v5821_v12 = vpop.permute.xlu0 %5820 }
 0xbbe   :  { %4047 = vmatpush.msrb.mxu1 %v5818_v39  ;;  %5681 = vmatpush.msra.mxu2 %v5818_v39  ;;  %v5822_v47 = vunpack.i.l.bf16 %v5821_v12  ;;  %v5823_v6 = vunpack.i.h.bf16 %v5821_v12  ;;  %v4189_v39 = vld [vmem:[%s10529_s11] sm:$0xff] }
 0xbc0   :  { %4048 = vmatpush.msrb.mxu1 %v5822_v47  ;;  %5682 = vmatpush.msra.mxu2 %v5822_v47 }
 0xbc2   :  { %4049 = vmatpush.msrb.mxu1 %v5823_v6  ;;  %5683 = vmatpush.msra.mxu2 %v5823_v6 }
 0xbc4   :  { %4050 = vmatpush.msrb.mxu1 %v5827_v11  ;;  %5684 = vmatpush.msra.mxu2 %v5827_v11 }
 0xbc5   :  { %v3967_v10 = vpop.permute.xlu0 %3966 }
 0xbc6   :  { %4051 = vmatpush.msrb.mxu1 %v5828_v22  ;;  %5685 = vmatpush.msra.mxu2 %v5828_v22 }
 0xbc7   :  { %4100 = vmatmul.f32.vlgmr.msra.gmra.mxu2 %v3915_v17  ;;  %4052 = vmatmul.f32.vlgmr.msrb.gmra.mxu1 %v3883_v1  ;;  %v4190_v1 = vld [vmem:[%s10529_s11 + $0x8] sm:$0xff] }
 0xbc8   :  { %4119 = vmatpush.msrb.mxu2 %v3967_v10 }
 0xbcf   :  { %5619 = vmatmul.msk.f32.vlgmr.msrb.gmra.mxu2 %vm725_vm0, %v3884_v15  ;;  %4055 = vmatmul.f32.gmra.mxu1 %v3885_v43 }
 0xbd7   :  { %5620 = vmatmul.msk.f32.gmra.mxu2 %vm725_vm0, %v3886_v25  ;;  %4058 = vmatmul.f32.gmra.mxu1 %v3887_v56 }
 0xbdf   :  { %5621 = vmatmul.msk.f32.gmra.mxu2 %vm725_vm0, %v3888_v19  ;;  %4061 = vmatmul.f32.gmra.mxu1 %v3889_v63 }
 0xbe7   :  { %5622 = vmatmul.msk.f32.gmra.mxu2 %vm725_vm0, %v3890_v2  ;;  %4064 = vmatmul.f32.gmra.mxu1 %v3891_v9  ;;  %v4191_v9 = vld [vmem:[%s10529_s11 + $0x10] sm:$0xff] }
 0xbef   :  { %5623 = vmatmul.msk.f32.gmra.mxu2 %vm725_vm0, %v3892_v31  ;;  %4067 = vmatmul.f32.gmra.mxu1 %v3893_v34 }
 0xbf7   :  { %5624 = vmatmul.msk.f32.gmra.mxu2 %vm725_vm0, %v3894_v32  ;;  %4070 = vmatmul.f32.gmra.mxu1 %v3895_v14 }
 0xbff   :  { %5625 = vmatmul.msk.f32.gmra.mxu2 %vm725_vm0, %v3896_v50  ;;  %4073 = vmatmul.f32.gmra.mxu1 %v3897_v45 }
 0xc07   :  { %5626 = vmatmul.msk.f32.gmra.mxu2 %vm725_vm0, %v3898_v28  ;;  %4076 = vmatmul.f32.gmra.mxu1 %v3899_v55 }
 0xc0f   :  { %5627 = vmatmul.msk.f32.gmra.mxu2 %vm725_vm0, %v3900_v27  ;;  %4079 = vmatmul.f32.gmra.mxu1 %v3901_v48 }
 0xc17   :  { %5628 = vmatmul.msk.f32.gmra.mxu2 %vm725_vm0, %v3902_v33  ;;  %4082 = vmatmul.f32.gmra.mxu1 %v3903_v20 }
 0xc1f   :  { %5629 = vmatmul.msk.f32.gmra.mxu2 %vm725_vm0, %v3904_v49  ;;  %4085 = vmatmul.f32.gmra.mxu1 %v3905_v54 }
 0xc27   :  { %5630 = vmatmul.msk.f32.gmra.mxu2 %vm725_vm0, %v3906_v18  ;;  %4088 = vmatmul.f32.gmra.mxu1 %v3907_v61 }
 0xc2f   :  { %5631 = vmatmul.msk.f32.gmra.mxu2 %vm725_vm0, %v3908_v36  ;;  %4091 = vmatmul.f32.gmra.mxu1 %v3909_v46 }
 0xc37   :  { %5632 = vmatmul.msk.f32.gmra.mxu2 %vm725_vm0, %v3910_v21  ;;  %4094 = vmatmul.f32.gmra.mxu1 %v3911_v37 }
 0xc3f   :  { %5633 = vmatmul.msk.f32.gmra.mxu2 %vm725_vm0, %v3912_v38  ;;  %4097 = vmatmul.f32.gmra.mxu1 %v3913_v62 }
 0xc44   :  { %v4053_v8 = vpop.f32.mrf.mxu1 }
 0xc47   :  { %5634 = vmatmul.msk.f32.gmra.mxu2 %vm725_vm0, %v3914_v35 }
 0xc4a   :  { %v9158_v16 = vpop.f32.mrf.mxu2 }
 0xc4c   :  { %v4056_v30 = vpop.f32.mrf.mxu1 }
 0xc4f   :  { %5635 = vmatmul.msk.f32.gmra.mxu2 %vm725_vm0, %v3916_v58 }
 0xc52   :  { %v4121_v7 = vpop.f32.mrf.mxu2 }
 0xc53   :  { %v4122_v60 = vadd.f32 %v4121_v7, %v4053_v8 }
 0xc54   :  { %v4059_v12 = vpop.f32.mrf.mxu1 }
 0xc55   :  { %v4172_v47 = vadd.f32 %v4122_v60, %v8977_v40 }
 0xc57   :  { %v9168_v41 = vadd.f32 %v4189_v39, %v4172_v47 }
 0xc59   :  { %v9171_v6 = vmul.f32 0.70710677, %v9168_v41 }
 0xc5a   :  { %v4124_v11 = vpop.f32.mrf.mxu2 }
 0xc5b   :  { %v4257_v22 = vand.u32 2147483647, %v9171_v6  ;;  %v4125_v17 = vadd.f32 %v4124_v11, %v4056_v30  ;;  %vm4818_vm10 = vcmp.lt.f32.partialorder %v9171_v6, 0.0 }
 0xc5c   :  { %v4062_v10 = vpop.f32.mrf.mxu1 }
 0xc5d   :  { %v4274_v15 = vmul.f32 0.3275911, %v4257_v22  ;;  %v4173_v43 = vadd.f32 %v4125_v17, %v8974_v3  ;;  %v4716_v58 = vsub.f32 0.0, %v4257_v22 }
 0xc5f   :  { %v4291_v25 = vadd.f32 1.0, %v4274_v15  ;;  %v9178_v56 = vadd.f32 %v4190_v1, %v4173_v43  ;;  %v4733_v15 = vmul.f32 %v4716_v58, %v4257_v22 }
 0xc61   :  { %6113 = vrcp.f32 %v4291_v25  ;;  %v9181_v40 = vmul.f32 0.70710677, %v9178_v56  ;;  %v4319_v49 = vand.u32 2147483648, %v4291_v25  ;;  %v4317_v36 = vand.u32 2147483647, %v4291_v25 }
 0xc62   :  { %v4127_v19 = vpop.f32.mrf.mxu2  ;;  %vm4313_vm14 = vweird.f32 %v4291_v25 }
 0xc63   :  { %v9184_v63 = vand.u32 2147483647, %v9181_v40  ;;  %v4128_v2 = vadd.f32 %v4127_v19, %v4059_v12  ;;  %v4320_v8 = vor.u32 1.1754944e-38, %v4319_v49  ;;  %vm4318_vm2 = vcmp.eq.f32.partialorder %v4317_v36, 8.507059e+37  ;;  %v4194_v36 = vld [vmem:[%s10529_s11 + $0x28] sm:$0xff] }
 0xc64   :  { %v4065_v34 = vpop.f32.mrf.mxu1 }
 0xc65   :  { %v4275_v31 = vmul.f32 0.3275911, %v9184_v63  ;;  %v4174_v3 = vadd.f32 %v4128_v2, %v9031_v4  ;;  %v4192_v4 = vld [vmem:[%s10529_s11 + $0x18] sm:$0xff] }
 0xc67   :  { %v6114_v32 = vpop.eup %6113  ;;  %v9191_v14 = vadd.f32 1.0, %v4275_v31  ;;  %v9193_v50 = vadd.f32 %v4191_v9, %v4174_v3 }
 0xc68   :  { %v4309_v45 = vmul.f32 %v6114_v32, %v4291_v25  ;;  %vm4314_vm15 = vweird.f32 %v6114_v32  ;;  %v4193_v25 = vld [vmem:[%s10529_s11 + $0x20] sm:$0xff] }
 0xc69   :  { %6115 = vrcp.f32 %v9191_v14  ;;  %v9197_v28 = vmul.f32 0.70710677, %v9193_v50  ;;  %vm4315_vm1 = vmor %vm4313_vm14, %vm4314_vm15  ;;  %v4334_v2 = vand.u32 2147483648, %v9191_v14  ;;  %vm4328_vm7 = vweird.f32 %v9191_v14 }
 0xc6a   :  { %v4310_v55 = vsub.f32 1.0, %v4309_v45  ;;  %v4130_v27 = vpop.f32.mrf.mxu2 }
 0xc6b   :  { %v9200_v48 = vand.u32 2147483647, %v9197_v28  ;;  %v4131_v33 = vadd.f32 %v4130_v27, %v4062_v10  ;;  %v4750_v27 = vmul.f32 1.442695, %v4733_v15 }
 0xc6c   :  { %v4311_v20 = vmul.f32 %v6114_v32, %v4310_v55  ;;  %v4068_v61 = vpop.f32.mrf.mxu1 }
 0xc6d   :  { %v4276_v54 = vmul.f32 0.3275911, %v9200_v48  ;;  %v4175_v18 = vadd.f32 %v4131_v33, %v9028_v59 }
 0xc6e   :  { %v4312_v46 = vadd.f32 %v6114_v32, %v4311_v20  ;;  %v4335_v20 = vor.u32 1.1754944e-38, %v4334_v2 }
 0xc6f   :  { %v6116_v21 = vpop.eup %6115  ;;  %v9207_v37 = vadd.f32 1.0, %v4276_v54  ;;  %v9209_v38 = vadd.f32 %v4192_v4, %v4175_v18  ;;  %v4717_v54 = vsub.f32 0.0, %v9184_v63 }
 0xc70   :  { %v4324_v62 = vmul.f32 %v6116_v21, %v9191_v14  ;;  %v4316_v35 = vsel %vm4315_vm1, %v6114_v32, %v4312_v46  ;;  %vm4329_vm3 = vweird.f32 %v6116_v21  ;;  %vm4819_vm1 = vcmp.lt.f32.partialorder %v9181_v40, 0.0 }
 0xc71   :  { %6117 = vrcp.f32 %v9207_v37  ;;  %v9214_v59 = vmul.f32 0.70710677, %v9209_v38  ;;  %v9216_v60 = vsel %vm4318_vm2, %v4320_v8, %v4316_v35  ;;  %vm9234_vm4 = vmor %vm4328_vm7, %vm4329_vm3  ;;  %vm4343_vm6 = vweird.f32 %v9207_v37 }
 0xc72   :  { %v4325_v30 = vsub.f32 1.0, %v4324_v62  ;;  %v4133_v7 = vpop.f32.mrf.mxu2  ;;  %v4563_v12 = vmul.f32 1.0614054, %v9216_v60  ;;  %vm4820_vm2 = vcmp.lt.f32.partialorder %v9197_v28, 0.0 }
 0xc73   :  { %v4134_v39 = vadd.f32 %v4133_v7, %v4065_v34  ;;  %v9220_v47 = vand.u32 2147483647, %v9214_v59  ;;  %v4347_v7 = vand.u32 2147483647, %v9207_v37 }
 0xc74   :  { %v4326_v11 = vmul.f32 %v6116_v21, %v4325_v30  ;;  %v4071_v1 = vpop.f32.mrf.mxu1  ;;  %v4580_v10 = vadd.f32 -1.4531521, %v4563_v12 }
 0xc75   :  { %v4176_v17 = vadd.f32 %v4134_v39, %v8962_v24  ;;  %v4277_v43 = vmul.f32 0.3275911, %v9220_v47  ;;  %v4332_v24 = vand.u32 2147483647, %v9191_v14  ;;  %vm4348_vm9 = vcmp.eq.f32.partialorder %v4347_v7, 8.507059e+37 }
 0xc76   :  { %v4327_v19 = vadd.f32 %v6116_v21, %v4326_v11  ;;  %v4597_v31 = vmul.f32 %v4580_v10, %v9216_v60 }
 0xc77   :  { %v6118_v9 = vpop.eup %6117  ;;  %v9232_v34 = vadd.f32 1.0, %v4277_v43  ;;  %v9238_v32 = vadd.f32 %v4193_v25, %v4176_v17  ;;  %vm4333_vm11 = vcmp.eq.f32.partialorder %v4332_v24, 8.507059e+37 }
 0xc78   :  { %v4339_v3 = vmul.f32 %v6118_v9, %v9207_v37  ;;  %v4614_v45 = vadd.f32 1.4214138, %v4597_v31  ;;  %v4331_v55 = vsel %vm9234_vm4, %v6116_v21, %v4327_v19  ;;  %vm4344_vm5 = vweird.f32 %v6118_v9 }
 0xc79   :  { %6119 = vrcp.f32 %v9232_v34  ;;  %v9248_v46 = vsel %vm4333_vm11, %v4335_v20, %v4331_v55  ;;  %v4349_v21 = vand.u32 2147483648, %v9207_v37  ;;  %v9253_v62 = vmul.f32 0.70710677, %v9238_v32  ;;  %vm9258_vm8 = vmor %vm4343_vm6, %vm4344_vm5 }
 0xc7a   :  { %v4340_v33 = vsub.f32 1.0, %v4339_v3  ;;  %v4136_v4 = vpop.f32.mrf.mxu2  ;;  %v4631_v49 = vmul.f32 %v4614_v45, %v9216_v60  ;;  %v4564_v58 = vmul.f32 1.0614054, %v9248_v46  ;;  %6121 = vpow2.f32 %v4750_v27 }
 0xc7b   :  { %v4137_v14 = vadd.f32 %v4136_v4, %v4068_v61  ;;  %v4350_v15 = vor.u32 1.1754944e-38, %v4349_v21  ;;  %v9270_v43 = vand.u32 2147483647, %v9253_v62  ;;  %v4734_v37 = vmul.f32 %v4717_v54, %v9184_v63 }
 0xc7c   :  { %v4341_v18 = vmul.f32 %v6118_v9, %v4340_v33  ;;  %v4074_v35 = vpop.f32.mrf.mxu1  ;;  %v4648_v8 = vadd.f32 -0.28449672, %v4631_v49  ;;  %v4581_v17 = vadd.f32 -1.4531521, %v4564_v58  ;;  %v4718_v54 = vsub.f32 0.0, %v9200_v48 }
 0xc7d   :  { %v4177_v61 = vadd.f32 %v4137_v14, %v8960_v0  ;;  %v4278_v63 = vmul.f32 0.3275911, %v9270_v43  ;;  %v4752_v4 = vmul.f32 1.442695, %v4734_v37  ;;  %vm4358_vm13 = vweird.f32 %v9232_v34 }
 0xc7e   :  { %v4342_v30 = vadd.f32 %v6118_v9, %v4341_v18  ;;  %v4665_v11 = vmul.f32 %v4648_v8, %v9216_v60  ;;  %v4598_v2 = vmul.f32 %v4581_v17, %v9248_v46  ;;  %v4735_v7 = vmul.f32 %v4718_v54, %v9200_v48 }
 0xc7f   :  { %v9262_v12 = vadd.f32 %v4194_v36, %v4177_v61  ;;  %v9267_v10 = vpop.eup %6119  ;;  %6123 = vpow2.f32 %v4752_v4 }
 0xc80   :  { %v4346_v0 = vsel %vm9258_vm8, %v6118_v9, %v4342_v30  ;;  %v4682_v19 = vadd.f32 0.2548296, %v4665_v11  ;;  %v4354_v9 = vmul.f32 %v9267_v10, %v9232_v34  ;;  %v4615_v45 = vadd.f32 1.4214138, %v4598_v2  ;;  %v6122_v55 = vpop.eup %6121 }
 0xc81   :  { %v9275_v31 = vmul.f32 0.70710677, %v9262_v12  ;;  %v9277_v3 = vsel %vm4348_vm9, %v4350_v15, %v4346_v0  ;;  %vm4359_vm12 = vweird.f32 %v9267_v10  ;;  %vm4821_vm9 = vcmp.lt.f32.partialorder %v9214_v59, 0.0 }
 0xc82   :  { %v4139_v25 = vpop.f32.mrf.mxu2  ;;  %v4699_v22 = vmul.f32 %v4682_v19, %v9216_v60  ;;  %v4565_v33 = vmul.f32 1.0614054, %v9277_v3  ;;  %v4632_v49 = vmul.f32 %v4615_v45, %v9248_v46  ;;  %v4355_v36 = vsub.f32 1.0, %v4354_v9  ;;  %vm9332_vm15 = vmor %vm4358_vm13, %vm4359_vm12 }
 0xc83   :  { %v4140_v24 = vadd.f32 %v4139_v25, %v4071_v1  ;;  %v4195_v1 = vld [vmem:[%s10529_s11 + $0x30] sm:$0xff]  ;;  %v9291_v60 = vand.u32 2147483647, %v9275_v31  ;;  %v4719_v9 = vsub.f32 0.0, %v9220_v47 }
 0xc84   :  { %v4784_v20 = vmul.f32 %v6122_v55, %v4699_v22  ;;  %v4077_v14 = vpop.f32.mrf.mxu1  ;;  %v4582_v18 = vadd.f32 -1.4531521, %v4565_v33  ;;  %v4649_v8 = vadd.f32 -0.28449672, %v4632_v49  ;;  %v4356_v11 = vmul.f32 %v9267_v10, %v4355_v36 }
 0xc85   :  { %v4178_v27 = vadd.f32 %v4140_v24, %v9016_v13  ;;  %v9293_v13 = vadd.f32 1.0, %v4278_v63  ;;  %v4279_v39 = vmul.f32 0.3275911, %v9291_v60  ;;  %v4754_v24 = vmul.f32 1.442695, %v4735_v7 }
 0xc86   :  { %v4801_v21 = vsub.f32 1.0, %v4784_v20  ;;  %v4599_v58 = vmul.f32 %v4582_v18, %v9277_v3  ;;  %v4666_v0 = vmul.f32 %v4649_v8, %v9248_v46  ;;  %v4364_v55 = vand.u32 2147483648, %v9232_v34 }
 0xc87   :  { %v9295_v61 = vadd.f32 %v4195_v1, %v4178_v27  ;;  %6125 = vrcp.f32 %v9293_v13  ;;  %v9309_v22 = vadd.f32 1.0, %v4279_v39  ;;  %v4357_v6 = vadd.f32 %v9267_v10, %v4356_v11 }
 0xc88   :  { %v4835_v17 = vsub.f32 0.0, %v4801_v21  ;;  %v4616_v15 = vadd.f32 1.4214138, %v4599_v58  ;;  %v4683_v2 = vadd.f32 0.2548296, %v4666_v0  ;;  %v4223_v1 = vmul.f32 0.5, %v9168_v41 }
 0xc89   :  { %v9304_v37 = vmul.f32 0.70710677, %v9295_v61  ;;  %v4720_v49 = vsub.f32 0.0, %v9270_v43  ;;  %v4362_v18 = vand.u32 2147483647, %v9232_v34  ;;  %6127 = vrcp.f32 %v9309_v22 }
 0xc8a   :  { %v4142_v30 = vpop.f32.mrf.mxu2  ;;  %v4852_v19 = vsel %vm4818_vm10, %v4835_v17, %v4801_v21  ;;  %v4633_v48 = vmul.f32 %v4616_v15, %v9277_v3  ;;  %v4700_v63 = vmul.f32 %v4683_v2, %v9248_v46  ;;  %v4196_v46 = vld [vmem:[%s10529_s11 + $0x38] sm:$0xff]  ;;  %6129 = vpow2.f32 %v4754_v24  ;;  %v4197_v15 = vld [vmem:[%s10529_s11 + $0x40] sm:$0xff] }
 0xc8b   :  { %v4143_v25 = vadd.f32 %v4142_v30, %v4074_v35  ;;  %v4869_v45 = vadd.f32 1.0, %v4852_v19  ;;  %v6124_v35 = vpop.eup %6123  ;;  %v9318_v33 = vand.u32 2147483647, %v9304_v37  ;;  %v4365_v58 = vor.u32 1.1754944e-38, %v4364_v55 }
 0xc8c   :  { %v9314_v27 = vpop.f32.mrf.mxu1  ;;  %v4650_v20 = vadd.f32 -0.28449672, %v4633_v48  ;;  %v4785_v8 = vmul.f32 %v6124_v35, %v4700_v63  ;;  %v4736_v30 = vmul.f32 %v4719_v9, %v9220_v47  ;;  %v4361_v34 = vsel %vm9332_vm15, %v9267_v10, %v4357_v6 }
 0xc8d   :  { %v4179_v4 = vadd.f32 %v4143_v25, %v9014_v29  ;;  %v9328_v36 = vpop.eup %6125  ;;  %v4886_v41 = vmul.f32 %v4869_v45, %v4223_v1  ;;  %v4280_v7 = vmul.f32 0.3275911, %v9318_v33  ;;  %v4737_v0 = vmul.f32 %v4720_v49, %v9270_v43 }
 0xc8e   :  { %v4802_v11 = vsub.f32 1.0, %v4785_v8  ;;  %v4667_v17 = vmul.f32 %v4650_v20, %v9277_v3  ;;  %vm4363_vm14 = vcmp.eq.f32.partialorder %v4362_v18, 8.507059e+37  ;;  %v4721_v10 = vsub.f32 0.0, %v9291_v60 }
 0xc8f   :  { %v9342_v39 = vadd.f32 %v4196_v46, %v4179_v4  ;;  %4920 = vrot.lane.b32.xlu2 %v4886_v41, %s6188_s25  ;;  %v9354_v2 = vsel %vm4363_vm14, %v4365_v58, %v4361_v34  ;;  %v9357_v48 = vmul.f32 0.5, %v9193_v50  ;;  %v4756_v24 = vmul.f32 1.442695, %v4736_v30 }
 0xc90   :  { %v4836_v25 = vsub.f32 0.0, %v4802_v11  ;;  %v4684_v19 = vadd.f32 0.2548296, %v4667_v17  ;;  %v4224_v9 = vmul.f32 0.5, %v9178_v56  ;;  %v9363_v43 = vadd.f32 1.0, %v4280_v7 }
 0xc91   :  { %v9366_v45 = vmul.f32 0.70710677, %v9342_v39  ;;  %v4566_v40 = vmul.f32 1.0614054, %v9354_v2  ;;  %v9374_v1 = vmul.f32 0.5, %v9209_v38  ;;  %v4738_v49 = vmul.f32 %v4721_v10, %v9291_v60 }
 0xc92   :  { %v4145_v54 = vpop.f32.mrf.mxu2  ;;  %v4853_v55 = vsel %vm4819_vm1, %v4836_v25, %v4802_v11  ;;  %v4701_v63 = vmul.f32 %v4684_v19, %v9277_v3  ;;  %v4758_v20 = vmul.f32 1.442695, %v4737_v0  ;;  %6131 = vpow2.f32 %v4756_v24  ;;  %v4198_v25 = vld [vmem:[%s10529_s11 + $0x48] sm:$0xff] }
 0xc93   :  { %v4146_v21 = vadd.f32 %v4145_v54, %v4077_v14  ;;  %v4369_v14 = vmul.f32 %v9328_v36, %v9293_v13  ;;  %v4870_v46 = vadd.f32 1.0, %v4853_v55  ;;  %v9380_v18 = vmul.f32 0.5, %v9238_v32 }
 0xc94   :  { %v4083_v56 = vpop.f32.mrf.mxu1  ;;  %6133 = vrcp.f32 %v9363_v43  ;;  %v4264_v29 = vand.u32 2147483647, %v9366_v45  ;;  %v4583_v8 = vadd.f32 -1.4531521, %v4566_v40  ;;  %v9390_v30 = vmul.f32 0.5, %v9262_v12 }
 0xc95   :  { %v4180_v47 = vadd.f32 %v4146_v21, %v8934_v44  ;;  %v9361_v44 = vpop.eup %6127  ;;  %v4370_v50 = vsub.f32 1.0, %v4369_v14  ;;  %v4887_v41 = vmul.f32 %v4870_v46, %v4224_v9  ;;  %6135 = vpow2.f32 %v4758_v20 }
 0xc96   :  { %v6130_v6 = vpop.eup %6129  ;;  %v4384_v3 = vmul.f32 %v9361_v44, %v9309_v22  ;;  %v4394_v32 = vand.u32 2147483648, %v9309_v22  ;;  %v4760_v34 = vmul.f32 1.442695, %v4738_v49  ;;  %v4722_v11 = vsub.f32 0.0, %v9318_v33 }
 0xc97   :  { %v9370_v35 = vadd.f32 %v4197_v15, %v4180_v47  ;;  %v4786_v54 = vmul.f32 %v6130_v6, %v4701_v63  ;;  %v4371_v58 = vmul.f32 %v9328_v36, %v4370_v50  ;;  %4922 = vrot.lane.b32.xlu1 %v4887_v41, %s6188_s25  ;;  %v4600_v17 = vmul.f32 %v4583_v8, %v9354_v2 }
 0xc98   :  { %v4385_v7 = vsub.f32 1.0, %v4384_v3  ;;  %v9397_v14 = vmul.f32 0.5, %v9295_v61  ;;  %vm4373_vm3 = vweird.f32 %v9293_v13  ;;  %v4377_v12 = vand.u32 2147483647, %v9293_v13  ;;  %v9402_v47 = vpop.eup %6131 }
 0xc99   :  { %v9386_v21 = vmul.f32 0.70710677, %v9370_v35  ;;  %v4803_v60 = vsub.f32 1.0, %v4786_v54  ;;  %vm4388_vm7 = vweird.f32 %v9309_v22  ;;  %v4281_v10 = vmul.f32 0.3275911, %v4264_v29 }
 0xc9a   :  { %v4148_v4 = vpop.f32.mrf.mxu2  ;;  %v4372_v19 = vadd.f32 %v9328_v36, %v4371_v58  ;;  %vm4374_vm4 = vweird.f32 %v9328_v36  ;;  %v4617_v55 = vadd.f32 1.4214138, %v4600_v17  ;;  %v4379_v63 = vand.u32 2147483648, %v9293_v13 }
 0xc9b   :  { %v4149_v38 = vadd.f32 %v4148_v4, %v9314_v27  ;;  %v4837_v27 = vsub.f32 0.0, %v4803_v60  ;;  %v9406_v15 = vand.u32 2147483647, %v9386_v21  ;;  %v4386_v6 = vmul.f32 %v9361_v44, %v4385_v7  ;;  %vm9429_vm11 = vmor %vm4373_vm3, %vm4374_vm4 }
 0xc9c   :  { %v4395_v50 = vor.u32 1.1754944e-38, %v4394_v32  ;;  %6137 = vpow2.f32 %v4760_v34  ;;  %v4739_v4 = vmul.f32 %v4722_v11, %v9318_v33  ;;  %v4086_v40 = vpop.f32.mrf.mxu1  ;;  %v4723_v49 = vsub.f32 0.0, %v4264_v29  ;;  %v4199_v34 = vld [vmem:[%s10529_s11 + $0x50] sm:$0xff] }
 0xc9d   :  { %v4181_v0 = vadd.f32 %v4149_v38, %v8936_v26  ;;  %v9413_v26 = vpop.eup %6133  ;;  %v4854_v24 = vsel %vm4820_vm2, %v4837_v27, %v4803_v60  ;;  %v4634_v28 = vmul.f32 %v4617_v55, %v9354_v2  ;;  %v9435_v54 = vadd.f32 1.0, %v4281_v10 }
 0xc9e   :  { %v9420_v20 = vpop.eup %6135  ;;  %v4871_v3 = vadd.f32 1.0, %v4854_v24  ;;  %v4399_v33 = vmul.f32 %v9413_v26, %v9363_v43  ;;  %v4282_v41 = vmul.f32 0.3275911, %v9406_v15  ;;  %v4376_v38 = vsel %vm9429_vm11, %v9328_v36, %v4372_v19 }
 0xc9f   :  { %v9422_v46 = vadd.f32 %v4198_v25, %v4181_v0  ;;  %v4651_v13 = vadd.f32 -0.28449672, %v4634_v28  ;;  %v4380_v58 = vor.u32 1.1754944e-38, %v4379_v63  ;;  %vm4389_vm5 = vweird.f32 %v9361_v44 }
 0xca0   :  { %v4888_v60 = vmul.f32 %v4871_v3, %v9357_v48  ;;  %v4409_v32 = vand.u32 2147483648, %v9363_v43  ;;  %vm4378_vm6 = vcmp.eq.f32.partialorder %v4377_v12, 8.507059e+37  ;;  %v4387_v7 = vadd.f32 %v9361_v44, %v4386_v6  ;;  %vm9466_vm8 = vmor %vm4388_vm7, %vm4389_vm5  ;;  %v4200_v3 = vld [vmem:[%s10529_s11 + $0x58] sm:$0xff] }
 0xca1   :  { %v4740_v11 = vmul.f32 %v4723_v49, %v4264_v29  ;;  %v9450_v36 = vmul.f32 0.70710677, %v9422_v46  ;;  %v9454_v48 = vsel %vm4378_vm6, %v4380_v58, %v4376_v38  ;;  %v4762_v17 = vmul.f32 1.442695, %v4739_v4 }
 0xca2   :  { %v4151_v61 = vpop.f32.mrf.mxu2  ;;  %4924 = vrot.lane.b32.xlu0 %v4888_v60, %s6188_s25  ;;  %v9456_v27 = vpop.eup %6137  ;;  %6139 = vrcp.f32 %v9435_v54  ;;  %v9459_v0 = vadd.f32 1.0, %v4282_v41  ;;  %v4392_v10 = vand.u32 2147483647, %v9309_v22  ;;  %v4400_v25 = vsub.f32 1.0, %v4399_v33 }
 0xca3   :  { %v4152_v9 = vadd.f32 %v4151_v61, %v4083_v56  ;;  %v9471_v61 = vmul.f32 0.5, %v9342_v39  ;;  %v4567_v63 = vmul.f32 1.0614054, %v9454_v48  ;;  %v4391_v22 = vsel %vm9466_vm8, %v9361_v44, %v4387_v7 }
 0xca4   :  { %v4764_v6 = vmul.f32 1.442695, %v4740_v11  ;;  %v4724_v4 = vsub.f32 0.0, %v9406_v15  ;;  %v4266_v39 = vand.u32 2147483647, %v9450_v36  ;;  %6141 = vrcp.f32 %v9459_v0  ;;  %v4089_v56 = vpop.f32.mrf.mxu1 }
 0xca5   :  { %v4182_v8 = vadd.f32 %v4152_v9, %v9003_v57  ;;  %v4668_v57 = vmul.f32 %v4651_v13, %v9354_v2  ;;  %v4424_v9 = vand.u32 2147483648, %v9435_v54  ;;  %v4584_v28 = vadd.f32 -1.4531521, %v4567_v63 }
 0xca6   :  { %vm4393_vm10 = vcmp.eq.f32.partialorder %v4392_v10, 8.507059e+37  ;;  %v9489_v44 = vor.u32 1.1754944e-38, %v4409_v32  ;;  %6143 = vpow2.f32 %v4762_v17  ;;  %vm4404_vm12 = vweird.f32 %v9413_v26 }
 0xca7   :  { %v9473_v19 = vadd.f32 %v4199_v34, %v4182_v8  ;;  %v4685_v55 = vadd.f32 0.2548296, %v4668_v57  ;;  %v9494_v41 = vsel %vm4393_vm10, %v4395_v50, %v4391_v22  ;;  %v4601_v38 = vmul.f32 %v4584_v28, %v9454_v48 }
 0xca8   :  { %v4568_v60 = vmul.f32 1.0614054, %v9494_v41  ;;  %v9503_v8 = vmul.f32 0.5, %v9370_v35  ;;  %v4741_v13 = vmul.f32 %v4724_v4, %v9406_v15  ;;  %v4283_v58 = vmul.f32 0.3275911, %v4266_v39 }
 0xca9   :  { %v9492_v33 = vmul.f32 0.70710677, %v9473_v19  ;;  %v4401_v50 = vmul.f32 %v9413_v26, %v4400_v25  ;;  %vm4403_vm13 = vweird.f32 %v9363_v43  ;;  %v9510_v34 = vor.u32 1.1754944e-38, %v4424_v9 }
 0xcaa   :  { %v4154_v12 = vpop.f32.mrf.mxu2  ;;  %6145 = vpow2.f32 %v4764_v6  ;;  %v4618_v57 = vadd.f32 1.4214138, %v4601_v38  ;;  %v4725_v10 = vsub.f32 0.0, %v4266_v39  ;;  %v4585_v25 = vadd.f32 -1.4531521, %v4568_v60  ;;  %v4201_v6 = vld [vmem:[%s10529_s11 + $0x60] sm:$0xff]  ;;  %vm9560_vm15 = vmor %vm4403_vm13, %vm4404_vm12 }
 0xcab   :  { %v4155_v24 = vadd.f32 %v4154_v12, %v4086_v40  ;;  %v4702_v40 = vmul.f32 %v4685_v55, %v9354_v2  ;;  %v4267_v35 = vand.u32 2147483647, %v9492_v33  ;;  %v4439_v12 = vand.u32 2147483648, %v9459_v0 }
 0xcac   :  { %v4766_v9 = vmul.f32 1.442695, %v4741_v13  ;;  %v9522_v55 = vadd.f32 1.0, %v4283_v58  ;;  %v4635_v22 = vmul.f32 %v4618_v57, %v9454_v48  ;;  %v9532_v4 = vmul.f32 0.5, %v9422_v46 }
 0xcad   :  { %v4183_v49 = vadd.f32 %v4155_v24, %v9001_v52  ;;  %v9496_v52 = vpop.eup %6139  ;;  %v4787_v2 = vmul.f32 %v9402_v47, %v4702_v40  ;;  %v4742_v13 = vmul.f32 %v4725_v10, %v4266_v39  ;;  %v4402_v59 = vadd.f32 %v9413_v26, %v4401_v50 }
 0xcae   :  { %v9514_v11 = vmul.f32 %v9496_v52, %v9435_v54  ;;  %v9517_v17 = vpop.eup %6141  ;;  %v4652_v38 = vadd.f32 -0.28449672, %v4635_v22  ;;  %6147 = vrcp.f32 %v9522_v55  ;;  %v9565_v22 = vor.u32 1.1754944e-38, %v4439_v12 }
 0xcaf   :  { %v9506_v32 = vadd.f32 %v4200_v3, %v4183_v49  ;;  %v4804_v47 = vsub.f32 1.0, %v4787_v2  ;;  %v9520_v24 = vpop.eup %6143  ;;  %v4602_v3 = vmul.f32 %v4585_v25, %v9494_v41  ;;  %v4429_v28 = vmul.f32 %v9517_v17, %v9459_v0 }
 0xcb0   :  { %v9540_v60 = vpop.eup %6145  ;;  %v4669_v57 = vmul.f32 %v4652_v38, %v9454_v48  ;;  %v4407_v25 = vand.u32 2147483647, %v9363_v43  ;;  %v4415_v50 = vsub.f32 1.0, %v9514_v11  ;;  %6149 = vpow2.f32 %v4766_v9 }
 0xcb1   :  { %v4838_v29 = vsub.f32 0.0, %v4804_v47  ;;  %v9525_v63 = vmul.f32 0.70710677, %v9506_v32  ;;  %v4619_v46 = vadd.f32 1.4214138, %v4602_v3  ;;  %vm4419_vm14 = vweird.f32 %v9496_v52 }
 0xcb2   :  { %v4157_v7 = vpop.f32.mrf.mxu2  ;;  %v4686_v3 = vadd.f32 0.2548296, %v4669_v57  ;;  %v4406_v43 = vsel %vm9560_vm15, %v9413_v26, %v4402_v59  ;;  %vm4822_vm1 = vcmp.lt.f32.partialorder %v9253_v62, 0.0  ;;  %vm4418_vm2 = vweird.f32 %v9435_v54 }
 0xcb3   :  { %v4158_v15 = vadd.f32 %v4157_v7, %v4089_v56  ;;  %v4855_v49 = vsel %vm4821_vm9, %v4838_v29, %v4804_v47  ;;  %v4284_v56 = vmul.f32 0.3275911, %v4267_v35  ;;  %v4092_v7 = vpop.f32.mrf.mxu1  ;;  %v9548_v47 = vand.u32 2147483647, %v9525_v63  ;;  %vm9640_vm4 = vmor %vm4418_vm2, %vm4419_vm14 }
 0xcb4   :  { %v4872_v2 = vadd.f32 1.0, %v4855_v49  ;;  %v4636_v39 = vmul.f32 %v4619_v46, %v9494_v41  ;;  %v4430_v49 = vsub.f32 1.0, %v4429_v28  ;;  %v4703_v38 = vmul.f32 %v4686_v3, %v9454_v48  ;;  %v4202_v46 = vld [vmem:[%s10529_s11 + $0x68] sm:$0xff]  ;;  %v9585_v26 = vpop.eup %6147 }
 0xcb5   :  { %v4184_v40 = vadd.f32 %v4158_v15, %v8947_v42  ;;  %v4726_v15 = vsub.f32 0.0, %v4267_v35  ;;  %v4285_v11 = vmul.f32 0.3275911, %v9548_v47  ;;  %vm4408_vm3 = vcmp.eq.f32.partialorder %v4407_v25, 8.507059e+37 }
 0xcb6   :  { %v4889_v42 = vmul.f32 %v4872_v2, %v9374_v1  ;;  %v4768_v2 = vmul.f32 1.442695, %v4742_v13  ;;  %v4653_v12 = vadd.f32 -0.28449672, %v4636_v39  ;;  %v4416_v48 = vmul.f32 %v9496_v52, %v4415_v50 }
 0xcb7   :  { %v9542_v58 = vadd.f32 %v4201_v6, %v4184_v40  ;;  %v9567_v6 = vadd.f32 1.0, %v4284_v56  ;;  %v4454_v40 = vand.u32 2147483648, %v9522_v55  ;;  %v4743_v56 = vmul.f32 %v4726_v15, %v4267_v35  ;;  %v9601_v15 = vpop.eup %6149 }
 0xcb8   :  { %4926 = vrot.lane.b32.xlu2 %v4889_v42, %s6188_s25  ;;  %v4670_v13 = vmul.f32 %v4653_v12, %v9494_v41  ;;  %v9591_v35 = vsel %vm4408_vm3, %v9489_v44, %v4406_v43  ;;  %v9595_v59 = vmul.f32 %v9517_v17, %v4430_v49  ;;  %v9598_v42 = vmul.f32 0.5, %v9473_v19 }
 0xcb9   :  { %v9552_v29 = vmul.f32 0.70710677, %v9542_v58  ;;  %6151 = vrcp.f32 %v9567_v6  ;;  %v4788_v57 = vmul.f32 %v9420_v20, %v4703_v38  ;;  %v9603_v39 = vadd.f32 1.0, %v4285_v11 }
 0xcba   :  { %v4160_v10 = vpop.f32.mrf.mxu2  ;;  %vm4823_vm7 = vcmp.lt.f32.partialorder %v9275_v31, 0.0  ;;  %v9609_v44 = vor.u32 1.1754944e-38, %v4454_v40  ;;  %6153 = vpow2.f32 %v4768_v2  ;;  %v4444_v20 = vmul.f32 %v9585_v26, %v9522_v55 }
 0xcbb   :  { %v4161_v9 = vadd.f32 %v4160_v10, %v4092_v7  ;;  %v9580_v28 = vand.u32 2147483647, %v9552_v29  ;;  %v4687_v10 = vadd.f32 0.2548296, %v4670_v13  ;;  %v4805_v1 = vsub.f32 1.0, %v4788_v57  ;;  %v4095_v50 = vpop.f32.mrf.mxu1 }
 0xcbc   :  { %v4469_v3 = vand.u32 2147483648, %v9567_v6  ;;  %v4770_v43 = vmul.f32 1.442695, %v4743_v56  ;;  %v9617_v12 = vmul.f32 0.5, %v9506_v32  ;;  %v4417_v2 = vadd.f32 %v9496_v52, %v4416_v48 }
 0xcbd   :  { %v4185_v7 = vadd.f32 %v4161_v9, %v8949_v5  ;;  %v4569_v5 = vmul.f32 1.0614054, %v9591_v35  ;;  %v4286_v19 = vmul.f32 0.3275911, %v9580_v28  ;;  %v4704_v11 = vmul.f32 %v4687_v10, %v9494_v41 }
 0xcbe   :  { %v4839_v9 = vsub.f32 0.0, %v4805_v1  ;;  %6155 = vrcp.f32 %v9603_v39  ;;  %v4422_v57 = vand.u32 2147483647, %v9435_v54  ;;  %vm4434_vm11 = vweird.f32 %v9517_v17 }
 0xcbf   :  { %v9605_v25 = vadd.f32 %v4202_v46, %v4185_v7  ;;  %v9623_v38 = vpop.eup %6151  ;;  %v4727_v46 = vsub.f32 0.0, %v9548_v47  ;;  %v4789_v13 = vmul.f32 %v9456_v27, %v4704_v11  ;;  %v4586_v56 = vadd.f32 -1.4531521, %v4569_v5 }
 0xcc0   :  { %v4856_v41 = vsel %vm4822_vm1, %v4839_v9, %v4805_v1  ;;  %v9630_v32 = vadd.f32 1.0, %v4286_v19  ;;  %v9646_v1 = vpop.eup %6153  ;;  %v4445_v19 = vsub.f32 1.0, %v4444_v20  ;;  %v4459_v11 = vmul.f32 %v9623_v38, %v9567_v6 }
 0xcc1   :  { %10580 = vst [vmem:[#allocation3_spill] sm:$0xff] %v9605_v25  ;;  %v9620_v40 = vmul.f32 0.70710677, %v9605_v25  ;;  %v4873_v27 = vadd.f32 1.0, %v4856_v41  ;;  %v4806_v62 = vsub.f32 1.0, %v4789_v13  ;;  %v4603_v10 = vmul.f32 %v4586_v56, %v9591_v35  ;;  %v4203_v25 = vld [vmem:[%s10529_s11 + $0x70] sm:$0xff] }
 0xcc2   :  { %v4163_v49 = vpop.f32.mrf.mxu2  ;;  %v4421_v54 = vsel %vm9640_vm4, %v9496_v52, %v4417_v2  ;;  %vm4433_vm5 = vweird.f32 %v9459_v0  ;;  %v4744_v41 = vmul.f32 %v4727_v46, %v9548_v47  ;;  %6157 = vrcp.f32 %v9630_v32 }
 0xcc3   :  { %10581 = vst [vmem:[#allocation4_spill] sm:$0xff] %v9620_v40  ;;  %v9633_v7 = vand.u32 2147483647, %v9620_v40  ;;  %v4164_v5 = vadd.f32 %v4163_v49, %v4095_v50  ;;  %v4890_v13 = vmul.f32 %v4873_v27, %v9380_v18  ;;  %v4728_v50 = vsub.f32 0.0, %v9580_v28  ;;  %vm9714_vm9 = vmor %vm4433_vm5, %vm4434_vm11 }
 0xcc4   :  { %v4840_v49 = vsub.f32 0.0, %v4806_v62  ;;  %v4620_v20 = vadd.f32 1.4214138, %v4603_v10  ;;  %vm4423_vm6 = vcmp.eq.f32.partialorder %v4422_v57, 8.507059e+37  ;;  %v9663_v52 = vpop.eup %6155  ;;  %v9665_v2 = vor.u32 1.1754944e-38, %v4469_v3 }
 0xcc5   :  { %v4287_v9 = vmul.f32 0.3275911, %v9633_v7  ;;  %v4186_v56 = vadd.f32 %v4164_v5, %v8988_v23  ;;  %4928 = vrot.lane.b32.xlu1 %v4890_v13, %s6188_s25  ;;  %v9673_v46 = vsel %vm4423_vm6, %v9510_v34, %v4421_v54  ;;  %v4098_v23 = vpop.f32.mrf.mxu1  ;;  %v4446_v27 = vmul.f32 %v9585_v26, %v4445_v19 }
 0xcc6   :  { %v4857_v18 = vsel %vm4823_vm7, %v4840_v49, %v4806_v62  ;;  %v4460_v10 = vsub.f32 1.0, %v4459_v11  ;;  %6159 = vpow2.f32 %v4770_v43  ;;  %v4484_v3 = vand.u32 2147483648, %v9603_v39  ;;  %v4204_v11 = vld [vmem:[%s10529_s11 + $0x78] sm:$0xff] }
 0xcc7   :  { %v9670_v47 = vadd.f32 1.0, %v4287_v9  ;;  %v4874_v57 = vadd.f32 1.0, %v4857_v18  ;;  %v4772_v5 = vmul.f32 1.442695, %v4744_v41  ;;  %v4637_v13 = vmul.f32 %v4620_v20, %v9591_v35 }
 0xcc8   :  { %v9678_v40 = vadd.f32 %v4203_v25, %v4186_v56  ;;  %v4745_v31 = vmul.f32 %v4728_v50, %v9580_v28  ;;  %v4570_v34 = vmul.f32 1.0614054, %v9673_v46  ;;  %v4432_v25 = vadd.f32 %v9517_v17, %v9595_v59  ;;  %v9692_v54 = vpop.eup %6157 }
 0xcc9   :  { %v4891_v62 = vmul.f32 %v4874_v57, %v9390_v30  ;;  %6161 = vrcp.f32 %v9670_v47  ;;  %v4654_v19 = vadd.f32 -0.28449672, %v4637_v13  ;;  %vm4449_vm8 = vweird.f32 %v9585_v26 }
 0xcca   :  { %v4166_v48 = vpop.f32.mrf.mxu2  ;;  %10584 = vst [vmem:[#allocation5_spill] sm:$0xff] %v9678_v40  ;;  %v9685_v43 = vmul.f32 0.70710677, %v9678_v40  ;;  %v9696_v30 = vmul.f32 %v9623_v38, %v4460_v10  ;;  %v4474_v28 = vmul.f32 %v9663_v52, %v9603_v39  ;;  %v4587_v41 = vadd.f32 -1.4531521, %v4570_v34 }
 0xccb   :  { %v4167_v9 = vadd.f32 %v4166_v48, %v4098_v23  ;;  %4930 = vrot.lane.b32.xlu0 %v4891_v62, %s6188_s25  ;;  %v4729_v49 = vsub.f32 0.0, %v9633_v7  ;;  %v4671_v20 = vmul.f32 %v4654_v19, %v9591_v35  ;;  %v4437_v56 = vand.u32 2147483647, %v9459_v0 }
 0xccc   :  { %v9705_v59 = vand.u32 2147483647, %v9685_v43  ;;  %v9708_v18 = vpop.eup %6159  ;;  %vm4448_vm10 = vweird.f32 %v9522_v55  ;;  %v4774_v48 = vmul.f32 1.442695, %v4745_v31  ;;  %v4604_v10 = vmul.f32 %v4587_v41, %v9673_v46 }
 0xccd   :  { %v4187_v50 = vadd.f32 %v4167_v9, %v8990_v51  ;;  %v4499_v51 = vand.u32 2147483648, %v9630_v32  ;;  %v4489_v13 = vmul.f32 %v9692_v54, %v9630_v32  ;;  %v4688_v62 = vadd.f32 0.2548296, %v4671_v20  ;;  %vm9769_vm1 = vmor %vm4448_vm10, %vm4449_vm8 }
 0xcce   :  { %v4288_v34 = vmul.f32 0.3275911, %v9705_v59  ;;  %v4436_v0 = vsel %vm9714_vm9, %v9517_v17, %v4432_v25  ;;  %vm4824_vm12 = vcmp.lt.f32.partialorder %v9304_v37, 0.0  ;;  %v9730_v9 = vor.u32 1.1754944e-38, %v4484_v3  ;;  %v5017_v37 = vld [vmem:[%s10530_s13 + $0x58] sm:$0xff] }
 0xccf   :  { %v9721_v57 = vadd.f32 %v4204_v11, %v4187_v50  ;;  %6163 = vpow2.f32 %v4772_v5  ;;  %v4621_v31 = vadd.f32 1.4214138, %v4604_v10  ;;  %v9735_v11 = vpop.eup %6161  ;;  %v4475_v41 = vsub.f32 1.0, %v4474_v28  ;;  %5074 = vmatpush.msra.mxu3 %v5017_v37 }
 0xcd0   :  { %v4746_v50 = vmul.f32 %v4729_v49, %v9633_v7  ;;  %v4705_v20 = vmul.f32 %v4688_v62, %v9591_v35  ;;  %vm4438_vm13 = vcmp.eq.f32.partialorder %v4437_v56, 8.507059e+37  ;;  %v9739_v40 = vadd.f32 1.0, %v4288_v34 }
 0xcd1   :  { %v9733_v19 = vmul.f32 0.70710677, %v9721_v57  ;;  %v4638_v17 = vmul.f32 %v4621_v31, %v9673_v46  ;;  %v9746_v5 = vsel %vm4438_vm13, %v9565_v22, %v4436_v0  ;;  %vm4464_vm15 = vweird.f32 %v9623_v38 }
 0xcd2   :  { %v4490_v25 = vsub.f32 1.0, %v4489_v13  ;;  %v9749_v23 = vor.u32 1.1754944e-38, %v4499_v51  ;;  %6165 = vpow2.f32 %v4774_v48  ;;  %v4790_v7 = vmul.f32 %v9520_v24, %v4705_v20  ;;  %v4169_v56 = vpop.f32.mrf.mxu2 }
 0xcd3   :  { %v9743_v3 = vand.u32 2147483647, %v9733_v19  ;;  %v4504_v35 = vmul.f32 %v9735_v11, %v9670_v47  ;;  %v4514_v28 = vand.u32 2147483648, %v9670_v47  ;;  %v4655_v49 = vadd.f32 -0.28449672, %v4638_v17 }
 0xcd4   :  { %v4447_v10 = vadd.f32 %v9585_v26, %v4446_v27  ;;  %vm4463_vm14 = vweird.f32 %v9567_v6  ;;  %v4807_v22 = vsub.f32 1.0, %v4790_v7  ;;  %v4571_v51 = vmul.f32 1.0614054, %v9746_v5 }
 0xcd5   :  { %v4289_v62 = vmul.f32 0.3275911, %v9743_v3  ;;  %v4170_v48 = vadd.f32 %v4169_v56, %v9158_v16  ;;  %v9760_v13 = vpop.eup %6163  ;;  %v4776_v24 = vmul.f32 1.442695, %v4746_v50  ;;  %6167 = vrcp.f32 %v9739_v40  ;;  %vm9836_vm5 = vmor %vm4463_vm14, %vm4464_vm15 }
 0xcd6   :  { %v4672_v34 = vmul.f32 %v4655_v49, %v9673_v46  ;;  %v4452_v0 = vand.u32 2147483647, %v9522_v55  ;;  %v4841_v31 = vsub.f32 0.0, %v4807_v22  ;;  %v4588_v16 = vadd.f32 -1.4531521, %v4571_v51  ;;  %v4205_v55 = vld [vmem:[%s10529_s11 + $0x80] sm:$0xff] }
 0xcd7   :  { %v9773_v20 = vadd.f32 1.0, %v4289_v62  ;;  %v4188_v50 = vadd.f32 %v4170_v48, %v9039_v53  ;;  %v9777_v17 = vmul.f32 %v9663_v52, %v4475_v41  ;;  %v9780_v7 = vmul.f32 %v9692_v54, %v4490_v25 }
 0xcd8   :  { %v4689_v49 = vadd.f32 0.2548296, %v4672_v34  ;;  %v4451_v56 = vsel %vm9769_vm1, %v9585_v26, %v4447_v10  ;;  %v9788_v62 = vpop.eup %6165  ;;  %vm4825_vm2 = vcmp.lt.f32.partialorder %v9366_v45, 0.0  ;;  %v4505_v53 = vsub.f32 1.0, %v4504_v35  ;;  %v5016_v35 = vld [vmem:[%s10530_s13 + $0x50] sm:$0xff] }
 0xcd9   :  { %v4858_v41 = vsel %vm4824_vm12, %v4841_v31, %v4807_v22  ;;  %v4730_v25 = vsub.f32 0.0, %v9705_v59  ;;  %6169 = vrcp.f32 %v9773_v20  ;;  %vm4479_vm3 = vweird.f32 %v9663_v52  ;;  %5075 = vmatpush.msra.mxu3 %v5016_v35 }
 0xcda   :  { %v9796_v51 = vor.u32 1.1754944e-38, %v4514_v28  ;;  %6171 = vpow2.f32 %v4776_v24  ;;  %v4875_v48 = vadd.f32 1.0, %v4858_v41  ;;  %v4706_v26 = vmul.f32 %v4689_v49, %v9673_v46 }
 0xcdb   :  { %v4605_v10 = vmul.f32 %v4588_v16, %v9746_v5  ;;  %v9800_v34 = vadd.f32 %v4205_v55, %v4188_v50  ;;  %vm4453_vm7 = vcmp.eq.f32.partialorder %v4452_v0, 8.507059e+37  ;;  %v4462_v28 = vadd.f32 %v9623_v38, %v9696_v30  ;;  %v9810_v22 = vpop.eup %6167 }
 0xcdc   :  { %vm4478_vm4 = vweird.f32 %v9603_v39  ;;  %v4892_v46 = vmul.f32 %v4875_v48, %v9397_v14  ;;  %v4529_v24 = vand.u32 2147483648, %v9739_v40  ;;  %v4791_v0 = vmul.f32 %v9540_v60, %v4706_v26  ;;  %v5015_v14 = vld [vmem:[%s10530_s13 + $0x48] sm:$0xff] }
 0xcdd   :  { %v9817_v27 = vsel %vm4453_vm7, %v9609_v44, %v4451_v56  ;;  %vm4494_vm11 = vweird.f32 %v9692_v54  ;;  %v9821_v31 = vmul.f32 %v9735_v11, %v4505_v53  ;;  %v9824_v30 = vmul.f32 %v4730_v25, %v9705_v59  ;;  %5076 = vmatpush.msra.mxu3 %v5015_v14  ;;  %v5013_v14 = vld [vmem:[%s10530_s13 + $0x38] sm:$0xff]  ;;  %vm9893_vm10 = vmor %vm4478_vm4, %vm4479_vm3 }
 0xcde   :  { %v4622_v16 = vadd.f32 1.4214138, %v4605_v10  ;;  %v9827_v50 = vmul.f32 0.70710677, %v9800_v34  ;;  %4932 = vrot.lane.b32.xlu2 %v4892_v46, %s6188_s25  ;;  %v4808_v44 = vsub.f32 1.0, %v4791_v0  ;;  %v4731_v59 = vsub.f32 0.0, %v9743_v3 }
 0xcdf   :  { %v4572_v49 = vmul.f32 1.0614054, %v9817_v27  ;;  %v4467_v55 = vand.u32 2147483647, %v9567_v6  ;;  %v9844_v56 = vpop.eup %6169  ;;  %vm4493_vm6 = vweird.f32 %v9630_v32  ;;  %v4519_v53 = vmul.f32 %v9810_v22, %v9739_v40 }
 0xce0   :  { %v4639_v41 = vmul.f32 %v4622_v16, %v9746_v5  ;;  %v9851_v25 = vand.u32 2147483647, %v9827_v50  ;;  %v4466_v48 = vsel %vm9836_vm5, %v9623_v38, %v4462_v28  ;;  %v9856_v26 = vpop.eup %6171  ;;  %v9858_v10 = vor.u32 1.1754944e-38, %v4529_v24  ;;  %v5014_v24 = vld [vmem:[%s10530_s13 + $0x40] sm:$0xff]  ;;  %vm9922_vm14 = vmor %vm4493_vm6, %vm4494_vm11 }
 0xce1   :  { %v4842_v6 = vsub.f32 0.0, %v4808_v44  ;;  %v4534_v37 = vmul.f32 %v9844_v56, %v9773_v20  ;;  %v4589_v35 = vadd.f32 -1.4531521, %v4572_v49  ;;  %v4544_v46 = vand.u32 2147483648, %v9773_v20  ;;  %5077 = vmatpush.msra.mxu3 %v5014_v24 }
 0xce2   :  { %v4656_v0 = vadd.f32 -0.28449672, %v4639_v41  ;;  %v4290_v16 = vmul.f32 0.3275911, %v9851_v25  ;;  %vm4468_vm8 = vcmp.eq.f32.partialorder %v4467_v55, 8.507059e+37  ;;  %v4477_v49 = vadd.f32 %v9663_v52, %v9777_v17  ;;  %v5012_v17 = vld [vmem:[%s10530_s13 + $0x30] sm:$0xff] }
 0xce3   :  { %v4859_v60 = vsel %vm4825_vm2, %v4842_v6, %v4808_v44  ;;  %v4606_v38 = vmul.f32 %v4589_v35, %v9817_v27  ;;  %v9868_v28 = vsel %vm4468_vm8, %v9665_v2, %v4466_v48  ;;  %vm4509_vm9 = vweird.f32 %v9735_v11  ;;  %5078 = vmatpush.msra.mxu3 %v5013_v14 }
 0xce4   :  { %v4520_v45 = vsub.f32 1.0, %v4519_v53  ;;  %v4876_v44 = vadd.f32 1.0, %v4859_v60  ;;  %v4673_v55 = vmul.f32 %v4656_v0, %v9746_v5  ;;  %v9880_v41 = vadd.f32 1.0, %v4290_v16 }
 0xce5   :  { %v4535_v2 = vsub.f32 1.0, %v4534_v37  ;;  %v9883_v48 = vmul.f32 %v4731_v59, %v9743_v3  ;;  %v4623_v6 = vadd.f32 1.4214138, %v4606_v38  ;;  %v4573_v35 = vmul.f32 1.0614054, %v9868_v28  ;;  %v5011_v38 = vld [vmem:[%s10530_s13 + $0x28] sm:$0xff]  ;;  %5079 = vmatpush.msra.mxu3 %v5012_v17 }
 0xce6   :  { %vm4508_vm12 = vweird.f32 %v9670_v47  ;;  %v4893_v3 = vmul.f32 %v4876_v44, %v9471_v61  ;;  %v9899_v59 = vor.u32 1.1754944e-38, %v4544_v46  ;;  %v4690_v37 = vadd.f32 0.2548296, %v4673_v55  ;;  %v5009_v17 = vld [vmem:[%s10530_s13 + $0x18] sm:$0xff] }
 0xce7   :  { %6173 = vrcp.f32 %v9880_v41  ;;  %vm4826_vm13 = vcmp.lt.f32.partialorder %v9386_v21, 0.0  ;;  %v4559_v0 = vand.u32 2147483648, %v9880_v41  ;;  %v4640_v16 = vmul.f32 %v4623_v6, %v9817_v27  ;;  %5080 = vmatpush.msra.mxu3 %v5011_v38  ;;  %vm9971_vm8 = vmor %vm4508_vm12, %vm4509_vm9  ;;  %v5006_v21 = vld [vmem:[%s10530_s13] sm:$0xff] }
 0xce8   :  { %v4590_v60 = vadd.f32 -1.4531521, %v4573_v35  ;;  %v4481_v61 = vsel %vm9893_vm10, %v9663_v52, %v4477_v49  ;;  %vm4524_vm15 = vweird.f32 %v9810_v22  ;;  %4934 = vrot.lane.b32.xlu1 %v4893_v3, %s6188_s25  ;;  %v4707_v46 = vmul.f32 %v4690_v37, %v9746_v5 }
 0xce9   :  { %v4482_v24 = vand.u32 2147483647, %v9603_v39  ;;  %v4492_v14 = vadd.f32 %v9692_v54, %v9780_v7  ;;  %v4497_v44 = vand.u32 2147483647, %v9630_v32  ;;  %v4521_v49 = vmul.f32 %v9810_v22, %v4520_v45  ;;  %v5010_v7 = vld [vmem:[%s10530_s13 + $0x20] sm:$0xff]  ;;  %v4921_v37 = vpop.permute.xlu2 %4920 }
 0xcea   :  { %v9928_v5 = vmul.f32 %v9844_v56, %v4535_v2  ;;  %v4657_v55 = vadd.f32 -0.28449672, %v4640_v16  ;;  %v4607_v39 = vmul.f32 %v4590_v60, %v9868_v28  ;;  %vm4523_vm1 = vweird.f32 %v9739_v40  ;;  %5081 = vmatpush.msra.mxu3 %v5010_v7 }
 0xceb   :  { %v4792_v32 = vmul.f32 %v9601_v15, %v4707_v46  ;;  %vm4483_vm2 = vcmp.eq.f32.partialorder %v4482_v24, 8.507059e+37  ;;  %vm4971_vm3 = vcmask 785920   ;;  %v4496_v45 = vsel %vm9922_vm14, %v9692_v54, %v4492_v14  ;;  %vm9999_vm12 = vmor %vm4523_vm1, %vm4524_vm15 }
 0xcec   :  { %vm4539_vm7 = vweird.f32 %v9844_v56  ;;  %v4674_v2 = vmul.f32 %v4657_v55, %v9817_v27  ;;  %v4624_v6 = vadd.f32 1.4214138, %v4607_v39  ;;  %v9942_v35 = vsel %vm4483_vm2, %v9730_v9, %v4481_v61  ;;  %4972 = vst.msk [vmem:[#allocation2] sm:$0xff] %vm4971_vm3, %v4921_v37  ;;  %5082 = vmatpush.msra.mxu3 %v5009_v17  ;;  %v5007_v39 = vld [vmem:[%s10530_s13 + $0x8] sm:$0xff] }
 0xced   :  { %vm4498_vm4 = vcmp.eq.f32.partialorder %v4497_v44, 8.507059e+37  ;;  %v9947_v15 = vpop.eup %6173  ;;  %v4809_v53 = vsub.f32 1.0, %v4792_v32  ;;  %v9949_v3 = vor.u32 1.1754944e-38, %v4559_v0  ;;  %v4574_v54 = vmul.f32 1.0614054, %v9942_v35  ;;  %v5008_v0 = vld [vmem:[%s10530_s13 + $0x10] sm:$0xff] }
 0xcee   :  { %v9953_v16 = vsel %vm4498_vm4, %v9749_v23, %v4496_v45  ;;  %vm4538_vm11 = vweird.f32 %v9773_v20  ;;  %v4549_v9 = vmul.f32 %v9947_v15, %v9880_v41  ;;  %v4691_v60 = vadd.f32 0.2548296, %v4674_v2  ;;  %5083 = vmatpush.msra.mxu3 %v5008_v0 }
 0xcef   :  { %v4641_v38 = vmul.f32 %v4624_v6, %v9868_v28  ;;  %vm5018_vm5 = vcmask 785408   ;;  %vm4827_vm6 = vcmp.lt.f32.partialorder %v9450_v36, 0.0  ;;  %v4843_v61 = vsub.f32 0.0, %v4809_v53  ;;  %vm10024_vm15 = vmor %vm4538_vm11, %vm4539_vm7 }
 0xcf0   :  { %v4591_v23 = vadd.f32 -1.4531521, %v4574_v54  ;;  %v4575_v46 = vmul.f32 1.0614054, %v9953_v16  ;;  %v4507_v24 = vadd.f32 %v9735_v11, %v9821_v31  ;;  %v4550_v44 = vsub.f32 1.0, %v4549_v9  ;;  %5084 = vmatpush.msra.mxu3 %v5007_v39 }
 0xcf1   :  { %v4708_v52 = vmul.f32 %v4691_v60, %v9817_v27  ;;  %v4658_v55 = vadd.f32 -0.28449672, %v4641_v38  ;;  %v4512_v7 = vand.u32 2147483647, %v9670_v47  ;;  %v4860_v31 = vsel %vm4826_vm13, %v4843_v61, %v4809_v53 }
 0xcf2   :  { %v4608_v32 = vmul.f32 %v4591_v23, %v9942_v35  ;;  %v4592_v45 = vadd.f32 -1.4531521, %v4575_v46  ;;  %v4511_v2 = vsel %vm9971_vm8, %v9735_v11, %v4507_v24  ;;  %v4877_v6 = vadd.f32 1.0, %v4860_v31  ;;  %5085 = vmatpush.msra.mxu3 %v5006_v21 }
 0xcf3   :  { %v4551_v27 = vmul.f32 %v9947_v15, %v4550_v44  ;;  %vm4554_vm9 = vweird.f32 %v9947_v15  ;;  %v4793_v17 = vmul.f32 %v9646_v1, %v4708_v52  ;;  %v4675_v47 = vmul.f32 %v4658_v55, %v9868_v28  ;;  %v4989_v61 = vld [vmem:[#allocation2] sm:$0xff] }
 0xcf4   :  { %v4625_v53 = vadd.f32 1.4214138, %v4608_v32  ;;  %v4609_v54 = vmul.f32 %v4592_v45, %v9953_v16  ;;  %vm4513_vm10 = vcmp.eq.f32.partialorder %v4512_v7, 8.507059e+37  ;;  %v4522_v11 = vadd.f32 %v9810_v22, %v4521_v49  ;;  %5636 = vmatmul.msk.f32.vlgmr.msra.gmra.mxu3 %vm5018_vm5, %v4989_v61 }
 0xcf5   :  { %v4894_v1 = vmul.f32 %v4877_v6, %v9503_v8  ;;  %vm4553_vm13 = vweird.f32 %v9880_v41  ;;  %v4810_v9 = vsub.f32 1.0, %v4793_v17  ;;  %v4692_v60 = vadd.f32 0.2548296, %v4675_v47 }
 0xcf6   :  { %v10006_v38 = vsel %vm4513_vm10, %v9796_v51, %v4511_v2  ;;  %vm4828_vm14 = vcmp.lt.f32.partialorder %v9492_v33, 0.0  ;;  %v4642_v49 = vmul.f32 %v4625_v53, %v9942_v35  ;;  %v4626_v0 = vadd.f32 1.4214138, %v4609_v54  ;;  %vm10054_vm4 = vmor %vm4553_vm13, %vm4554_vm9 }
 0xcf7   :  { %v4576_v23 = vmul.f32 1.0614054, %v10006_v38  ;;  %v4526_v8 = vsel %vm9999_vm12, %v9810_v22, %v4522_v11  ;;  %4936 = vrot.lane.b32.xlu0 %v4894_v1, %s6188_s25  ;;  %v4844_v46 = vsub.f32 0.0, %v4810_v9  ;;  %v4709_v24 = vmul.f32 %v4692_v60, %v9868_v28 }
 0xcf8   :  { %v4527_v51 = vand.u32 2147483647, %v9739_v40  ;;  %v4537_v14 = vadd.f32 %v9844_v56, %v9928_v5  ;;  %v4659_v22 = vadd.f32 -0.28449672, %v4642_v49  ;;  %v4643_v52 = vmul.f32 %v4626_v0, %v9953_v16 }
 0xcf9   :  { %v4593_v55 = vadd.f32 -1.4531521, %v4576_v23  ;;  %v4542_v28 = vand.u32 2147483647, %v9773_v20  ;;  %v4861_v40 = vsel %vm4827_vm6, %v4844_v46, %v4810_v9  ;;  %v4794_v39 = vmul.f32 %v9708_v18, %v4709_v24 }
 0xcfa   :  { %vm4528_vm1 = vcmp.eq.f32.partialorder %v4527_v51, 8.507059e+37  ;;  %v4541_v5 = vsel %vm10024_vm15, %v9844_v56, %v4537_v14  ;;  %v4878_v7 = vadd.f32 1.0, %v4861_v40  ;;  %v4676_v31 = vmul.f32 %v4659_v22, %v9942_v35 }
 0xcfb   :  { %v4660_v32 = vadd.f32 -0.28449672, %v4643_v52  ;;  %v4610_v45 = vmul.f32 %v4593_v55, %v10006_v38  ;;  %v4811_v2 = vsub.f32 1.0, %v4794_v39  ;;  %v10039_v6 = vsel %vm4528_vm1, %v9858_v10, %v4526_v8 }
 0xcfc   :  { %vm4543_vm2 = vcmp.eq.f32.partialorder %v4542_v28, 8.507059e+37  ;;  %v4557_v36 = vand.u32 2147483647, %v9880_v41  ;;  %v4895_v18 = vmul.f32 %v4878_v7, %v9532_v4  ;;  %v4693_v20 = vadd.f32 0.2548296, %v4676_v31 }
 0xcfd   :  { %v4677_v17 = vmul.f32 %v4660_v32, %v9953_v16  ;;  %v4627_v47 = vadd.f32 1.4214138, %v4610_v45  ;;  %vm4829_vm7 = vcmp.lt.f32.partialorder %v9525_v63, 0.0  ;;  %v4845_v56 = vsub.f32 0.0, %v4811_v2 }
 0xcfe   :  { %v4577_v21 = vmul.f32 1.0614054, %v10039_v6  ;;  %v10047_v53 = vsel %vm4543_vm2, %v9899_v59, %v4541_v5  ;;  %v4552_v10 = vadd.f32 %v9947_v15, %v4551_v27  ;;  %4938 = vrot.lane.b32.xlu2 %v4895_v18, %s6188_s25  ;;  %v4710_v54 = vmul.f32 %v4693_v20, %v9942_v35 }
 0xcff   :  { %v4694_v11 = vadd.f32 0.2548296, %v4677_v17  ;;  %v4644_v37 = vmul.f32 %v4627_v47, %v10006_v38  ;;  %v4578_v59 = vmul.f32 1.0614054, %v10047_v53  ;;  %v4862_v27 = vsel %vm4828_vm14, %v4845_v56, %v4811_v2 }
 0xd00   :  { %v4594_v1 = vadd.f32 -1.4531521, %v4577_v21  ;;  %v4556_v41 = vsel %vm10054_vm4, %v9947_v15, %v4552_v10  ;;  %vm4558_vm11 = vcmp.eq.f32.partialorder %v4557_v36, 8.507059e+37  ;;  %v4879_v9 = vadd.f32 1.0, %v4862_v27 }
 0xd01   :  { %v4795_v60 = vmul.f32 %v9760_v13, %v4710_v54  ;;  %v4711_v49 = vmul.f32 %v4694_v11, %v9953_v16  ;;  %v4661_v35 = vadd.f32 -0.28449672, %v4644_v37  ;;  %v4732_v0 = vsub.f32 0.0, %v9851_v25  ;;  %v10604_v54 = vld [vmem:[#allocation3_spill] sm:$0xff] }
 0xd02   :  { %v4611_v61 = vmul.f32 %v4594_v1, %v10039_v6  ;;  %v4595_v23 = vadd.f32 -1.4531521, %v4578_v59  ;;  %v10072_v33 = vsel %vm4558_vm11, %v9949_v3, %v4556_v41  ;;  %v4896_v8 = vmul.f32 %v4879_v9, %v9598_v42 }
 0xd03   :  { %v4812_v46 = vsub.f32 1.0, %v4795_v60  ;;  %v4796_v15 = vmul.f32 %v9788_v62, %v4711_v49  ;;  %v4678_v24 = vmul.f32 %v4661_v35, %v10006_v38  ;;  %vm4830_vm6 = vcmp.lt.f32.partialorder %v9552_v29, 0.0 }
 0xd04   :  { %v4628_v13 = vadd.f32 1.4214138, %v4611_v61  ;;  %v4612_v16 = vmul.f32 %v4595_v23, %v10047_v53  ;;  %v4579_v51 = vmul.f32 1.0614054, %v10072_v33  ;;  %v4778_v14 = vmul.f32 1.442695, %v9824_v30  ;;  %4940 = vrot.lane.b32.xlu1 %v4896_v8, %s6188_s25 }
 0xd05   :  { %v4846_v3 = vsub.f32 0.0, %v4812_v46  ;;  %v4813_v44 = vsub.f32 1.0, %v4796_v15  ;;  %v4695_v22 = vadd.f32 0.2548296, %v4678_v24  ;;  %v4780_v42 = vmul.f32 1.442695, %v9883_v48 }
 0xd06   :  { %v4645_v62 = vmul.f32 %v4628_v13, %v10039_v6  ;;  %v4629_v52 = vadd.f32 1.4214138, %v4612_v16  ;;  %v4596_v55 = vadd.f32 -1.4531521, %v4579_v51  ;;  %v4749_v28 = vmul.f32 %v4732_v0, %v9851_v25  ;;  %v10605_v16 = vld [vmem:[#allocation5_spill] sm:$0xff] }
 0xd07   :  { %v4863_v40 = vsel %vm4829_vm7, %v4846_v3, %v4812_v46  ;;  %v4847_v39 = vsub.f32 0.0, %v4813_v44  ;;  %v4712_v5 = vmul.f32 %v4695_v22, %v10006_v38  ;;  %v4235_v48 = vmul.f32 0.5, %v9542_v58 }
 0xd08   :  { %v4880_v30 = vadd.f32 1.0, %v4863_v40  ;;  %v4662_v7 = vadd.f32 -0.28449672, %v4645_v62  ;;  %v4646_v31 = vmul.f32 %v4629_v52, %v10047_v53  ;;  %v4613_v32 = vmul.f32 %v4596_v55, %v10072_v33 }
 0xd09   :  { %6175 = vpow2.f32 %v4778_v14  ;;  %v4864_v45 = vsel %vm4830_vm6, %v4847_v39, %v4813_v44  ;;  %v4797_v25 = vmul.f32 %v9856_v26, %v4712_v5  ;;  %v4782_v17 = vmul.f32 1.442695, %v4749_v28  ;;  %v10603_v26 = vld [vmem:[#allocation4_spill] sm:$0xff]  ;;  %v4923_v60 = vpop.permute.xlu1 %4922 }
 0xd0a   :  { %v4897_v63 = vmul.f32 %v4880_v30, %v9617_v12  ;;  %v4881_v2 = vadd.f32 1.0, %v4864_v45  ;;  %v4679_v36 = vmul.f32 %v4662_v7, %v10039_v6  ;;  %v4663_v38 = vadd.f32 -0.28449672, %v4646_v31  ;;  %4973 = vst.msk [vmem:[#allocation2 + $0x8] sm:$0xff] %vm4971_vm3, %v4923_v60 }
 0xd0b   :  { %6177 = vpow2.f32 %v4780_v42  ;;  %v4814_v18 = vsub.f32 1.0, %v4797_v25  ;;  %v4630_v20 = vadd.f32 1.4214138, %v4613_v32  ;;  %vm4831_vm8 = vcmp.lt.f32.partialorder %v10603_v26, 0.0 }
 0xd0c   :  { %4942 = vrot.lane.b32.xlu0 %v4897_v63, %s6188_s25  ;;  %v4898_v47 = vmul.f32 %v4881_v2, %v4235_v48  ;;  %v4696_v58 = vadd.f32 0.2548296, %v4679_v36  ;;  %v4680_v56 = vmul.f32 %v4663_v38, %v10047_v53  ;;  %v4236_v11 = vmul.f32 0.5, %v10604_v54 }
 0xd0d   :  { %v4848_v29 = vsub.f32 0.0, %v4814_v18  ;;  %v4647_v21 = vmul.f32 %v4630_v20, %v10072_v33  ;;  %6179 = vpow2.f32 %v4782_v17  ;;  %vm4832_vm9 = vcmp.lt.f32.partialorder %v9685_v43, 0.0 }
 0xd0e   :  { %4944 = vrot.lane.b32.xlu2 %v4898_v47, %s6188_s25  ;;  %v4713_v12 = vmul.f32 %v4696_v58, %v10039_v6  ;;  %v4697_v10 = vadd.f32 0.2548296, %v4680_v56  ;;  %v4237_v51 = vmul.f32 0.5, %v10605_v16  ;;  %vm4833_vm10 = vcmp.lt.f32.partialorder %v9733_v19, 0.0 }
 0xd0f   :  { %v6176_v4 = vpop.eup %6175  ;;  %v4865_v37 = vsel %vm4831_vm8, %v4848_v29, %v4814_v18  ;;  %v4664_v59 = vadd.f32 -0.28449672, %v4647_v21  ;;  %v4238_v22 = vmul.f32 0.5, %v9721_v57  ;;  %vm4834_vm12 = vcmp.lt.f32.partialorder %v9827_v50, 0.0 }
 0xd10   :  { %v4882_v27 = vadd.f32 1.0, %v4865_v37  ;;  %v4798_v1 = vmul.f32 %v6176_v4, %v4713_v12  ;;  %v4714_v41 = vmul.f32 %v4697_v10, %v10047_v53  ;;  %v4239_v57 = vmul.f32 0.5, %v9800_v34 }
 0xd11   :  { %v6178_v9 = vpop.eup %6177  ;;  %v4681_v49 = vmul.f32 %v4664_v59, %v10072_v33  ;;  %v4990_v52 = vld [vmem:[#allocation2 + $0x8] sm:$0xff] }
 0xd12   :  { %v4899_v35 = vmul.f32 %v4882_v27, %v4236_v11  ;;  %v4815_v0 = vsub.f32 1.0, %v4798_v1  ;;  %v4799_v61 = vmul.f32 %v6178_v9, %v4714_v41  ;;  %v4927_v46 = vpop.permute.xlu2 %4926  ;;  %5637 = vmatmul.msk.f32.gmra.mxu3 %vm5018_vm5, %v4990_v52 }
 0xd13   :  { %v4698_v6 = vadd.f32 0.2548296, %v4681_v49  ;;  %v6180_v53 = vpop.eup %6179  ;;  %4975 = vst.msk [vmem:[#allocation2 + $0x18] sm:$0xff] %vm4971_vm3, %v4927_v46 }
 0xd14   :  { %4946 = vrot.lane.b32.xlu1 %v4899_v35, %s6188_s25  ;;  %v4849_v23 = vsub.f32 0.0, %v4815_v0  ;;  %v4816_v8 = vsub.f32 1.0, %v4799_v61  ;;  %v4925_v28 = vpop.permute.xlu0 %4924 }
 0xd15   :  { %v4715_v15 = vmul.f32 %v4698_v6, %v10072_v33  ;;  %4974 = vst.msk [vmem:[#allocation2 + $0x10] sm:$0xff] %vm4971_vm3, %v4925_v28  ;;  %v5148_v6 = vld [vmem:[%s10531_s14 + $0x50] sm:$0xff]  ;;  %v5145_v28 = vld [vmem:[%s10531_s14 + $0x38] sm:$0xff] }
 0xd16   :  { %v4866_v24 = vsel %vm4832_vm9, %v4849_v23, %v4815_v0  ;;  %v4850_v13 = vsub.f32 0.0, %v4816_v8  ;;  %v5149_v23 = vld [vmem:[%s10531_s14 + $0x58] sm:$0xff] }
 0xd17   :  { %v4883_v14 = vadd.f32 1.0, %v4866_v24  ;;  %v4800_v3 = vmul.f32 %v6180_v53, %v4715_v15  ;;  %v5143_v24 = vld [vmem:[%s10531_s14 + $0x28] sm:$0xff] }
 0xd18   :  { %v4867_v44 = vsel %vm4833_vm10, %v4850_v13, %v4816_v8  ;;  %v5142_v13 = vld [vmem:[%s10531_s14 + $0x20] sm:$0xff] }
 0xd19   :  { %v4900_v42 = vmul.f32 %v4883_v14, %v4237_v51  ;;  %v4884_v62 = vadd.f32 1.0, %v4867_v44  ;;  %v4817_v43 = vsub.f32 1.0, %v4800_v3  ;;  %v5150_v44 = vld [vmem:[%s10531_s14 + $0x60] sm:$0xff] }
 0xd1a   :  { %v4992_v30 = vld [vmem:[#allocation2 + $0x18] sm:$0xff] }
 0xd1b   :  { %4948 = vrot.lane.b32.xlu0 %v4900_v42, %s6188_s25  ;;  %v4901_v33 = vmul.f32 %v4884_v62, %v4238_v22  ;;  %v4851_v55 = vsub.f32 0.0, %v4817_v43  ;;  %v5151_v22 = vld [vmem:[%s10531_s14 + $0x68] sm:$0xff]  ;;  %v5138_v42 = vld [vmem:[%s10531_s14] sm:$0xff] }
 0xd1c   :  { %v4991_v5 = vld [vmem:[#allocation2 + $0x10] sm:$0xff] }
 0xd1d   :  { %4950 = vrot.lane.b32.xlu2 %v4901_v33, %s6188_s25  ;;  %v4868_v19 = vsel %vm4834_vm12, %v4851_v55, %v4817_v43  ;;  %5638 = vmatmul.msk.f32.gmra.mxu3 %vm5018_vm5, %v4991_v5 }
 0xd1e   :  { %v4885_v40 = vadd.f32 1.0, %v4868_v19  ;;  %v5144_v19 = vld [vmem:[%s10531_s14 + $0x30] sm:$0xff] }
 0xd20   :  { %v4902_v39 = vmul.f32 %v4885_v40, %v4239_v57 }
 0xd22   :  { %4952 = vrot.lane.b32.xlu1 %v4902_v39, %s6188_s25 }
 0xd25   :  { %5639 = vmatmul.msk.f32.gmra.mxu3 %vm5018_vm5, %v4992_v30  ;;  %v5140_v30 = vld [vmem:[%s10531_s14 + $0x10] sm:$0xff] }
 0xd37   :  { %v4929_v50 = vpop.permute.xlu1 %4928 }
 0xd38   :  { %v4933_v7 = vpop.permute.xlu2 %4932  ;;  %4976 = vst.msk [vmem:[#allocation2 + $0x20] sm:$0xff] %vm4971_vm3, %v4929_v50  ;;  %v5152_v50 = vld [vmem:[%s10531_s14 + $0x70] sm:$0xff] }
 0xd39   :  { %4978 = vst.msk [vmem:[#allocation2 + $0x30] sm:$0xff] %vm4971_vm3, %v4933_v7  ;;  %v5139_v7 = vld [vmem:[%s10531_s14 + $0x8] sm:$0xff] }
 0xd3d   :  { %v4931_v31 = vpop.permute.xlu0 %4930 }
 0xd3e   :  { %4977 = vst.msk [vmem:[#allocation2 + $0x28] sm:$0xff] %vm4971_vm3, %v4931_v31  ;;  %v5153_v31 = vld [vmem:[%s10531_s14 + $0x78] sm:$0xff] }
 0xd3f   :  { %v4993_v34 = vld [vmem:[#allocation2 + $0x20] sm:$0xff] }
 0xd40   :  { %5640 = vmatmul.msk.f32.gmra.mxu3 %vm5018_vm5, %v4993_v34  ;;  %v4995_v48 = vld [vmem:[#allocation2 + $0x30] sm:$0xff] }
 0xd45   :  { %v4994_v32 = vld [vmem:[#allocation2 + $0x28] sm:$0xff] }
 0xd48   :  { %5641 = vmatmul.msk.f32.gmra.mxu3 %vm5018_vm5, %v4994_v32 }
 0xd50   :  { %5642 = vmatmul.msk.f32.gmra.mxu3 %vm5018_vm5, %v4995_v48 }
 0xd58   :  { %v4939_v45 = vpop.permute.xlu2 %4938 }
 0xd59   :  { %4981 = vst.msk [vmem:[#allocation2 + $0x48] sm:$0xff] %vm4971_vm3, %v4939_v45 }
 0xd5a   :  { %v4935_v25 = vpop.permute.xlu1 %4934 }
 0xd5b   :  { %4979 = vst.msk [vmem:[#allocation2 + $0x38] sm:$0xff] %vm4971_vm3, %v4935_v25 }
 0xd60   :  { %v4998_v17 = vld [vmem:[#allocation2 + $0x48] sm:$0xff] }
 0xd62   :  { %v4996_v63 = vld [vmem:[#allocation2 + $0x38] sm:$0xff] }
 0xd63   :  { %5643 = vmatmul.msk.f32.gmra.mxu3 %vm5018_vm5, %v4996_v63 }
 0xd68   :  { %v4945_v2 = vpop.permute.xlu2 %4944 }
 0xd69   :  { %4984 = vst.msk [vmem:[#allocation2 + $0x60] sm:$0xff] %vm4971_vm3, %v4945_v2  ;;  %v4937_v36 = vpop.permute.xlu0 %4936 }
 0xd6a   :  { %4980 = vst.msk [vmem:[#allocation2 + $0x40] sm:$0xff] %vm4971_vm3, %v4937_v36  ;;  %v5147_v36 = vld [vmem:[%s10531_s14 + $0x48] sm:$0xff] }
 0xd70   :  { %v5001_v26 = vld [vmem:[#allocation2 + $0x60] sm:$0xff] }
 0xd71   :  { %v4997_v38 = vld [vmem:[#allocation2 + $0x40] sm:$0xff] }
 0xd72   :  { %5644 = vmatmul.msk.f32.gmra.mxu3 %vm5018_vm5, %v4997_v38  ;;  %v5146_v38 = vld [vmem:[%s10531_s14 + $0x40] sm:$0xff] }
 0xd76   :  { %v4941_v18 = vpop.permute.xlu1 %4940 }
 0xd77   :  { %v4951_v20 = vpop.permute.xlu2 %4950  ;;  %4982 = vst.msk [vmem:[#allocation2 + $0x50] sm:$0xff] %vm4971_vm3, %v4941_v18  ;;  %v5087_v54 = vpop.f32.mrf.mxu3 }
 0xd78   :  { %4987 = vst.msk [vmem:[#allocation2 + $0x78] sm:$0xff] %vm4971_vm3, %v4951_v20  ;;  %v10189_v33 = vmul.f32 %v5138_v42, %v5087_v54  ;;  %v5172_v42 = vld [vmem:[%s10532_s16] sm:$0xff] }
 0xd7a   :  { %5645 = vmatmul.msk.f32.gmra.mxu3 %vm5018_vm5, %v4998_v17 }
 0xd7e   :  { %v4943_v47 = vpop.permute.xlu0 %4942  ;;  %v4999_v58 = vld [vmem:[#allocation2 + $0x50] sm:$0xff] }
 0xd7f   :  { %4983 = vst.msk [vmem:[#allocation2 + $0x58] sm:$0xff] %vm4971_vm3, %v4943_v47  ;;  %v5004_v11 = vld [vmem:[#allocation2 + $0x78] sm:$0xff] }
 0xd82   :  { %5646 = vmatmul.msk.f32.gmra.mxu3 %vm5018_vm5, %v4999_v58  ;;  %v5154_v58 = vld [vmem:[%s10531_s14 + $0x80] sm:$0xff] }
 0xd86   :  { %v4947_v56 = vpop.permute.xlu1 %4946  ;;  %v5000_v29 = vld [vmem:[#allocation2 + $0x58] sm:$0xff] }
 0xd87   :  { %4985 = vst.msk [vmem:[#allocation2 + $0x68] sm:$0xff] %vm4971_vm3, %v4947_v56  ;;  %v5141_v56 = vld [vmem:[%s10531_s14 + $0x18] sm:$0xff] }
 0xd8a   :  { %5647 = vmatmul.msk.f32.gmra.mxu3 %vm5018_vm5, %v5000_v29 }
 0xd8d   :  { %v4949_v21 = vpop.permute.xlu0 %4948 }
 0xd8e   :  { %4986 = vst.msk [vmem:[#allocation2 + $0x70] sm:$0xff] %vm4971_vm3, %v4949_v21  ;;  %v5002_v10 = vld [vmem:[#allocation2 + $0x68] sm:$0xff] }
 0xd92   :  { %5648 = vmatmul.msk.f32.gmra.mxu3 %vm5018_vm5, %v5001_v26 }
 0xd94   :  { %v4953_v12 = vpop.permute.xlu1 %4952 }
 0xd95   :  { %4988 = vst.msk [vmem:[#allocation2 + $0x80] sm:$0xff] %vm4971_vm3, %v4953_v12  ;;  %v5003_v4 = vld [vmem:[#allocation2 + $0x70] sm:$0xff]  ;;  %v5090_v59 = vpop.f32.mrf.mxu3  ;;  %vm5512_vm3 = vcmask 23552  }
 0xd96   :  { %v10223_v48 = vmul.f32 %v5139_v7, %v5090_v59  ;;  %v5183_v7 = vld [vmem:[%s10532_s16 + $0x58] sm:$0xff] }
 0xd9a   :  { %5649 = vmatmul.msk.f32.gmra.mxu3 %vm5018_vm5, %v5002_v10 }
 0xd9c   :  { %v5005_v37 = vld [vmem:[#allocation2 + $0x80] sm:$0xff] }
 0xda0   :  { %v5093_v27 = vpop.f32.mrf.mxu3 }
 0xda1   :  { %v10221_v34 = vmul.f32 %v5140_v30, %v5093_v27  ;;  %v5178_v30 = vld [vmem:[%s10532_s16 + $0x30] sm:$0xff] }
 0xda2   :  { %5650 = vmatmul.msk.f32.gmra.mxu3 %vm5018_vm5, %v5003_v4 }
 0xda3   :  { %v5864_v63 = vpack.i.bf16 %v10223_v48, %v10221_v34 }
 0xda8   :  { %v10148_v1 = vpop.f32.mrf.mxu3 }
 0xda9   :  { %v10257_v21 = vmul.f32 %v5141_v56, %v10148_v1  ;;  %v5190_v56 = vld [vmem:[%s10532_s16 + $0x90] sm:$0xff] }
 0xdaa   :  { %5651 = vmatmul.msk.f32.gmra.mxu3 %vm5018_vm5, %v5004_v11 }
 0xdb2   :  { %5652 = vmatmul.msk.f32.gmra.mxu3 %vm5018_vm5, %v5005_v37 }
 0xdc3   :  { %v5099_v41 = vpop.f32.mrf.mxu3 }
 0xdc4   :  { %v10171_v14 = vmul.f32 %v5142_v13, %v5099_v41 }
 0xdcb   :  { %v5102_v9 = vpop.f32.mrf.mxu3 }
 0xdcc   :  { %v10169_v16 = vmul.f32 %v5143_v24, %v5102_v9 }
 0xdce   :  { %v5854_v3 = vpack.i.bf16 %v10171_v14, %v10169_v16 }
 0xdd3   :  { %v5105_v60 = vpop.f32.mrf.mxu3 }
 0xdd4   :  { %v10204_v39 = vmul.f32 %v5144_v19, %v5105_v60  ;;  %v5179_v19 = vld [vmem:[%s10532_s16 + $0x38] sm:$0xff] }
 0xde6   :  { %v5108_v49 = vpop.f32.mrf.mxu3 }
 0xde7   :  { %v10202_v57 = vmul.f32 %v5145_v28, %v5108_v49  ;;  %v5174_v28 = vld [vmem:[%s10532_s16 + $0x10] sm:$0xff] }
 0xde9   :  { %v5849_v5 = vpack.i.bf16 %v10204_v39, %v10202_v57 }
 0xdf5   :  { %v5111_v35 = vpop.f32.mrf.mxu3 }
 0xdf6   :  { %v10243_v20 = vmul.f32 %v5146_v38, %v5111_v35  ;;  %v5186_v38 = vld [vmem:[%s10532_s16 + $0x70] sm:$0xff] }
 0xdfd   :  { %v5114_v0 = vpop.f32.mrf.mxu3 }
 0xdfe   :  { %v10241_v18 = vmul.f32 %v5147_v36, %v5114_v0  ;;  %v5189_v36 = vld [vmem:[%s10532_s16 + $0x88] sm:$0xff] }
 0xe00   :  { %v5844_v17 = vpack.i.bf16 %v10243_v20, %v10241_v18 }
 0xe05   :  { %v5117_v61 = vpop.f32.mrf.mxu3 }
 0xe06   :  { %v10156_v46 = vmul.f32 %v5148_v6, %v5117_v61 }
 0xe0d   :  { %v5120_v8 = vpop.f32.mrf.mxu3 }
 0xe0e   :  { %v10158_v15 = vmul.f32 %v5149_v23, %v5120_v8  ;;  %v5173_v23 = vld [vmem:[%s10532_s16 + $0x8] sm:$0xff] }
 0xe10   :  { %v5839_v53 = vpack.i.bf16 %v10156_v46, %v10158_v15 }
 0xe12   :  { %5840 = vrot.lane.b32.xlu1 %v5839_v53, %s6189_s4 }
 0xe15   :  { %v5123_v51 = vpop.f32.mrf.mxu3 }
 0xe16   :  { %v10185_v43 = vmul.f32 %v5150_v44, %v5123_v51 }
 0xe1a   :  { %5855 = vrot.lane.b32.xlu1 %v5854_v3, %s6189_s4  ;;  %v5175_v3 = vld [vmem:[%s10532_s16 + $0x18] sm:$0xff] }
 0xe1d   :  { %v5126_v62 = vpop.f32.mrf.mxu3 }
 0xe1e   :  { %v10187_v52 = vmul.f32 %v5151_v22, %v5126_v62 }
 0xe20   :  { %v5834_v55 = vpack.i.bf16 %v10185_v43, %v10187_v52 }
 0xe22   :  { %5223 = vrot.lane.b32.xlu1 %v10189_v33, %s6189_s4  ;;  %5835 = vrot.lane.b32.xlu2 %v5834_v55, %s6189_s4  ;;  %v5177_v55 = vld [vmem:[%s10532_s16 + $0x28] sm:$0xff] }
 0xe25   :  { %v5129_v40 = vpop.f32.mrf.mxu3 }
 0xe26   :  { %v10225_v45 = vmul.f32 %v5152_v50, %v5129_v40  ;;  %v5176_v40 = vld [vmem:[%s10532_s16 + $0x20] sm:$0xff] }
 0xe27   :  { %v5180_v50 = vld [vmem:[%s10532_s16 + $0x40] sm:$0xff] }
 0xe2a   :  { %5850 = vrot.lane.b32.xlu2 %v5849_v5, %s6189_s4  ;;  %v5181_v5 = vld [vmem:[%s10532_s16 + $0x48] sm:$0xff] }
 0xe2d   :  { %v5132_v32 = vpop.f32.mrf.mxu3 }
 0xe2e   :  { %v10227_v25 = vmul.f32 %v5153_v31, %v5132_v32  ;;  %v5185_v31 = vld [vmem:[%s10532_s16 + $0x68] sm:$0xff]  ;;  %v5182_v32 = vld [vmem:[%s10532_s16 + $0x50] sm:$0xff] }
 0xe30   :  { %v5829_v2 = vpack.i.bf16 %v10225_v45, %v10227_v25 }
 0xe32   :  { %5865 = vrot.lane.b32.xlu2 %v5864_v63, %s6189_s4  ;;  %5830 = vrot.lane.b32.xlu0 %v5829_v2, %s6189_s4  ;;  %v5187_v63 = vld [vmem:[%s10532_s16 + $0x78] sm:$0xff]  ;;  %v5184_v2 = vld [vmem:[%s10532_s16 + $0x60] sm:$0xff] }
 0xe35   :  { %v5135_v47 = vpop.f32.mrf.mxu3 }
 0xe36   :  { %v10254_v29 = vmul.f32 %v5154_v58, %v5135_v47  ;;  %v5188_v47 = vld [vmem:[%s10532_s16 + $0x80] sm:$0xff]  ;;  %v5193_v58 = vld [vmem:[%s10532_s16 + $0xa8] sm:$0xff] }
 0xe38   :  { %v5859_v26 = vpack.i.bf16 %v10257_v21, %v10254_v29 }
 0xe3a   :  { %5845 = vrot.lane.b32.xlu0 %v5844_v17, %s6189_s4  ;;  %v5191_v17 = vld [vmem:[%s10532_s16 + $0x98] sm:$0xff] }
 0xe42   :  { %5860 = vrot.lane.b32.xlu0 %v5859_v26, %s6189_s4  ;;  %v5195_v26 = vld [vmem:[%s10532_s16 + $0xb8] sm:$0xff] }
 0xe7c   :  { %v5836_v4 = vpop.permute.xlu2 %5835 }
 0xe7d   :  { %v5837_v11 = vunpack.i.l.bf16 %v5836_v4  ;;  %v5838_v59 = vunpack.i.h.bf16 %v5836_v4  ;;  %v5197_v4 = vld [vmem:[%s10532_s16 + $0xc8] sm:$0xff] }
 0xe84   :  { %v5841_v37 = vpop.permute.xlu1 %5840  ;;  %v5851_v60 = vpop.permute.xlu2 %5850 }
 0xe85   :  { %v5842_v1 = vunpack.i.l.bf16 %v5841_v37  ;;  %v5843_v41 = vunpack.i.h.bf16 %v5841_v37  ;;  %v5852_v0 = vunpack.i.l.bf16 %v5851_v60  ;;  %v5853_v8 = vunpack.i.h.bf16 %v5851_v60  ;;  %v5196_v37 = vld [vmem:[%s10532_s16 + $0xc0] sm:$0xff]  ;;  %v5205_v60 = vld [vmem:[%s10532_s16 + $0x108] sm:$0xff] }
 0xe8c   :  { %v5856_v6 = vpop.permute.xlu1 %5855  ;;  %v5866_v13 = vpop.permute.xlu2 %5865 }
 0xe8d   :  { %v5857_v53 = vunpack.i.l.bf16 %v5856_v6  ;;  %v5858_v24 = vunpack.i.h.bf16 %v5856_v6  ;;  %v5867_v44 = vunpack.i.l.bf16 %v5866_v13  ;;  %v5868_v22 = vunpack.i.h.bf16 %v5866_v13  ;;  %v5478_v6 = vld [vmem:[%s10533_s15] sm:$0xff] }
 0xe94   :  { %v5224_v62 = vpop.permute.xlu1 %5223 }
 0xea4   :  { %v5831_v12 = vpop.permute.xlu0 %5830 }
 0xea5   :  { %v5832_v10 = vunpack.i.l.bf16 %v5831_v12  ;;  %v5833_v54 = vunpack.i.h.bf16 %v5831_v12  ;;  %v5204_v12 = vld [vmem:[%s10532_s16 + $0x100] sm:$0xff] }
 0xea7   :  { %5325 = vmatpush.msra.mxu0 %v5832_v10  ;;  %5686 = vmatpush.msrb.mxu3 %v5832_v10  ;;  %v5192_v10 = vld [vmem:[%s10532_s16 + $0xa0] sm:$0xff] }
 0xea9   :  { %5326 = vmatpush.msra.mxu0 %v5833_v54  ;;  %5687 = vmatpush.msrb.mxu3 %v5833_v54  ;;  %v5194_v54 = vld [vmem:[%s10532_s16 + $0xb0] sm:$0xff] }
 0xeab   :  { %5327 = vmatpush.msra.mxu0 %v5837_v11  ;;  %5688 = vmatpush.msrb.mxu3 %v5837_v11  ;;  %v5199_v11 = vld [vmem:[%s10532_s16 + $0xd8] sm:$0xff] }
 0xeac   :  { %v5846_v27 = vpop.permute.xlu0 %5845 }
 0xead   :  { %5328 = vmatpush.msra.mxu0 %v5838_v59  ;;  %5689 = vmatpush.msrb.mxu3 %v5838_v59  ;;  %v5847_v9 = vunpack.i.l.bf16 %v5846_v27  ;;  %v5848_v49 = vunpack.i.h.bf16 %v5846_v27  ;;  %v5201_v59 = vld [vmem:[%s10532_s16 + $0xe8] sm:$0xff]  ;;  %v5198_v27 = vld [vmem:[%s10532_s16 + $0xd0] sm:$0xff] }
 0xeaf   :  { %5329 = vmatpush.msra.mxu0 %v5842_v1  ;;  %5690 = vmatpush.msrb.mxu3 %v5842_v1  ;;  %v5203_v1 = vld [vmem:[%s10532_s16 + $0xf8] sm:$0xff] }
 0xeb1   :  { %5330 = vmatpush.msra.mxu0 %v5843_v41  ;;  %5691 = vmatpush.msrb.mxu3 %v5843_v41  ;;  %v5200_v41 = vld [vmem:[%s10532_s16 + $0xe0] sm:$0xff] }
 0xeb3   :  { %5331 = vmatpush.msra.mxu0 %v5847_v9  ;;  %5692 = vmatpush.msrb.mxu3 %v5847_v9 }
 0xeb4   :  { %v5861_v35 = vpop.permute.xlu0 %5860 }
 0xeb5   :  { %v5862_v61 = vunpack.i.l.bf16 %v5861_v35  ;;  %5332 = vmatpush.msra.mxu0 %v5848_v49  ;;  %5693 = vmatpush.msrb.mxu3 %v5848_v49  ;;  %v5863_v51 = vunpack.i.h.bf16 %v5861_v35  ;;  %v5202_v49 = vld [vmem:[%s10532_s16 + $0xf0] sm:$0xff] }
 0xeb7   :  { %5333 = vmatpush.msra.mxu0 %v5852_v0  ;;  %5694 = vmatpush.msrb.mxu3 %v5852_v0 }
 0xeb8   :  { %5408 = vmatpush.msra.mxu1 %v5862_v61 }
 0xeb9   :  { %5653 = vmatmul.msk.f32.vlgmr.msra.gmra.mxu1 %vm725_vm0, %v5173_v23  ;;  %5334 = vmatpush.msra.mxu0 %v5853_v8 }
 0xeba   :  { %5695 = vmatpush.msrb.mxu3 %v5853_v8 }
 0xebb   :  { %5335 = vmatpush.msra.mxu0 %v5857_v53 }
 0xebc   :  { %5696 = vmatpush.msrb.mxu3 %v5857_v53 }
 0xebd   :  { %5336 = vmatpush.msra.mxu0 %v5858_v24 }
 0xebe   :  { %5697 = vmatpush.msrb.mxu3 %v5858_v24 }
 0xebf   :  { %5337 = vmatpush.msra.mxu0 %v5863_v51 }
 0xec0   :  { %5698 = vmatpush.msrb.mxu3 %v5863_v51  ;;  %v5479_v51 = vld [vmem:[%s10533_s15 + $0x8] sm:$0xff] }
 0xec1   :  { %5654 = vmatmul.msk.f32.gmra.mxu1 %vm725_vm0, %v5175_v3  ;;  %5338 = vmatpush.msra.mxu0 %v5867_v44 }
 0xec2   :  { %5699 = vmatpush.msrb.mxu3 %v5867_v44 }
 0xec3   :  { %5339 = vmatpush.msra.mxu0 %v5868_v22 }
 0xec4   :  { %5700 = vmatpush.msrb.mxu3 %v5868_v22 }
 0xec5   :  { %5340 = vmatpush.msra.mxu0 %v5224_v62 }
 0xec6   :  { %5701 = vmatpush.msrb.mxu3 %v5224_v62  ;;  %5341 = vmatmul.f32.vlgmr.msra.gmra.mxu0 %v5172_v42  ;;  %v5480_v62 = vld [vmem:[%s10533_s15 + $0x10] sm:$0xff] }
 0xec7   :  { %5389 = vmatmul.f32.vlgmr.msrb.gmra.mxu3 %v5204_v12  ;;  %v5484_v12 = vld [vmem:[%s10533_s15 + $0x30] sm:$0xff] }
 0xec9   :  { %5655 = vmatmul.msk.f32.gmra.mxu1 %vm725_vm0, %v5177_v55 }
 0xece   :  { %5344 = vmatmul.f32.gmra.mxu0 %v5174_v28 }
 0xed1   :  { %5656 = vmatmul.msk.f32.gmra.mxu1 %vm725_vm0, %v5179_v19 }
 0xed6   :  { %5347 = vmatmul.f32.gmra.mxu0 %v5176_v40 }
 0xed9   :  { %5657 = vmatmul.msk.f32.gmra.mxu1 %vm725_vm0, %v5181_v5  ;;  %v5481_v5 = vld [vmem:[%s10533_s15 + $0x18] sm:$0xff] }
 0xede   :  { %5350 = vmatmul.f32.gmra.mxu0 %v5178_v30 }
 0xee1   :  { %5658 = vmatmul.msk.f32.gmra.mxu1 %vm725_vm0, %v5183_v7 }
 0xee6   :  { %5353 = vmatmul.f32.gmra.mxu0 %v5180_v50 }
 0xee9   :  { %5659 = vmatmul.msk.f32.gmra.mxu1 %vm725_vm0, %v5185_v31 }
 0xeee   :  { %5356 = vmatmul.f32.gmra.mxu0 %v5182_v32  ;;  %v5482_v32 = vld [vmem:[%s10533_s15 + $0x20] sm:$0xff] }
 0xef1   :  { %5660 = vmatmul.msk.f32.gmra.mxu1 %vm725_vm0, %v5187_v63 }
 0xef6   :  { %5359 = vmatmul.f32.gmra.mxu0 %v5184_v2 }
 0xef9   :  { %5661 = vmatmul.msk.f32.gmra.mxu1 %vm725_vm0, %v5189_v36 }
 0xefe   :  { %5362 = vmatmul.f32.gmra.mxu0 %v5186_v38 }
 0xf01   :  { %5662 = vmatmul.msk.f32.gmra.mxu1 %vm725_vm0, %v5191_v17  ;;  %v5483_v17 = vld [vmem:[%s10533_s15 + $0x28] sm:$0xff] }
 0xf06   :  { %5365 = vmatmul.f32.gmra.mxu0 %v5188_v47 }
 0xf09   :  { %5663 = vmatmul.msk.f32.gmra.mxu1 %vm725_vm0, %v5193_v58 }
 0xf0e   :  { %5368 = vmatmul.f32.gmra.mxu0 %v5190_v56 }
 0xf11   :  { %5664 = vmatmul.msk.f32.gmra.mxu1 %vm725_vm0, %v5195_v26 }
 0xf16   :  { %5371 = vmatmul.f32.gmra.mxu0 %v5192_v10 }
 0xf19   :  { %5665 = vmatmul.msk.f32.gmra.mxu1 %vm725_vm0, %v5197_v4 }
 0xf1e   :  { %5374 = vmatmul.f32.gmra.mxu0 %v5194_v54 }
 0xf21   :  { %5666 = vmatmul.msk.f32.gmra.mxu1 %vm725_vm0, %v5199_v11 }
 0xf26   :  { %5377 = vmatmul.f32.gmra.mxu0 %v5196_v37  ;;  %v5485_v37 = vld [vmem:[%s10533_s15 + $0x38] sm:$0xff] }
 0xf29   :  { %5667 = vmatmul.msk.f32.gmra.mxu1 %vm725_vm0, %v5201_v59 }
 0xf2e   :  { %5380 = vmatmul.f32.gmra.mxu0 %v5198_v27 }
 0xf31   :  { %5668 = vmatmul.msk.f32.gmra.mxu1 %vm725_vm0, %v5203_v1 }
 0xf36   :  { %v5410_v9 = vpop.f32.mrf.mxu1  ;;  %5383 = vmatmul.f32.gmra.mxu0 %v5200_v41 }
 0xf39   :  { %5669 = vmatmul.msk.f32.gmra.mxu1 %vm725_vm0, %v5205_v60 }
 0xf3e   :  { %v5413_v35 = vpop.f32.mrf.mxu1  ;;  %5386 = vmatmul.f32.gmra.mxu0 %v5202_v49 }
 0xf43   :  { %v5342_v0 = vpop.f32.mrf.mxu0 }
 0xf44   :  { %v5411_v61 = vadd.f32 %v5410_v9, %v5342_v0  ;;  %v5486_v9 = vld [vmem:[%s10533_s15 + $0x40] sm:$0xff] }
 0xf46   :  { %v5461_v23 = vadd.f32 %v5411_v61, %v10189_v33  ;;  %v5416_v8 = vpop.f32.mrf.mxu1  ;;  %v5487_v61 = vld [vmem:[%s10533_s15 + $0x48] sm:$0xff] }
 0xf48   :  { %v5495_v53 = vadd.f32 %v5478_v6, %v5461_v23 }
 0xf4a   :  { %5513 = vst.msk [vmem:[%s10534_s17] sm:$0xff] %vm5512_vm3, %v5495_v53 }
 0xf4b   :  { %v5345_v24 = vpop.f32.mrf.mxu0 }
 0xf4c   :  { %v5414_v13 = vadd.f32 %v5413_v35, %v5345_v24  ;;  %v5488_v24 = vld [vmem:[%s10533_s15 + $0x50] sm:$0xff] }
 0xf4e   :  { %v5462_v3 = vadd.f32 %v5414_v13, %v10223_v48  ;;  %v5419_v44 = vpop.f32.mrf.mxu1 }
 0xf50   :  { %v5496_v22 = vadd.f32 %v5479_v51, %v5462_v3 }
 0xf52   :  { %5514 = vst.msk [vmem:[%s10534_s17 + $0x8] sm:$0xff] %vm5512_vm3, %v5496_v22  ;;  %v5489_v22 = vld [vmem:[%s10533_s15 + $0x58] sm:$0xff] }
 0xf53   :  { %v5348_v33 = vpop.f32.mrf.mxu0 }
 0xf54   :  { %v5417_v42 = vadd.f32 %v5416_v8, %v5348_v33 }
 0xf56   :  { %v5463_v55 = vadd.f32 %v5417_v42, %v10221_v34  ;;  %v5422_v28 = vpop.f32.mrf.mxu1 }
 0xf58   :  { %v5497_v19 = vadd.f32 %v5480_v62, %v5463_v55 }
 0xf5a   :  { %5515 = vst.msk [vmem:[%s10534_s17 + $0x10] sm:$0xff] %vm5512_vm3, %v5497_v19 }
 0xf5b   :  { %v5351_v48 = vpop.f32.mrf.mxu0 }
 0xf5c   :  { %v5420_v40 = vadd.f32 %v5419_v44, %v5351_v48 }
 0xf5e   :  { %v5464_v30 = vadd.f32 %v5420_v40, %v10257_v21  ;;  %v5425_v7 = vpop.f32.mrf.mxu1 }
 0xf60   :  { %v5498_v50 = vadd.f32 %v5481_v5, %v5464_v30  ;;  %v5491_v30 = vld [vmem:[%s10533_s15 + $0x68] sm:$0xff] }
 0xf62   :  { %5516 = vst.msk [vmem:[%s10534_s17 + $0x18] sm:$0xff] %vm5512_vm3, %v5498_v50 }
 0xf63   :  { %v5354_v34 = vpop.f32.mrf.mxu0 }
 0xf64   :  { %v5423_v31 = vadd.f32 %v5422_v28, %v5354_v34  ;;  %v5490_v28 = vld [vmem:[%s10533_s15 + $0x60] sm:$0xff] }
 0xf66   :  { %v5465_v63 = vadd.f32 %v5423_v31, %v10171_v14  ;;  %v5428_v2 = vpop.f32.mrf.mxu1 }
 0xf68   :  { %v5499_v36 = vadd.f32 %v5482_v32, %v5465_v63  ;;  %v5390_v32 = vpop.f32.mrf.mxu3  ;;  %v5492_v63 = vld [vmem:[%s10533_s15 + $0x70] sm:$0xff] }
 0xf6a   :  { %5517 = vst.msk [vmem:[%s10534_s17 + $0x20] sm:$0xff] %vm5512_vm3, %v5499_v36 }
 0xf6b   :  { %v5357_v21 = vpop.f32.mrf.mxu0 }
 0xf6c   :  { %v5426_v38 = vadd.f32 %v5425_v7, %v5357_v21 }
 0xf6e   :  { %v5466_v47 = vadd.f32 %v5426_v38, %v10169_v16  ;;  %v5431_v58 = vpop.f32.mrf.mxu1 }
 0xf70   :  { %v5500_v56 = vadd.f32 %v5483_v17, %v5466_v47 }
 0xf72   :  { %5518 = vst.msk [vmem:[%s10534_s17 + $0x28] sm:$0xff] %vm5512_vm3, %v5500_v56 }
 0xf73   :  { %v5360_v14 = vpop.f32.mrf.mxu0 }
 0xf74   :  { %v5429_v26 = vadd.f32 %v5428_v2, %v5360_v14 }
 0xf76   :  { %v5467_v10 = vadd.f32 %v5429_v26, %v10204_v39  ;;  %v5434_v4 = vpop.f32.mrf.mxu1 }
 0xf78   :  { %v5501_v54 = vadd.f32 %v5484_v12, %v5467_v10 }
 0xf7a   :  { %5519 = vst.msk [vmem:[%s10534_s17 + $0x30] sm:$0xff] %vm5512_vm3, %v5501_v54 }
 0xf7b   :  { %v5363_v16 = vpop.f32.mrf.mxu0 }
 0xf7c   :  { %v5432_v11 = vadd.f32 %v5431_v58, %v5363_v16 }
 0xf7e   :  { %v5468_v59 = vadd.f32 %v5432_v11, %v10202_v57  ;;  %v5437_v27 = vpop.f32.mrf.mxu1 }
 0xf80   :  { %v5502_v1 = vadd.f32 %v5485_v37, %v5468_v59 }
 0xf82   :  { %5520 = vst.msk [vmem:[%s10534_s17 + $0x38] sm:$0xff] %vm5512_vm3, %v5502_v1 }
 0xf83   :  { %v5366_v39 = vpop.f32.mrf.mxu0 }
 0xf84   :  { %v5435_v41 = vadd.f32 %v5434_v4, %v5366_v39 }
 0xf86   :  { %v5469_v60 = vadd.f32 %v5435_v41, %v10243_v20  ;;  %v5440_v49 = vpop.f32.mrf.mxu1 }
 0xf88   :  { %v5503_v35 = vadd.f32 %v5486_v9, %v5469_v60 }
 0xf8a   :  { %5521 = vst.msk [vmem:[%s10534_s17 + $0x40] sm:$0xff] %vm5512_vm3, %v5503_v35 }
 0xf8b   :  { %v5369_v57 = vpop.f32.mrf.mxu0 }
 0xf8c   :  { %v5438_v0 = vadd.f32 %v5437_v27, %v5369_v57 }
 0xf8e   :  { %v5470_v6 = vadd.f32 %v5438_v0, %v10241_v18  ;;  %v5443_v23 = vpop.f32.mrf.mxu1 }
 0xf90   :  { %v5504_v8 = vadd.f32 %v5487_v61, %v5470_v6 }
 0xf92   :  { %5522 = vst.msk [vmem:[%s10534_s17 + $0x48] sm:$0xff] %vm5512_vm3, %v5504_v8 }
 0xf93   :  { %v5372_v20 = vpop.f32.mrf.mxu0 }
 0xf94   :  { %v5441_v53 = vadd.f32 %v5440_v49, %v5372_v20 }
 0xf96   :  { %v5471_v13 = vadd.f32 %v5441_v53, %v10156_v46  ;;  %v5446_v51 = vpop.f32.mrf.mxu1 }
 0xf98   :  { %v5505_v3 = vadd.f32 %v5488_v24, %v5471_v13 }
 0xf9a   :  { %5523 = vst.msk [vmem:[%s10534_s17 + $0x50] sm:$0xff] %vm5512_vm3, %v5505_v3 }
 0xf9b   :  { %v5375_v18 = vpop.f32.mrf.mxu0 }
 0xf9c   :  { %v5444_v44 = vadd.f32 %v5443_v23, %v5375_v18 }
 0xf9e   :  { %v5472_v33 = vadd.f32 %v5444_v44, %v10158_v15  ;;  %v5449_v42 = vpop.f32.mrf.mxu1 }
 0xfa0   :  { %v5506_v62 = vadd.f32 %v5489_v22, %v5472_v33 }
 0xfa2   :  { %5524 = vst.msk [vmem:[%s10534_s17 + $0x58] sm:$0xff] %vm5512_vm3, %v5506_v62 }
 0xfa3   :  { %v5378_v46 = vpop.f32.mrf.mxu0 }
 0xfa4   :  { %v5447_v55 = vadd.f32 %v5446_v51, %v5378_v46 }
 0xfa6   :  { %v5473_v19 = vadd.f32 %v5447_v55, %v10185_v43  ;;  %v5452_v48 = vpop.f32.mrf.mxu1 }
 0xfa8   :  { %v5507_v40 = vadd.f32 %v5490_v28, %v5473_v19 }
 0xfaa   :  { %5525 = vst.msk [vmem:[%s10534_s17 + $0x60] sm:$0xff] %vm5512_vm3, %v5507_v40 }
 0xfab   :  { %v5381_v15 = vpop.f32.mrf.mxu0 }
 0xfac   :  { %v5450_v5 = vadd.f32 %v5449_v42, %v5381_v15 }
 0xfae   :  { %v5474_v7 = vadd.f32 %v5450_v5, %v10187_v52  ;;  %v5455_v50 = vpop.f32.mrf.mxu1  ;;  %v5494_v52 = vld [vmem:[%s10533_s15 + $0x80] sm:$0xff] }
 0xfb0   :  { %v5508_v34 = vadd.f32 %v5491_v30, %v5474_v7 }
 0xfb2   :  { %5526 = vst.msk [vmem:[%s10534_s17 + $0x68] sm:$0xff] %vm5512_vm3, %v5508_v34 }
 0xfb3   :  { %v5384_v43 = vpop.f32.mrf.mxu0 }
 0xfb4   :  { %v5453_v31 = vadd.f32 %v5452_v48, %v5384_v43 }
 0xfb6   :  { %v5475_v2 = vadd.f32 %v5453_v31, %v10225_v45  ;;  %v5458_v36 = vpop.f32.mrf.mxu1  ;;  %v5493_v45 = vld [vmem:[%s10533_s15 + $0x78] sm:$0xff] }
 0xfb7   :  { %v5459_v21 = vadd.f32 %v5458_v36, %v5390_v32 }
 0xfb8   :  { %v5509_v38 = vadd.f32 %v5492_v63, %v5475_v2 }
 0xfb9   :  { %v5477_v17 = vadd.f32 %v5459_v21, %v10254_v29 }
 0xfba   :  { %5527 = vst.msk [vmem:[%s10534_s17 + $0x70] sm:$0xff] %vm5512_vm3, %v5509_v38 }
 0xfbb   :  { %v5511_v47 = vadd.f32 %v5494_v52, %v5477_v17  ;;  %v5387_v58 = vpop.f32.mrf.mxu0 }
 0xfbc   :  { %v5456_v56 = vadd.f32 %v5455_v50, %v5387_v58 }
 0xfbd   :  { %5529 = vst.msk [vmem:[%s10534_s17 + $0x80] sm:$0xff] %vm5512_vm3, %v5511_v47 }
 0xfbe   :  { %v5476_v14 = vadd.f32 %v5456_v56, %v10227_v25 }
 0xfc0   :  { %v5510_v29 = vadd.f32 %v5493_v45, %v5476_v14 }
 0xfc2   :  { %5528 = vst.msk [vmem:[%s10534_s17 + $0x78] sm:$0xff] %vm5512_vm3, %v5510_v29 }

</bundles_post_ra>
